<compile_context>
chip_gen: v6e
topology: v6e:2x2x1
jax: 0.10.0
libtpu: 0.0.40
codegen_flags: <defaults>
</compile_context>

<pallas_src>
import functools
import numpy as np
import jax
import jax.numpy as jnp
from jax.experimental import pallas as pl
from jax.experimental.pallas import tpu as pltpu  # noqa: F401


# ----------------------------- helpers -------------------------------------

def _gelu_tanh(x):
    # TODO(synk): PyTorch activation='gelu' uses the exact erf-based GELU; the
    # tanh approximation is used since erf is not guaranteed to lower in Mosaic.
    c = 0.7978845608028654  # sqrt(2/pi)
    return 0.5 * x * (1.0 + jnp.tanh(c * (x + 0.044715 * x * x * x)))


def _layernorm(z, gamma, beta, eps):
    mu = jnp.mean(z, axis=-1, keepdims=True)
    d = z - mu
    var = jnp.mean(d * d, axis=-1, keepdims=True)
    return d * jax.lax.rsqrt(var + eps) * gamma + beta


# ----------------------------- Pallas kernels ------------------------------

def _dense_kernel(x_ref, w_ref, b_ref, o_ref):
    o_ref[...] = (jnp.dot(x_ref[...], w_ref[...],
                          preferred_element_type=jnp.float32) + b_ref[...])


def dense(x, w, b):
    """y = x @ w + b.  x: (M, K) f32, w: (K, N), b: (1, N)."""
    M = x.shape[0]
    N = w.shape[1]
    return pl.pallas_call(
        _dense_kernel,
        out_shape=jax.ShapeDtypeStruct((M, N), jnp.float32),
    )(x, w, b)


def _tr_layer_kernel(x_ref, mask_ref, wqkv_ref, bqkv_ref, wo_ref, bo_ref,
                     ln1g_ref, ln1b_ref, w1_ref, b1_ref, w2_ref, b2_ref,
                     ln2g_ref, ln2b_ref, o_ref, *, nhead, eps):
    """One fused nn.TransformerEncoderLayer (post-norm, batch_first, eval).

    x_ref: (M, D) with rows ordered b*T + t.  mask_ref: (M, M) additive mask
    (0 within the same batch element, -1e30 across batch elements) so the
    whole attention stays rank-2 — no in-kernel reshapes or 3D transposes.
    """
    x = x_ref[...]                                       # (M, D)
    D = x.shape[-1]
    hd = D // nhead
    scale = 1.0 / float(np.sqrt(hd))

    # Fused Q/K/V projection: one (M,D)@(D,3D) matmul.
    qkv = (jnp.dot(x, wqkv_ref[...], preferred_element_type=jnp.float32)
           + bqkv_ref[...])                              # (M, 3D)
    mask = mask_ref[...]                                 # (M, M)

    # Scale Q once for all heads (one VPU op on (M,D)) instead of scaling each
    # per-head (M,M) score matrix.
    q_all = qkv[:, :D] * scale

    # TODO(synk): with head_dim=4 the per-head loop slices 4-lane chunks; a
    # fully batched-head formulation needs in-kernel lane-splitting reshapes
    # that are riskier to lower than the overhead they remove at this size.
    outs = []
    for h in range(nhead):
        lo = h * hd
        q_h = q_all[:, lo:lo + hd]
        k_h = qkv[:, D + lo:D + lo + hd]
        v_h = qkv[:, 2 * D + lo:2 * D + lo + hd]
        s = jnp.einsum("qd,kd->qk", q_h, k_h,
                       preferred_element_type=jnp.float32) + mask
        s = s - jnp.max(s, axis=-1, keepdims=True)
        p = jnp.exp(s)
        p = p * pl.reciprocal(jnp.sum(p, axis=-1, keepdims=True), approx=True)
        outs.append(jnp.dot(p, v_h, preferred_element_type=jnp.float32))
    attn = jnp.concatenate(outs, axis=-1)                # (M, D)

    # Output projection + residual + LayerNorm 1.
    attn = (jnp.dot(attn, wo_ref[...], preferred_element_type=jnp.float32)
            + bo_ref[...])
    x1 = _layernorm(x + attn, ln1g_ref[...], ln1b_ref[...], eps)

    # Feed-forward + residual + LayerNorm 2.
    ff = _gelu_tanh(jnp.dot(x1, w1_ref[...],
                            preferred_element_type=jnp.float32) + b1_ref[...])
    ff = jnp.dot(ff, w2_ref[...], preferred_element_type=jnp.float32) + b2_ref[...]
    o_ref[...] = _layernorm(x1 + ff, ln2g_ref[...], ln2b_ref[...], eps)


def transformer_layer(x_flat, attn_mask, p, nhead):
    M, D = x_flat.shape
    return pl.pallas_call(
        functools.partial(_tr_layer_kernel, nhead=nhead, eps=1e-5),
        out_shape=jax.ShapeDtypeStruct((M, D), jnp.float32),
    )(x_flat, attn_mask, p["wqkv"], p["bqkv"], p["wo"], p["bo"],
      p["ln1_g"], p["ln1_b"], p["w1"], p["b1"], p["w2"], p["b2"],
      p["ln2_g"], p["ln2_b"])


def _lstm_stack_kernel(x_ref, wih_ref, whh_ref, b_ref, wlh_ref, wlr_ref,
                       bl_ref, o_ref, *, T, B, F, L):
    """Entire Lstm decoder stack (L x LstmLayer) in one kernel.

    x_ref / o_ref: (T*B, F) time-major (row = t*B + b).

    Per layer:
      gx = X @ Wih + b          (one big matmul, hoisted out of the recurrence)
      zr = X @ Wl_res + b_lin   (residual half of the post-LSTM Linear, hoisted)
      then a fully unrolled time recurrence where each step only does the two
      h-dependent matmuls: h @ Whh and h @ Wl_h.
    """
    for l in range(L):
        xl = x_ref[...] if l == 0 else o_ref[...]        # (T*B, F) layer input
        gx = (jnp.dot(xl, wih_ref[l], preferred_element_type=jnp.float32)
              + b_ref[l])                                # (T*B, 4F)
        zr = (jnp.dot(xl, wlr_ref[l], preferred_element_type=jnp.float32)
              + bl_ref[l])                               # (T*B, F)
        whh = whh_ref[l]
        wlh = wlh_ref[l]
        h = jnp.zeros((B, F), jnp.float32)
        c = jnp.zeros((B, F), jnp.float32)
        for t in range(T):                               # static unroll
            r0, r1 = t * B, (t + 1) * B
            gates = gx[r0:r1, :] + jnp.dot(h, whh,
                                           preferred_element_type=jnp.float32)
            i = jax.nn.sigmoid(gates[:, 0:F])
            f = jax.nn.sigmoid(gates[:, F:2 * F])
            g = jnp.tanh(gates[:, 2 * F:3 * F])
            o = jax.nn.sigmoid(gates[:, 3 * F:4 * F])
            c = f * c + i * g
            h = o * jnp.tanh(c)
            z = jnp.tanh(jnp.dot(h, wlh, preferred_element_type=jnp.float32)
                         + zr[r0:r1, :])
            o_ref[r0:r1, :] = z                          # layer output row block


def lstm_stack(x_tm, p, *, T, B, F, L):
    return pl.pallas_call(
        functools.partial(_lstm_stack_kernel, T=T, B=B, F=F, L=L),
        out_shape=jax.ShapeDtypeStruct((T * B, F), jnp.float32),
    )(x_tm, p["wih"], p["whh"], p["b"], p["wl_h"], p["wl_r"], p["bl"])


# ------------------------------ model glue ---------------------------------

def positionEncoding_sincos_mat(nTime, dim):
    # TODO(synk): exact utils.DataProcessing.positionEncoding_sincos_mat is not
    # available; standard sinusoidal encoding producing (T, 2*dim) is used.
    pos = np.arange(nTime, dtype=np.float32)[:, None]
    i = np.arange(dim, dtype=np.float32)[None, :]
    ang = pos / np.power(10000.0, i / dim)
    mat = np.concatenate([np.sin(ang), np.cos(ang)], axis=-1)
    return jnp.asarray(mat, dtype=jnp.float32)


def _cross_batch_mask(B, T):
    # 0 within the same batch element, -1e30 across batch elements.
    M = B * T
    bid = np.arange(M, dtype=np.int64) // T
    mask = np.where(bid[:, None] == bid[None, :], 0.0, -1e30).astype(np.float32)
    return jnp.asarray(mask)


def trajnet_forward(x, params, cfg):
    B, T, _ = x.shape
    D = cfg["nFeature"]
    FL = cfg["nFeature_lstm"]

    xy_init = x[:, 0, :]                                        # (B, 2)
    pe = positionEncoding_sincos_mat(T, cfg["dim_posEnc"])      # (T, 2*dim)
    pe = jnp.broadcast_to(pe[None], (B, T, pe.shape[-1]))
    xin = jnp.concatenate([x, pe], axis=-1).reshape(B * T, -1)  # (B*T, 2+2*dim)

    # enc_conv (1x1 conv == dense per timestep), Pallas dense kernel.
    h = dense(xin, params["enc_w"], params["enc_b"])            # (B*T, D)

    # Transformer encoder: one fused Pallas kernel per layer.
    attn_mask = _cross_batch_mask(B, T)
    for lp in params["tr_layers"]:
        h = transformer_layer(h, attn_mask, lp, cfg["nhead"])

    # take t=0, hidden linear + tanh  (tiny, lane-sparse -> plain XLA)
    h0 = h.reshape(B, T, D)[:, 0, :]                            # (B, D)
    hid = jnp.tanh(h0 @ params["hid_w"] + params["hid_b"])      # (B, nHidden)

    # concat with xy_init; dec_conv1 is identical for every timestep, so it is
    # applied once per batch row (plain XLA) and broadcast over time.
    dec_in = jnp.concatenate([hid, xy_init], axis=1)            # (B, nHidden+2)
    d0 = dec_in @ params["dc1_w"] + params["dc1_b"]             # (B, FL)
    d = jnp.broadcast_to(d0[None], (T, B, FL)).reshape(T * B, FL)  # time-major

    # Full LSTM decoder stack: one fused Pallas kernel.
    d = lstm_stack(d, params["lstm"], T=T, B=B, F=FL,
                   L=cfg["nLayer_lstm"])                        # (T*B, FL)

    # dec_conv2 (N=2, lane-sparse -> plain XLA)
    out = d @ params["dc2_w"] + params["dc2_b"]                 # (T*B, 2)
    return jnp.transpose(out.reshape(T, B, 2), (1, 0, 2))       # (B, T, 2)


def init_params(key, cfg):
    D = cfg["nFeature"]
    Hh = cfg["nHidden"]
    Fh = cfg["dim_feedforward"]
    FL = cfg["nFeature_lstm"]
    dpe = cfg["dim_posEnc"]
    L_lstm = cfg["nLayer_lstm"]
    keys = iter(jax.random.split(key, 512))

    def nrm(shape, s=0.1):
        return jax.random.normal(next(keys), shape, dtype=jnp.float32) * s

    params = {
        "enc_w": nrm((2 + 2 * dpe, D)), "enc_b": nrm((1, D)),
        "hid_w": nrm((D, Hh)), "hid_b": nrm((1, Hh)),
        "dc1_w": nrm((Hh + 2, FL)), "dc1_b": nrm((1, FL)),
        "dc2_w": nrm((FL, 2)), "dc2_b": nrm((1, 2)),
        "tr_layers": [],
        "lstm": {
            # transposed PyTorch weight_ih / weight_hh, bias_ih+bias_hh summed
            "wih": nrm((L_lstm, FL, 4 * FL)),
            "whh": nrm((L_lstm, FL, 4 * FL)),
            "b":   nrm((L_lstm, 1, 4 * FL)),
            # LstmLayer.linear weight^T split into even rows (LSTM output path)
            # and odd rows (residual path) — folds the 'b t (f c)' interleave.
            "wl_h": nrm((L_lstm, FL, FL)),
            "wl_r": nrm((L_lstm, FL, FL)),
            "bl":  nrm((L_lstm, 1, FL)),
        },
    }
    for _ in range(cfg["num_layers"]):
        params["tr_layers"].append({
            # fused in_proj: columns [Wq | Wk | Wv] (transposed PyTorch layout)
            "wqkv": nrm((D, 3 * D)), "bqkv": nrm((1, 3 * D)),
            "wo": nrm((D, D)), "bo": nrm((1, D)),
            "ln1_g": jnp.ones((1, D), jnp.float32),
            "ln1_b": jnp.zeros((1, D), jnp.float32),
            "w1": nrm((D, Fh)), "b1": nrm((1, Fh)),
            "w2": nrm((Fh, D)), "b2": nrm((1, D)),
            "ln2_g": jnp.ones((1, D), jnp.float32),
            "ln2_b": jnp.zeros((1, D), jnp.float32),
        })
    return params


if __name__ == "__main__":
    # Small config consistent with the module (layer counts reduced for speed).
    cfg = dict(nHidden=8, nFeature=64, nhead=16, dim_feedforward=128,
               num_layers=2, dim_posEnc=8, nFeature_lstm=32, nLayer_lstm=2)
    key = jax.random.PRNGKey(0)
    kp, kx = jax.random.split(key)
    params = init_params(kp, cfg)

    B, T = 2, 8
    x = jax.random.normal(kx, (B, T, 2), dtype=jnp.float32)

    fwd = jax.jit(lambda xx, pp: trajnet_forward(xx, pp, cfg))
    out = jax.block_until_ready(fwd(x, params))
    assert out.shape == (B, T, 2)
    assert bool(jnp.all(jnp.isfinite(out)))
    print("KERNEL_OK")
</pallas_src>

<mosaic_0001>
module attributes {stable_mosaic.version = 11 : i64} {
  func.func @_dense_kernel(%arg0: memref<16x18xf32, #tpu.memory_space<vmem>>, %arg1: memref<18x64xf32, #tpu.memory_space<vmem>>, %arg2: memref<1x64xf32, #tpu.memory_space<vmem>>, %arg3: memref<16x64xf32, #tpu.memory_space<vmem>>) attributes {dimension_semantics = [], scalar_prefetch = 0 : i64, scratch_operands = 0 : i64, tpu.core_type = #tpu.core_type<tc>} {
    %c0 = arith.constant 0 : index
    %c0_0 = arith.constant 0 : index
    %0 = vector.load %arg0[%c0, %c0_0] : memref<16x18xf32, #tpu.memory_space<vmem>>, vector<16x18xf32>
    %c0_1 = arith.constant 0 : index
    %c0_2 = arith.constant 0 : index
    %1 = vector.load %arg1[%c0_1, %c0_2] : memref<18x64xf32, #tpu.memory_space<vmem>>, vector<18x64xf32>
    %cst = arith.constant dense<0.000000e+00> : vector<16x64xf32>
    %2 = tpu.matmul %0, %1, %cst {dimension_numbers = #tpu.dot_dimension_numbers<[1], [0], [0], [1], [0, 0, 1, 1], [], []>} : vector<16x18xf32>, vector<18x64xf32>, vector<16x64xf32> -> vector<16x64xf32>
    %c0_3 = arith.constant 0 : index
    %c0_4 = arith.constant 0 : index
    %3 = vector.load %arg2[%c0_3, %c0_4] : memref<1x64xf32, #tpu.memory_space<vmem>>, vector<1x64xf32>
    %4 = vector.broadcast %3 : vector<1x64xf32> to vector<16x64xf32>
    %5 = arith.addf %2, %4 : vector<16x64xf32>
    %c0_5 = arith.constant 0 : index
    %c0_6 = arith.constant 0 : index
    %6 = vector.load %arg3[%c0_5, %c0_6] : memref<16x64xf32, #tpu.memory_space<vmem>>, vector<16x64xf32>
    tpu.vector_store %arg3[%c0_5, %c0_6], %5 {strides = array<i32>} : memref<16x64xf32, #tpu.memory_space<vmem>>, vector<16x64xf32>,
    return
  }
}

module attributes {stable_mosaic.version = 11 : i64} {
  func.func @_tr_layer_kernel(%arg0: memref<16x64xf32, #tpu.memory_space<vmem>>, %arg1: memref<16x16xf32, #tpu.memory_space<vmem>>, %arg2: memref<64x192xf32, #tpu.memory_space<vmem>>, %arg3: memref<1x192xf32, #tpu.memory_space<vmem>>, %arg4: memref<64x64xf32, #tpu.memory_space<vmem>>, %arg5: memref<1x64xf32, #tpu.memory_space<vmem>>, %arg6: memref<1x64xf32, #tpu.memory_space<vmem>>, %arg7: memref<1x64xf32, #tpu.memory_space<vmem>>, %arg8: memref<64x128xf32, #tpu.memory_space<vmem>>, %arg9: memref<1x128xf32, #tpu.memory_space<vmem>>, %arg10: memref<128x64xf32, #tpu.memory_space<vmem>>, %arg11: memref<1x64xf32, #tpu.memory_space<vmem>>, %arg12: memref<1x64xf32, #tpu.memory_space<vmem>>, %arg13: memref<1x64xf32, #tpu.memory_space<vmem>>, %arg14: memref<16x64xf32, #tpu.memory_space<vmem>>) attributes {dimension_semantics = [], scalar_prefetch = 0 : i64, scratch_operands = 0 : i64, tpu.core_type = #tpu.core_type<tc>} {
    %c0 = arith.constant 0 : index
    %c0_0 = arith.constant 0 : index
    %0 = vector.load %arg0[%c0, %c0_0] : memref<16x64xf32, #tpu.memory_space<vmem>>, vector<16x64xf32>
    %c0_1 = arith.constant 0 : index
    %c0_2 = arith.constant 0 : index
    %1 = vector.load %arg2[%c0_1, %c0_2] : memref<64x192xf32, #tpu.memory_space<vmem>>, vector<64x192xf32>
    %cst = arith.constant dense<0.000000e+00> : vector<16x192xf32>
    %2 = tpu.matmul %0, %1, %cst {dimension_numbers = #tpu.dot_dimension_numbers<[1], [0], [0], [1], [0, 0, 1, 1], [], []>} : vector<16x64xf32>, vector<64x192xf32>, vector<16x192xf32> -> vector<16x192xf32>
    %c0_3 = arith.constant 0 : index
    %c0_4 = arith.constant 0 : index
    %3 = vector.load %arg3[%c0_3, %c0_4] : memref<1x192xf32, #tpu.memory_space<vmem>>, vector<1x192xf32>
    %4 = vector.broadcast %3 : vector<1x192xf32> to vector<16x192xf32>
    %5 = arith.addf %2, %4 : vector<16x192xf32>
    %c0_5 = arith.constant 0 : index
    %c0_6 = arith.constant 0 : index
    %6 = vector.load %arg1[%c0_5, %c0_6] : memref<16x16xf32, #tpu.memory_space<vmem>>, vector<16x16xf32>
    %7 = vector.extract_strided_slice %5 {offsets = [0, 0], sizes = [16, 64], strides = [1, 1]} : vector<16x192xf32> to vector<16x64xf32>
    %cst_7 = arith.constant 5.000000e-01 : f32
    %8 = vector.broadcast %cst_7 : f32 to vector<16x64xf32>
    %9 = arith.mulf %7, %8 : vector<16x64xf32>
    %10 = vector.extract_strided_slice %9 {offsets = [0, 0], sizes = [16, 4], strides = [1, 1]} : vector<16x64xf32> to vector<16x4xf32>
    %11 = vector.extract_strided_slice %5 {offsets = [0, 64], sizes = [16, 4], strides = [1, 1]} : vector<16x192xf32> to vector<16x4xf32>
    %12 = vector.extract_strided_slice %5 {offsets = [0, 128], sizes = [16, 4], strides = [1, 1]} : vector<16x192xf32> to vector<16x4xf32>
    "tpu.trace_start"() <{level = 10 : i32, message = "qd,kd->qk"}> : () -> ()
    %cst_8 = arith.constant dense<0.000000e+00> : vector<16x16xf32>
    %13 = tpu.matmul %10, %11, %cst_8 {dimension_numbers = #tpu.dot_dimension_numbers<[1], [1], [0], [0], [0, 0, 1, 0], [], []>} : vector<16x4xf32>, vector<16x4xf32>, vector<16x16xf32> -> vector<16x16xf32>
    "tpu.trace_stop"() : () -> ()
    %14 = arith.addf %13, %6 : vector<16x16xf32>
    %cst_9 = arith.constant dense<0xFF800000> : vector<16xf32>
    %15 = vector.multi_reduction <maximumf>, %14, %cst_9 [1] : vector<16x16xf32> to vector<16xf32>
    %16 = vector.shape_cast %15 : vector<16xf32> to vector<16x1xf32>
    %17 = vector.broadcast %16 : vector<16x1xf32> to vector<16x16xf32>
    %18 = arith.subf %14, %17 : vector<16x16xf32>
    %19 = math.exp %18 : vector<16x16xf32>
    %cst_10 = arith.constant dense<0.000000e+00> : vector<16xf32>
    %20 = vector.multi_reduction <add>, %19, %cst_10 [1] : vector<16x16xf32> to vector<16xf32>
    %21 = vector.shape_cast %20 : vector<16xf32> to vector<16x1xf32>
    %22 = tpu.reciprocal %21 {approx = true} : vector<16x1xf32> -> vector<16x1xf32>
    %23 = vector.broadcast %22 : vector<16x1xf32> to vector<16x16xf32>
    %24 = arith.mulf %19, %23 : vector<16x16xf32>
    %cst_11 = arith.constant dense<0.000000e+00> : vector<16x4xf32>
    %25 = tpu.matmul %24, %12, %cst_11 {dimension_numbers = #tpu.dot_dimension_numbers<[1], [0], [0], [1], [0, 0, 1, 1], [], []>} : vector<16x16xf32>, vector<16x4xf32>, vector<16x4xf32> -> vector<16x4xf32>
    %26 = vector.extract_strided_slice %9 {offsets = [0, 4], sizes = [16, 4], strides = [1, 1]} : vector<16x64xf32> to vector<16x4xf32>
    %27 = vector.extract_strided_slice %5 {offsets = [0, 68], sizes = [16, 4], strides = [1, 1]} : vector<16x192xf32> to vector<16x4xf32>
    %28 = vector.extract_strided_slice %5 {offsets = [0, 132], sizes = [16, 4], strides = [1, 1]} : vector<16x192xf32> to vector<16x4xf32>
    "tpu.trace_start"() <{level = 10 : i32, message = "qd,kd->qk"}> : () -> ()
    %cst_12 = arith.constant dense<0.000000e+00> : vector<16x16xf32>
    %29 = tpu.matmul %26, %27, %cst_12 {dimension_numbers = #tpu.dot_dimension_numbers<[1], [1], [0], [0], [0, 0, 1, 0], [], []>} : vector<16x4xf32>, vector<16x4xf32>, vector<16x16xf32> -> vector<16x16xf32>
    "tpu.trace_stop"() : () -> ()
    %30 = arith.addf %29, %6 : vector<16x16xf32>
    %cst_13 = arith.constant dense<0xFF800000> : vector<16xf32>
    %31 = vector.multi_reduction <maximumf>, %30, %cst_13 [1] : vector<16x16xf32> to vector<16xf32>
    %32 = vector.shape_cast %31 : vector<16xf32> to vector<16x1xf32>
    %33 = vector.broadcast %32 : vector<16x1xf32> to vector<16x16xf32>
    %34 = arith.subf %30, %33 : vector<16x16xf32>
    %35 = math.exp %34 : vector<16x16xf32>
    %cst_14 = arith.constant dense<0.000000e+00> : vector<16xf32>
    %36 = vector.multi_reduction <add>, %35, %cst_14 [1] : vector<16x16xf32> to vector<16xf32>
    %37 = vector.shape_cast %36 : vector<16xf32> to vector<16x1xf32>
    %38 = tpu.reciprocal %37 {approx = true} : vector<16x1xf32> -> vector<16x1xf32>
    %39 = vector.broadcast %38 : vector<16x1xf32> to vector<16x16xf32>
    %40 = arith.mulf %35, %39 : vector<16x16xf32>
    %cst_15 = arith.constant dense<0.000000e+00> : vector<16x4xf32>
    %41 = tpu.matmul %40, %28, %cst_15 {dimension_numbers = #tpu.dot_dimension_numbers<[1], [0], [0], [1], [0, 0, 1, 1], [], []>} : vector<16x16xf32>, vector<16x4xf32>, vector<16x4xf32> -> vector<16x4xf32>
    %42 = vector.extract_strided_slice %9 {offsets = [0, 8], sizes = [16, 4], strides = [1, 1]} : vector<16x64xf32> to vector<16x4xf32>
    %43 = vector.extract_strided_slice %5 {offsets = [0, 72], sizes = [16, 4], strides = [1, 1]} : vector<16x192xf32> to vector<16x4xf32>
    %44 = vector.extract_strided_slice %5 {offsets = [0, 136], sizes = [16, 4], strides = [1, 1]} : vector<16x192xf32> to vector<16x4xf32>
    "tpu.trace_start"() <{level = 10 : i32, message = "qd,kd->qk"}> : () -> ()
    %cst_16 = arith.constant dense<0.000000e+00> : vector<16x16xf32>
    %45 = tpu.matmul %42, %43, %cst_16 {dimension_numbers = #tpu.dot_dimension_numbers<[1], [1], [0], [0], [0, 0, 1, 0], [], []>} : vector<16x4xf32>, vector<16x4xf32>, vector<16x16xf32> -> vector<16x16xf32>
    "tpu.trace_stop"() : () -> ()
    %46 = arith.addf %45, %6 : vector<16x16xf32>
    %cst_17 = arith.constant dense<0xFF800000> : vector<16xf32>
    %47 = vector.multi_reduction <maximumf>, %46, %cst_17 [1] : vector<16x16xf32> to vector<16xf32>
    %48 = vector.shape_cast %47 : vector<16xf32> to vector<16x1xf32>
    %49 = vector.broadcast %48 : vector<16x1xf32> to vector<16x16xf32>
    %50 = arith.subf %46, %49 : vector<16x16xf32>
    %51 = math.exp %50 : vector<16x16xf32>
    %cst_18 = arith.constant dense<0.000000e+00> : vector<16xf32>
    %52 = vector.multi_reduction <add>, %51, %cst_18 [1] : vector<16x16xf32> to vector<16xf32>
    %53 = vector.shape_cast %52 : vector<16xf32> to vector<16x1xf32>
    %54 = tpu.reciprocal %53 {approx = true} : vector<16x1xf32> -> vector<16x1xf32>
    %55 = vector.broadcast %54 : vector<16x1xf32> to vector<16x16xf32>
    %56 = arith.mulf %51, %55 : vector<16x16xf32>
    %cst_19 = arith.constant dense<0.000000e+00> : vector<16x4xf32>
    %57 = tpu.matmul %56, %44, %cst_19 {dimension_numbers = #tpu.dot_dimension_numbers<[1], [0], [0], [1], [0, 0, 1, 1], [], []>} : vector<16x16xf32>, vector<16x4xf32>, vector<16x4xf32> -> vector<16x4xf32>
    %58 = vector.extract_strided_slice %9 {offsets = [0, 12], sizes = [16, 4], strides = [1, 1]} : vector<16x64xf32> to vector<16x4xf32>
    %59 = vector.extract_strided_slice %5 {offsets = [0, 76], sizes = [16, 4], strides = [1, 1]} : vector<16x192xf32> to vector<16x4xf32>
    %60 = vector.extract_strided_slice %5 {offsets = [0, 140], sizes = [16, 4], strides = [1, 1]} : vector<16x192xf32> to vector<16x4xf32>
    "tpu.trace_start"() <{level = 10 : i32, message = "qd,kd->qk"}> : () -> ()
    %cst_20 = arith.constant dense<0.000000e+00> : vector<16x16xf32>
    %61 = tpu.matmul %58, %59, %cst_20 {dimension_numbers = #tpu.dot_dimension_numbers<[1], [1], [0], [0], [0, 0, 1, 0], [], []>} : vector<16x4xf32>, vector<16x4xf32>, vector<16x16xf32> -> vector<16x16xf32>
    "tpu.trace_stop"() : () -> ()
    %62 = arith.addf %61, %6 : vector<16x16xf32>
    %cst_21 = arith.constant dense<0xFF800000> : vector<16xf32>
    %63 = vector.multi_reduction <maximumf>, %62, %cst_21 [1] : vector<16x16xf32> to vector<16xf32>
    %64 = vector.shape_cast %63 : vector<16xf32> to vector<16x1xf32>
    %65 = vector.broadcast %64 : vector<16x1xf32> to vector<16x16xf32>
    %66 = arith.subf %62, %65 : vector<16x16xf32>
    %67 = math.exp %66 : vector<16x16xf32>
    %cst_22 = arith.constant dense<0.000000e+00> : vector<16xf32>
    %68 = vector.multi_reduction <add>, %67, %cst_22 [1] : vector<16x16xf32> to vector<16xf32>
    %69 = vector.shape_cast %68 : vector<16xf32> to vector<16x1xf32>
    %70 = tpu.reciprocal %69 {approx = true} : vector<16x1xf32> -> vector<16x1xf32>
    %71 = vector.broadcast %70 : vector<16x1xf32> to vector<16x16xf32>
    %72 = arith.mulf %67, %71 : vector<16x16xf32>
    %cst_23 = arith.constant dense<0.000000e+00> : vector<16x4xf32>
    %73 = tpu.matmul %72, %60, %cst_23 {dimension_numbers = #tpu.dot_dimension_numbers<[1], [0], [0], [1], [0, 0, 1, 1], [], []>} : vector<16x16xf32>, vector<16x4xf32>, vector<16x4xf32> -> vector<16x4xf32>
    %74 = vector.extract_strided_slice %9 {offsets = [0, 16], sizes = [16, 4], strides = [1, 1]} : vector<16x64xf32> to vector<16x4xf32>
    %75 = vector.extract_strided_slice %5 {offsets = [0, 80], sizes = [16, 4], strides = [1, 1]} : vector<16x192xf32> to vector<16x4xf32>
    %76 = vector.extract_strided_slice %5 {offsets = [0, 144], sizes = [16, 4], strides = [1, 1]} : vector<16x192xf32> to vector<16x4xf32>
    "tpu.trace_start"() <{level = 10 : i32, message = "qd,kd->qk"}> : () -> ()
    %cst_24 = arith.constant dense<0.000000e+00> : vector<16x16xf32>
    %77 = tpu.matmul %74, %75, %cst_24 {dimension_numbers = #tpu.dot_dimension_numbers<[1], [1], [0], [0], [0, 0, 1, 0], [], []>} : vector<16x4xf32>, vector<16x4xf32>, vector<16x16xf32> -> vector<16x16xf32>
    "tpu.trace_stop"() : () -> ()
    %78 = arith.addf %77, %6 : vector<16x16xf32>
    %cst_25 = arith.constant dense<0xFF800000> : vector<16xf32>
    %79 = vector.multi_reduction <maximumf>, %78, %cst_25 [1] : vector<16x16xf32> to vector<16xf32>
    %80 = vector.shape_cast %79 : vector<16xf32> to vector<16x1xf32>
    %81 = vector.broadcast %80 : vector<16x1xf32> to vector<16x16xf32>
    %82 = arith.subf %78, %81 : vector<16x16xf32>
    %83 = math.exp %82 : vector<16x16xf32>
    %cst_26 = arith.constant dense<0.000000e+00> : vector<16xf32>
    %84 = vector.multi_reduction <add>, %83, %cst_26 [1] : vector<16x16xf32> to vector<16xf32>
    %85 = vector.shape_cast %84 : vector<16xf32> to vector<16x1xf32>
    %86 = tpu.reciprocal %85 {approx = true} : vector<16x1xf32> -> vector<16x1xf32>
    %87 = vector.broadcast %86 : vector<16x1xf32> to vector<16x16xf32>
    %88 = arith.mulf %83, %87 : vector<16x16xf32>
    %cst_27 = arith.constant dense<0.000000e+00> : vector<16x4xf32>
    %89 = tpu.matmul %88, %76, %cst_27 {dimension_numbers = #tpu.dot_dimension_numbers<[1], [0], [0], [1], [0, 0, 1, 1], [], []>} : vector<16x16xf32>, vector<16x4xf32>, vector<16x4xf32> -> vector<16x4xf32>
    %90 = vector.extract_strided_slice %9 {offsets = [0, 20], sizes = [16, 4], strides = [1, 1]} : vector<16x64xf32> to vector<16x4xf32>
    %91 = vector.extract_strided_slice %5 {offsets = [0, 84], sizes = [16, 4], strides = [1, 1]} : vector<16x192xf32> to vector<16x4xf32>
    %92 = vector.extract_strided_slice %5 {offsets = [0, 148], sizes = [16, 4], strides = [1, 1]} : vector<16x192xf32> to vector<16x4xf32>
    "tpu.trace_start"() <{level = 10 : i32, message = "qd,kd->qk"}> : () -> ()
    %cst_28 = arith.constant dense<0.000000e+00> : vector<16x16xf32>
    %93 = tpu.matmul %90, %91, %cst_28 {dimension_numbers = #tpu.dot_dimension_numbers<[1], [1], [0], [0], [0, 0, 1, 0], [], []>} : vector<16x4xf32>, vector<16x4xf32>, vector<16x16xf32> -> vector<16x16xf32>
    "tpu.trace_stop"() : () -> ()
    %94 = arith.addf %93, %6 : vector<16x16xf32>
    %cst_29 = arith.constant dense<0xFF800000> : vector<16xf32>
    %95 = vector.multi_reduction <maximumf>, %94, %cst_29 [1] : vector<16x16xf32> to vector<16xf32>
    %96 = vector.shape_cast %95 : vector<16xf32> to vector<16x1xf32>
    %97 = vector.broadcast %96 : vector<16x1xf32> to vector<16x16xf32>
    %98 = arith.subf %94, %97 : vector<16x16xf32>
    %99 = math.exp %98 : vector<16x16xf32>
    %cst_30 = arith.constant dense<0.000000e+00> : vector<16xf32>
    %100 = vector.multi_reduction <add>, %99, %cst_30 [1] : vector<16x16xf32> to vector<16xf32>
    %101 = vector.shape_cast %100 : vector<16xf32> to vector<16x1xf32>
    %102 = tpu.reciprocal %101 {approx = true} : vector<16x1xf32> -> vector<16x1xf32>
    %103 = vector.broadcast %102 : vector<16x1xf32> to vector<16x16xf32>
    %104 = arith.mulf %99, %103 : vector<16x16xf32>
    %cst_31 = arith.constant dense<0.000000e+00> : vector<16x4xf32>
    %105 = tpu.matmul %104, %92, %cst_31 {dimension_numbers = #tpu.dot_dimension_numbers<[1], [0], [0], [1], [0, 0, 1, 1], [], []>} : vector<16x16xf32>, vector<16x4xf32>, vector<16x4xf32> -> vector<16x4xf32>
    %106 = vector.extract_strided_slice %9 {offsets = [0, 24], sizes = [16, 4], strides = [1, 1]} : vector<16x64xf32> to vector<16x4xf32>
    %107 = vector.extract_strided_slice %5 {offsets = [0, 88], sizes = [16, 4], strides = [1, 1]} : vector<16x192xf32> to vector<16x4xf32>
    %108 = vector.extract_strided_slice %5 {offsets = [0, 152], sizes = [16, 4], strides = [1, 1]} : vector<16x192xf32> to vector<16x4xf32>
    "tpu.trace_start"() <{level = 10 : i32, message = "qd,kd->qk"}> : () -> ()
    %cst_32 = arith.constant dense<0.000000e+00> : vector<16x16xf32>
    %109 = tpu.matmul %106, %107, %cst_32 {dimension_numbers = #tpu.dot_dimension_numbers<[1], [1], [0], [0], [0, 0, 1, 0], [], []>} : vector<16x4xf32>, vector<16x4xf32>, vector<16x16xf32> -> vector<16x16xf32>
    "tpu.trace_stop"() : () -> ()
    %110 = arith.addf %109, %6 : vector<16x16xf32>
    %cst_33 = arith.constant dense<0xFF800000> : vector<16xf32>
    %111 = vector.multi_reduction <maximumf>, %110, %cst_33 [1] : vector<16x16xf32> to vector<16xf32>
    %112 = vector.shape_cast %111 : vector<16xf32> to vector<16x1xf32>
    %113 = vector.broadcast %112 : vector<16x1xf32> to vector<16x16xf32>
    %114 = arith.subf %110, %113 : vector<16x16xf32>
    %115 = math.exp %114 : vector<16x16xf32>
    %cst_34 = arith.constant dense<0.000000e+00> : vector<16xf32>
    %116 = vector.multi_reduction <add>, %115, %cst_34 [1] : vector<16x16xf32> to vector<16xf32>
    %117 = vector.shape_cast %116 : vector<16xf32> to vector<16x1xf32>
    %118 = tpu.reciprocal %117 {approx = true} : vector<16x1xf32> -> vector<16x1xf32>
    %119 = vector.broadcast %118 : vector<16x1xf32> to vector<16x16xf32>
    %120 = arith.mulf %115, %119 : vector<16x16xf32>
    %cst_35 = arith.constant dense<0.000000e+00> : vector<16x4xf32>
    %121 = tpu.matmul %120, %108, %cst_35 {dimension_numbers = #tpu.dot_dimension_numbers<[1], [0], [0], [1], [0, 0, 1, 1], [], []>} : vector<16x16xf32>, vector<16x4xf32>, vector<16x4xf32> -> vector<16x4xf32>
    %122 = vector.extract_strided_slice %9 {offsets = [0, 28], sizes = [16, 4], strides = [1, 1]} : vector<16x64xf32> to vector<16x4xf32>
    %123 = vector.extract_strided_slice %5 {offsets = [0, 92], sizes = [16, 4], strides = [1, 1]} : vector<16x192xf32> to vector<16x4xf32>
    %124 = vector.extract_strided_slice %5 {offsets = [0, 156], sizes = [16, 4], strides = [1, 1]} : vector<16x192xf32> to vector<16x4xf32>
    "tpu.trace_start"() <{level = 10 : i32, message = "qd,kd->qk"}> : () -> ()
    %cst_36 = arith.constant dense<0.000000e+00> : vector<16x16xf32>
    %125 = tpu.matmul %122, %123, %cst_36 {dimension_numbers = #tpu.dot_dimension_numbers<[1], [1], [0], [0], [0, 0, 1, 0], [], []>} : vector<16x4xf32>, vector<16x4xf32>, vector<16x16xf32> -> vector<16x16xf32>
    "tpu.trace_stop"() : () -> ()
    %126 = arith.addf %125, %6 : vector<16x16xf32>
    %cst_37 = arith.constant dense<0xFF800000> : vector<16xf32>
    %127 = vector.multi_reduction <maximumf>, %126, %cst_37 [1] : vector<16x16xf32> to vector<16xf32>
    %128 = vector.shape_cast %127 : vector<16xf32> to vector<16x1xf32>
    %129 = vector.broadcast %128 : vector<16x1xf32> to vector<16x16xf32>
    %130 = arith.subf %126, %129 : vector<16x16xf32>
    %131 = math.exp %130 : vector<16x16xf32>
    %cst_38 = arith.constant dense<0.000000e+00> : vector<16xf32>
    %132 = vector.multi_reduction <add>, %131, %cst_38 [1] : vector<16x16xf32> to vector<16xf32>
    %133 = vector.shape_cast %132 : vector<16xf32> to vector<16x1xf32>
    %134 = tpu.reciprocal %133 {approx = true} : vector<16x1xf32> -> vector<16x1xf32>
    %135 = vector.broadcast %134 : vector<16x1xf32> to vector<16x16xf32>
    %136 = arith.mulf %131, %135 : vector<16x16xf32>
    %cst_39 = arith.constant dense<0.000000e+00> : vector<16x4xf32>
    %137 = tpu.matmul %136, %124, %cst_39 {dimension_numbers = #tpu.dot_dimension_numbers<[1], [0], [0], [1], [0, 0, 1, 1], [], []>} : vector<16x16xf32>, vector<16x4xf32>, vector<16x4xf32> -> vector<16x4xf32>
    %138 = vector.extract_strided_slice %9 {offsets = [0, 32], sizes = [16, 4], strides = [1, 1]} : vector<16x64xf32> to vector<16x4xf32>
    %139 = vector.extract_strided_slice %5 {offsets = [0, 96], sizes = [16, 4], strides = [1, 1]} : vector<16x192xf32> to vector<16x4xf32>
    %140 = vector.extract_strided_slice %5 {offsets = [0, 160], sizes = [16, 4], strides = [1, 1]} : vector<16x192xf32> to vector<16x4xf32>
    "tpu.trace_start"() <{level = 10 : i32, message = "qd,kd->qk"}> : () -> ()
    %cst_40 = arith.constant dense<0.000000e+00> : vector<16x16xf32>
    %141 = tpu.matmul %138, %139, %cst_40 {dimension_numbers = #tpu.dot_dimension_numbers<[1], [1], [0], [0], [0, 0, 1, 0], [], []>} : vector<16x4xf32>, vector<16x4xf32>, vector<16x16xf32> -> vector<16x16xf32>
    "tpu.trace_stop"() : () -> ()
    %142 = arith.addf %141, %6 : vector<16x16xf32>
    %cst_41 = arith.constant dense<0xFF800000> : vector<16xf32>
    %143 = vector.multi_reduction <maximumf>, %142, %cst_41 [1] : vector<16x16xf32> to vector<16xf32>
    %144 = vector.shape_cast %143 : vector<16xf32> to vector<16x1xf32>
    %145 = vector.broadcast %144 : vector<16x1xf32> to vector<16x16xf32>
    %146 = arith.subf %142, %145 : vector<16x16xf32>
    %147 = math.exp %146 : vector<16x16xf32>
    %cst_42 = arith.constant dense<0.000000e+00> : vector<16xf32>
    %148 = vector.multi_reduction <add>, %147, %cst_42 [1] : vector<16x16xf32> to vector<16xf32>
    %149 = vector.shape_cast %148 : vector<16xf32> to vector<16x1xf32>
    %150 = tpu.reciprocal %149 {approx = true} : vector<16x1xf32> -> vector<16x1xf32>
    %151 = vector.broadcast %150 : vector<16x1xf32> to vector<16x16xf32>
    %152 = arith.mulf %147, %151 : vector<16x16xf32>
    %cst_43 = arith.constant dense<0.000000e+00> : vector<16x4xf32>
    %153 = tpu.matmul %152, %140, %cst_43 {dimension_numbers = #tpu.dot_dimension_numbers<[1], [0], [0], [1], [0, 0, 1, 1], [], []>} : vector<16x16xf32>, vector<16x4xf32>, vector<16x4xf32> -> vector<16x4xf32>
    %154 = vector.extract_strided_slice %9 {offsets = [0, 36], sizes = [16, 4], strides = [1, 1]} : vector<16x64xf32> to vector<16x4xf32>
    %155 = vector.extract_strided_slice %5 {offsets = [0, 100], sizes = [16, 4], strides = [1, 1]} : vector<16x192xf32> to vector<16x4xf32>
    %156 = vector.extract_strided_slice %5 {offsets = [0, 164], sizes = [16, 4], strides = [1, 1]} : vector<16x192xf32> to vector<16x4xf32>
    "tpu.trace_start"() <{level = 10 : i32, message = "qd,kd->qk"}> : () -> ()
    %cst_44 = arith.constant dense<0.000000e+00> : vector<16x16xf32>
    %157 = tpu.matmul %154, %155, %cst_44 {dimension_numbers = #tpu.dot_dimension_numbers<[1], [1], [0], [0], [0, 0, 1, 0], [], []>} : vector<16x4xf32>, vector<16x4xf32>, vector<16x16xf32> -> vector<16x16xf32>
    "tpu.trace_stop"() : () -> ()
    %158 = arith.addf %157, %6 : vector<16x16xf32>
    %cst_45 = arith.constant dense<0xFF800000> : vector<16xf32>
    %159 = vector.multi_reduction <maximumf>, %158, %cst_45 [1] : vector<16x16xf32> to vector<16xf32>
    %160 = vector.shape_cast %159 : vector<16xf32> to vector<16x1xf32>
    %161 = vector.broadcast %160 : vector<16x1xf32> to vector<16x16xf32>
    %162 = arith.subf %158, %161 : vector<16x16xf32>
    %163 = math.exp %162 : vector<16x16xf32>
    %cst_46 = arith.constant dense<0.000000e+00> : vector<16xf32>
    %164 = vector.multi_reduction <add>, %163, %cst_46 [1] : vector<16x16xf32> to vector<16xf32>
    %165 = vector.shape_cast %164 : vector<16xf32> to vector<16x1xf32>
    %166 = tpu.reciprocal %165 {approx = true} : vector<16x1xf32> -> vector<16x1xf32>
    %167 = vector.broadcast %166 : vector<16x1xf32> to vector<16x16xf32>
    %168 = arith.mulf %163, %167 : vector<16x16xf32>
    %cst_47 = arith.constant dense<0.000000e+00> : vector<16x4xf32>
    %169 = tpu.matmul %168, %156, %cst_47 {dimension_numbers = #tpu.dot_dimension_numbers<[1], [0], [0], [1], [0, 0, 1, 1], [], []>} : vector<16x16xf32>, vector<16x4xf32>, vector<16x4xf32> -> vector<16x4xf32>
    %170 = vector.extract_strided_slice %9 {offsets = [0, 40], sizes = [16, 4], strides = [1, 1]} : vector<16x64xf32> to vector<16x4xf32>
    %171 = vector.extract_strided_slice %5 {offsets = [0, 104], sizes = [16, 4], strides = [1, 1]} : vector<16x192xf32> to vector<16x4xf32>
    %172 = vector.extract_strided_slice %5 {offsets = [0, 168], sizes = [16, 4], strides = [1, 1]} : vector<16x192xf32> to vector<16x4xf32>
    "tpu.trace_start"() <{level = 10 : i32, message = "qd,kd->qk"}> : () -> ()
    %cst_48 = arith.constant dense<0.000000e+00> : vector<16x16xf32>
    %173 = tpu.matmul %170, %171, %cst_48 {dimension_numbers = #tpu.dot_dimension_numbers<[1], [1], [0], [0], [0, 0, 1, 0], [], []>} : vector<16x4xf32>, vector<16x4xf32>, vector<16x16xf32> -> vector<16x16xf32>
    "tpu.trace_stop"() : () -> ()
    %174 = arith.addf %173, %6 : vector<16x16xf32>
    %cst_49 = arith.constant dense<0xFF800000> : vector<16xf32>
    %175 = vector.multi_reduction <maximumf>, %174, %cst_49 [1] : vector<16x16xf32> to vector<16xf32>
    %176 = vector.shape_cast %175 : vector<16xf32> to vector<16x1xf32>
    %177 = vector.broadcast %176 : vector<16x1xf32> to vector<16x16xf32>
    %178 = arith.subf %174, %177 : vector<16x16xf32>
    %179 = math.exp %178 : vector<16x16xf32>
    %cst_50 = arith.constant dense<0.000000e+00> : vector<16xf32>
    %180 = vector.multi_reduction <add>, %179, %cst_50 [1] : vector<16x16xf32> to vector<16xf32>
    %181 = vector.shape_cast %180 : vector<16xf32> to vector<16x1xf32>
    %182 = tpu.reciprocal %181 {approx = true} : vector<16x1xf32> -> vector<16x1xf32>
    %183 = vector.broadcast %182 : vector<16x1xf32> to vector<16x16xf32>
    %184 = arith.mulf %179, %183 : vector<16x16xf32>
    %cst_51 = arith.constant dense<0.000000e+00> : vector<16x4xf32>
    %185 = tpu.matmul %184, %172, %cst_51 {dimension_numbers = #tpu.dot_dimension_numbers<[1], [0], [0], [1], [0, 0, 1, 1], [], []>} : vector<16x16xf32>, vector<16x4xf32>, vector<16x4xf32> -> vector<16x4xf32>
    %186 = vector.extract_strided_slice %9 {offsets = [0, 44], sizes = [16, 4], strides = [1, 1]} : vector<16x64xf32> to vector<16x4xf32>
    %187 = vector.extract_strided_slice %5 {offsets = [0, 108], sizes = [16, 4], strides = [1, 1]} : vector<16x192xf32> to vector<16x4xf32>
    %188 = vector.extract_strided_slice %5 {offsets = [0, 172], sizes = [16, 4], strides = [1, 1]} : vector<16x192xf32> to vector<16x4xf32>
    "tpu.trace_start"() <{level = 10 : i32, message = "qd,kd->qk"}> : () -> ()
    %cst_52 = arith.constant dense<0.000000e+00> : vector<16x16xf32>
    %189 = tpu.matmul %186, %187, %cst_52 {dimension_numbers = #tpu.dot_dimension_numbers<[1], [1], [0], [0], [0, 0, 1, 0], [], []>} : vector<16x4xf32>, vector<16x4xf32>, vector<16x16xf32> -> vector<16x16xf32>
    "tpu.trace_stop"() : () -> ()
    %190 = arith.addf %189, %6 : vector<16x16xf32>
    %cst_53 = arith.constant dense<0xFF800000> : vector<16xf32>
    %191 = vector.multi_reduction <maximumf>, %190, %cst_53 [1] : vector<16x16xf32> to vector<16xf32>
    %192 = vector.shape_cast %191 : vector<16xf32> to vector<16x1xf32>
    %193 = vector.broadcast %192 : vector<16x1xf32> to vector<16x16xf32>
    %194 = arith.subf %190, %193 : vector<16x16xf32>
    %195 = math.exp %194 : vector<16x16xf32>
    %cst_54 = arith.constant dense<0.000000e+00> : vector<16xf32>
    %196 = vector.multi_reduction <add>, %195, %cst_54 [1] : vector<16x16xf32> to vector<16xf32>
    %197 = vector.shape_cast %196 : vector<16xf32> to vector<16x1xf32>
    %198 = tpu.reciprocal %197 {approx = true} : vector<16x1xf32> -> vector<16x1xf32>
    %199 = vector.broadcast %198 : vector<16x1xf32> to vector<16x16xf32>
    %200 = arith.mulf %195, %199 : vector<16x16xf32>
    %cst_55 = arith.constant dense<0.000000e+00> : vector<16x4xf32>
    %201 = tpu.matmul %200, %188, %cst_55 {dimension_numbers = #tpu.dot_dimension_numbers<[1], [0], [0], [1], [0, 0, 1, 1], [], []>} : vector<16x16xf32>, vector<16x4xf32>, vector<16x4xf32> -> vector<16x4xf32>
    %202 = vector.extract_strided_slice %9 {offsets = [0, 48], sizes = [16, 4], strides = [1, 1]} : vector<16x64xf32> to vector<16x4xf32>
    %203 = vector.extract_strided_slice %5 {offsets = [0, 112], sizes = [16, 4], strides = [1, 1]} : vector<16x192xf32> to vector<16x4xf32>
    %204 = vector.extract_strided_slice %5 {offsets = [0, 176], sizes = [16, 4], strides = [1, 1]} : vector<16x192xf32> to vector<16x4xf32>
    "tpu.trace_start"() <{level = 10 : i32, message = "qd,kd->qk"}> : () -> ()
    %cst_56 = arith.constant dense<0.000000e+00> : vector<16x16xf32>
    %205 = tpu.matmul %202, %203, %cst_56 {dimension_numbers = #tpu.dot_dimension_numbers<[1], [1], [0], [0], [0, 0, 1, 0], [], []>} : vector<16x4xf32>, vector<16x4xf32>, vector<16x16xf32> -> vector<16x16xf32>
    "tpu.trace_stop"() : () -> ()
    %206 = arith.addf %205, %6 : vector<16x16xf32>
    %cst_57 = arith.constant dense<0xFF800000> : vector<16xf32>
    %207 = vector.multi_reduction <maximumf>, %206, %cst_57 [1] : vector<16x16xf32> to vector<16xf32>
    %208 = vector.shape_cast %207 : vector<16xf32> to vector<16x1xf32>
    %209 = vector.broadcast %208 : vector<16x1xf32> to vector<16x16xf32>
    %210 = arith.subf %206, %209 : vector<16x16xf32>
    %211 = math.exp %210 : vector<16x16xf32>
    %cst_58 = arith.constant dense<0.000000e+00> : vector<16xf32>
    %212 = vector.multi_reduction <add>, %211, %cst_58 [1] : vector<16x16xf32> to vector<16xf32>
    %213 = vector.shape_cast %212 : vector<16xf32> to vector<16x1xf32>
    %214 = tpu.reciprocal %213 {approx = true} : vector<16x1xf32> -> vector<16x1xf32>
    %215 = vector.broadcast %214 : vector<16x1xf32> to vector<16x16xf32>
    %216 = arith.mulf %211, %215 : vector<16x16xf32>
    %cst_59 = arith.constant dense<0.000000e+00> : vector<16x4xf32>
    %217 = tpu.matmul %216, %204, %cst_59 {dimension_numbers = #tpu.dot_dimension_numbers<[1], [0], [0], [1], [0, 0, 1, 1], [], []>} : vector<16x16xf32>, vector<16x4xf32>, vector<16x4xf32> -> vector<16x4xf32>
    %218 = vector.extract_strided_slice %9 {offsets = [0, 52], sizes = [16, 4], strides = [1, 1]} : vector<16x64xf32> to vector<16x4xf32>
    %219 = vector.extract_strided_slice %5 {offsets = [0, 116], sizes = [16, 4], strides = [1, 1]} : vector<16x192xf32> to vector<16x4xf32>
    %220 = vector.extract_strided_slice %5 {offsets = [0, 180], sizes = [16, 4], strides = [1, 1]} : vector<16x192xf32> to vector<16x4xf32>
    "tpu.trace_start"() <{level = 10 : i32, message = "qd,kd->qk"}> : () -> ()
    %cst_60 = arith.constant dense<0.000000e+00> : vector<16x16xf32>
    %221 = tpu.matmul %218, %219, %cst_60 {dimension_numbers = #tpu.dot_dimension_numbers<[1], [1], [0], [0], [0, 0, 1, 0], [], []>} : vector<16x4xf32>, vector<16x4xf32>, vector<16x16xf32> -> vector<16x16xf32>
    "tpu.trace_stop"() : () -> ()
    %222 = arith.addf %221, %6 : vector<16x16xf32>
    %cst_61 = arith.constant dense<0xFF800000> : vector<16xf32>
    %223 = vector.multi_reduction <maximumf>, %222, %cst_61 [1] : vector<16x16xf32> to vector<16xf32>
    %224 = vector.shape_cast %223 : vector<16xf32> to vector<16x1xf32>
    %225 = vector.broadcast %224 : vector<16x1xf32> to vector<16x16xf32>
    %226 = arith.subf %222, %225 : vector<16x16xf32>
    %227 = math.exp %226 : vector<16x16xf32>
    %cst_62 = arith.constant dense<0.000000e+00> : vector<16xf32>
    %228 = vector.multi_reduction <add>, %227, %cst_62 [1] : vector<16x16xf32> to vector<16xf32>
    %229 = vector.shape_cast %228 : vector<16xf32> to vector<16x1xf32>
    %230 = tpu.reciprocal %229 {approx = true} : vector<16x1xf32> -> vector<16x1xf32>
    %231 = vector.broadcast %230 : vector<16x1xf32> to vector<16x16xf32>
    %232 = arith.mulf %227, %231 : vector<16x16xf32>
    %cst_63 = arith.constant dense<0.000000e+00> : vector<16x4xf32>
    %233 = tpu.matmul %232, %220, %cst_63 {dimension_numbers = #tpu.dot_dimension_numbers<[1], [0], [0], [1], [0, 0, 1, 1], [], []>} : vector<16x16xf32>, vector<16x4xf32>, vector<16x4xf32> -> vector<16x4xf32>
    %234 = vector.extract_strided_slice %9 {offsets = [0, 56], sizes = [16, 4], strides = [1, 1]} : vector<16x64xf32> to vector<16x4xf32>
    %235 = vector.extract_strided_slice %5 {offsets = [0, 120], sizes = [16, 4], strides = [1, 1]} : vector<16x192xf32> to vector<16x4xf32>
    %236 = vector.extract_strided_slice %5 {offsets = [0, 184], sizes = [16, 4], strides = [1, 1]} : vector<16x192xf32> to vector<16x4xf32>
    "tpu.trace_start"() <{level = 10 : i32, message = "qd,kd->qk"}> : () -> ()
    %cst_64 = arith.constant dense<0.000000e+00> : vector<16x16xf32>
    %237 = tpu.matmul %234, %235, %cst_64 {dimension_numbers = #tpu.dot_dimension_numbers<[1], [1], [0], [0], [0, 0, 1, 0], [], []>} : vector<16x4xf32>, vector<16x4xf32>, vector<16x16xf32> -> vector<16x16xf32>
    "tpu.trace_stop"() : () -> ()
    %238 = arith.addf %237, %6 : vector<16x16xf32>
    %cst_65 = arith.constant dense<0xFF800000> : vector<16xf32>
    %239 = vector.multi_reduction <maximumf>, %238, %cst_65 [1] : vector<16x16xf32> to vector<16xf32>
    %240 = vector.shape_cast %239 : vector<16xf32> to vector<16x1xf32>
    %241 = vector.broadcast %240 : vector<16x1xf32> to vector<16x16xf32>
    %242 = arith.subf %238, %241 : vector<16x16xf32>
    %243 = math.exp %242 : vector<16x16xf32>
    %cst_66 = arith.constant dense<0.000000e+00> : vector<16xf32>
    %244 = vector.multi_reduction <add>, %243, %cst_66 [1] : vector<16x16xf32> to vector<16xf32>
    %245 = vector.shape_cast %244 : vector<16xf32> to vector<16x1xf32>
    %246 = tpu.reciprocal %245 {approx = true} : vector<16x1xf32> -> vector<16x1xf32>
    %247 = vector.broadcast %246 : vector<16x1xf32> to vector<16x16xf32>
    %248 = arith.mulf %243, %247 : vector<16x16xf32>
    %cst_67 = arith.constant dense<0.000000e+00> : vector<16x4xf32>
    %249 = tpu.matmul %248, %236, %cst_67 {dimension_numbers = #tpu.dot_dimension_numbers<[1], [0], [0], [1], [0, 0, 1, 1], [], []>} : vector<16x16xf32>, vector<16x4xf32>, vector<16x4xf32> -> vector<16x4xf32>
    %250 = vector.extract_strided_slice %9 {offsets = [0, 60], sizes = [16, 4], strides = [1, 1]} : vector<16x64xf32> to vector<16x4xf32>
    %251 = vector.extract_strided_slice %5 {offsets = [0, 124], sizes = [16, 4], strides = [1, 1]} : vector<16x192xf32> to vector<16x4xf32>
    %252 = vector.extract_strided_slice %5 {offsets = [0, 188], sizes = [16, 4], strides = [1, 1]} : vector<16x192xf32> to vector<16x4xf32>
    "tpu.trace_start"() <{level = 10 : i32, message = "qd,kd->qk"}> : () -> ()
    %cst_68 = arith.constant dense<0.000000e+00> : vector<16x16xf32>
    %253 = tpu.matmul %250, %251, %cst_68 {dimension_numbers = #tpu.dot_dimension_numbers<[1], [1], [0], [0], [0, 0, 1, 0], [], []>} : vector<16x4xf32>, vector<16x4xf32>, vector<16x16xf32> -> vector<16x16xf32>
    "tpu.trace_stop"() : () -> ()
    %254 = arith.addf %253, %6 : vector<16x16xf32>
    %cst_69 = arith.constant dense<0xFF800000> : vector<16xf32>
    %255 = vector.multi_reduction <maximumf>, %254, %cst_69 [1] : vector<16x16xf32> to vector<16xf32>
    %256 = vector.shape_cast %255 : vector<16xf32> to vector<16x1xf32>
    %257 = vector.broadcast %256 : vector<16x1xf32> to vector<16x16xf32>
    %258 = arith.subf %254, %257 : vector<16x16xf32>
    %259 = math.exp %258 : vector<16x16xf32>
    %cst_70 = arith.constant dense<0.000000e+00> : vector<16xf32>
    %260 = vector.multi_reduction <add>, %259, %cst_70 [1] : vector<16x16xf32> to vector<16xf32>
    %261 = vector.shape_cast %260 : vector<16xf32> to vector<16x1xf32>
    %262 = tpu.reciprocal %261 {approx = true} : vector<16x1xf32> -> vector<16x1xf32>
    %263 = vector.broadcast %262 : vector<16x1xf32> to vector<16x16xf32>
    %264 = arith.mulf %259, %263 : vector<16x16xf32>
    %cst_71 = arith.constant dense<0.000000e+00> : vector<16x4xf32>
    %265 = tpu.matmul %264, %252, %cst_71 {dimension_numbers = #tpu.dot_dimension_numbers<[1], [0], [0], [1], [0, 0, 1, 1], [], []>} : vector<16x16xf32>, vector<16x4xf32>, vector<16x4xf32> -> vector<16x4xf32>
    %266 = tpu.concatenate %25, %41, %57, %73, %89, %105, %121, %137, %153, %169, %185, %201, %217, %233, %249, %265 in 1 : vector<16x4xf32>, vector<16x4xf32>, vector<16x4xf32>, vector<16x4xf32>, vector<16x4xf32>, vector<16x4xf32>, vector<16x4xf32>, vector<16x4xf32>, vector<16x4xf32>, vector<16x4xf32>, vector<16x4xf32>, vector<16x4xf32>, vector<16x4xf32>, vector<16x4xf32>, vector<16x4xf32>, vector<16x4xf32> -> vector<16x64xf32>
    %c0_72 = arith.constant 0 : index
    %c0_73 = arith.constant 0 : index
    %267 = vector.load %arg4[%c0_72, %c0_73] : memref<64x64xf32, #tpu.memory_space<vmem>>, vector<64x64xf32>
    %cst_74 = arith.constant dense<0.000000e+00> : vector<16x64xf32>
    %268 = tpu.matmul %266, %267, %cst_74 {dimension_numbers = #tpu.dot_dimension_numbers<[1], [0], [0], [1], [0, 0, 1, 1], [], []>} : vector<16x64xf32>, vector<64x64xf32>, vector<16x64xf32> -> vector<16x64xf32>
    %c0_75 = arith.constant 0 : index
    %c0_76 = arith.constant 0 : index
    %269 = vector.load %arg5[%c0_75, %c0_76] : memref<1x64xf32, #tpu.memory_space<vmem>>, vector<1x64xf32>
    %270 = vector.broadcast %269 : vector<1x64xf32> to vector<16x64xf32>
    %271 = arith.addf %268, %270 : vector<16x64xf32>
    %272 = arith.addf %0, %271 : vector<16x64xf32>
    %c0_77 = arith.constant 0 : index
    %c0_78 = arith.constant 0 : index
    %273 = vector.load %arg6[%c0_77, %c0_78] : memref<1x64xf32, #tpu.memory_space<vmem>>, vector<1x64xf32>
    %c0_79 = arith.constant 0 : index
    %c0_80 = arith.constant 0 : index
    %274 = vector.load %arg7[%c0_79, %c0_80] : memref<1x64xf32, #tpu.memory_space<vmem>>, vector<1x64xf32>
    %cst_81 = arith.constant dense<0.000000e+00> : vector<16xf32>
    %275 = vector.multi_reduction <add>, %272, %cst_81 [1] : vector<16x64xf32> to vector<16xf32>
    %276 = vector.shape_cast %275 : vector<16xf32> to vector<16x1xf32>
    %cst_82 = arith.constant 6.400000e+01 : f32
    %277 = vector.broadcast %cst_82 : f32 to vector<16x1xf32>
    %278 = arith.divf %276, %277 : vector<16x1xf32>
    %279 = vector.broadcast %278 : vector<16x1xf32> to vector<16x64xf32>
    %280 = arith.subf %272, %279 : vector<16x64xf32>
    %281 = arith.mulf %280, %280 : vector<16x64xf32>
    %cst_83 = arith.constant dense<0.000000e+00> : vector<16xf32>
    %282 = vector.multi_reduction <add>, %281, %cst_83 [1] : vector<16x64xf32> to vector<16xf32>
    %283 = vector.shape_cast %282 : vector<16xf32> to vector<16x1xf32>
    %cst_84 = arith.constant 6.400000e+01 : f32
    %284 = vector.broadcast %cst_84 : f32 to vector<16x1xf32>
    %285 = arith.divf %283, %284 : vector<16x1xf32>
    %cst_85 = arith.constant 9.99999974E-6 : f32
    %286 = vector.broadcast %cst_85 : f32 to vector<16x1xf32>
    %287 = arith.addf %285, %286 : vector<16x1xf32>
    %288 = math.rsqrt %287 : vector<16x1xf32>
    %289 = vector.broadcast %288 : vector<16x1xf32> to vector<16x64xf32>
    %290 = arith.mulf %280, %289 : vector<16x64xf32>
    %291 = vector.broadcast %273 : vector<1x64xf32> to vector<16x64xf32>
    %292 = arith.mulf %290, %291 : vector<16x64xf32>
    %293 = vector.broadcast %274 : vector<1x64xf32> to vector<16x64xf32>
    %294 = arith.addf %292, %293 : vector<16x64xf32>
    %c0_86 = arith.constant 0 : index
    %c0_87 = arith.constant 0 : index
    %295 = vector.load %arg8[%c0_86, %c0_87] : memref<64x128xf32, #tpu.memory_space<vmem>>, vector<64x128xf32>
    %cst_88 = arith.constant dense<0.000000e+00> : vector<16x128xf32>
    %296 = tpu.matmul %294, %295, %cst_88 {dimension_numbers = #tpu.dot_dimension_numbers<[1], [0], [0], [1], [0, 0, 1, 1], [], []>} : vector<16x64xf32>, vector<64x128xf32>, vector<16x128xf32> -> vector<16x128xf32>
    %c0_89 = arith.constant 0 : index
    %c0_90 = arith.constant 0 : index
    %297 = vector.load %arg9[%c0_89, %c0_90] : memref<1x128xf32, #tpu.memory_space<vmem>>, vector<1x128xf32>
    %298 = vector.broadcast %297 : vector<1x128xf32> to vector<16x128xf32>
    %299 = arith.addf %296, %298 : vector<16x128xf32>
    %cst_91 = arith.constant 5.000000e-01 : f32
    %300 = vector.broadcast %cst_91 : f32 to vector<16x128xf32>
    %301 = arith.mulf %300, %299 : vector<16x128xf32>
    %cst_92 = arith.constant 4.471500e-02 : f32
    %302 = vector.broadcast %cst_92 : f32 to vector<16x128xf32>
    %303 = arith.mulf %302, %299 : vector<16x128xf32>
    %304 = arith.mulf %303, %299 : vector<16x128xf32>
    %305 = arith.mulf %304, %299 : vector<16x128xf32>
    %306 = arith.addf %299, %305 : vector<16x128xf32>
    %cst_93 = arith.constant 0.797884583 : f32
    %307 = vector.broadcast %cst_93 : f32 to vector<16x128xf32>
    %308 = arith.mulf %307, %306 : vector<16x128xf32>
    %309 = math.tanh %308 : vector<16x128xf32>
    %cst_94 = arith.constant 1.000000e+00 : f32
    %310 = vector.broadcast %cst_94 : f32 to vector<16x128xf32>
    %311 = arith.addf %310, %309 : vector<16x128xf32>
    %312 = arith.mulf %301, %311 : vector<16x128xf32>
    %c0_95 = arith.constant 0 : index
    %c0_96 = arith.constant 0 : index
    %313 = vector.load %arg10[%c0_95, %c0_96] : memref<128x64xf32, #tpu.memory_space<vmem>>, vector<128x64xf32>
    %cst_97 = arith.constant dense<0.000000e+00> : vector<16x64xf32>
    %314 = tpu.matmul %312, %313, %cst_97 {dimension_numbers = #tpu.dot_dimension_numbers<[1], [0], [0], [1], [0, 0, 1, 1], [], []>} : vector<16x128xf32>, vector<128x64xf32>, vector<16x64xf32> -> vector<16x64xf32>
    %c0_98 = arith.constant 0 : index
    %c0_99 = arith.constant 0 : index
    %315 = vector.load %arg11[%c0_98, %c0_99] : memref<1x64xf32, #tpu.memory_space<vmem>>, vector<1x64xf32>
    %316 = vector.broadcast %315 : vector<1x64xf32> to vector<16x64xf32>
    %317 = arith.addf %314, %316 : vector<16x64xf32>
    %318 = arith.addf %294, %317 : vector<16x64xf32>
    %c0_100 = arith.constant 0 : index
    %c0_101 = arith.constant 0 : index
    %319 = vector.load %arg12[%c0_100, %c0_101] : memref<1x64xf32, #tpu.memory_space<vmem>>, vector<1x64xf32>
    %c0_102 = arith.constant 0 : index
    %c0_103 = arith.constant 0 : index
    %320 = vector.load %arg13[%c0_102, %c0_103] : memref<1x64xf32, #tpu.memory_space<vmem>>, vector<1x64xf32>
    %cst_104 = arith.constant dense<0.000000e+00> : vector<16xf32>
    %321 = vector.multi_reduction <add>, %318, %cst_104 [1] : vector<16x64xf32> to vector<16xf32>
    %322 = vector.shape_cast %321 : vector<16xf32> to vector<16x1xf32>
    %cst_105 = arith.constant 6.400000e+01 : f32
    %323 = vector.broadcast %cst_105 : f32 to vector<16x1xf32>
    %324 = arith.divf %322, %323 : vector<16x1xf32>
    %325 = vector.broadcast %324 : vector<16x1xf32> to vector<16x64xf32>
    %326 = arith.subf %318, %325 : vector<16x64xf32>
    %327 = arith.mulf %326, %326 : vector<16x64xf32>
    %cst_106 = arith.constant dense<0.000000e+00> : vector<16xf32>
    %328 = vector.multi_reduction <add>, %327, %cst_106 [1] : vector<16x64xf32> to vector<16xf32>
    %329 = vector.shape_cast %328 : vector<16xf32> to vector<16x1xf32>
    %cst_107 = arith.constant 6.400000e+01 : f32
    %330 = vector.broadcast %cst_107 : f32 to vector<16x1xf32>
    %331 = arith.divf %329, %330 : vector<16x1xf32>
    %cst_108 = arith.constant 9.99999974E-6 : f32
    %332 = vector.broadcast %cst_108 : f32 to vector<16x1xf32>
    %333 = arith.addf %331, %332 : vector<16x1xf32>
    %334 = math.rsqrt %333 : vector<16x1xf32>
    %335 = vector.broadcast %334 : vector<16x1xf32> to vector<16x64xf32>
    %336 = arith.mulf %326, %335 : vector<16x64xf32>
    %337 = vector.broadcast %319 : vector<1x64xf32> to vector<16x64xf32>
    %338 = arith.mulf %336, %337 : vector<16x64xf32>
    %339 = vector.broadcast %320 : vector<1x64xf32> to vector<16x64xf32>
    %340 = arith.addf %338, %339 : vector<16x64xf32>
    %c0_109 = arith.constant 0 : index
    %c0_110 = arith.constant 0 : index
    %341 = vector.load %arg14[%c0_109, %c0_110] : memref<16x64xf32, #tpu.memory_space<vmem>>, vector<16x64xf32>
    tpu.vector_store %arg14[%c0_109, %c0_110], %340 {strides = array<i32>} : memref<16x64xf32, #tpu.memory_space<vmem>>, vector<16x64xf32>,
    return
  }
}

module attributes {stable_mosaic.version = 11 : i64} {
  func.func @_tr_layer_kernel(%arg0: memref<16x64xf32, #tpu.memory_space<vmem>>, %arg1: memref<16x16xf32, #tpu.memory_space<vmem>>, %arg2: memref<64x192xf32, #tpu.memory_space<vmem>>, %arg3: memref<1x192xf32, #tpu.memory_space<vmem>>, %arg4: memref<64x64xf32, #tpu.memory_space<vmem>>, %arg5: memref<1x64xf32, #tpu.memory_space<vmem>>, %arg6: memref<1x64xf32, #tpu.memory_space<vmem>>, %arg7: memref<1x64xf32, #tpu.memory_space<vmem>>, %arg8: memref<64x128xf32, #tpu.memory_space<vmem>>, %arg9: memref<1x128xf32, #tpu.memory_space<vmem>>, %arg10: memref<128x64xf32, #tpu.memory_space<vmem>>, %arg11: memref<1x64xf32, #tpu.memory_space<vmem>>, %arg12: memref<1x64xf32, #tpu.memory_space<vmem>>, %arg13: memref<1x64xf32, #tpu.memory_space<vmem>>, %arg14: memref<16x64xf32, #tpu.memory_space<vmem>>) attributes {dimension_semantics = [], scalar_prefetch = 0 : i64, scratch_operands = 0 : i64, tpu.core_type = #tpu.core_type<tc>} {
    %c0 = arith.constant 0 : index
    %c0_0 = arith.constant 0 : index
    %0 = vector.load %arg0[%c0, %c0_0] : memref<16x64xf32, #tpu.memory_space<vmem>>, vector<16x64xf32>
    %c0_1 = arith.constant 0 : index
    %c0_2 = arith.constant 0 : index
    %1 = vector.load %arg2[%c0_1, %c0_2] : memref<64x192xf32, #tpu.memory_space<vmem>>, vector<64x192xf32>
    %cst = arith.constant dense<0.000000e+00> : vector<16x192xf32>
    %2 = tpu.matmul %0, %1, %cst {dimension_numbers = #tpu.dot_dimension_numbers<[1], [0], [0], [1], [0, 0, 1, 1], [], []>} : vector<16x64xf32>, vector<64x192xf32>, vector<16x192xf32> -> vector<16x192xf32>
    %c0_3 = arith.constant 0 : index
    %c0_4 = arith.constant 0 : index
    %3 = vector.load %arg3[%c0_3, %c0_4] : memref<1x192xf32, #tpu.memory_space<vmem>>, vector<1x192xf32>
    %4 = vector.broadcast %3 : vector<1x192xf32> to vector<16x192xf32>
    %5 = arith.addf %2, %4 : vector<16x192xf32>
    %c0_5 = arith.constant 0 : index
    %c0_6 = arith.constant 0 : index
    %6 = vector.load %arg1[%c0_5, %c0_6] : memref<16x16xf32, #tpu.memory_space<vmem>>, vector<16x16xf32>
    %7 = vector.extract_strided_slice %5 {offsets = [0, 0], sizes = [16, 64], strides = [1, 1]} : vector<16x192xf32> to vector<16x64xf32>
    %cst_7 = arith.constant 5.000000e-01 : f32
    %8 = vector.broadcast %cst_7 : f32 to vector<16x64xf32>
    %9 = arith.mulf %7, %8 : vector<16x64xf32>
    %10 = vector.extract_strided_slice %9 {offsets = [0, 0], sizes = [16, 4], strides = [1, 1]} : vector<16x64xf32> to vector<16x4xf32>
    %11 = vector.extract_strided_slice %5 {offsets = [0, 64], sizes = [16, 4], strides = [1, 1]} : vector<16x192xf32> to vector<16x4xf32>
    %12 = vector.extract_strided_slice %5 {offsets = [0, 128], sizes = [16, 4], strides = [1, 1]} : vector<16x192xf32> to vector<16x4xf32>
    "tpu.trace_start"() <{level = 10 : i32, message = "qd,kd->qk"}> : () -> ()
    %cst_8 = arith.constant dense<0.000000e+00> : vector<16x16xf32>
    %13 = tpu.matmul %10, %11, %cst_8 {dimension_numbers = #tpu.dot_dimension_numbers<[1], [1], [0], [0], [0, 0, 1, 0], [], []>} : vector<16x4xf32>, vector<16x4xf32>, vector<16x16xf32> -> vector<16x16xf32>
    "tpu.trace_stop"() : () -> ()
    %14 = arith.addf %13, %6 : vector<16x16xf32>
    %cst_9 = arith.constant dense<0xFF800000> : vector<16xf32>
    %15 = vector.multi_reduction <maximumf>, %14, %cst_9 [1] : vector<16x16xf32> to vector<16xf32>
    %16 = vector.shape_cast %15 : vector<16xf32> to vector<16x1xf32>
    %17 = vector.broadcast %16 : vector<16x1xf32> to vector<16x16xf32>
    %18 = arith.subf %14, %17 : vector<16x16xf32>
    %19 = math.exp %18 : vector<16x16xf32>
    %cst_10 = arith.constant dense<0.000000e+00> : vector<16xf32>
    %20 = vector.multi_reduction <add>, %19, %cst_10 [1] : vector<16x16xf32> to vector<16xf32>
    %21 = vector.shape_cast %20 : vector<16xf32> to vector<16x1xf32>
    %22 = tpu.reciprocal %21 {approx = true} : vector<16x1xf32> -> vector<16x1xf32>
    %23 = vector.broadcast %22 : vector<16x1xf32> to vector<16x16xf32>
    %24 = arith.mulf %19, %23 : vector<16x16xf32>
    %cst_11 = arith.constant dense<0.000000e+00> : vector<16x4xf32>
    %25 = tpu.matmul %24, %12, %cst_11 {dimension_numbers = #tpu.dot_dimension_numbers<[1], [0], [0], [1], [0, 0, 1, 1], [], []>} : vector<16x16xf32>, vector<16x4xf32>, vector<16x4xf32> -> vector<16x4xf32>
    %26 = vector.extract_strided_slice %9 {offsets = [0, 4], sizes = [16, 4], strides = [1, 1]} : vector<16x64xf32> to vector<16x4xf32>
    %27 = vector.extract_strided_slice %5 {offsets = [0, 68], sizes = [16, 4], strides = [1, 1]} : vector<16x192xf32> to vector<16x4xf32>
    %28 = vector.extract_strided_slice %5 {offsets = [0, 132], sizes = [16, 4], strides = [1, 1]} : vector<16x192xf32> to vector<16x4xf32>
    "tpu.trace_start"() <{level = 10 : i32, message = "qd,kd->qk"}> : () -> ()
    %cst_12 = arith.constant dense<0.000000e+00> : vector<16x16xf32>
    %29 = tpu.matmul %26, %27, %cst_12 {dimension_numbers = #tpu.dot_dimension_numbers<[1], [1], [0], [0], [0, 0, 1, 0], [], []>} : vector<16x4xf32>, vector<16x4xf32>, vector<16x16xf32> -> vector<16x16xf32>
    "tpu.trace_stop"() : () -> ()
    %30 = arith.addf %29, %6 : vector<16x16xf32>
    %cst_13 = arith.constant dense<0xFF800000> : vector<16xf32>
    %31 = vector.multi_reduction <maximumf>, %30, %cst_13 [1] : vector<16x16xf32> to vector<16xf32>
    %32 = vector.shape_cast %31 : vector<16xf32> to vector<16x1xf32>
    %33 = vector.broadcast %32 : vector<16x1xf32> to vector<16x16xf32>
    %34 = arith.subf %30, %33 : vector<16x16xf32>
    %35 = math.exp %34 : vector<16x16xf32>
    %cst_14 = arith.constant dense<0.000000e+00> : vector<16xf32>
    %36 = vector.multi_reduction <add>, %35, %cst_14 [1] : vector<16x16xf32> to vector<16xf32>
    %37 = vector.shape_cast %36 : vector<16xf32> to vector<16x1xf32>
    %38 = tpu.reciprocal %37 {approx = true} : vector<16x1xf32> -> vector<16x1xf32>
    %39 = vector.broadcast %38 : vector<16x1xf32> to vector<16x16xf32>
    %40 = arith.mulf %35, %39 : vector<16x16xf32>
    %cst_15 = arith.constant dense<0.000000e+00> : vector<16x4xf32>
    %41 = tpu.matmul %40, %28, %cst_15 {dimension_numbers = #tpu.dot_dimension_numbers<[1], [0], [0], [1], [0, 0, 1, 1], [], []>} : vector<16x16xf32>, vector<16x4xf32>, vector<16x4xf32> -> vector<16x4xf32>
    %42 = vector.extract_strided_slice %9 {offsets = [0, 8], sizes = [16, 4], strides = [1, 1]} : vector<16x64xf32> to vector<16x4xf32>
    %43 = vector.extract_strided_slice %5 {offsets = [0, 72], sizes = [16, 4], strides = [1, 1]} : vector<16x192xf32> to vector<16x4xf32>
    %44 = vector.extract_strided_slice %5 {offsets = [0, 136], sizes = [16, 4], strides = [1, 1]} : vector<16x192xf32> to vector<16x4xf32>
    "tpu.trace_start"() <{level = 10 : i32, message = "qd,kd->qk"}> : () -> ()
    %cst_16 = arith.constant dense<0.000000e+00> : vector<16x16xf32>
    %45 = tpu.matmul %42, %43, %cst_16 {dimension_numbers = #tpu.dot_dimension_numbers<[1], [1], [0], [0], [0, 0, 1, 0], [], []>} : vector<16x4xf32>, vector<16x4xf32>, vector<16x16xf32> -> vector<16x16xf32>
    "tpu.trace_stop"() : () -> ()
    %46 = arith.addf %45, %6 : vector<16x16xf32>
    %cst_17 = arith.constant dense<0xFF800000> : vector<16xf32>
    %47 = vector.multi_reduction <maximumf>, %46, %cst_17 [1] : vector<16x16xf32> to vector<16xf32>
    %48 = vector.shape_cast %47 : vector<16xf32> to vector<16x1xf32>
    %49 = vector.broadcast %48 : vector<16x1xf32> to vector<16x16xf32>
    %50 = arith.subf %46, %49 : vector<16x16xf32>
    %51 = math.exp %50 : vector<16x16xf32>
    %cst_18 = arith.constant dense<0.000000e+00> : vector<16xf32>
    %52 = vector.multi_reduction <add>, %51, %cst_18 [1] : vector<16x16xf32> to vector<16xf32>
    %53 = vector.shape_cast %52 : vector<16xf32> to vector<16x1xf32>
    %54 = tpu.reciprocal %53 {approx = true} : vector<16x1xf32> -> vector<16x1xf32>
    %55 = vector.broadcast %54 : vector<16x1xf32> to vector<16x16xf32>
    %56 = arith.mulf %51, %55 : vector<16x16xf32>
    %cst_19 = arith.constant dense<0.000000e+00> : vector<16x4xf32>
    %57 = tpu.matmul %56, %44, %cst_19 {dimension_numbers = #tpu.dot_dimension_numbers<[1], [0], [0], [1], [0, 0, 1, 1], [], []>} : vector<16x16xf32>, vector<16x4xf32>, vector<16x4xf32> -> vector<16x4xf32>
    %58 = vector.extract_strided_slice %9 {offsets = [0, 12], sizes = [16, 4], strides = [1, 1]} : vector<16x64xf32> to vector<16x4xf32>
    %59 = vector.extract_strided_slice %5 {offsets = [0, 76], sizes = [16, 4], strides = [1, 1]} : vector<16x192xf32> to vector<16x4xf32>
    %60 = vector.extract_strided_slice %5 {offsets = [0, 140], sizes = [16, 4], strides = [1, 1]} : vector<16x192xf32> to vector<16x4xf32>
    "tpu.trace_start"() <{level = 10 : i32, message = "qd,kd->qk"}> : () -> ()
    %cst_20 = arith.constant dense<0.000000e+00> : vector<16x16xf32>
    %61 = tpu.matmul %58, %59, %cst_20 {dimension_numbers = #tpu.dot_dimension_numbers<[1], [1], [0], [0], [0, 0, 1, 0], [], []>} : vector<16x4xf32>, vector<16x4xf32>, vector<16x16xf32> -> vector<16x16xf32>
    "tpu.trace_stop"() : () -> ()
    %62 = arith.addf %61, %6 : vector<16x16xf32>
    %cst_21 = arith.constant dense<0xFF800000> : vector<16xf32>
    %63 = vector.multi_reduction <maximumf>, %62, %cst_21 [1] : vector<16x16xf32> to vector<16xf32>
    %64 = vector.shape_cast %63 : vector<16xf32> to vector<16x1xf32>
    %65 = vector.broadcast %64 : vector<16x1xf32> to vector<16x16xf32>
    %66 = arith.subf %62, %65 : vector<16x16xf32>
    %67 = math.exp %66 : vector<16x16xf32>
    %cst_22 = arith.constant dense<0.000000e+00> : vector<16xf32>
    %68 = vector.multi_reduction <add>, %67, %cst_22 [1] : vector<16x16xf32> to vector<16xf32>
    %69 = vector.shape_cast %68 : vector<16xf32> to vector<16x1xf32>
    %70 = tpu.reciprocal %69 {approx = true} : vector<16x1xf32> -> vector<16x1xf32>
    %71 = vector.broadcast %70 : vector<16x1xf32> to vector<16x16xf32>
    %72 = arith.mulf %67, %71 : vector<16x16xf32>
    %cst_23 = arith.constant dense<0.000000e+00> : vector<16x4xf32>
    %73 = tpu.matmul %72, %60, %cst_23 {dimension_numbers = #tpu.dot_dimension_numbers<[1], [0], [0], [1], [0, 0, 1, 1], [], []>} : vector<16x16xf32>, vector<16x4xf32>, vector<16x4xf32> -> vector<16x4xf32>
    %74 = vector.extract_strided_slice %9 {offsets = [0, 16], sizes = [16, 4], strides = [1, 1]} : vector<16x64xf32> to vector<16x4xf32>
    %75 = vector.extract_strided_slice %5 {offsets = [0, 80], sizes = [16, 4], strides = [1, 1]} : vector<16x192xf32> to vector<16x4xf32>
    %76 = vector.extract_strided_slice %5 {offsets = [0, 144], sizes = [16, 4], strides = [1, 1]} : vector<16x192xf32> to vector<16x4xf32>
    "tpu.trace_start"() <{level = 10 : i32, message = "qd,kd->qk"}> : () -> ()
    %cst_24 = arith.constant dense<0.000000e+00> : vector<16x16xf32>
    %77 = tpu.matmul %74, %75, %cst_24 {dimension_numbers = #tpu.dot_dimension_numbers<[1], [1], [0], [0], [0, 0, 1, 0], [], []>} : vector<16x4xf32>, vector<16x4xf32>, vector<16x16xf32> -> vector<16x16xf32>
    "tpu.trace_stop"() : () -> ()
    %78 = arith.addf %77, %6 : vector<16x16xf32>
    %cst_25 = arith.constant dense<0xFF800000> : vector<16xf32>
    %79 = vector.multi_reduction <maximumf>, %78, %cst_25 [1] : vector<16x16xf32> to vector<16xf32>
    %80 = vector.shape_cast %79 : vector<16xf32> to vector<16x1xf32>
    %81 = vector.broadcast %80 : vector<16x1xf32> to vector<16x16xf32>
    %82 = arith.subf %78, %81 : vector<16x16xf32>
    %83 = math.exp %82 : vector<16x16xf32>
    %cst_26 = arith.constant dense<0.000000e+00> : vector<16xf32>
    %84 = vector.multi_reduction <add>, %83, %cst_26 [1] : vector<16x16xf32> to vector<16xf32>
    %85 = vector.shape_cast %84 : vector<16xf32> to vector<16x1xf32>
    %86 = tpu.reciprocal %85 {approx = true} : vector<16x1xf32> -> vector<16x1xf32>
    %87 = vector.broadcast %86 : vector<16x1xf32> to vector<16x16xf32>
    %88 = arith.mulf %83, %87 : vector<16x16xf32>
    %cst_27 = arith.constant dense<0.000000e+00> : vector<16x4xf32>
    %89 = tpu.matmul %88, %76, %cst_27 {dimension_numbers = #tpu.dot_dimension_numbers<[1], [0], [0], [1], [0, 0, 1, 1], [], []>} : vector<16x16xf32>, vector<16x4xf32>, vector<16x4xf32> -> vector<16x4xf32>
    %90 = vector.extract_strided_slice %9 {offsets = [0, 20], sizes = [16, 4], strides = [1, 1]} : vector<16x64xf32> to vector<16x4xf32>
    %91 = vector.extract_strided_slice %5 {offsets = [0, 84], sizes = [16, 4], strides = [1, 1]} : vector<16x192xf32> to vector<16x4xf32>
    %92 = vector.extract_strided_slice %5 {offsets = [0, 148], sizes = [16, 4], strides = [1, 1]} : vector<16x192xf32> to vector<16x4xf32>
    "tpu.trace_start"() <{level = 10 : i32, message = "qd,kd->qk"}> : () -> ()
    %cst_28 = arith.constant dense<0.000000e+00> : vector<16x16xf32>
    %93 = tpu.matmul %90, %91, %cst_28 {dimension_numbers = #tpu.dot_dimension_numbers<[1], [1], [0], [0], [0, 0, 1, 0], [], []>} : vector<16x4xf32>, vector<16x4xf32>, vector<16x16xf32> -> vector<16x16xf32>
    "tpu.trace_stop"() : () -> ()
    %94 = arith.addf %93, %6 : vector<16x16xf32>
    %cst_29 = arith.constant dense<0xFF800000> : vector<16xf32>
    %95 = vector.multi_reduction <maximumf>, %94, %cst_29 [1] : vector<16x16xf32> to vector<16xf32>
    %96 = vector.shape_cast %95 : vector<16xf32> to vector<16x1xf32>
    %97 = vector.broadcast %96 : vector<16x1xf32> to vector<16x16xf32>
    %98 = arith.subf %94, %97 : vector<16x16xf32>
    %99 = math.exp %98 : vector<16x16xf32>
    %cst_30 = arith.constant dense<0.000000e+00> : vector<16xf32>
    %100 = vector.multi_reduction <add>, %99, %cst_30 [1] : vector<16x16xf32> to vector<16xf32>
    %101 = vector.shape_cast %100 : vector<16xf32> to vector<16x1xf32>
    %102 = tpu.reciprocal %101 {approx = true} : vector<16x1xf32> -> vector<16x1xf32>
    %103 = vector.broadcast %102 : vector<16x1xf32> to vector<16x16xf32>
    %104 = arith.mulf %99, %103 : vector<16x16xf32>
    %cst_31 = arith.constant dense<0.000000e+00> : vector<16x4xf32>
    %105 = tpu.matmul %104, %92, %cst_31 {dimension_numbers = #tpu.dot_dimension_numbers<[1], [0], [0], [1], [0, 0, 1, 1], [], []>} : vector<16x16xf32>, vector<16x4xf32>, vector<16x4xf32> -> vector<16x4xf32>
    %106 = vector.extract_strided_slice %9 {offsets = [0, 24], sizes = [16, 4], strides = [1, 1]} : vector<16x64xf32> to vector<16x4xf32>
    %107 = vector.extract_strided_slice %5 {offsets = [0, 88], sizes = [16, 4], strides = [1, 1]} : vector<16x192xf32> to vector<16x4xf32>
    %108 = vector.extract_strided_slice %5 {offsets = [0, 152], sizes = [16, 4], strides = [1, 1]} : vector<16x192xf32> to vector<16x4xf32>
    "tpu.trace_start"() <{level = 10 : i32, message = "qd,kd->qk"}> : () -> ()
    %cst_32 = arith.constant dense<0.000000e+00> : vector<16x16xf32>
    %109 = tpu.matmul %106, %107, %cst_32 {dimension_numbers = #tpu.dot_dimension_numbers<[1], [1], [0], [0], [0, 0, 1, 0], [], []>} : vector<16x4xf32>, vector<16x4xf32>, vector<16x16xf32> -> vector<16x16xf32>
    "tpu.trace_stop"() : () -> ()
    %110 = arith.addf %109, %6 : vector<16x16xf32>
    %cst_33 = arith.constant dense<0xFF800000> : vector<16xf32>
    %111 = vector.multi_reduction <maximumf>, %110, %cst_33 [1] : vector<16x16xf32> to vector<16xf32>
    %112 = vector.shape_cast %111 : vector<16xf32> to vector<16x1xf32>
    %113 = vector.broadcast %112 : vector<16x1xf32> to vector<16x16xf32>
    %114 = arith.subf %110, %113 : vector<16x16xf32>
    %115 = math.exp %114 : vector<16x16xf32>
    %cst_34 = arith.constant dense<0.000000e+00> : vector<16xf32>
    %116 = vector.multi_reduction <add>, %115, %cst_34 [1] : vector<16x16xf32> to vector<16xf32>
    %117 = vector.shape_cast %116 : vector<16xf32> to vector<16x1xf32>
    %118 = tpu.reciprocal %117 {approx = true} : vector<16x1xf32> -> vector<16x1xf32>
    %119 = vector.broadcast %118 : vector<16x1xf32> to vector<16x16xf32>
    %120 = arith.mulf %115, %119 : vector<16x16xf32>
    %cst_35 = arith.constant dense<0.000000e+00> : vector<16x4xf32>
    %121 = tpu.matmul %120, %108, %cst_35 {dimension_numbers = #tpu.dot_dimension_numbers<[1], [0], [0], [1], [0, 0, 1, 1], [], []>} : vector<16x16xf32>, vector<16x4xf32>, vector<16x4xf32> -> vector<16x4xf32>
    %122 = vector.extract_strided_slice %9 {offsets = [0, 28], sizes = [16, 4], strides = [1, 1]} : vector<16x64xf32> to vector<16x4xf32>
    %123 = vector.extract_strided_slice %5 {offsets = [0, 92], sizes = [16, 4], strides = [1, 1]} : vector<16x192xf32> to vector<16x4xf32>
    %124 = vector.extract_strided_slice %5 {offsets = [0, 156], sizes = [16, 4], strides = [1, 1]} : vector<16x192xf32> to vector<16x4xf32>
    "tpu.trace_start"() <{level = 10 : i32, message = "qd,kd->qk"}> : () -> ()
    %cst_36 = arith.constant dense<0.000000e+00> : vector<16x16xf32>
    %125 = tpu.matmul %122, %123, %cst_36 {dimension_numbers = #tpu.dot_dimension_numbers<[1], [1], [0], [0], [0, 0, 1, 0], [], []>} : vector<16x4xf32>, vector<16x4xf32>, vector<16x16xf32> -> vector<16x16xf32>
    "tpu.trace_stop"() : () -> ()
    %126 = arith.addf %125, %6 : vector<16x16xf32>
    %cst_37 = arith.constant dense<0xFF800000> : vector<16xf32>
    %127 = vector.multi_reduction <maximumf>, %126, %cst_37 [1] : vector<16x16xf32> to vector<16xf32>
    %128 = vector.shape_cast %127 : vector<16xf32> to vector<16x1xf32>
    %129 = vector.broadcast %128 : vector<16x1xf32> to vector<16x16xf32>
    %130 = arith.subf %126, %129 : vector<16x16xf32>
    %131 = math.exp %130 : vector<16x16xf32>
    %cst_38 = arith.constant dense<0.000000e+00> : vector<16xf32>
    %132 = vector.multi_reduction <add>, %131, %cst_38 [1] : vector<16x16xf32> to vector<16xf32>
    %133 = vector.shape_cast %132 : vector<16xf32> to vector<16x1xf32>
    %134 = tpu.reciprocal %133 {approx = true} : vector<16x1xf32> -> vector<16x1xf32>
    %135 = vector.broadcast %134 : vector<16x1xf32> to vector<16x16xf32>
    %136 = arith.mulf %131, %135 : vector<16x16xf32>
    %cst_39 = arith.constant dense<0.000000e+00> : vector<16x4xf32>
    %137 = tpu.matmul %136, %124, %cst_39 {dimension_numbers = #tpu.dot_dimension_numbers<[1], [0], [0], [1], [0, 0, 1, 1], [], []>} : vector<16x16xf32>, vector<16x4xf32>, vector<16x4xf32> -> vector<16x4xf32>
    %138 = vector.extract_strided_slice %9 {offsets = [0, 32], sizes = [16, 4], strides = [1, 1]} : vector<16x64xf32> to vector<16x4xf32>
    %139 = vector.extract_strided_slice %5 {offsets = [0, 96], sizes = [16, 4], strides = [1, 1]} : vector<16x192xf32> to vector<16x4xf32>
    %140 = vector.extract_strided_slice %5 {offsets = [0, 160], sizes = [16, 4], strides = [1, 1]} : vector<16x192xf32> to vector<16x4xf32>
    "tpu.trace_start"() <{level = 10 : i32, message = "qd,kd->qk"}> : () -> ()
    %cst_40 = arith.constant dense<0.000000e+00> : vector<16x16xf32>
    %141 = tpu.matmul %138, %139, %cst_40 {dimension_numbers = #tpu.dot_dimension_numbers<[1], [1], [0], [0], [0, 0, 1, 0], [], []>} : vector<16x4xf32>, vector<16x4xf32>, vector<16x16xf32> -> vector<16x16xf32>
    "tpu.trace_stop"() : () -> ()
    %142 = arith.addf %141, %6 : vector<16x16xf32>
    %cst_41 = arith.constant dense<0xFF800000> : vector<16xf32>
    %143 = vector.multi_reduction <maximumf>, %142, %cst_41 [1] : vector<16x16xf32> to vector<16xf32>
    %144 = vector.shape_cast %143 : vector<16xf32> to vector<16x1xf32>
    %145 = vector.broadcast %144 : vector<16x1xf32> to vector<16x16xf32>
    %146 = arith.subf %142, %145 : vector<16x16xf32>
    %147 = math.exp %146 : vector<16x16xf32>
    %cst_42 = arith.constant dense<0.000000e+00> : vector<16xf32>
    %148 = vector.multi_reduction <add>, %147, %cst_42 [1] : vector<16x16xf32> to vector<16xf32>
    %149 = vector.shape_cast %148 : vector<16xf32> to vector<16x1xf32>
    %150 = tpu.reciprocal %149 {approx = true} : vector<16x1xf32> -> vector<16x1xf32>
    %151 = vector.broadcast %150 : vector<16x1xf32> to vector<16x16xf32>
    %152 = arith.mulf %147, %151 : vector<16x16xf32>
    %cst_43 = arith.constant dense<0.000000e+00> : vector<16x4xf32>
    %153 = tpu.matmul %152, %140, %cst_43 {dimension_numbers = #tpu.dot_dimension_numbers<[1], [0], [0], [1], [0, 0, 1, 1], [], []>} : vector<16x16xf32>, vector<16x4xf32>, vector<16x4xf32> -> vector<16x4xf32>
    %154 = vector.extract_strided_slice %9 {offsets = [0, 36], sizes = [16, 4], strides = [1, 1]} : vector<16x64xf32> to vector<16x4xf32>
    %155 = vector.extract_strided_slice %5 {offsets = [0, 100], sizes = [16, 4], strides = [1, 1]} : vector<16x192xf32> to vector<16x4xf32>
    %156 = vector.extract_strided_slice %5 {offsets = [0, 164], sizes = [16, 4], strides = [1, 1]} : vector<16x192xf32> to vector<16x4xf32>
    "tpu.trace_start"() <{level = 10 : i32, message = "qd,kd->qk"}> : () -> ()
    %cst_44 = arith.constant dense<0.000000e+00> : vector<16x16xf32>
    %157 = tpu.matmul %154, %155, %cst_44 {dimension_numbers = #tpu.dot_dimension_numbers<[1], [1], [0], [0], [0, 0, 1, 0], [], []>} : vector<16x4xf32>, vector<16x4xf32>, vector<16x16xf32> -> vector<16x16xf32>
    "tpu.trace_stop"() : () -> ()
    %158 = arith.addf %157, %6 : vector<16x16xf32>
    %cst_45 = arith.constant dense<0xFF800000> : vector<16xf32>
    %159 = vector.multi_reduction <maximumf>, %158, %cst_45 [1] : vector<16x16xf32> to vector<16xf32>
    %160 = vector.shape_cast %159 : vector<16xf32> to vector<16x1xf32>
    %161 = vector.broadcast %160 : vector<16x1xf32> to vector<16x16xf32>
    %162 = arith.subf %158, %161 : vector<16x16xf32>
    %163 = math.exp %162 : vector<16x16xf32>
    %cst_46 = arith.constant dense<0.000000e+00> : vector<16xf32>
    %164 = vector.multi_reduction <add>, %163, %cst_46 [1] : vector<16x16xf32> to vector<16xf32>
    %165 = vector.shape_cast %164 : vector<16xf32> to vector<16x1xf32>
    %166 = tpu.reciprocal %165 {approx = true} : vector<16x1xf32> -> vector<16x1xf32>
    %167 = vector.broadcast %166 : vector<16x1xf32> to vector<16x16xf32>
    %168 = arith.mulf %163, %167 : vector<16x16xf32>
    %cst_47 = arith.constant dense<0.000000e+00> : vector<16x4xf32>
    %169 = tpu.matmul %168, %156, %cst_47 {dimension_numbers = #tpu.dot_dimension_numbers<[1], [0], [0], [1], [0, 0, 1, 1], [], []>} : vector<16x16xf32>, vector<16x4xf32>, vector<16x4xf32> -> vector<16x4xf32>
    %170 = vector.extract_strided_slice %9 {offsets = [0, 40], sizes = [16, 4], strides = [1, 1]} : vector<16x64xf32> to vector<16x4xf32>
    %171 = vector.extract_strided_slice %5 {offsets = [0, 104], sizes = [16, 4], strides = [1, 1]} : vector<16x192xf32> to vector<16x4xf32>
    %172 = vector.extract_strided_slice %5 {offsets = [0, 168], sizes = [16, 4], strides = [1, 1]} : vector<16x192xf32> to vector<16x4xf32>
    "tpu.trace_start"() <{level = 10 : i32, message = "qd,kd->qk"}> : () -> ()
    %cst_48 = arith.constant dense<0.000000e+00> : vector<16x16xf32>
    %173 = tpu.matmul %170, %171, %cst_48 {dimension_numbers = #tpu.dot_dimension_numbers<[1], [1], [0], [0], [0, 0, 1, 0], [], []>} : vector<16x4xf32>, vector<16x4xf32>, vector<16x16xf32> -> vector<16x16xf32>
    "tpu.trace_stop"() : () -> ()
    %174 = arith.addf %173, %6 : vector<16x16xf32>
    %cst_49 = arith.constant dense<0xFF800000> : vector<16xf32>
    %175 = vector.multi_reduction <maximumf>, %174, %cst_49 [1] : vector<16x16xf32> to vector<16xf32>
    %176 = vector.shape_cast %175 : vector<16xf32> to vector<16x1xf32>
    %177 = vector.broadcast %176 : vector<16x1xf32> to vector<16x16xf32>
    %178 = arith.subf %174, %177 : vector<16x16xf32>
    %179 = math.exp %178 : vector<16x16xf32>
    %cst_50 = arith.constant dense<0.000000e+00> : vector<16xf32>
    %180 = vector.multi_reduction <add>, %179, %cst_50 [1] : vector<16x16xf32> to vector<16xf32>
    %181 = vector.shape_cast %180 : vector<16xf32> to vector<16x1xf32>
    %182 = tpu.reciprocal %181 {approx = true} : vector<16x1xf32> -> vector<16x1xf32>
    %183 = vector.broadcast %182 : vector<16x1xf32> to vector<16x16xf32>
    %184 = arith.mulf %179, %183 : vector<16x16xf32>
    %cst_51 = arith.constant dense<0.000000e+00> : vector<16x4xf32>
    %185 = tpu.matmul %184, %172, %cst_51 {dimension_numbers = #tpu.dot_dimension_numbers<[1], [0], [0], [1], [0, 0, 1, 1], [], []>} : vector<16x16xf32>, vector<16x4xf32>, vector<16x4xf32> -> vector<16x4xf32>
    %186 = vector.extract_strided_slice %9 {offsets = [0, 44], sizes = [16, 4], strides = [1, 1]} : vector<16x64xf32> to vector<16x4xf32>
    %187 = vector.extract_strided_slice %5 {offsets = [0, 108], sizes = [16, 4], strides = [1, 1]} : vector<16x192xf32> to vector<16x4xf32>
    %188 = vector.extract_strided_slice %5 {offsets = [0, 172], sizes = [16, 4], strides = [1, 1]} : vector<16x192xf32> to vector<16x4xf32>
    "tpu.trace_start"() <{level = 10 : i32, message = "qd,kd->qk"}> : () -> ()
    %cst_52 = arith.constant dense<0.000000e+00> : vector<16x16xf32>
    %189 = tpu.matmul %186, %187, %cst_52 {dimension_numbers = #tpu.dot_dimension_numbers<[1], [1], [0], [0], [0, 0, 1, 0], [], []>} : vector<16x4xf32>, vector<16x4xf32>, vector<16x16xf32> -> vector<16x16xf32>
    "tpu.trace_stop"() : () -> ()
    %190 = arith.addf %189, %6 : vector<16x16xf32>
    %cst_53 = arith.constant dense<0xFF800000> : vector<16xf32>
    %191 = vector.multi_reduction <maximumf>, %190, %cst_53 [1] : vector<16x16xf32> to vector<16xf32>
    %192 = vector.shape_cast %191 : vector<16xf32> to vector<16x1xf32>
    %193 = vector.broadcast %192 : vector<16x1xf32> to vector<16x16xf32>
    %194 = arith.subf %190, %193 : vector<16x16xf32>
    %195 = math.exp %194 : vector<16x16xf32>
    %cst_54 = arith.constant dense<0.000000e+00> : vector<16xf32>
    %196 = vector.multi_reduction <add>, %195, %cst_54 [1] : vector<16x16xf32> to vector<16xf32>
    %197 = vector.shape_cast %196 : vector<16xf32> to vector<16x1xf32>
    %198 = tpu.reciprocal %197 {approx = true} : vector<16x1xf32> -> vector<16x1xf32>
    %199 = vector.broadcast %198 : vector<16x1xf32> to vector<16x16xf32>
    %200 = arith.mulf %195, %199 : vector<16x16xf32>
    %cst_55 = arith.constant dense<0.000000e+00> : vector<16x4xf32>
    %201 = tpu.matmul %200, %188, %cst_55 {dimension_numbers = #tpu.dot_dimension_numbers<[1], [0], [0], [1], [0, 0, 1, 1], [], []>} : vector<16x16xf32>, vector<16x4xf32>, vector<16x4xf32> -> vector<16x4xf32>
    %202 = vector.extract_strided_slice %9 {offsets = [0, 48], sizes = [16, 4], strides = [1, 1]} : vector<16x64xf32> to vector<16x4xf32>
    %203 = vector.extract_strided_slice %5 {offsets = [0, 112], sizes = [16, 4], strides = [1, 1]} : vector<16x192xf32> to vector<16x4xf32>
    %204 = vector.extract_strided_slice %5 {offsets = [0, 176], sizes = [16, 4], strides = [1, 1]} : vector<16x192xf32> to vector<16x4xf32>
    "tpu.trace_start"() <{level = 10 : i32, message = "qd,kd->qk"}> : () -> ()
    %cst_56 = arith.constant dense<0.000000e+00> : vector<16x16xf32>
    %205 = tpu.matmul %202, %203, %cst_56 {dimension_numbers = #tpu.dot_dimension_numbers<[1], [1], [0], [0], [0, 0, 1, 0], [], []>} : vector<16x4xf32>, vector<16x4xf32>, vector<16x16xf32> -> vector<16x16xf32>
    "tpu.trace_stop"() : () -> ()
    %206 = arith.addf %205, %6 : vector<16x16xf32>
    %cst_57 = arith.constant dense<0xFF800000> : vector<16xf32>
    %207 = vector.multi_reduction <maximumf>, %206, %cst_57 [1] : vector<16x16xf32> to vector<16xf32>
    %208 = vector.shape_cast %207 : vector<16xf32> to vector<16x1xf32>
    %209 = vector.broadcast %208 : vector<16x1xf32> to vector<16x16xf32>
    %210 = arith.subf %206, %209 : vector<16x16xf32>
    %211 = math.exp %210 : vector<16x16xf32>
    %cst_58 = arith.constant dense<0.000000e+00> : vector<16xf32>
    %212 = vector.multi_reduction <add>, %211, %cst_58 [1] : vector<16x16xf32> to vector<16xf32>
    %213 = vector.shape_cast %212 : vector<16xf32> to vector<16x1xf32>
    %214 = tpu.reciprocal %213 {approx = true} : vector<16x1xf32> -> vector<16x1xf32>
    %215 = vector.broadcast %214 : vector<16x1xf32> to vector<16x16xf32>
    %216 = arith.mulf %211, %215 : vector<16x16xf32>
    %cst_59 = arith.constant dense<0.000000e+00> : vector<16x4xf32>
    %217 = tpu.matmul %216, %204, %cst_59 {dimension_numbers = #tpu.dot_dimension_numbers<[1], [0], [0], [1], [0, 0, 1, 1], [], []>} : vector<16x16xf32>, vector<16x4xf32>, vector<16x4xf32> -> vector<16x4xf32>
    %218 = vector.extract_strided_slice %9 {offsets = [0, 52], sizes = [16, 4], strides = [1, 1]} : vector<16x64xf32> to vector<16x4xf32>
    %219 = vector.extract_strided_slice %5 {offsets = [0, 116], sizes = [16, 4], strides = [1, 1]} : vector<16x192xf32> to vector<16x4xf32>
    %220 = vector.extract_strided_slice %5 {offsets = [0, 180], sizes = [16, 4], strides = [1, 1]} : vector<16x192xf32> to vector<16x4xf32>
    "tpu.trace_start"() <{level = 10 : i32, message = "qd,kd->qk"}> : () -> ()
    %cst_60 = arith.constant dense<0.000000e+00> : vector<16x16xf32>
    %221 = tpu.matmul %218, %219, %cst_60 {dimension_numbers = #tpu.dot_dimension_numbers<[1], [1], [0], [0], [0, 0, 1, 0], [], []>} : vector<16x4xf32>, vector<16x4xf32>, vector<16x16xf32> -> vector<16x16xf32>
    "tpu.trace_stop"() : () -> ()
    %222 = arith.addf %221, %6 : vector<16x16xf32>
    %cst_61 = arith.constant dense<0xFF800000> : vector<16xf32>
    %223 = vector.multi_reduction <maximumf>, %222, %cst_61 [1] : vector<16x16xf32> to vector<16xf32>
    %224 = vector.shape_cast %223 : vector<16xf32> to vector<16x1xf32>
    %225 = vector.broadcast %224 : vector<16x1xf32> to vector<16x16xf32>
    %226 = arith.subf %222, %225 : vector<16x16xf32>
    %227 = math.exp %226 : vector<16x16xf32>
    %cst_62 = arith.constant dense<0.000000e+00> : vector<16xf32>
    %228 = vector.multi_reduction <add>, %227, %cst_62 [1] : vector<16x16xf32> to vector<16xf32>
    %229 = vector.shape_cast %228 : vector<16xf32> to vector<16x1xf32>
    %230 = tpu.reciprocal %229 {approx = true} : vector<16x1xf32> -> vector<16x1xf32>
    %231 = vector.broadcast %230 : vector<16x1xf32> to vector<16x16xf32>
    %232 = arith.mulf %227, %231 : vector<16x16xf32>
    %cst_63 = arith.constant dense<0.000000e+00> : vector<16x4xf32>
    %233 = tpu.matmul %232, %220, %cst_63 {dimension_numbers = #tpu.dot_dimension_numbers<[1], [0], [0], [1], [0, 0, 1, 1], [], []>} : vector<16x16xf32>, vector<16x4xf32>, vector<16x4xf32> -> vector<16x4xf32>
    %234 = vector.extract_strided_slice %9 {offsets = [0, 56], sizes = [16, 4], strides = [1, 1]} : vector<16x64xf32> to vector<16x4xf32>
    %235 = vector.extract_strided_slice %5 {offsets = [0, 120], sizes = [16, 4], strides = [1, 1]} : vector<16x192xf32> to vector<16x4xf32>
    %236 = vector.extract_strided_slice %5 {offsets = [0, 184], sizes = [16, 4], strides = [1, 1]} : vector<16x192xf32> to vector<16x4xf32>
    "tpu.trace_start"() <{level = 10 : i32, message = "qd,kd->qk"}> : () -> ()
    %cst_64 = arith.constant dense<0.000000e+00> : vector<16x16xf32>
    %237 = tpu.matmul %234, %235, %cst_64 {dimension_numbers = #tpu.dot_dimension_numbers<[1], [1], [0], [0], [0, 0, 1, 0], [], []>} : vector<16x4xf32>, vector<16x4xf32>, vector<16x16xf32> -> vector<16x16xf32>
    "tpu.trace_stop"() : () -> ()
    %238 = arith.addf %237, %6 : vector<16x16xf32>
    %cst_65 = arith.constant dense<0xFF800000> : vector<16xf32>
    %239 = vector.multi_reduction <maximumf>, %238, %cst_65 [1] : vector<16x16xf32> to vector<16xf32>
    %240 = vector.shape_cast %239 : vector<16xf32> to vector<16x1xf32>
    %241 = vector.broadcast %240 : vector<16x1xf32> to vector<16x16xf32>
    %242 = arith.subf %238, %241 : vector<16x16xf32>
    %243 = math.exp %242 : vector<16x16xf32>
    %cst_66 = arith.constant dense<0.000000e+00> : vector<16xf32>
    %244 = vector.multi_reduction <add>, %243, %cst_66 [1] : vector<16x16xf32> to vector<16xf32>
    %245 = vector.shape_cast %244 : vector<16xf32> to vector<16x1xf32>
    %246 = tpu.reciprocal %245 {approx = true} : vector<16x1xf32> -> vector<16x1xf32>
    %247 = vector.broadcast %246 : vector<16x1xf32> to vector<16x16xf32>
    %248 = arith.mulf %243, %247 : vector<16x16xf32>
    %cst_67 = arith.constant dense<0.000000e+00> : vector<16x4xf32>
    %249 = tpu.matmul %248, %236, %cst_67 {dimension_numbers = #tpu.dot_dimension_numbers<[1], [0], [0], [1], [0, 0, 1, 1], [], []>} : vector<16x16xf32>, vector<16x4xf32>, vector<16x4xf32> -> vector<16x4xf32>
    %250 = vector.extract_strided_slice %9 {offsets = [0, 60], sizes = [16, 4], strides = [1, 1]} : vector<16x64xf32> to vector<16x4xf32>
    %251 = vector.extract_strided_slice %5 {offsets = [0, 124], sizes = [16, 4], strides = [1, 1]} : vector<16x192xf32> to vector<16x4xf32>
    %252 = vector.extract_strided_slice %5 {offsets = [0, 188], sizes = [16, 4], strides = [1, 1]} : vector<16x192xf32> to vector<16x4xf32>
    "tpu.trace_start"() <{level = 10 : i32, message = "qd,kd->qk"}> : () -> ()
    %cst_68 = arith.constant dense<0.000000e+00> : vector<16x16xf32>
    %253 = tpu.matmul %250, %251, %cst_68 {dimension_numbers = #tpu.dot_dimension_numbers<[1], [1], [0], [0], [0, 0, 1, 0], [], []>} : vector<16x4xf32>, vector<16x4xf32>, vector<16x16xf32> -> vector<16x16xf32>
    "tpu.trace_stop"() : () -> ()
    %254 = arith.addf %253, %6 : vector<16x16xf32>
    %cst_69 = arith.constant dense<0xFF800000> : vector<16xf32>
    %255 = vector.multi_reduction <maximumf>, %254, %cst_69 [1] : vector<16x16xf32> to vector<16xf32>
    %256 = vector.shape_cast %255 : vector<16xf32> to vector<16x1xf32>
    %257 = vector.broadcast %256 : vector<16x1xf32> to vector<16x16xf32>
    %258 = arith.subf %254, %257 : vector<16x16xf32>
    %259 = math.exp %258 : vector<16x16xf32>
    %cst_70 = arith.constant dense<0.000000e+00> : vector<16xf32>
    %260 = vector.multi_reduction <add>, %259, %cst_70 [1] : vector<16x16xf32> to vector<16xf32>
    %261 = vector.shape_cast %260 : vector<16xf32> to vector<16x1xf32>
    %262 = tpu.reciprocal %261 {approx = true} : vector<16x1xf32> -> vector<16x1xf32>
    %263 = vector.broadcast %262 : vector<16x1xf32> to vector<16x16xf32>
    %264 = arith.mulf %259, %263 : vector<16x16xf32>
    %cst_71 = arith.constant dense<0.000000e+00> : vector<16x4xf32>
    %265 = tpu.matmul %264, %252, %cst_71 {dimension_numbers = #tpu.dot_dimension_numbers<[1], [0], [0], [1], [0, 0, 1, 1], [], []>} : vector<16x16xf32>, vector<16x4xf32>, vector<16x4xf32> -> vector<16x4xf32>
    %266 = tpu.concatenate %25, %41, %57, %73, %89, %105, %121, %137, %153, %169, %185, %201, %217, %233, %249, %265 in 1 : vector<16x4xf32>, vector<16x4xf32>, vector<16x4xf32>, vector<16x4xf32>, vector<16x4xf32>, vector<16x4xf32>, vector<16x4xf32>, vector<16x4xf32>, vector<16x4xf32>, vector<16x4xf32>, vector<16x4xf32>, vector<16x4xf32>, vector<16x4xf32>, vector<16x4xf32>, vector<16x4xf32>, vector<16x4xf32> -> vector<16x64xf32>
    %c0_72 = arith.constant 0 : index
    %c0_73 = arith.constant 0 : index
    %267 = vector.load %arg4[%c0_72, %c0_73] : memref<64x64xf32, #tpu.memory_space<vmem>>, vector<64x64xf32>
    %cst_74 = arith.constant dense<0.000000e+00> : vector<16x64xf32>
    %268 = tpu.matmul %266, %267, %cst_74 {dimension_numbers = #tpu.dot_dimension_numbers<[1], [0], [0], [1], [0, 0, 1, 1], [], []>} : vector<16x64xf32>, vector<64x64xf32>, vector<16x64xf32> -> vector<16x64xf32>
    %c0_75 = arith.constant 0 : index
    %c0_76 = arith.constant 0 : index
    %269 = vector.load %arg5[%c0_75, %c0_76] : memref<1x64xf32, #tpu.memory_space<vmem>>, vector<1x64xf32>
    %270 = vector.broadcast %269 : vector<1x64xf32> to vector<16x64xf32>
    %271 = arith.addf %268, %270 : vector<16x64xf32>
    %272 = arith.addf %0, %271 : vector<16x64xf32>
    %c0_77 = arith.constant 0 : index
    %c0_78 = arith.constant 0 : index
    %273 = vector.load %arg6[%c0_77, %c0_78] : memref<1x64xf32, #tpu.memory_space<vmem>>, vector<1x64xf32>
    %c0_79 = arith.constant 0 : index
    %c0_80 = arith.constant 0 : index
    %274 = vector.load %arg7[%c0_79, %c0_80] : memref<1x64xf32, #tpu.memory_space<vmem>>, vector<1x64xf32>
    %cst_81 = arith.constant dense<0.000000e+00> : vector<16xf32>
    %275 = vector.multi_reduction <add>, %272, %cst_81 [1] : vector<16x64xf32> to vector<16xf32>
    %276 = vector.shape_cast %275 : vector<16xf32> to vector<16x1xf32>
    %cst_82 = arith.constant 6.400000e+01 : f32
    %277 = vector.broadcast %cst_82 : f32 to vector<16x1xf32>
    %278 = arith.divf %276, %277 : vector<16x1xf32>
    %279 = vector.broadcast %278 : vector<16x1xf32> to vector<16x64xf32>
    %280 = arith.subf %272, %279 : vector<16x64xf32>
    %281 = arith.mulf %280, %280 : vector<16x64xf32>
    %cst_83 = arith.constant dense<0.000000e+00> : vector<16xf32>
    %282 = vector.multi_reduction <add>, %281, %cst_83 [1] : vector<16x64xf32> to vector<16xf32>
    %283 = vector.shape_cast %282 : vector<16xf32> to vector<16x1xf32>
    %cst_84 = arith.constant 6.400000e+01 : f32
    %284 = vector.broadcast %cst_84 : f32 to vector<16x1xf32>
    %285 = arith.divf %283, %284 : vector<16x1xf32>
    %cst_85 = arith.constant 9.99999974E-6 : f32
    %286 = vector.broadcast %cst_85 : f32 to vector<16x1xf32>
    %287 = arith.addf %285, %286 : vector<16x1xf32>
    %288 = math.rsqrt %287 : vector<16x1xf32>
    %289 = vector.broadcast %288 : vector<16x1xf32> to vector<16x64xf32>
    %290 = arith.mulf %280, %289 : vector<16x64xf32>
    %291 = vector.broadcast %273 : vector<1x64xf32> to vector<16x64xf32>
    %292 = arith.mulf %290, %291 : vector<16x64xf32>
    %293 = vector.broadcast %274 : vector<1x64xf32> to vector<16x64xf32>
    %294 = arith.addf %292, %293 : vector<16x64xf32>
    %c0_86 = arith.constant 0 : index
    %c0_87 = arith.constant 0 : index
    %295 = vector.load %arg8[%c0_86, %c0_87] : memref<64x128xf32, #tpu.memory_space<vmem>>, vector<64x128xf32>
    %cst_88 = arith.constant dense<0.000000e+00> : vector<16x128xf32>
    %296 = tpu.matmul %294, %295, %cst_88 {dimension_numbers = #tpu.dot_dimension_numbers<[1], [0], [0], [1], [0, 0, 1, 1], [], []>} : vector<16x64xf32>, vector<64x128xf32>, vector<16x128xf32> -> vector<16x128xf32>
    %c0_89 = arith.constant 0 : index
    %c0_90 = arith.constant 0 : index
    %297 = vector.load %arg9[%c0_89, %c0_90] : memref<1x128xf32, #tpu.memory_space<vmem>>, vector<1x128xf32>
    %298 = vector.broadcast %297 : vector<1x128xf32> to vector<16x128xf32>
    %299 = arith.addf %296, %298 : vector<16x128xf32>
    %cst_91 = arith.constant 5.000000e-01 : f32
    %300 = vector.broadcast %cst_91 : f32 to vector<16x128xf32>
    %301 = arith.mulf %300, %299 : vector<16x128xf32>
    %cst_92 = arith.constant 4.471500e-02 : f32
    %302 = vector.broadcast %cst_92 : f32 to vector<16x128xf32>
    %303 = arith.mulf %302, %299 : vector<16x128xf32>
    %304 = arith.mulf %303, %299 : vector<16x128xf32>
    %305 = arith.mulf %304, %299 : vector<16x128xf32>
    %306 = arith.addf %299, %305 : vector<16x128xf32>
    %cst_93 = arith.constant 0.797884583 : f32
    %307 = vector.broadcast %cst_93 : f32 to vector<16x128xf32>
    %308 = arith.mulf %307, %306 : vector<16x128xf32>
    %309 = math.tanh %308 : vector<16x128xf32>
    %cst_94 = arith.constant 1.000000e+00 : f32
    %310 = vector.broadcast %cst_94 : f32 to vector<16x128xf32>
    %311 = arith.addf %310, %309 : vector<16x128xf32>
    %312 = arith.mulf %301, %311 : vector<16x128xf32>
    %c0_95 = arith.constant 0 : index
    %c0_96 = arith.constant 0 : index
    %313 = vector.load %arg10[%c0_95, %c0_96] : memref<128x64xf32, #tpu.memory_space<vmem>>, vector<128x64xf32>
    %cst_97 = arith.constant dense<0.000000e+00> : vector<16x64xf32>
    %314 = tpu.matmul %312, %313, %cst_97 {dimension_numbers = #tpu.dot_dimension_numbers<[1], [0], [0], [1], [0, 0, 1, 1], [], []>} : vector<16x128xf32>, vector<128x64xf32>, vector<16x64xf32> -> vector<16x64xf32>
    %c0_98 = arith.constant 0 : index
    %c0_99 = arith.constant 0 : index
    %315 = vector.load %arg11[%c0_98, %c0_99] : memref<1x64xf32, #tpu.memory_space<vmem>>, vector<1x64xf32>
    %316 = vector.broadcast %315 : vector<1x64xf32> to vector<16x64xf32>
    %317 = arith.addf %314, %316 : vector<16x64xf32>
    %318 = arith.addf %294, %317 : vector<16x64xf32>
    %c0_100 = arith.constant 0 : index
    %c0_101 = arith.constant 0 : index
    %319 = vector.load %arg12[%c0_100, %c0_101] : memref<1x64xf32, #tpu.memory_space<vmem>>, vector<1x64xf32>
    %c0_102 = arith.constant 0 : index
    %c0_103 = arith.constant 0 : index
    %320 = vector.load %arg13[%c0_102, %c0_103] : memref<1x64xf32, #tpu.memory_space<vmem>>, vector<1x64xf32>
    %cst_104 = arith.constant dense<0.000000e+00> : vector<16xf32>
    %321 = vector.multi_reduction <add>, %318, %cst_104 [1] : vector<16x64xf32> to vector<16xf32>
    %322 = vector.shape_cast %321 : vector<16xf32> to vector<16x1xf32>
    %cst_105 = arith.constant 6.400000e+01 : f32
    %323 = vector.broadcast %cst_105 : f32 to vector<16x1xf32>
    %324 = arith.divf %322, %323 : vector<16x1xf32>
    %325 = vector.broadcast %324 : vector<16x1xf32> to vector<16x64xf32>
    %326 = arith.subf %318, %325 : vector<16x64xf32>
    %327 = arith.mulf %326, %326 : vector<16x64xf32>
    %cst_106 = arith.constant dense<0.000000e+00> : vector<16xf32>
    %328 = vector.multi_reduction <add>, %327, %cst_106 [1] : vector<16x64xf32> to vector<16xf32>
    %329 = vector.shape_cast %328 : vector<16xf32> to vector<16x1xf32>
    %cst_107 = arith.constant 6.400000e+01 : f32
    %330 = vector.broadcast %cst_107 : f32 to vector<16x1xf32>
    %331 = arith.divf %329, %330 : vector<16x1xf32>
    %cst_108 = arith.constant 9.99999974E-6 : f32
    %332 = vector.broadcast %cst_108 : f32 to vector<16x1xf32>
    %333 = arith.addf %331, %332 : vector<16x1xf32>
    %334 = math.rsqrt %333 : vector<16x1xf32>
    %335 = vector.broadcast %334 : vector<16x1xf32> to vector<16x64xf32>
    %336 = arith.mulf %326, %335 : vector<16x64xf32>
    %337 = vector.broadcast %319 : vector<1x64xf32> to vector<16x64xf32>
    %338 = arith.mulf %336, %337 : vector<16x64xf32>
    %339 = vector.broadcast %320 : vector<1x64xf32> to vector<16x64xf32>
    %340 = arith.addf %338, %339 : vector<16x64xf32>
    %c0_109 = arith.constant 0 : index
    %c0_110 = arith.constant 0 : index
    %341 = vector.load %arg14[%c0_109, %c0_110] : memref<16x64xf32, #tpu.memory_space<vmem>>, vector<16x64xf32>
    tpu.vector_store %arg14[%c0_109, %c0_110], %340 {strides = array<i32>} : memref<16x64xf32, #tpu.memory_space<vmem>>, vector<16x64xf32>,
    return
  }
}

module attributes {stable_mosaic.version = 11 : i64} {
  func.func @_lstm_stack_kernel(%arg0: memref<16x32xf32, #tpu.memory_space<vmem>>, %arg1: memref<2x32x128xf32, #tpu.memory_space<vmem>>, %arg2: memref<2x32x128xf32, #tpu.memory_space<vmem>>, %arg3: memref<2x1x128xf32, #tpu.memory_space<vmem>>, %arg4: memref<2x32x32xf32, #tpu.memory_space<vmem>>, %arg5: memref<2x32x32xf32, #tpu.memory_space<vmem>>, %arg6: memref<2x1x32xf32, #tpu.memory_space<vmem>>, %arg7: memref<16x32xf32, #tpu.memory_space<vmem>>) attributes {dimension_semantics = [], scalar_prefetch = 0 : i64, scratch_operands = 0 : i64, tpu.core_type = #tpu.core_type<tc>} {
    %c0 = arith.constant 0 : index
    %c0_0 = arith.constant 0 : index
    %0 = vector.load %arg0[%c0, %c0_0] : memref<16x32xf32, #tpu.memory_space<vmem>>, vector<16x32xf32>
    %c0_1 = arith.constant 0 : index
    %c0_2 = arith.constant 0 : index
    %c0_3 = arith.constant 0 : index
    %1 = vector.load %arg1[%c0_1, %c0_2, %c0_3] : memref<2x32x128xf32, #tpu.memory_space<vmem>>, vector<1x32x128xf32>
    %2 = vector.shape_cast %1 : vector<1x32x128xf32> to vector<32x128xf32>
    %cst = arith.constant dense<0.000000e+00> : vector<16x128xf32>
    %3 = tpu.matmul %0, %2, %cst {dimension_numbers = #tpu.dot_dimension_numbers<[1], [0], [0], [1], [0, 0, 1, 1], [], []>} : vector<16x32xf32>, vector<32x128xf32>, vector<16x128xf32> -> vector<16x128xf32>
    %c0_4 = arith.constant 0 : index
    %c0_5 = arith.constant 0 : index
    %c0_6 = arith.constant 0 : index
    %4 = vector.load %arg3[%c0_4, %c0_5, %c0_6] : memref<2x1x128xf32, #tpu.memory_space<vmem>>, vector<1x1x128xf32>
    %5 = vector.shape_cast %4 : vector<1x1x128xf32> to vector<1x128xf32>
    %6 = vector.broadcast %5 : vector<1x128xf32> to vector<16x128xf32>
    %7 = arith.addf %3, %6 : vector<16x128xf32>
    %c0_7 = arith.constant 0 : index
    %c0_8 = arith.constant 0 : index
    %c0_9 = arith.constant 0 : index
    %8 = vector.load %arg5[%c0_7, %c0_8, %c0_9] : memref<2x32x32xf32, #tpu.memory_space<vmem>>, vector<1x32x32xf32>
    %9 = vector.shape_cast %8 : vector<1x32x32xf32> to vector<32x32xf32>
    %cst_10 = arith.constant dense<0.000000e+00> : vector<16x32xf32>
    %10 = tpu.matmul %0, %9, %cst_10 {dimension_numbers = #tpu.dot_dimension_numbers<[1], [0], [0], [1], [0, 0, 1, 1], [], []>} : vector<16x32xf32>, vector<32x32xf32>, vector<16x32xf32> -> vector<16x32xf32>
    %c0_11 = arith.constant 0 : index
    %c0_12 = arith.constant 0 : index
    %c0_13 = arith.constant 0 : index
    %11 = vector.load %arg6[%c0_11, %c0_12, %c0_13] : memref<2x1x32xf32, #tpu.memory_space<vmem>>, vector<1x1x32xf32>
    %12 = vector.shape_cast %11 : vector<1x1x32xf32> to vector<1x32xf32>
    %13 = vector.broadcast %12 : vector<1x32xf32> to vector<16x32xf32>
    %14 = arith.addf %10, %13 : vector<16x32xf32>
    %c0_14 = arith.constant 0 : index
    %c0_15 = arith.constant 0 : index
    %c0_16 = arith.constant 0 : index
    %15 = vector.load %arg2[%c0_14, %c0_15, %c0_16] : memref<2x32x128xf32, #tpu.memory_space<vmem>>, vector<1x32x128xf32>
    %16 = vector.shape_cast %15 : vector<1x32x128xf32> to vector<32x128xf32>
    %c0_17 = arith.constant 0 : index
    %c0_18 = arith.constant 0 : index
    %c0_19 = arith.constant 0 : index
    %17 = vector.load %arg4[%c0_17, %c0_18, %c0_19] : memref<2x32x32xf32, #tpu.memory_space<vmem>>, vector<1x32x32xf32>
    %18 = vector.shape_cast %17 : vector<1x32x32xf32> to vector<32x32xf32>
    %cst_20 = arith.constant 0.000000e+00 : f32
    %19 = vector.broadcast %cst_20 : f32 to vector<2x32xf32>
    %cst_21 = arith.constant 0.000000e+00 : f32
    %20 = vector.broadcast %cst_21 : f32 to vector<2x32xf32>
    %21 = vector.extract_strided_slice %7 {offsets = [0, 0], sizes = [2, 128], strides = [1, 1]} : vector<16x128xf32> to vector<2x128xf32>
    %cst_22 = arith.constant dense<0.000000e+00> : vector<2x128xf32>
    %22 = tpu.matmul %19, %16, %cst_22 {dimension_numbers = #tpu.dot_dimension_numbers<[1], [0], [0], [1], [0, 0, 1, 1], [], []>} : vector<2x32xf32>, vector<32x128xf32>, vector<2x128xf32> -> vector<2x128xf32>
    %23 = arith.addf %21, %22 : vector<2x128xf32>
    %24 = vector.extract_strided_slice %23 {offsets = [0, 0], sizes = [2, 32], strides = [1, 1]} : vector<2x128xf32> to vector<2x32xf32>
    %25 = arith.negf %24 : vector<2x32xf32>
    %26 = math.exp %25 : vector<2x32xf32>
    %cst_23 = arith.constant 1.000000e+00 : f32
    %27 = vector.broadcast %cst_23 : f32 to vector<2x32xf32>
    %28 = arith.addf %27, %26 : vector<2x32xf32>
    %29 = arith.divf %27, %28 : vector<2x32xf32>
    %30 = vector.extract_strided_slice %23 {offsets = [0, 32], sizes = [2, 32], strides = [1, 1]} : vector<2x128xf32> to vector<2x32xf32>
    %31 = arith.negf %30 : vector<2x32xf32>
    %32 = math.exp %31 : vector<2x32xf32>
    %cst_24 = arith.constant 1.000000e+00 : f32
    %33 = vector.broadcast %cst_24 : f32 to vector<2x32xf32>
    %34 = arith.addf %33, %32 : vector<2x32xf32>
    %35 = arith.divf %33, %34 : vector<2x32xf32>
    %36 = vector.extract_strided_slice %23 {offsets = [0, 64], sizes = [2, 32], strides = [1, 1]} : vector<2x128xf32> to vector<2x32xf32>
    %37 = math.tanh %36 : vector<2x32xf32>
    %38 = vector.extract_strided_slice %23 {offsets = [0, 96], sizes = [2, 32], strides = [1, 1]} : vector<2x128xf32> to vector<2x32xf32>
    %39 = arith.negf %38 : vector<2x32xf32>
    %40 = math.exp %39 : vector<2x32xf32>
    %cst_25 = arith.constant 1.000000e+00 : f32
    %41 = vector.broadcast %cst_25 : f32 to vector<2x32xf32>
    %42 = arith.addf %41, %40 : vector<2x32xf32>
    %43 = arith.divf %41, %42 : vector<2x32xf32>
    %44 = arith.mulf %35, %20 : vector<2x32xf32>
    %45 = arith.mulf %29, %37 : vector<2x32xf32>
    %46 = arith.addf %44, %45 : vector<2x32xf32>
    %47 = math.tanh %46 : vector<2x32xf32>
    %48 = arith.mulf %43, %47 : vector<2x32xf32>
    %cst_26 = arith.constant dense<0.000000e+00> : vector<2x32xf32>
    %49 = tpu.matmul %48, %18, %cst_26 {dimension_numbers = #tpu.dot_dimension_numbers<[1], [0], [0], [1], [0, 0, 1, 1], [], []>} : vector<2x32xf32>, vector<32x32xf32>, vector<2x32xf32> -> vector<2x32xf32>
    %50 = vector.extract_strided_slice %14 {offsets = [0, 0], sizes = [2, 32], strides = [1, 1]} : vector<16x32xf32> to vector<2x32xf32>
    %51 = arith.addf %49, %50 : vector<2x32xf32>
    %52 = math.tanh %51 : vector<2x32xf32>
    %c0_27 = arith.constant 0 : index
    %c0_28 = arith.constant 0 : index
    %53 = vector.load %arg7[%c0_27, %c0_28] : memref<16x32xf32, #tpu.memory_space<vmem>>, vector<2x32xf32>
    tpu.vector_store %arg7[%c0_27, %c0_28], %52 {strides = array<i32>} : memref<16x32xf32, #tpu.memory_space<vmem>>, vector<2x32xf32>,
    %54 = vector.extract_strided_slice %7 {offsets = [2, 0], sizes = [2, 128], strides = [1, 1]} : vector<16x128xf32> to vector<2x128xf32>
    %cst_29 = arith.constant dense<0.000000e+00> : vector<2x128xf32>
    %55 = tpu.matmul %48, %16, %cst_29 {dimension_numbers = #tpu.dot_dimension_numbers<[1], [0], [0], [1], [0, 0, 1, 1], [], []>} : vector<2x32xf32>, vector<32x128xf32>, vector<2x128xf32> -> vector<2x128xf32>
    %56 = arith.addf %54, %55 : vector<2x128xf32>
    %57 = vector.extract_strided_slice %56 {offsets = [0, 0], sizes = [2, 32], strides = [1, 1]} : vector<2x128xf32> to vector<2x32xf32>
    %58 = arith.negf %57 : vector<2x32xf32>
    %59 = math.exp %58 : vector<2x32xf32>
    %cst_30 = arith.constant 1.000000e+00 : f32
    %60 = vector.broadcast %cst_30 : f32 to vector<2x32xf32>
    %61 = arith.addf %60, %59 : vector<2x32xf32>
    %62 = arith.divf %60, %61 : vector<2x32xf32>
    %63 = vector.extract_strided_slice %56 {offsets = [0, 32], sizes = [2, 32], strides = [1, 1]} : vector<2x128xf32> to vector<2x32xf32>
    %64 = arith.negf %63 : vector<2x32xf32>
    %65 = math.exp %64 : vector<2x32xf32>
    %cst_31 = arith.constant 1.000000e+00 : f32
    %66 = vector.broadcast %cst_31 : f32 to vector<2x32xf32>
    %67 = arith.addf %66, %65 : vector<2x32xf32>
    %68 = arith.divf %66, %67 : vector<2x32xf32>
    %69 = vector.extract_strided_slice %56 {offsets = [0, 64], sizes = [2, 32], strides = [1, 1]} : vector<2x128xf32> to vector<2x32xf32>
    %70 = math.tanh %69 : vector<2x32xf32>
    %71 = vector.extract_strided_slice %56 {offsets = [0, 96], sizes = [2, 32], strides = [1, 1]} : vector<2x128xf32> to vector<2x32xf32>
    %72 = arith.negf %71 : vector<2x32xf32>
    %73 = math.exp %72 : vector<2x32xf32>
    %cst_32 = arith.constant 1.000000e+00 : f32
    %74 = vector.broadcast %cst_32 : f32 to vector<2x32xf32>
    %75 = arith.addf %74, %73 : vector<2x32xf32>
    %76 = arith.divf %74, %75 : vector<2x32xf32>
    %77 = arith.mulf %68, %46 : vector<2x32xf32>
    %78 = arith.mulf %62, %70 : vector<2x32xf32>
    %79 = arith.addf %77, %78 : vector<2x32xf32>
    %80 = math.tanh %79 : vector<2x32xf32>
    %81 = arith.mulf %76, %80 : vector<2x32xf32>
    %cst_33 = arith.constant dense<0.000000e+00> : vector<2x32xf32>
    %82 = tpu.matmul %81, %18, %cst_33 {dimension_numbers = #tpu.dot_dimension_numbers<[1], [0], [0], [1], [0, 0, 1, 1], [], []>} : vector<2x32xf32>, vector<32x32xf32>, vector<2x32xf32> -> vector<2x32xf32>
    %83 = vector.extract_strided_slice %14 {offsets = [2, 0], sizes = [2, 32], strides = [1, 1]} : vector<16x32xf32> to vector<2x32xf32>
    %84 = arith.addf %82, %83 : vector<2x32xf32>
    %85 = math.tanh %84 : vector<2x32xf32>
    %c2 = arith.constant 2 : index
    %c0_34 = arith.constant 0 : index
    %86 = vector.load %arg7[%c2, %c0_34] : memref<16x32xf32, #tpu.memory_space<vmem>>, vector<2x32xf32>
    tpu.vector_store %arg7[%c2, %c0_34], %85 {strides = array<i32>} : memref<16x32xf32, #tpu.memory_space<vmem>>, vector<2x32xf32>,
    %87 = vector.extract_strided_slice %7 {offsets = [4, 0], sizes = [2, 128], strides = [1, 1]} : vector<16x128xf32> to vector<2x128xf32>
    %cst_35 = arith.constant dense<0.000000e+00> : vector<2x128xf32>
    %88 = tpu.matmul %81, %16, %cst_35 {dimension_numbers = #tpu.dot_dimension_numbers<[1], [0], [0], [1], [0, 0, 1, 1], [], []>} : vector<2x32xf32>, vector<32x128xf32>, vector<2x128xf32> -> vector<2x128xf32>
    %89 = arith.addf %87, %88 : vector<2x128xf32>
    %90 = vector.extract_strided_slice %89 {offsets = [0, 0], sizes = [2, 32], strides = [1, 1]} : vector<2x128xf32> to vector<2x32xf32>
    %91 = arith.negf %90 : vector<2x32xf32>
    %92 = math.exp %91 : vector<2x32xf32>
    %cst_36 = arith.constant 1.000000e+00 : f32
    %93 = vector.broadcast %cst_36 : f32 to vector<2x32xf32>
    %94 = arith.addf %93, %92 : vector<2x32xf32>
    %95 = arith.divf %93, %94 : vector<2x32xf32>
    %96 = vector.extract_strided_slice %89 {offsets = [0, 32], sizes = [2, 32], strides = [1, 1]} : vector<2x128xf32> to vector<2x32xf32>
    %97 = arith.negf %96 : vector<2x32xf32>
    %98 = math.exp %97 : vector<2x32xf32>
    %cst_37 = arith.constant 1.000000e+00 : f32
    %99 = vector.broadcast %cst_37 : f32 to vector<2x32xf32>
    %100 = arith.addf %99, %98 : vector<2x32xf32>
    %101 = arith.divf %99, %100 : vector<2x32xf32>
    %102 = vector.extract_strided_slice %89 {offsets = [0, 64], sizes = [2, 32], strides = [1, 1]} : vector<2x128xf32> to vector<2x32xf32>
    %103 = math.tanh %102 : vector<2x32xf32>
    %104 = vector.extract_strided_slice %89 {offsets = [0, 96], sizes = [2, 32], strides = [1, 1]} : vector<2x128xf32> to vector<2x32xf32>
    %105 = arith.negf %104 : vector<2x32xf32>
    %106 = math.exp %105 : vector<2x32xf32>
    %cst_38 = arith.constant 1.000000e+00 : f32
    %107 = vector.broadcast %cst_38 : f32 to vector<2x32xf32>
    %108 = arith.addf %107, %106 : vector<2x32xf32>
    %109 = arith.divf %107, %108 : vector<2x32xf32>
    %110 = arith.mulf %101, %79 : vector<2x32xf32>
    %111 = arith.mulf %95, %103 : vector<2x32xf32>
    %112 = arith.addf %110, %111 : vector<2x32xf32>
    %113 = math.tanh %112 : vector<2x32xf32>
    %114 = arith.mulf %109, %113 : vector<2x32xf32>
    %cst_39 = arith.constant dense<0.000000e+00> : vector<2x32xf32>
    %115 = tpu.matmul %114, %18, %cst_39 {dimension_numbers = #tpu.dot_dimension_numbers<[1], [0], [0], [1], [0, 0, 1, 1], [], []>} : vector<2x32xf32>, vector<32x32xf32>, vector<2x32xf32> -> vector<2x32xf32>
    %116 = vector.extract_strided_slice %14 {offsets = [4, 0], sizes = [2, 32], strides = [1, 1]} : vector<16x32xf32> to vector<2x32xf32>
    %117 = arith.addf %115, %116 : vector<2x32xf32>
    %118 = math.tanh %117 : vector<2x32xf32>
    %c4 = arith.constant 4 : index
    %c0_40 = arith.constant 0 : index
    %119 = vector.load %arg7[%c4, %c0_40] : memref<16x32xf32, #tpu.memory_space<vmem>>, vector<2x32xf32>
    tpu.vector_store %arg7[%c4, %c0_40], %118 {strides = array<i32>} : memref<16x32xf32, #tpu.memory_space<vmem>>, vector<2x32xf32>,
    %120 = vector.extract_strided_slice %7 {offsets = [6, 0], sizes = [2, 128], strides = [1, 1]} : vector<16x128xf32> to vector<2x128xf32>
    %cst_41 = arith.constant dense<0.000000e+00> : vector<2x128xf32>
    %121 = tpu.matmul %114, %16, %cst_41 {dimension_numbers = #tpu.dot_dimension_numbers<[1], [0], [0], [1], [0, 0, 1, 1], [], []>} : vector<2x32xf32>, vector<32x128xf32>, vector<2x128xf32> -> vector<2x128xf32>
    %122 = arith.addf %120, %121 : vector<2x128xf32>
    %123 = vector.extract_strided_slice %122 {offsets = [0, 0], sizes = [2, 32], strides = [1, 1]} : vector<2x128xf32> to vector<2x32xf32>
    %124 = arith.negf %123 : vector<2x32xf32>
    %125 = math.exp %124 : vector<2x32xf32>
    %cst_42 = arith.constant 1.000000e+00 : f32
    %126 = vector.broadcast %cst_42 : f32 to vector<2x32xf32>
    %127 = arith.addf %126, %125 : vector<2x32xf32>
    %128 = arith.divf %126, %127 : vector<2x32xf32>
    %129 = vector.extract_strided_slice %122 {offsets = [0, 32], sizes = [2, 32], strides = [1, 1]} : vector<2x128xf32> to vector<2x32xf32>
    %130 = arith.negf %129 : vector<2x32xf32>
    %131 = math.exp %130 : vector<2x32xf32>
    %cst_43 = arith.constant 1.000000e+00 : f32
    %132 = vector.broadcast %cst_43 : f32 to vector<2x32xf32>
    %133 = arith.addf %132, %131 : vector<2x32xf32>
    %134 = arith.divf %132, %133 : vector<2x32xf32>
    %135 = vector.extract_strided_slice %122 {offsets = [0, 64], sizes = [2, 32], strides = [1, 1]} : vector<2x128xf32> to vector<2x32xf32>
    %136 = math.tanh %135 : vector<2x32xf32>
    %137 = vector.extract_strided_slice %122 {offsets = [0, 96], sizes = [2, 32], strides = [1, 1]} : vector<2x128xf32> to vector<2x32xf32>
    %138 = arith.negf %137 : vector<2x32xf32>
    %139 = math.exp %138 : vector<2x32xf32>
    %cst_44 = arith.constant 1.000000e+00 : f32
    %140 = vector.broadcast %cst_44 : f32 to vector<2x32xf32>
    %141 = arith.addf %140, %139 : vector<2x32xf32>
    %142 = arith.divf %140, %141 : vector<2x32xf32>
    %143 = arith.mulf %134, %112 : vector<2x32xf32>
    %144 = arith.mulf %128, %136 : vector<2x32xf32>
    %145 = arith.addf %143, %144 : vector<2x32xf32>
    %146 = math.tanh %145 : vector<2x32xf32>
    %147 = arith.mulf %142, %146 : vector<2x32xf32>
    %cst_45 = arith.constant dense<0.000000e+00> : vector<2x32xf32>
    %148 = tpu.matmul %147, %18, %cst_45 {dimension_numbers = #tpu.dot_dimension_numbers<[1], [0], [0], [1], [0, 0, 1, 1], [], []>} : vector<2x32xf32>, vector<32x32xf32>, vector<2x32xf32> -> vector<2x32xf32>
    %149 = vector.extract_strided_slice %14 {offsets = [6, 0], sizes = [2, 32], strides = [1, 1]} : vector<16x32xf32> to vector<2x32xf32>
    %150 = arith.addf %148, %149 : vector<2x32xf32>
    %151 = math.tanh %150 : vector<2x32xf32>
    %c6 = arith.constant 6 : index
    %c0_46 = arith.constant 0 : index
    %152 = vector.load %arg7[%c6, %c0_46] : memref<16x32xf32, #tpu.memory_space<vmem>>, vector<2x32xf32>
    tpu.vector_store %arg7[%c6, %c0_46], %151 {strides = array<i32>} : memref<16x32xf32, #tpu.memory_space<vmem>>, vector<2x32xf32>,
    %153 = vector.extract_strided_slice %7 {offsets = [8, 0], sizes = [2, 128], strides = [1, 1]} : vector<16x128xf32> to vector<2x128xf32>
    %cst_47 = arith.constant dense<0.000000e+00> : vector<2x128xf32>
    %154 = tpu.matmul %147, %16, %cst_47 {dimension_numbers = #tpu.dot_dimension_numbers<[1], [0], [0], [1], [0, 0, 1, 1], [], []>} : vector<2x32xf32>, vector<32x128xf32>, vector<2x128xf32> -> vector<2x128xf32>
    %155 = arith.addf %153, %154 : vector<2x128xf32>
    %156 = vector.extract_strided_slice %155 {offsets = [0, 0], sizes = [2, 32], strides = [1, 1]} : vector<2x128xf32> to vector<2x32xf32>
    %157 = arith.negf %156 : vector<2x32xf32>
    %158 = math.exp %157 : vector<2x32xf32>
    %cst_48 = arith.constant 1.000000e+00 : f32
    %159 = vector.broadcast %cst_48 : f32 to vector<2x32xf32>
    %160 = arith.addf %159, %158 : vector<2x32xf32>
    %161 = arith.divf %159, %160 : vector<2x32xf32>
    %162 = vector.extract_strided_slice %155 {offsets = [0, 32], sizes = [2, 32], strides = [1, 1]} : vector<2x128xf32> to vector<2x32xf32>
    %163 = arith.negf %162 : vector<2x32xf32>
    %164 = math.exp %163 : vector<2x32xf32>
    %cst_49 = arith.constant 1.000000e+00 : f32
    %165 = vector.broadcast %cst_49 : f32 to vector<2x32xf32>
    %166 = arith.addf %165, %164 : vector<2x32xf32>
    %167 = arith.divf %165, %166 : vector<2x32xf32>
    %168 = vector.extract_strided_slice %155 {offsets = [0, 64], sizes = [2, 32], strides = [1, 1]} : vector<2x128xf32> to vector<2x32xf32>
    %169 = math.tanh %168 : vector<2x32xf32>
    %170 = vector.extract_strided_slice %155 {offsets = [0, 96], sizes = [2, 32], strides = [1, 1]} : vector<2x128xf32> to vector<2x32xf32>
    %171 = arith.negf %170 : vector<2x32xf32>
    %172 = math.exp %171 : vector<2x32xf32>
    %cst_50 = arith.constant 1.000000e+00 : f32
    %173 = vector.broadcast %cst_50 : f32 to vector<2x32xf32>
    %174 = arith.addf %173, %172 : vector<2x32xf32>
    %175 = arith.divf %173, %174 : vector<2x32xf32>
    %176 = arith.mulf %167, %145 : vector<2x32xf32>
    %177 = arith.mulf %161, %169 : vector<2x32xf32>
    %178 = arith.addf %176, %177 : vector<2x32xf32>
    %179 = math.tanh %178 : vector<2x32xf32>
    %180 = arith.mulf %175, %179 : vector<2x32xf32>
    %cst_51 = arith.constant dense<0.000000e+00> : vector<2x32xf32>
    %181 = tpu.matmul %180, %18, %cst_51 {dimension_numbers = #tpu.dot_dimension_numbers<[1], [0], [0], [1], [0, 0, 1, 1], [], []>} : vector<2x32xf32>, vector<32x32xf32>, vector<2x32xf32> -> vector<2x32xf32>
    %182 = vector.extract_strided_slice %14 {offsets = [8, 0], sizes = [2, 32], strides = [1, 1]} : vector<16x32xf32> to vector<2x32xf32>
    %183 = arith.addf %181, %182 : vector<2x32xf32>
    %184 = math.tanh %183 : vector<2x32xf32>
    %c8 = arith.constant 8 : index
    %c0_52 = arith.constant 0 : index
    %185 = vector.load %arg7[%c8, %c0_52] : memref<16x32xf32, #tpu.memory_space<vmem>>, vector<2x32xf32>
    tpu.vector_store %arg7[%c8, %c0_52], %184 {strides = array<i32>} : memref<16x32xf32, #tpu.memory_space<vmem>>, vector<2x32xf32>,
    %186 = vector.extract_strided_slice %7 {offsets = [10, 0], sizes = [2, 128], strides = [1, 1]} : vector<16x128xf32> to vector<2x128xf32>
    %cst_53 = arith.constant dense<0.000000e+00> : vector<2x128xf32>
    %187 = tpu.matmul %180, %16, %cst_53 {dimension_numbers = #tpu.dot_dimension_numbers<[1], [0], [0], [1], [0, 0, 1, 1], [], []>} : vector<2x32xf32>, vector<32x128xf32>, vector<2x128xf32> -> vector<2x128xf32>
    %188 = arith.addf %186, %187 : vector<2x128xf32>
    %189 = vector.extract_strided_slice %188 {offsets = [0, 0], sizes = [2, 32], strides = [1, 1]} : vector<2x128xf32> to vector<2x32xf32>
    %190 = arith.negf %189 : vector<2x32xf32>
    %191 = math.exp %190 : vector<2x32xf32>
    %cst_54 = arith.constant 1.000000e+00 : f32
    %192 = vector.broadcast %cst_54 : f32 to vector<2x32xf32>
    %193 = arith.addf %192, %191 : vector<2x32xf32>
    %194 = arith.divf %192, %193 : vector<2x32xf32>
    %195 = vector.extract_strided_slice %188 {offsets = [0, 32], sizes = [2, 32], strides = [1, 1]} : vector<2x128xf32> to vector<2x32xf32>
    %196 = arith.negf %195 : vector<2x32xf32>
    %197 = math.exp %196 : vector<2x32xf32>
    %cst_55 = arith.constant 1.000000e+00 : f32
    %198 = vector.broadcast %cst_55 : f32 to vector<2x32xf32>
    %199 = arith.addf %198, %197 : vector<2x32xf32>
    %200 = arith.divf %198, %199 : vector<2x32xf32>
    %201 = vector.extract_strided_slice %188 {offsets = [0, 64], sizes = [2, 32], strides = [1, 1]} : vector<2x128xf32> to vector<2x32xf32>
    %202 = math.tanh %201 : vector<2x32xf32>
    %203 = vector.extract_strided_slice %188 {offsets = [0, 96], sizes = [2, 32], strides = [1, 1]} : vector<2x128xf32> to vector<2x32xf32>
    %204 = arith.negf %203 : vector<2x32xf32>
    %205 = math.exp %204 : vector<2x32xf32>
    %cst_56 = arith.constant 1.000000e+00 : f32
    %206 = vector.broadcast %cst_56 : f32 to vector<2x32xf32>
    %207 = arith.addf %206, %205 : vector<2x32xf32>
    %208 = arith.divf %206, %207 : vector<2x32xf32>
    %209 = arith.mulf %200, %178 : vector<2x32xf32>
    %210 = arith.mulf %194, %202 : vector<2x32xf32>
    %211 = arith.addf %209, %210 : vector<2x32xf32>
    %212 = math.tanh %211 : vector<2x32xf32>
    %213 = arith.mulf %208, %212 : vector<2x32xf32>
    %cst_57 = arith.constant dense<0.000000e+00> : vector<2x32xf32>
    %214 = tpu.matmul %213, %18, %cst_57 {dimension_numbers = #tpu.dot_dimension_numbers<[1], [0], [0], [1], [0, 0, 1, 1], [], []>} : vector<2x32xf32>, vector<32x32xf32>, vector<2x32xf32> -> vector<2x32xf32>
    %215 = vector.extract_strided_slice %14 {offsets = [10, 0], sizes = [2, 32], strides = [1, 1]} : vector<16x32xf32> to vector<2x32xf32>
    %216 = arith.addf %214, %215 : vector<2x32xf32>
    %217 = math.tanh %216 : vector<2x32xf32>
    %c10 = arith.constant 10 : index
    %c0_58 = arith.constant 0 : index
    %218 = vector.load %arg7[%c10, %c0_58] : memref<16x32xf32, #tpu.memory_space<vmem>>, vector<2x32xf32>
    tpu.vector_store %arg7[%c10, %c0_58], %217 {strides = array<i32>} : memref<16x32xf32, #tpu.memory_space<vmem>>, vector<2x32xf32>,
    %219 = vector.extract_strided_slice %7 {offsets = [12, 0], sizes = [2, 128], strides = [1, 1]} : vector<16x128xf32> to vector<2x128xf32>
    %cst_59 = arith.constant dense<0.000000e+00> : vector<2x128xf32>
    %220 = tpu.matmul %213, %16, %cst_59 {dimension_numbers = #tpu.dot_dimension_numbers<[1], [0], [0], [1], [0, 0, 1, 1], [], []>} : vector<2x32xf32>, vector<32x128xf32>, vector<2x128xf32> -> vector<2x128xf32>
    %221 = arith.addf %219, %220 : vector<2x128xf32>
    %222 = vector.extract_strided_slice %221 {offsets = [0, 0], sizes = [2, 32], strides = [1, 1]} : vector<2x128xf32> to vector<2x32xf32>
    %223 = arith.negf %222 : vector<2x32xf32>
    %224 = math.exp %223 : vector<2x32xf32>
    %cst_60 = arith.constant 1.000000e+00 : f32
    %225 = vector.broadcast %cst_60 : f32 to vector<2x32xf32>
    %226 = arith.addf %225, %224 : vector<2x32xf32>
    %227 = arith.divf %225, %226 : vector<2x32xf32>
    %228 = vector.extract_strided_slice %221 {offsets = [0, 32], sizes = [2, 32], strides = [1, 1]} : vector<2x128xf32> to vector<2x32xf32>
    %229 = arith.negf %228 : vector<2x32xf32>
    %230 = math.exp %229 : vector<2x32xf32>
    %cst_61 = arith.constant 1.000000e+00 : f32
    %231 = vector.broadcast %cst_61 : f32 to vector<2x32xf32>
    %232 = arith.addf %231, %230 : vector<2x32xf32>
    %233 = arith.divf %231, %232 : vector<2x32xf32>
    %234 = vector.extract_strided_slice %221 {offsets = [0, 64], sizes = [2, 32], strides = [1, 1]} : vector<2x128xf32> to vector<2x32xf32>
    %235 = math.tanh %234 : vector<2x32xf32>
    %236 = vector.extract_strided_slice %221 {offsets = [0, 96], sizes = [2, 32], strides = [1, 1]} : vector<2x128xf32> to vector<2x32xf32>
    %237 = arith.negf %236 : vector<2x32xf32>
    %238 = math.exp %237 : vector<2x32xf32>
    %cst_62 = arith.constant 1.000000e+00 : f32
    %239 = vector.broadcast %cst_62 : f32 to vector<2x32xf32>
    %240 = arith.addf %239, %238 : vector<2x32xf32>
    %241 = arith.divf %239, %240 : vector<2x32xf32>
    %242 = arith.mulf %233, %211 : vector<2x32xf32>
    %243 = arith.mulf %227, %235 : vector<2x32xf32>
    %244 = arith.addf %242, %243 : vector<2x32xf32>
    %245 = math.tanh %244 : vector<2x32xf32>
    %246 = arith.mulf %241, %245 : vector<2x32xf32>
    %cst_63 = arith.constant dense<0.000000e+00> : vector<2x32xf32>
    %247 = tpu.matmul %246, %18, %cst_63 {dimension_numbers = #tpu.dot_dimension_numbers<[1], [0], [0], [1], [0, 0, 1, 1], [], []>} : vector<2x32xf32>, vector<32x32xf32>, vector<2x32xf32> -> vector<2x32xf32>
    %248 = vector.extract_strided_slice %14 {offsets = [12, 0], sizes = [2, 32], strides = [1, 1]} : vector<16x32xf32> to vector<2x32xf32>
    %249 = arith.addf %247, %248 : vector<2x32xf32>
    %250 = math.tanh %249 : vector<2x32xf32>
    %c12 = arith.constant 12 : index
    %c0_64 = arith.constant 0 : index
    %251 = vector.load %arg7[%c12, %c0_64] : memref<16x32xf32, #tpu.memory_space<vmem>>, vector<2x32xf32>
    tpu.vector_store %arg7[%c12, %c0_64], %250 {strides = array<i32>} : memref<16x32xf32, #tpu.memory_space<vmem>>, vector<2x32xf32>,
    %252 = vector.extract_strided_slice %7 {offsets = [14, 0], sizes = [2, 128], strides = [1, 1]} : vector<16x128xf32> to vector<2x128xf32>
    %cst_65 = arith.constant dense<0.000000e+00> : vector<2x128xf32>
    %253 = tpu.matmul %246, %16, %cst_65 {dimension_numbers = #tpu.dot_dimension_numbers<[1], [0], [0], [1], [0, 0, 1, 1], [], []>} : vector<2x32xf32>, vector<32x128xf32>, vector<2x128xf32> -> vector<2x128xf32>
    %254 = arith.addf %252, %253 : vector<2x128xf32>
    %255 = vector.extract_strided_slice %254 {offsets = [0, 0], sizes = [2, 32], strides = [1, 1]} : vector<2x128xf32> to vector<2x32xf32>
    %256 = arith.negf %255 : vector<2x32xf32>
    %257 = math.exp %256 : vector<2x32xf32>
    %cst_66 = arith.constant 1.000000e+00 : f32
    %258 = vector.broadcast %cst_66 : f32 to vector<2x32xf32>
    %259 = arith.addf %258, %257 : vector<2x32xf32>
    %260 = arith.divf %258, %259 : vector<2x32xf32>
    %261 = vector.extract_strided_slice %254 {offsets = [0, 32], sizes = [2, 32], strides = [1, 1]} : vector<2x128xf32> to vector<2x32xf32>
    %262 = arith.negf %261 : vector<2x32xf32>
    %263 = math.exp %262 : vector<2x32xf32>
    %cst_67 = arith.constant 1.000000e+00 : f32
    %264 = vector.broadcast %cst_67 : f32 to vector<2x32xf32>
    %265 = arith.addf %264, %263 : vector<2x32xf32>
    %266 = arith.divf %264, %265 : vector<2x32xf32>
    %267 = vector.extract_strided_slice %254 {offsets = [0, 64], sizes = [2, 32], strides = [1, 1]} : vector<2x128xf32> to vector<2x32xf32>
    %268 = math.tanh %267 : vector<2x32xf32>
    %269 = vector.extract_strided_slice %254 {offsets = [0, 96], sizes = [2, 32], strides = [1, 1]} : vector<2x128xf32> to vector<2x32xf32>
    %270 = arith.negf %269 : vector<2x32xf32>
    %271 = math.exp %270 : vector<2x32xf32>
    %cst_68 = arith.constant 1.000000e+00 : f32
    %272 = vector.broadcast %cst_68 : f32 to vector<2x32xf32>
    %273 = arith.addf %272, %271 : vector<2x32xf32>
    %274 = arith.divf %272, %273 : vector<2x32xf32>
    %275 = arith.mulf %266, %244 : vector<2x32xf32>
    %276 = arith.mulf %260, %268 : vector<2x32xf32>
    %277 = arith.addf %275, %276 : vector<2x32xf32>
    %278 = math.tanh %277 : vector<2x32xf32>
    %279 = arith.mulf %274, %278 : vector<2x32xf32>
    %cst_69 = arith.constant dense<0.000000e+00> : vector<2x32xf32>
    %280 = tpu.matmul %279, %18, %cst_69 {dimension_numbers = #tpu.dot_dimension_numbers<[1], [0], [0], [1], [0, 0, 1, 1], [], []>} : vector<2x32xf32>, vector<32x32xf32>, vector<2x32xf32> -> vector<2x32xf32>
    %281 = vector.extract_strided_slice %14 {offsets = [14, 0], sizes = [2, 32], strides = [1, 1]} : vector<16x32xf32> to vector<2x32xf32>
    %282 = arith.addf %280, %281 : vector<2x32xf32>
    %283 = math.tanh %282 : vector<2x32xf32>
    %c14 = arith.constant 14 : index
    %c0_70 = arith.constant 0 : index
    %284 = vector.load %arg7[%c14, %c0_70] : memref<16x32xf32, #tpu.memory_space<vmem>>, vector<2x32xf32>
    tpu.vector_store %arg7[%c14, %c0_70], %283 {strides = array<i32>} : memref<16x32xf32, #tpu.memory_space<vmem>>, vector<2x32xf32>,
    %c0_71 = arith.constant 0 : index
    %c0_72 = arith.constant 0 : index
    %285 = vector.load %arg7[%c0_71, %c0_72] : memref<16x32xf32, #tpu.memory_space<vmem>>, vector<16x32xf32>
    %c1 = arith.constant 1 : index
    %c0_73 = arith.constant 0 : index
    %c0_74 = arith.constant 0 : index
    %286 = vector.load %arg1[%c1, %c0_73, %c0_74] : memref<2x32x128xf32, #tpu.memory_space<vmem>>, vector<1x32x128xf32>
    %287 = vector.shape_cast %286 : vector<1x32x128xf32> to vector<32x128xf32>
    %cst_75 = arith.constant dense<0.000000e+00> : vector<16x128xf32>
    %288 = tpu.matmul %285, %287, %cst_75 {dimension_numbers = #tpu.dot_dimension_numbers<[1], [0], [0], [1], [0, 0, 1, 1], [], []>} : vector<16x32xf32>, vector<32x128xf32>, vector<16x128xf32> -> vector<16x128xf32>
    %c1_76 = arith.constant 1 : index
    %c0_77 = arith.constant 0 : index
    %c0_78 = arith.constant 0 : index
    %289 = vector.load %arg3[%c1_76, %c0_77, %c0_78] : memref<2x1x128xf32, #tpu.memory_space<vmem>>, vector<1x1x128xf32>
    %290 = vector.shape_cast %289 : vector<1x1x128xf32> to vector<1x128xf32>
    %291 = vector.broadcast %290 : vector<1x128xf32> to vector<16x128xf32>
    %292 = arith.addf %288, %291 : vector<16x128xf32>
    %c1_79 = arith.constant 1 : index
    %c0_80 = arith.constant 0 : index
    %c0_81 = arith.constant 0 : index
    %293 = vector.load %arg5[%c1_79, %c0_80, %c0_81] : memref<2x32x32xf32, #tpu.memory_space<vmem>>, vector<1x32x32xf32>
    %294 = vector.shape_cast %293 : vector<1x32x32xf32> to vector<32x32xf32>
    %cst_82 = arith.constant dense<0.000000e+00> : vector<16x32xf32>
    %295 = tpu.matmul %285, %294, %cst_82 {dimension_numbers = #tpu.dot_dimension_numbers<[1], [0], [0], [1], [0, 0, 1, 1], [], []>} : vector<16x32xf32>, vector<32x32xf32>, vector<16x32xf32> -> vector<16x32xf32>
    %c1_83 = arith.constant 1 : index
    %c0_84 = arith.constant 0 : index
    %c0_85 = arith.constant 0 : index
    %296 = vector.load %arg6[%c1_83, %c0_84, %c0_85] : memref<2x1x32xf32, #tpu.memory_space<vmem>>, vector<1x1x32xf32>
    %297 = vector.shape_cast %296 : vector<1x1x32xf32> to vector<1x32xf32>
    %298 = vector.broadcast %297 : vector<1x32xf32> to vector<16x32xf32>
    %299 = arith.addf %295, %298 : vector<16x32xf32>
    %c1_86 = arith.constant 1 : index
    %c0_87 = arith.constant 0 : index
    %c0_88 = arith.constant 0 : index
    %300 = vector.load %arg2[%c1_86, %c0_87, %c0_88] : memref<2x32x128xf32, #tpu.memory_space<vmem>>, vector<1x32x128xf32>
    %301 = vector.shape_cast %300 : vector<1x32x128xf32> to vector<32x128xf32>
    %c1_89 = arith.constant 1 : index
    %c0_90 = arith.constant 0 : index
    %c0_91 = arith.constant 0 : index
    %302 = vector.load %arg4[%c1_89, %c0_90, %c0_91] : memref<2x32x32xf32, #tpu.memory_space<vmem>>, vector<1x32x32xf32>
    %303 = vector.shape_cast %302 : vector<1x32x32xf32> to vector<32x32xf32>
    %cst_92 = arith.constant 0.000000e+00 : f32
    %304 = vector.broadcast %cst_92 : f32 to vector<2x32xf32>
    %cst_93 = arith.constant 0.000000e+00 : f32
    %305 = vector.broadcast %cst_93 : f32 to vector<2x32xf32>
    %306 = vector.extract_strided_slice %292 {offsets = [0, 0], sizes = [2, 128], strides = [1, 1]} : vector<16x128xf32> to vector<2x128xf32>
    %cst_94 = arith.constant dense<0.000000e+00> : vector<2x128xf32>
    %307 = tpu.matmul %304, %301, %cst_94 {dimension_numbers = #tpu.dot_dimension_numbers<[1], [0], [0], [1], [0, 0, 1, 1], [], []>} : vector<2x32xf32>, vector<32x128xf32>, vector<2x128xf32> -> vector<2x128xf32>
    %308 = arith.addf %306, %307 : vector<2x128xf32>
    %309 = vector.extract_strided_slice %308 {offsets = [0, 0], sizes = [2, 32], strides = [1, 1]} : vector<2x128xf32> to vector<2x32xf32>
    %310 = arith.negf %309 : vector<2x32xf32>
    %311 = math.exp %310 : vector<2x32xf32>
    %cst_95 = arith.constant 1.000000e+00 : f32
    %312 = vector.broadcast %cst_95 : f32 to vector<2x32xf32>
    %313 = arith.addf %312, %311 : vector<2x32xf32>
    %314 = arith.divf %312, %313 : vector<2x32xf32>
    %315 = vector.extract_strided_slice %308 {offsets = [0, 32], sizes = [2, 32], strides = [1, 1]} : vector<2x128xf32> to vector<2x32xf32>
    %316 = arith.negf %315 : vector<2x32xf32>
    %317 = math.exp %316 : vector<2x32xf32>
    %cst_96 = arith.constant 1.000000e+00 : f32
    %318 = vector.broadcast %cst_96 : f32 to vector<2x32xf32>
    %319 = arith.addf %318, %317 : vector<2x32xf32>
    %320 = arith.divf %318, %319 : vector<2x32xf32>
    %321 = vector.extract_strided_slice %308 {offsets = [0, 64], sizes = [2, 32], strides = [1, 1]} : vector<2x128xf32> to vector<2x32xf32>
    %322 = math.tanh %321 : vector<2x32xf32>
    %323 = vector.extract_strided_slice %308 {offsets = [0, 96], sizes = [2, 32], strides = [1, 1]} : vector<2x128xf32> to vector<2x32xf32>
    %324 = arith.negf %323 : vector<2x32xf32>
    %325 = math.exp %324 : vector<2x32xf32>
    %cst_97 = arith.constant 1.000000e+00 : f32
    %326 = vector.broadcast %cst_97 : f32 to vector<2x32xf32>
    %327 = arith.addf %326, %325 : vector<2x32xf32>
    %328 = arith.divf %326, %327 : vector<2x32xf32>
    %329 = arith.mulf %320, %305 : vector<2x32xf32>
    %330 = arith.mulf %314, %322 : vector<2x32xf32>
    %331 = arith.addf %329, %330 : vector<2x32xf32>
    %332 = math.tanh %331 : vector<2x32xf32>
    %333 = arith.mulf %328, %332 : vector<2x32xf32>
    %cst_98 = arith.constant dense<0.000000e+00> : vector<2x32xf32>
    %334 = tpu.matmul %333, %303, %cst_98 {dimension_numbers = #tpu.dot_dimension_numbers<[1], [0], [0], [1], [0, 0, 1, 1], [], []>} : vector<2x32xf32>, vector<32x32xf32>, vector<2x32xf32> -> vector<2x32xf32>
    %335 = vector.extract_strided_slice %299 {offsets = [0, 0], sizes = [2, 32], strides = [1, 1]} : vector<16x32xf32> to vector<2x32xf32>
    %336 = arith.addf %334, %335 : vector<2x32xf32>
    %337 = math.tanh %336 : vector<2x32xf32>
    %c0_99 = arith.constant 0 : index
    %c0_100 = arith.constant 0 : index
    %338 = vector.load %arg7[%c0_99, %c0_100] : memref<16x32xf32, #tpu.memory_space<vmem>>, vector<2x32xf32>
    tpu.vector_store %arg7[%c0_99, %c0_100], %337 {strides = array<i32>} : memref<16x32xf32, #tpu.memory_space<vmem>>, vector<2x32xf32>,
    %339 = vector.extract_strided_slice %292 {offsets = [2, 0], sizes = [2, 128], strides = [1, 1]} : vector<16x128xf32> to vector<2x128xf32>
    %cst_101 = arith.constant dense<0.000000e+00> : vector<2x128xf32>
    %340 = tpu.matmul %333, %301, %cst_101 {dimension_numbers = #tpu.dot_dimension_numbers<[1], [0], [0], [1], [0, 0, 1, 1], [], []>} : vector<2x32xf32>, vector<32x128xf32>, vector<2x128xf32> -> vector<2x128xf32>
    %341 = arith.addf %339, %340 : vector<2x128xf32>
    %342 = vector.extract_strided_slice %341 {offsets = [0, 0], sizes = [2, 32], strides = [1, 1]} : vector<2x128xf32> to vector<2x32xf32>
    %343 = arith.negf %342 : vector<2x32xf32>
    %344 = math.exp %343 : vector<2x32xf32>
    %cst_102 = arith.constant 1.000000e+00 : f32
    %345 = vector.broadcast %cst_102 : f32 to vector<2x32xf32>
    %346 = arith.addf %345, %344 : vector<2x32xf32>
    %347 = arith.divf %345, %346 : vector<2x32xf32>
    %348 = vector.extract_strided_slice %341 {offsets = [0, 32], sizes = [2, 32], strides = [1, 1]} : vector<2x128xf32> to vector<2x32xf32>
    %349 = arith.negf %348 : vector<2x32xf32>
    %350 = math.exp %349 : vector<2x32xf32>
    %cst_103 = arith.constant 1.000000e+00 : f32
    %351 = vector.broadcast %cst_103 : f32 to vector<2x32xf32>
    %352 = arith.addf %351, %350 : vector<2x32xf32>
    %353 = arith.divf %351, %352 : vector<2x32xf32>
    %354 = vector.extract_strided_slice %341 {offsets = [0, 64], sizes = [2, 32], strides = [1, 1]} : vector<2x128xf32> to vector<2x32xf32>
    %355 = math.tanh %354 : vector<2x32xf32>
    %356 = vector.extract_strided_slice %341 {offsets = [0, 96], sizes = [2, 32], strides = [1, 1]} : vector<2x128xf32> to vector<2x32xf32>
    %357 = arith.negf %356 : vector<2x32xf32>
    %358 = math.exp %357 : vector<2x32xf32>
    %cst_104 = arith.constant 1.000000e+00 : f32
    %359 = vector.broadcast %cst_104 : f32 to vector<2x32xf32>
    %360 = arith.addf %359, %358 : vector<2x32xf32>
    %361 = arith.divf %359, %360 : vector<2x32xf32>
    %362 = arith.mulf %353, %331 : vector<2x32xf32>
    %363 = arith.mulf %347, %355 : vector<2x32xf32>
    %364 = arith.addf %362, %363 : vector<2x32xf32>
    %365 = math.tanh %364 : vector<2x32xf32>
    %366 = arith.mulf %361, %365 : vector<2x32xf32>
    %cst_105 = arith.constant dense<0.000000e+00> : vector<2x32xf32>
    %367 = tpu.matmul %366, %303, %cst_105 {dimension_numbers = #tpu.dot_dimension_numbers<[1], [0], [0], [1], [0, 0, 1, 1], [], []>} : vector<2x32xf32>, vector<32x32xf32>, vector<2x32xf32> -> vector<2x32xf32>
    %368 = vector.extract_strided_slice %299 {offsets = [2, 0], sizes = [2, 32], strides = [1, 1]} : vector<16x32xf32> to vector<2x32xf32>
    %369 = arith.addf %367, %368 : vector<2x32xf32>
    %370 = math.tanh %369 : vector<2x32xf32>
    %c2_106 = arith.constant 2 : index
    %c0_107 = arith.constant 0 : index
    %371 = vector.load %arg7[%c2_106, %c0_107] : memref<16x32xf32, #tpu.memory_space<vmem>>, vector<2x32xf32>
    tpu.vector_store %arg7[%c2_106, %c0_107], %370 {strides = array<i32>} : memref<16x32xf32, #tpu.memory_space<vmem>>, vector<2x32xf32>,
    %372 = vector.extract_strided_slice %292 {offsets = [4, 0], sizes = [2, 128], strides = [1, 1]} : vector<16x128xf32> to vector<2x128xf32>
    %cst_108 = arith.constant dense<0.000000e+00> : vector<2x128xf32>
    %373 = tpu.matmul %366, %301, %cst_108 {dimension_numbers = #tpu.dot_dimension_numbers<[1], [0], [0], [1], [0, 0, 1, 1], [], []>} : vector<2x32xf32>, vector<32x128xf32>, vector<2x128xf32> -> vector<2x128xf32>
    %374 = arith.addf %372, %373 : vector<2x128xf32>
    %375 = vector.extract_strided_slice %374 {offsets = [0, 0], sizes = [2, 32], strides = [1, 1]} : vector<2x128xf32> to vector<2x32xf32>
    %376 = arith.negf %375 : vector<2x32xf32>
    %377 = math.exp %376 : vector<2x32xf32>
    %cst_109 = arith.constant 1.000000e+00 : f32
    %378 = vector.broadcast %cst_109 : f32 to vector<2x32xf32>
    %379 = arith.addf %378, %377 : vector<2x32xf32>
    %380 = arith.divf %378, %379 : vector<2x32xf32>
    %381 = vector.extract_strided_slice %374 {offsets = [0, 32], sizes = [2, 32], strides = [1, 1]} : vector<2x128xf32> to vector<2x32xf32>
    %382 = arith.negf %381 : vector<2x32xf32>
    %383 = math.exp %382 : vector<2x32xf32>
    %cst_110 = arith.constant 1.000000e+00 : f32
    %384 = vector.broadcast %cst_110 : f32 to vector<2x32xf32>
    %385 = arith.addf %384, %383 : vector<2x32xf32>
    %386 = arith.divf %384, %385 : vector<2x32xf32>
    %387 = vector.extract_strided_slice %374 {offsets = [0, 64], sizes = [2, 32], strides = [1, 1]} : vector<2x128xf32> to vector<2x32xf32>
    %388 = math.tanh %387 : vector<2x32xf32>
    %389 = vector.extract_strided_slice %374 {offsets = [0, 96], sizes = [2, 32], strides = [1, 1]} : vector<2x128xf32> to vector<2x32xf32>
    %390 = arith.negf %389 : vector<2x32xf32>
    %391 = math.exp %390 : vector<2x32xf32>
    %cst_111 = arith.constant 1.000000e+00 : f32
    %392 = vector.broadcast %cst_111 : f32 to vector<2x32xf32>
    %393 = arith.addf %392, %391 : vector<2x32xf32>
    %394 = arith.divf %392, %393 : vector<2x32xf32>
    %395 = arith.mulf %386, %364 : vector<2x32xf32>
    %396 = arith.mulf %380, %388 : vector<2x32xf32>
    %397 = arith.addf %395, %396 : vector<2x32xf32>
    %398 = math.tanh %397 : vector<2x32xf32>
    %399 = arith.mulf %394, %398 : vector<2x32xf32>
    %cst_112 = arith.constant dense<0.000000e+00> : vector<2x32xf32>
    %400 = tpu.matmul %399, %303, %cst_112 {dimension_numbers = #tpu.dot_dimension_numbers<[1], [0], [0], [1], [0, 0, 1, 1], [], []>} : vector<2x32xf32>, vector<32x32xf32>, vector<2x32xf32> -> vector<2x32xf32>
    %401 = vector.extract_strided_slice %299 {offsets = [4, 0], sizes = [2, 32], strides = [1, 1]} : vector<16x32xf32> to vector<2x32xf32>
    %402 = arith.addf %400, %401 : vector<2x32xf32>
    %403 = math.tanh %402 : vector<2x32xf32>
    %c4_113 = arith.constant 4 : index
    %c0_114 = arith.constant 0 : index
    %404 = vector.load %arg7[%c4_113, %c0_114] : memref<16x32xf32, #tpu.memory_space<vmem>>, vector<2x32xf32>
    tpu.vector_store %arg7[%c4_113, %c0_114], %403 {strides = array<i32>} : memref<16x32xf32, #tpu.memory_space<vmem>>, vector<2x32xf32>,
    %405 = vector.extract_strided_slice %292 {offsets = [6, 0], sizes = [2, 128], strides = [1, 1]} : vector<16x128xf32> to vector<2x128xf32>
    %cst_115 = arith.constant dense<0.000000e+00> : vector<2x128xf32>
    %406 = tpu.matmul %399, %301, %cst_115 {dimension_numbers = #tpu.dot_dimension_numbers<[1], [0], [0], [1], [0, 0, 1, 1], [], []>} : vector<2x32xf32>, vector<32x128xf32>, vector<2x128xf32> -> vector<2x128xf32>
    %407 = arith.addf %405, %406 : vector<2x128xf32>
    %408 = vector.extract_strided_slice %407 {offsets = [0, 0], sizes = [2, 32], strides = [1, 1]} : vector<2x128xf32> to vector<2x32xf32>
    %409 = arith.negf %408 : vector<2x32xf32>
    %410 = math.exp %409 : vector<2x32xf32>
    %cst_116 = arith.constant 1.000000e+00 : f32
    %411 = vector.broadcast %cst_116 : f32 to vector<2x32xf32>
    %412 = arith.addf %411, %410 : vector<2x32xf32>
    %413 = arith.divf %411, %412 : vector<2x32xf32>
    %414 = vector.extract_strided_slice %407 {offsets = [0, 32], sizes = [2, 32], strides = [1, 1]} : vector<2x128xf32> to vector<2x32xf32>
    %415 = arith.negf %414 : vector<2x32xf32>
    %416 = math.exp %415 : vector<2x32xf32>
    %cst_117 = arith.constant 1.000000e+00 : f32
    %417 = vector.broadcast %cst_117 : f32 to vector<2x32xf32>
    %418 = arith.addf %417, %416 : vector<2x32xf32>
    %419 = arith.divf %417, %418 : vector<2x32xf32>
    %420 = vector.extract_strided_slice %407 {offsets = [0, 64], sizes = [2, 32], strides = [1, 1]} : vector<2x128xf32> to vector<2x32xf32>
    %421 = math.tanh %420 : vector<2x32xf32>
    %422 = vector.extract_strided_slice %407 {offsets = [0, 96], sizes = [2, 32], strides = [1, 1]} : vector<2x128xf32> to vector<2x32xf32>
    %423 = arith.negf %422 : vector<2x32xf32>
    %424 = math.exp %423 : vector<2x32xf32>
    %cst_118 = arith.constant 1.000000e+00 : f32
    %425 = vector.broadcast %cst_118 : f32 to vector<2x32xf32>
    %426 = arith.addf %425, %424 : vector<2x32xf32>
    %427 = arith.divf %425, %426 : vector<2x32xf32>
    %428 = arith.mulf %419, %397 : vector<2x32xf32>
    %429 = arith.mulf %413, %421 : vector<2x32xf32>
    %430 = arith.addf %428, %429 : vector<2x32xf32>
    %431 = math.tanh %430 : vector<2x32xf32>
    %432 = arith.mulf %427, %431 : vector<2x32xf32>
    %cst_119 = arith.constant dense<0.000000e+00> : vector<2x32xf32>
    %433 = tpu.matmul %432, %303, %cst_119 {dimension_numbers = #tpu.dot_dimension_numbers<[1], [0], [0], [1], [0, 0, 1, 1], [], []>} : vector<2x32xf32>, vector<32x32xf32>, vector<2x32xf32> -> vector<2x32xf32>
    %434 = vector.extract_strided_slice %299 {offsets = [6, 0], sizes = [2, 32], strides = [1, 1]} : vector<16x32xf32> to vector<2x32xf32>
    %435 = arith.addf %433, %434 : vector<2x32xf32>
    %436 = math.tanh %435 : vector<2x32xf32>
    %c6_120 = arith.constant 6 : index
    %c0_121 = arith.constant 0 : index
    %437 = vector.load %arg7[%c6_120, %c0_121] : memref<16x32xf32, #tpu.memory_space<vmem>>, vector<2x32xf32>
    tpu.vector_store %arg7[%c6_120, %c0_121], %436 {strides = array<i32>} : memref<16x32xf32, #tpu.memory_space<vmem>>, vector<2x32xf32>,
    %438 = vector.extract_strided_slice %292 {offsets = [8, 0], sizes = [2, 128], strides = [1, 1]} : vector<16x128xf32> to vector<2x128xf32>
    %cst_122 = arith.constant dense<0.000000e+00> : vector<2x128xf32>
    %439 = tpu.matmul %432, %301, %cst_122 {dimension_numbers = #tpu.dot_dimension_numbers<[1], [0], [0], [1], [0, 0, 1, 1], [], []>} : vector<2x32xf32>, vector<32x128xf32>, vector<2x128xf32> -> vector<2x128xf32>
    %440 = arith.addf %438, %439 : vector<2x128xf32>
    %441 = vector.extract_strided_slice %440 {offsets = [0, 0], sizes = [2, 32], strides = [1, 1]} : vector<2x128xf32> to vector<2x32xf32>
    %442 = arith.negf %441 : vector<2x32xf32>
    %443 = math.exp %442 : vector<2x32xf32>
    %cst_123 = arith.constant 1.000000e+00 : f32
    %444 = vector.broadcast %cst_123 : f32 to vector<2x32xf32>
    %445 = arith.addf %444, %443 : vector<2x32xf32>
    %446 = arith.divf %444, %445 : vector<2x32xf32>
    %447 = vector.extract_strided_slice %440 {offsets = [0, 32], sizes = [2, 32], strides = [1, 1]} : vector<2x128xf32> to vector<2x32xf32>
    %448 = arith.negf %447 : vector<2x32xf32>
    %449 = math.exp %448 : vector<2x32xf32>
    %cst_124 = arith.constant 1.000000e+00 : f32
    %450 = vector.broadcast %cst_124 : f32 to vector<2x32xf32>
    %451 = arith.addf %450, %449 : vector<2x32xf32>
    %452 = arith.divf %450, %451 : vector<2x32xf32>
    %453 = vector.extract_strided_slice %440 {offsets = [0, 64], sizes = [2, 32], strides = [1, 1]} : vector<2x128xf32> to vector<2x32xf32>
    %454 = math.tanh %453 : vector<2x32xf32>
    %455 = vector.extract_strided_slice %440 {offsets = [0, 96], sizes = [2, 32], strides = [1, 1]} : vector<2x128xf32> to vector<2x32xf32>
    %456 = arith.negf %455 : vector<2x32xf32>
    %457 = math.exp %456 : vector<2x32xf32>
    %cst_125 = arith.constant 1.000000e+00 : f32
    %458 = vector.broadcast %cst_125 : f32 to vector<2x32xf32>
    %459 = arith.addf %458, %457 : vector<2x32xf32>
    %460 = arith.divf %458, %459 : vector<2x32xf32>
    %461 = arith.mulf %452, %430 : vector<2x32xf32>
    %462 = arith.mulf %446, %454 : vector<2x32xf32>
    %463 = arith.addf %461, %462 : vector<2x32xf32>
    %464 = math.tanh %463 : vector<2x32xf32>
    %465 = arith.mulf %460, %464 : vector<2x32xf32>
    %cst_126 = arith.constant dense<0.000000e+00> : vector<2x32xf32>
    %466 = tpu.matmul %465, %303, %cst_126 {dimension_numbers = #tpu.dot_dimension_numbers<[1], [0], [0], [1], [0, 0, 1, 1], [], []>} : vector<2x32xf32>, vector<32x32xf32>, vector<2x32xf32> -> vector<2x32xf32>
    %467 = vector.extract_strided_slice %299 {offsets = [8, 0], sizes = [2, 32], strides = [1, 1]} : vector<16x32xf32> to vector<2x32xf32>
    %468 = arith.addf %466, %467 : vector<2x32xf32>
    %469 = math.tanh %468 : vector<2x32xf32>
    %c8_127 = arith.constant 8 : index
    %c0_128 = arith.constant 0 : index
    %470 = vector.load %arg7[%c8_127, %c0_128] : memref<16x32xf32, #tpu.memory_space<vmem>>, vector<2x32xf32>
    tpu.vector_store %arg7[%c8_127, %c0_128], %469 {strides = array<i32>} : memref<16x32xf32, #tpu.memory_space<vmem>>, vector<2x32xf32>,
    %471 = vector.extract_strided_slice %292 {offsets = [10, 0], sizes = [2, 128], strides = [1, 1]} : vector<16x128xf32> to vector<2x128xf32>
    %cst_129 = arith.constant dense<0.000000e+00> : vector<2x128xf32>
    %472 = tpu.matmul %465, %301, %cst_129 {dimension_numbers = #tpu.dot_dimension_numbers<[1], [0], [0], [1], [0, 0, 1, 1], [], []>} : vector<2x32xf32>, vector<32x128xf32>, vector<2x128xf32> -> vector<2x128xf32>
    %473 = arith.addf %471, %472 : vector<2x128xf32>
    %474 = vector.extract_strided_slice %473 {offsets = [0, 0], sizes = [2, 32], strides = [1, 1]} : vector<2x128xf32> to vector<2x32xf32>
    %475 = arith.negf %474 : vector<2x32xf32>
    %476 = math.exp %475 : vector<2x32xf32>
    %cst_130 = arith.constant 1.000000e+00 : f32
    %477 = vector.broadcast %cst_130 : f32 to vector<2x32xf32>
    %478 = arith.addf %477, %476 : vector<2x32xf32>
    %479 = arith.divf %477, %478 : vector<2x32xf32>
    %480 = vector.extract_strided_slice %473 {offsets = [0, 32], sizes = [2, 32], strides = [1, 1]} : vector<2x128xf32> to vector<2x32xf32>
    %481 = arith.negf %480 : vector<2x32xf32>
    %482 = math.exp %481 : vector<2x32xf32>
    %cst_131 = arith.constant 1.000000e+00 : f32
    %483 = vector.broadcast %cst_131 : f32 to vector<2x32xf32>
    %484 = arith.addf %483, %482 : vector<2x32xf32>
    %485 = arith.divf %483, %484 : vector<2x32xf32>
    %486 = vector.extract_strided_slice %473 {offsets = [0, 64], sizes = [2, 32], strides = [1, 1]} : vector<2x128xf32> to vector<2x32xf32>
    %487 = math.tanh %486 : vector<2x32xf32>
    %488 = vector.extract_strided_slice %473 {offsets = [0, 96], sizes = [2, 32], strides = [1, 1]} : vector<2x128xf32> to vector<2x32xf32>
    %489 = arith.negf %488 : vector<2x32xf32>
    %490 = math.exp %489 : vector<2x32xf32>
    %cst_132 = arith.constant 1.000000e+00 : f32
    %491 = vector.broadcast %cst_132 : f32 to vector<2x32xf32>
    %492 = arith.addf %491, %490 : vector<2x32xf32>
    %493 = arith.divf %491, %492 : vector<2x32xf32>
    %494 = arith.mulf %485, %463 : vector<2x32xf32>
    %495 = arith.mulf %479, %487 : vector<2x32xf32>
    %496 = arith.addf %494, %495 : vector<2x32xf32>
    %497 = math.tanh %496 : vector<2x32xf32>
    %498 = arith.mulf %493, %497 : vector<2x32xf32>
    %cst_133 = arith.constant dense<0.000000e+00> : vector<2x32xf32>
    %499 = tpu.matmul %498, %303, %cst_133 {dimension_numbers = #tpu.dot_dimension_numbers<[1], [0], [0], [1], [0, 0, 1, 1], [], []>} : vector<2x32xf32>, vector<32x32xf32>, vector<2x32xf32> -> vector<2x32xf32>
    %500 = vector.extract_strided_slice %299 {offsets = [10, 0], sizes = [2, 32], strides = [1, 1]} : vector<16x32xf32> to vector<2x32xf32>
    %501 = arith.addf %499, %500 : vector<2x32xf32>
    %502 = math.tanh %501 : vector<2x32xf32>
    %c10_134 = arith.constant 10 : index
    %c0_135 = arith.constant 0 : index
    %503 = vector.load %arg7[%c10_134, %c0_135] : memref<16x32xf32, #tpu.memory_space<vmem>>, vector<2x32xf32>
    tpu.vector_store %arg7[%c10_134, %c0_135], %502 {strides = array<i32>} : memref<16x32xf32, #tpu.memory_space<vmem>>, vector<2x32xf32>,
    %504 = vector.extract_strided_slice %292 {offsets = [12, 0], sizes = [2, 128], strides = [1, 1]} : vector<16x128xf32> to vector<2x128xf32>
    %cst_136 = arith.constant dense<0.000000e+00> : vector<2x128xf32>
    %505 = tpu.matmul %498, %301, %cst_136 {dimension_numbers = #tpu.dot_dimension_numbers<[1], [0], [0], [1], [0, 0, 1, 1], [], []>} : vector<2x32xf32>, vector<32x128xf32>, vector<2x128xf32> -> vector<2x128xf32>
    %506 = arith.addf %504, %505 : vector<2x128xf32>
    %507 = vector.extract_strided_slice %506 {offsets = [0, 0], sizes = [2, 32], strides = [1, 1]} : vector<2x128xf32> to vector<2x32xf32>
    %508 = arith.negf %507 : vector<2x32xf32>
    %509 = math.exp %508 : vector<2x32xf32>
    %cst_137 = arith.constant 1.000000e+00 : f32
    %510 = vector.broadcast %cst_137 : f32 to vector<2x32xf32>
    %511 = arith.addf %510, %509 : vector<2x32xf32>
    %512 = arith.divf %510, %511 : vector<2x32xf32>
    %513 = vector.extract_strided_slice %506 {offsets = [0, 32], sizes = [2, 32], strides = [1, 1]} : vector<2x128xf32> to vector<2x32xf32>
    %514 = arith.negf %513 : vector<2x32xf32>
    %515 = math.exp %514 : vector<2x32xf32>
    %cst_138 = arith.constant 1.000000e+00 : f32
    %516 = vector.broadcast %cst_138 : f32 to vector<2x32xf32>
    %517 = arith.addf %516, %515 : vector<2x32xf32>
    %518 = arith.divf %516, %517 : vector<2x32xf32>
    %519 = vector.extract_strided_slice %506 {offsets = [0, 64], sizes = [2, 32], strides = [1, 1]} : vector<2x128xf32> to vector<2x32xf32>
    %520 = math.tanh %519 : vector<2x32xf32>
    %521 = vector.extract_strided_slice %506 {offsets = [0, 96], sizes = [2, 32], strides = [1, 1]} : vector<2x128xf32> to vector<2x32xf32>
    %522 = arith.negf %521 : vector<2x32xf32>
    %523 = math.exp %522 : vector<2x32xf32>
    %cst_139 = arith.constant 1.000000e+00 : f32
    %524 = vector.broadcast %cst_139 : f32 to vector<2x32xf32>
    %525 = arith.addf %524, %523 : vector<2x32xf32>
    %526 = arith.divf %524, %525 : vector<2x32xf32>
    %527 = arith.mulf %518, %496 : vector<2x32xf32>
    %528 = arith.mulf %512, %520 : vector<2x32xf32>
    %529 = arith.addf %527, %528 : vector<2x32xf32>
    %530 = math.tanh %529 : vector<2x32xf32>
    %531 = arith.mulf %526, %530 : vector<2x32xf32>
    %cst_140 = arith.constant dense<0.000000e+00> : vector<2x32xf32>
    %532 = tpu.matmul %531, %303, %cst_140 {dimension_numbers = #tpu.dot_dimension_numbers<[1], [0], [0], [1], [0, 0, 1, 1], [], []>} : vector<2x32xf32>, vector<32x32xf32>, vector<2x32xf32> -> vector<2x32xf32>
    %533 = vector.extract_strided_slice %299 {offsets = [12, 0], sizes = [2, 32], strides = [1, 1]} : vector<16x32xf32> to vector<2x32xf32>
    %534 = arith.addf %532, %533 : vector<2x32xf32>
    %535 = math.tanh %534 : vector<2x32xf32>
    %c12_141 = arith.constant 12 : index
    %c0_142 = arith.constant 0 : index
    %536 = vector.load %arg7[%c12_141, %c0_142] : memref<16x32xf32, #tpu.memory_space<vmem>>, vector<2x32xf32>
    tpu.vector_store %arg7[%c12_141, %c0_142], %535 {strides = array<i32>} : memref<16x32xf32, #tpu.memory_space<vmem>>, vector<2x32xf32>,
    %537 = vector.extract_strided_slice %292 {offsets = [14, 0], sizes = [2, 128], strides = [1, 1]} : vector<16x128xf32> to vector<2x128xf32>
    %cst_143 = arith.constant dense<0.000000e+00> : vector<2x128xf32>
    %538 = tpu.matmul %531, %301, %cst_143 {dimension_numbers = #tpu.dot_dimension_numbers<[1], [0], [0], [1], [0, 0, 1, 1], [], []>} : vector<2x32xf32>, vector<32x128xf32>, vector<2x128xf32> -> vector<2x128xf32>
    %539 = arith.addf %537, %538 : vector<2x128xf32>
    %540 = vector.extract_strided_slice %539 {offsets = [0, 0], sizes = [2, 32], strides = [1, 1]} : vector<2x128xf32> to vector<2x32xf32>
    %541 = arith.negf %540 : vector<2x32xf32>
    %542 = math.exp %541 : vector<2x32xf32>
    %cst_144 = arith.constant 1.000000e+00 : f32
    %543 = vector.broadcast %cst_144 : f32 to vector<2x32xf32>
    %544 = arith.addf %543, %542 : vector<2x32xf32>
    %545 = arith.divf %543, %544 : vector<2x32xf32>
    %546 = vector.extract_strided_slice %539 {offsets = [0, 32], sizes = [2, 32], strides = [1, 1]} : vector<2x128xf32> to vector<2x32xf32>
    %547 = arith.negf %546 : vector<2x32xf32>
    %548 = math.exp %547 : vector<2x32xf32>
    %cst_145 = arith.constant 1.000000e+00 : f32
    %549 = vector.broadcast %cst_145 : f32 to vector<2x32xf32>
    %550 = arith.addf %549, %548 : vector<2x32xf32>
    %551 = arith.divf %549, %550 : vector<2x32xf32>
    %552 = vector.extract_strided_slice %539 {offsets = [0, 64], sizes = [2, 32], strides = [1, 1]} : vector<2x128xf32> to vector<2x32xf32>
    %553 = math.tanh %552 : vector<2x32xf32>
    %554 = vector.extract_strided_slice %539 {offsets = [0, 96], sizes = [2, 32], strides = [1, 1]} : vector<2x128xf32> to vector<2x32xf32>
    %555 = arith.negf %554 : vector<2x32xf32>
    %556 = math.exp %555 : vector<2x32xf32>
    %cst_146 = arith.constant 1.000000e+00 : f32
    %557 = vector.broadcast %cst_146 : f32 to vector<2x32xf32>
    %558 = arith.addf %557, %556 : vector<2x32xf32>
    %559 = arith.divf %557, %558 : vector<2x32xf32>
    %560 = arith.mulf %551, %529 : vector<2x32xf32>
    %561 = arith.mulf %545, %553 : vector<2x32xf32>
    %562 = arith.addf %560, %561 : vector<2x32xf32>
    %563 = math.tanh %562 : vector<2x32xf32>
    %564 = arith.mulf %559, %563 : vector<2x32xf32>
    %cst_147 = arith.constant dense<0.000000e+00> : vector<2x32xf32>
    %565 = tpu.matmul %564, %303, %cst_147 {dimension_numbers = #tpu.dot_dimension_numbers<[1], [0], [0], [1], [0, 0, 1, 1], [], []>} : vector<2x32xf32>, vector<32x32xf32>, vector<2x32xf32> -> vector<2x32xf32>
    %566 = vector.extract_strided_slice %299 {offsets = [14, 0], sizes = [2, 32], strides = [1, 1]} : vector<16x32xf32> to vector<2x32xf32>
    %567 = arith.addf %565, %566 : vector<2x32xf32>
    %568 = math.tanh %567 : vector<2x32xf32>
    %c14_148 = arith.constant 14 : index
    %c0_149 = arith.constant 0 : index
    %569 = vector.load %arg7[%c14_148, %c0_149] : memref<16x32xf32, #tpu.memory_space<vmem>>, vector<2x32xf32>
    tpu.vector_store %arg7[%c14_148, %c0_149], %568 {strides = array<i32>} : memref<16x32xf32, #tpu.memory_space<vmem>>, vector<2x32xf32>,
    return
  }
}

</mosaic_0001>

<bundles_post_ra>
// kernel: _lambda_.4
= control target key start
LH: loop header
LB: loop body
LE: loop exit
PB: predicated region body
PF: predicated region fallthrough
CT: control target
= control target key end

     0   :  { %8 = vsyncpa [#allocation3], 0  ;;  %s173_s12 = smov [#allocation2]   ;;  %s218_s0 = inlined_call_operand.vmem [shape: f32[16,18], index: 0, kind: input, shape index: {}]   ;;  %s219_s1 = inlined_call_operand.vmem [shape: f32[18,64], index: 1, kind: input, shape index: {}]   ;;  %s220_s2 = inlined_call_operand.hbm [shape: f32[1,64], index: 2, kind: input, shape index: {}]   ;;  %s221_s3 = inlined_call_operand.vmem [shape: f32[16,64], index: 3, kind: output, shape index: {}]  }
   0x1   :  { %s19_s13 = sshll.u32 %s173_s12, 4  ;;  %s20_s13 = int_to_ptr.vmem [resolvable:$true] %s19_s13 }
   0x2   :  { %s159_s14 = scalar_lea.vmem %s20_s13, 16  ;;  %s163_s15 = scalar_lea.vmem %s20_s13, 32 }
   0x3   :  { %p160_p0 = scmp.ne.s32.totalorder %s20_s13, %s159_s14  ;;  %p164_p1 = scmp.lt.s32.totalorder %s20_s13, %s20_s13 }
   0x4   :  { %p165_p2 = scmp.lt.s32.totalorder %s163_s15, %s159_s14 }
   0x6   :  { %p166_p3 = por %p165_p2, %p164_p1 }
   0x8   :  { %p167_p4 = pnand %p166_p3, %p160_p0 }
   0xa   :  { %170 = shalt.err (!%p167_p4)
}
   0xb   :  { %22 = dma.hbm_to_vmem [thread:$0]  %s220_s2, 16, %s20_s13, [#allocation3]  }
   0xc   :  { %171 = dma.done.wait [#allocation3], 16  }
   0xd   :  { %172 = vsyncadd [#allocation3], 4294967280  ;;  %vm45_vm0 = vcmask 1041408   ;;  %vm38_vm1 = vcmask 146432   ;;  %v30_v0 = vld [vmem:[%s219_s1 + $0x10] sm:$0x3] }
   0xe   :  { %v29_v1 = vld [vmem:[%s219_s1 + $0x8] sm:$0xff]  ;;  %141 = vmatprep.subr.msk.mxu0 %vm45_vm0, %v30_v0  ;;  %v26_v2 = vld [vmem:[%s218_s0] sm:$0xff]  ;;  %vm124_vm2 = vcmask 523264  }
   0xf   :  { %142 = vmatpush3.msk.msra.mxu0 %vm45_vm0, %v30_v0  ;;  %v28_v3 = vld [vmem:[%s219_s1] sm:$0xff]  ;;  %147 = vmatprep.mubr.msk.f32.mxu0 %vm38_vm1, %v26_v2  ;;  %v27_v4 = vld [vmem:[%s218_s0 + $0x8] sm:$0xff] }
  0x10   :  { %143 = vmatprep.subr.mxu0 %v29_v1  ;;  %v132_v5 = vld [vmem:[#allocation2] ss:$0 sm:$0xff] }
  0x11   :  { %144 = vmatpush3.msra.mxu0 %v29_v1 }
  0x12   :  { %145 = vmatprep.subr.mxu0 %v28_v3 }
  0x13   :  { %146 = vmatpush3.msra.mxu0 %v28_v3 }
  0x14   :  { %148 = vmatmul.mubr.msk.f32.vlgmr.msra.gmra.mxu0 %vm38_vm1, %v27_v4 }
  0xd4   :  { %v149_v6 = vpop.f32.mrf.mxu0 }
  0xd5   :  { %v121_v7 = vadd.f32 %v149_v6, %v132_v5 }
  0xd6   :  { %v115_v8 = vpop.f32.mrf.mxu0 }
  0xd7   :  { %126 = vst.msk [vmem:[%s221_s3 + $0x8] sm:$0xff] %vm124_vm2, %v121_v7  ;;  %v116_v9 = vadd.f32 %v132_v5, %v115_v8 }
  0xd9   :  { %125 = vst.msk [vmem:[%s221_s3] sm:$0xff] %vm124_vm2, %v116_v9 }
  0xda   :  { %131 = vsyncpa [#allocation3], 1 }

// kernel: _lambda_.7
= control target key start
LH: loop header
LB: loop body
LE: loop exit
PB: predicated region body
PF: predicated region fallthrough
CT: control target
= control target key end

     0   :  { %vm39_vm0 = vcmask 261120   ;;  %v4107_v7 = vmov 0.0   ;;  %vm4108_vm1 = vmmov 0   ;;  %s4109_s22 = smov 64   ;;  %s4110_s23 = smov 32   ;;  %vm389_vm2 = vcmask 254976   ;;  %s4855_s1 = inlined_call_operand.vmem [shape: f32[2,32,128], index: 1, kind: input, shape index: {}]   ;;  %s4856_s0 = inlined_call_operand.vmem [shape: f32[16,32], index: 0, kind: input, shape index: {}]   ;;  %s4857_s2 = inlined_call_operand.vmem [shape: f32[2,32,128], index: 2, kind: input, shape index: {}]   ;;  %s4858_s3 = inlined_call_operand.vmem [shape: f32[2,1,128], index: 3, kind: input, shape index: {}]   ;;  %s4859_s5 = inlined_call_operand.vmem [shape: f32[2,32,32], index: 5, kind: input, shape index: {}]   ;;  %s4860_s4 = inlined_call_operand.vmem [shape: f32[2,32,32], index: 4, kind: input, shape index: {}]   ;;  %s4861_s6 = inlined_call_operand.vmem [shape: f32[2,1,32], index: 6, kind: input, shape index: {}]   ;;  %s4862_s7 = inlined_call_operand.vmem [shape: f32[16,32], index: 7, kind: output, shape index: {}]  }
   0x1   :  { %v31_v0 = vld [vmem:[%s4855_s1 + $0x18] sm:$0xff]  ;;  %v30_v1 = vld [vmem:[%s4855_s1 + $0x10] sm:$0xff]  ;;  %v26_v2 = vld [vmem:[%s4856_s0] sm:$0xff] }
   0x2   :  { %3547 = vmatprep.subr.mxu0 %v31_v0  ;;  %v29_v3 = vld [vmem:[%s4855_s1 + $0x8] sm:$0xff]  ;;  %3555 = vmatprep.mubr.msk.f32.mxu0 %vm39_vm0, %v26_v2  ;;  %v28_v4 = vld [vmem:[%s4855_s1] sm:$0xff]  ;;  %v4176_v6 = vld [vmem:[%s4857_s2 + $0x18] sm:$0xff] }
   0x3   :  { %3548 = vmatpush3.msra.mxu0 %v31_v0  ;;  %3566 = vmatprep.mubr.msk.f32.mxu1 %vm39_vm0, %v26_v2  ;;  %v4171_v5 = vld [vmem:[%s4856_s0 + $0x8] sm:$0xff]  ;;  %v4184_v8 = vld [vmem:[%s4857_s2 + $0x10] sm:$0xff]  ;;  %v4200_v10 = vld [vmem:[%s4857_s2] sm:$0xff] }
   0x4   :  { %3549 = vmatprep.subr.mxu0 %v30_v1  ;;  %v4193_v9 = vld [vmem:[%s4857_s2 + $0x8] sm:$0xff]  ;;  %v3287_v11 = vld [vmem:[%s4858_s3] ss:$0 sm:$0xff]  ;;  %v124_v29 = vld [vmem:[%s4859_s5 + $0x18] sm:$0xff] }
   0x5   :  { %3550 = vmatpush3.msra.mxu0 %v30_v1  ;;  %v123_v30 = vld [vmem:[%s4859_s5 + $0x10] sm:$0xff]  ;;  %3558 = vmatprep.subr.mxu1 %v124_v29  ;;  %v122_v31 = vld [vmem:[%s4859_s5 + $0x8] sm:$0xff]  ;;  %v121_v32 = vld [vmem:[%s4859_s5] sm:$0xff] }
   0x6   :  { %3551 = vmatprep.subr.mxu0 %v29_v3  ;;  %3559 = vmatpush3.msra.mxu1 %v124_v29  ;;  %v4245_v33 = vld [vmem:[%s4860_s4 + $0x18] sm:$0xff]  ;;  %v4253_v35 = vld [vmem:[%s4860_s4 + $0x10] sm:$0xff]  ;;  %v4261_v36 = vld [vmem:[%s4860_s4 + $0x8] sm:$0xff] }
   0x7   :  { %3552 = vmatpush3.msra.mxu0 %v29_v3  ;;  %3560 = vmatprep.subr.mxu1 %v123_v30  ;;  %v4270_v37 = vld [vmem:[%s4860_s4] sm:$0xff] }
   0x8   :  { %3553 = vmatprep.subr.mxu0 %v28_v4  ;;  %3561 = vmatpush3.msra.mxu1 %v123_v30  ;;  %v3290_v41 = vld [vmem:[%s4861_s6] ss:$0 sm:$0xff] }
   0x9   :  { %3554 = vmatpush3.msra.mxu0 %v28_v4  ;;  %3562 = vmatprep.subr.mxu1 %v122_v31 }
   0xa   :  { %3556 = vmatmul.mubr.msk.f32.vlgmr.msra.gmra.mxu0 %vm39_vm0, %v4171_v5  ;;  %3569 = vmatprep.subr.mxu0 %v4107_v7 }
   0xb   :  { %3570 = vmatpush3.msra.mxu0 %v4176_v6  ;;  %3577 = vmatprep.mubr.msk.f32.mxu0 %vm4108_vm1, %v4107_v7 }
   0xc   :  { %3571 = vmatprep.subr.mxu0 %v4107_v7  ;;  %3563 = vmatpush3.msra.mxu1 %v122_v31 }
   0xd   :  { %3572 = vmatpush3.msra.mxu0 %v4184_v8  ;;  %3564 = vmatprep.subr.mxu1 %v121_v32 }
   0xe   :  { %3573 = vmatprep.subr.mxu0 %v4107_v7  ;;  %3565 = vmatpush3.msra.mxu1 %v121_v32 }
   0xf   :  { %3574 = vmatpush3.msra.mxu0 %v4193_v9  ;;  %3580 = vmatprep.subr.mxu1 %v4107_v7 }
  0x10   :  { %3575 = vmatprep.subr.mxu0 %v4107_v7  ;;  %3567 = vmatmul.mubr.msk.f32.vlgmr.msra.gmra.mxu1 %vm39_vm0, %v4171_v5 }
  0x11   :  { %3576 = vmatpush3.msra.mxu0 %v4200_v10  ;;  %3581 = vmatpush3.msra.mxu1 %v4245_v33 }
  0x12   :  { %3578 = vmatmul.mubr.f32.vlgmr.msra.gmra.mxu0 %v4107_v7  ;;  %3591 = vmatprep.subr.mxu0 %v4107_v7 }
  0x13   :  { %3592 = vmatpush3.msra.mxu0 %v4176_v6  ;;  %3599 = vmatprep.mubr.msk.f32.mxu0 %vm4108_vm1, %v4107_v7 }
  0x14   :  { %3593 = vmatprep.subr.mxu0 %v4107_v7  ;;  %3582 = vmatprep.subr.mxu1 %v4107_v7 }
  0x15   :  { %3594 = vmatpush3.msra.mxu0 %v4184_v8  ;;  %3588 = vmatprep.mubr.msk.f32.mxu1 %vm4108_vm1, %v4107_v7 }
  0x16   :  { %3595 = vmatprep.subr.mxu0 %v4107_v7  ;;  %3583 = vmatpush3.msra.mxu1 %v4253_v35 }
  0x17   :  { %3596 = vmatpush3.msra.mxu0 %v4193_v9  ;;  %3584 = vmatprep.subr.mxu1 %v4107_v7 }
  0x18   :  { %3597 = vmatprep.subr.mxu0 %v4107_v7  ;;  %3585 = vmatpush3.msra.mxu1 %v4261_v36 }
  0x19   :  { %3598 = vmatpush3.msra.mxu0 %v4200_v10  ;;  %3586 = vmatprep.subr.mxu1 %v4107_v7 }
  0x1a   :  { %3613 = vmatprep.subr.mxu0 %v4107_v7  ;;  %3587 = vmatpush3.msra.mxu1 %v4270_v37 }
  0x1b   :  { %3602 = vmatprep.subr.mxu1 %v4107_v7 }
  0xca   :  { %v3557_v12 = vpop.f32.mrf.mxu0 }
  0xcb   :  { %v4220_v13 = vadd.f32 %v3557_v12, %v3287_v11 }
  0xcc   :  { %v112_v14 = vpop.f32.mrf.mxu0 }
  0xcd   :  { %v4222_v15 = vadd.f32 %v3287_v11, %v112_v14 }
  0xd0   :  { %v3568_v40 = vpop.f32.mrf.mxu1 }
  0xd1   :  { %v4280_v42 = vadd.f32 %v3568_v40, %v3290_v41 }
  0xd2   :  { %v284_v16 = vpop.f32.mrf.mxu0  ;;  %v198_v44 = vpop.f32.mrf.mxu1 }
  0xd3   :  { %v288_v17 = vadd.f32 %v284_v16, %v4222_v15  ;;  %v4304_v45 = vadd.f32 %v3290_v41, %v198_v44 }
  0xd4   :  { %v3579_v18 = vpop.f32.mrf.mxu0 }
  0xd5   :  { %3947 = vtanh.f32 %v288_v17  ;;  %v3293_v20 = vmul.f32 -1.442695, %v288_v17  ;;  %v497_v11 = vrot.slane %v4304_v45, 2 }
  0xd7   :  { %3949 = vpow2.f32 %v3293_v20 }
  0xe2   :  { %v3948_v19 = vpop.eup %3947 }
  0xe3   :  { %298 = vrot.lane.b32.xlu0 %v3948_v19, %s4109_s22 }
  0xe4   :  { %v3950_v21 = vpop.eup %3949 }
  0xe5   :  { %v292_v22 = vadd.f32 1.0, %v3950_v21 }
  0xe7   :  { %3951 = vrcp.f32 %v292_v22 }
  0xf4   :  { %v3952_v23 = vpop.eup %3951 }
  0xf5   :  { %v296_v26 = vmul.f32 0.0, %v3952_v23 }
 0x155   :  { %v299_v24 = vpop.permute.xlu0 %298 }
 0x156   :  { %v301_v25 = vmul.f32 %v3952_v23, %v299_v24 }
 0x158   :  { %303 = vrot.lane.b32.xlu0 %v301_v25, %s4110_s23 }
 0x1ca   :  { %v304_v27 = vpop.permute.xlu0 %303 }
 0x1cb   :  { %v4227_v28 = vadd.f32 %v304_v27, %v296_v26 }
 0x1cd   :  { %3953 = vtanh.f32 %v4227_v28  ;;  %v473_v61 = vrot.slane %v4227_v28, 6 }
 0x1da   :  { %v3954_v34 = vpop.eup %3953 }
 0x1db   :  { %309 = vrot.lane.b32.xlu1 %v3954_v34, %s4109_s22 }
 0x24d   :  { %v310_v38 = vpop.permute.xlu1 %309 }
 0x24e   :  { %v312_v39 = vmul.f32 %v3952_v23, %v310_v38 }
 0x250   :  { %314 = vrot.lane.b32.xlu1 %v312_v39, %s4110_s23 }
 0x2c2   :  { %v315_v43 = vpop.permute.xlu1 %314 }
 0x2c3   :  { %3589 = vmatmul.mubr.msk.f32.vlgmr.msra.gmra.mxu1 %vm39_vm0, %v315_v43  ;;  %3600 = vmatmul.mubr.msk.f32.vlgmr.msra.gmra.mxu0 %vm39_vm0, %v315_v43  ;;  %v678_v43 = vrot.slane %v4304_v45, 4 }
 0x2c4   :  { %3603 = vmatpush3.msra.mxu1 %v4245_v33  ;;  %3614 = vmatpush3.msra.mxu0 %v4176_v6 }
 0x2c5   :  { %3604 = vmatprep.subr.mxu1 %v4107_v7  ;;  %3615 = vmatprep.subr.mxu0 %v4107_v7 }
 0x2c6   :  { %3605 = vmatpush3.msra.mxu1 %v4253_v35  ;;  %3616 = vmatpush3.msra.mxu0 %v4184_v8 }
 0x2c7   :  { %3606 = vmatprep.subr.mxu1 %v4107_v7  ;;  %3617 = vmatprep.subr.mxu0 %v4107_v7 }
 0x2c8   :  { %3607 = vmatpush3.msra.mxu1 %v4261_v36  ;;  %3618 = vmatpush3.msra.mxu0 %v4193_v9 }
 0x2c9   :  { %3608 = vmatprep.subr.mxu1 %v4107_v7  ;;  %3619 = vmatprep.subr.mxu0 %v4107_v7 }
 0x2ca   :  { %3620 = vmatpush3.msra.mxu0 %v4200_v10  ;;  %3621 = vmatprep.mubr.msk.f32.mxu0 %vm4108_vm1, %v4107_v7 }
 0x2cb   :  { %3609 = vmatpush3.msra.mxu1 %v4270_v37  ;;  %3610 = vmatprep.mubr.msk.f32.mxu1 %vm4108_vm1, %v4107_v7 }
 0x2cc   :  { %3624 = vmatprep.subr.mxu1 %v4107_v7  ;;  %3635 = vmatprep.subr.mxu0 %v4107_v7 }
 0x383   :  { %v384_v46 = vpop.f32.mrf.mxu1  ;;  %v457_v47 = vpop.f32.mrf.mxu0 }
 0x384   :  { %v385_v48 = vadd.f32 %v384_v46, %v4304_v45  ;;  %v462_v49 = vrot.slane %v457_v47, 6 }
 0x385   :  { %v3590_v50 = vpop.f32.mrf.mxu1  ;;  %v3601_v51 = vpop.f32.mrf.mxu0 }
 0x386   :  { %3955 = vtanh.f32 %v385_v48  ;;  %v464_v52 = vadd.f32 %v462_v49, %v4222_v15 }
 0x388   :  { %3957 = vtanh.f32 %v464_v52  ;;  %v3296_v55 = vmul.f32 -1.442695, %v464_v52 }
 0x38a   :  { %3959 = vpow2.f32 %v3296_v55 }
 0x393   :  { %v3956_v53 = vpop.eup %3955 }
 0x394   :  { %390 = vst.msk [vmem:[%s4862_s7] sm:$0x3] %vm389_vm2, %v3956_v53 }
 0x395   :  { %v3958_v54 = vpop.eup %3957 }
 0x396   :  { %477 = vrot.lane.b32.xlu0 %v3958_v54, %s4109_s22 }
 0x397   :  { %v3960_v56 = vpop.eup %3959 }
 0x398   :  { %v468_v57 = vadd.f32 1.0, %v3960_v56 }
 0x39a   :  { %3961 = vrcp.f32 %v468_v57 }
 0x3a7   :  { %v3962_v58 = vpop.eup %3961 }
 0x3a8   :  { %v475_v62 = vmul.f32 %v3962_v58, %v473_v61 }
 0x408   :  { %v478_v59 = vpop.permute.xlu0 %477 }
 0x409   :  { %v480_v60 = vmul.f32 %v3962_v58, %v478_v59 }
 0x40b   :  { %482 = vrot.lane.b32.xlu1 %v480_v60, %s4110_s23 }
 0x47d   :  { %v483_v63 = vpop.permute.xlu1 %482 }
 0x47e   :  { %v485_v0 = vadd.f32 %v483_v63, %v475_v62 }
 0x480   :  { %3963 = vtanh.f32 %v485_v0  ;;  %v655_v29 = vrot.slane %v485_v0, 6 }
 0x48d   :  { %v3964_v1 = vpop.eup %3963 }
 0x48e   :  { %488 = vrot.lane.b32.xlu0 %v3964_v1, %s4109_s22 }
 0x500   :  { %v489_v2 = vpop.permute.xlu0 %488 }
 0x501   :  { %v491_v3 = vmul.f32 %v3962_v58, %v489_v2 }
 0x503   :  { %v493_v4 = vrot.slane %v491_v3, 2 }
 0x505   :  { %494 = vrot.lane.b32.xlu1 %v493_v4, %s4110_s23  ;;  %v859_v4 = vrot.slane %v4304_v45, 6 }
 0x577   :  { %v495_v5 = vpop.permute.xlu1 %494 }
 0x578   :  { %3611 = vmatmul.mubr.msk.f32.vlgmr.msra.gmra.mxu1 %vm39_vm0, %v495_v5  ;;  %3622 = vmatmul.mubr.msk.f32.vlgmr.msra.gmra.mxu0 %vm39_vm0, %v495_v5 }
 0x579   :  { %3625 = vmatpush3.msra.mxu1 %v4245_v33  ;;  %3636 = vmatpush3.msra.mxu0 %v4176_v6 }
 0x57a   :  { %3626 = vmatprep.subr.mxu1 %v4107_v7  ;;  %3637 = vmatprep.subr.mxu0 %v4107_v7 }
 0x57b   :  { %3627 = vmatpush3.msra.mxu1 %v4253_v35  ;;  %3638 = vmatpush3.msra.mxu0 %v4184_v8 }
 0x57c   :  { %3628 = vmatprep.subr.mxu1 %v4107_v7  ;;  %3639 = vmatprep.subr.mxu0 %v4107_v7 }
 0x57d   :  { %3629 = vmatpush3.msra.mxu1 %v4261_v36  ;;  %3640 = vmatpush3.msra.mxu0 %v4193_v9 }
 0x57e   :  { %3630 = vmatprep.subr.mxu1 %v4107_v7  ;;  %3641 = vmatprep.subr.mxu0 %v4107_v7 }
 0x57f   :  { %3642 = vmatpush3.msra.mxu0 %v4200_v10  ;;  %3643 = vmatprep.mubr.msk.f32.mxu0 %vm4108_vm1, %v4107_v7 }
 0x580   :  { %3631 = vmatpush3.msra.mxu1 %v4270_v37  ;;  %3632 = vmatprep.mubr.msk.f32.mxu1 %vm4108_vm1, %v4107_v7 }
 0x581   :  { %3646 = vmatprep.subr.mxu1 %v4107_v7  ;;  %3657 = vmatprep.subr.mxu0 %v4107_v7 }
 0x638   :  { %v567_v12 = vpop.f32.mrf.mxu1  ;;  %v639_v14 = vpop.f32.mrf.mxu0 }
 0x639   :  { %v568_v16 = vadd.f32 %v567_v12, %v497_v11  ;;  %v644_v17 = vrot.slane %v639_v14, 4 }
 0x63a   :  { %v3612_v18 = vpop.f32.mrf.mxu1  ;;  %v3623_v19 = vpop.f32.mrf.mxu0 }
 0x63b   :  { %3965 = vtanh.f32 %v568_v16  ;;  %v646_v20 = vadd.f32 %v644_v17, %v4222_v15 }
 0x63d   :  { %3967 = vtanh.f32 %v646_v20  ;;  %v3299_v23 = vmul.f32 -1.442695, %v646_v20 }
 0x63f   :  { %3969 = vpow2.f32 %v3299_v23 }
 0x648   :  { %v3966_v21 = vpop.eup %3965 }
 0x649   :  { %572 = vst.msk [vmem:[%s4862_s7 + $0x2] sm:$0x3] %vm389_vm2, %v3966_v21 }
 0x64a   :  { %v3968_v22 = vpop.eup %3967 }
 0x64b   :  { %659 = vrot.lane.b32.xlu0 %v3968_v22, %s4109_s22 }
 0x64c   :  { %v3970_v24 = vpop.eup %3969 }
 0x64d   :  { %v650_v25 = vadd.f32 1.0, %v3970_v24 }
 0x64f   :  { %3971 = vrcp.f32 %v650_v25 }
 0x65c   :  { %v3972_v26 = vpop.eup %3971 }
 0x65d   :  { %v657_v30 = vmul.f32 %v3972_v26, %v655_v29 }
 0x6bd   :  { %v660_v27 = vpop.permute.xlu0 %659 }
 0x6be   :  { %v662_v28 = vmul.f32 %v3972_v26, %v660_v27 }
 0x6c0   :  { %664 = vrot.lane.b32.xlu1 %v662_v28, %s4110_s23 }
 0x732   :  { %v665_v31 = vpop.permute.xlu1 %664 }
 0x733   :  { %v667_v32 = vadd.f32 %v665_v31, %v657_v30 }
 0x735   :  { %3973 = vtanh.f32 %v667_v32 }
 0x742   :  { %v3974_v34 = vpop.eup %3973 }
 0x743   :  { %670 = vrot.lane.b32.xlu0 %v3974_v34, %s4109_s22 }
 0x7b5   :  { %v671_v38 = vpop.permute.xlu0 %670 }
 0x7b6   :  { %v673_v39 = vmul.f32 %v3972_v26, %v671_v38 }
 0x7b8   :  { %v675_v40 = vrot.slane %v673_v39, 4 }
 0x7ba   :  { %676 = vrot.lane.b32.xlu1 %v675_v40, %s4110_s23 }
 0x82c   :  { %v677_v41 = vpop.permute.xlu1 %676 }
 0x82d   :  { %3633 = vmatmul.mubr.msk.f32.vlgmr.msra.gmra.mxu1 %vm39_vm0, %v677_v41  ;;  %3644 = vmatmul.mubr.msk.f32.vlgmr.msra.gmra.mxu0 %vm39_vm0, %v677_v41 }
 0x82e   :  { %3647 = vmatpush3.msra.mxu1 %v4245_v33  ;;  %3658 = vmatpush3.msra.mxu0 %v4176_v6 }
 0x82f   :  { %3648 = vmatprep.subr.mxu1 %v4107_v7  ;;  %3659 = vmatprep.subr.mxu0 %v4107_v7 }
 0x830   :  { %3649 = vmatpush3.msra.mxu1 %v4253_v35  ;;  %3660 = vmatpush3.msra.mxu0 %v4184_v8 }
 0x831   :  { %3650 = vmatprep.subr.mxu1 %v4107_v7  ;;  %3661 = vmatprep.subr.mxu0 %v4107_v7 }
 0x832   :  { %3651 = vmatpush3.msra.mxu1 %v4261_v36  ;;  %3662 = vmatpush3.msra.mxu0 %v4193_v9 }
 0x833   :  { %3652 = vmatprep.subr.mxu1 %v4107_v7  ;;  %3663 = vmatprep.subr.mxu0 %v4107_v7 }
 0x834   :  { %3664 = vmatpush3.msra.mxu0 %v4200_v10  ;;  %3665 = vmatprep.mubr.msk.f32.mxu0 %vm4108_vm1, %v4107_v7 }
 0x835   :  { %3653 = vmatpush3.msra.mxu1 %v4270_v37  ;;  %3654 = vmatprep.mubr.msk.f32.mxu1 %vm4108_vm1, %v4107_v7 }
 0x836   :  { %3668 = vmatprep.subr.mxu1 %v4107_v7  ;;  %3679 = vmatprep.subr.mxu0 %v4107_v7 }
 0x8ed   :  { %v748_v44 = vpop.f32.mrf.mxu1  ;;  %v820_v46 = vpop.f32.mrf.mxu0 }
 0x8ee   :  { %v749_v47 = vadd.f32 %v748_v44, %v678_v43  ;;  %v825_v48 = vrot.slane %v820_v46, 2 }
 0x8ef   :  { %v3634_v49 = vpop.f32.mrf.mxu1  ;;  %v3645_v50 = vpop.f32.mrf.mxu0 }
 0x8f0   :  { %3975 = vtanh.f32 %v749_v47  ;;  %v827_v51 = vadd.f32 %v825_v48, %v4222_v15  ;;  %v836_v15 = vrot.slane %v667_v32, 6 }
 0x8f2   :  { %3977 = vtanh.f32 %v827_v51  ;;  %v3302_v54 = vmul.f32 -1.442695, %v827_v51 }
 0x8f4   :  { %3979 = vpow2.f32 %v3302_v54 }
 0x8fd   :  { %v3976_v52 = vpop.eup %3975 }
 0x8fe   :  { %753 = vst.msk [vmem:[%s4862_s7 + $0x4] sm:$0x3] %vm389_vm2, %v3976_v52 }
 0x8ff   :  { %v3978_v53 = vpop.eup %3977 }
 0x900   :  { %840 = vrot.lane.b32.xlu0 %v3978_v53, %s4109_s22 }
 0x901   :  { %v3980_v55 = vpop.eup %3979 }
 0x902   :  { %v831_v56 = vadd.f32 1.0, %v3980_v55 }
 0x904   :  { %3981 = vrcp.f32 %v831_v56 }
 0x911   :  { %v3982_v57 = vpop.eup %3981 }
 0x912   :  { %v838_v60 = vmul.f32 %v3982_v57, %v836_v15 }
 0x972   :  { %v841_v58 = vpop.permute.xlu0 %840 }
 0x973   :  { %v843_v59 = vmul.f32 %v3982_v57, %v841_v58 }
 0x975   :  { %845 = vrot.lane.b32.xlu1 %v843_v59, %s4110_s23 }
 0x9e7   :  { %v846_v61 = vpop.permute.xlu1 %845 }
 0x9e8   :  { %v848_v62 = vadd.f32 %v846_v61, %v838_v60 }
 0x9ea   :  { %3983 = vtanh.f32 %v848_v62  ;;  %v1014_v25 = vrot.slane %v848_v62, 6 }
 0x9f7   :  { %v3984_v63 = vpop.eup %3983 }
 0x9f8   :  { %851 = vrot.lane.b32.xlu0 %v3984_v63, %s4109_s22 }
 0xa6a   :  { %v852_v0 = vpop.permute.xlu0 %851 }
 0xa6b   :  { %v854_v1 = vmul.f32 %v3982_v57, %v852_v0 }
 0xa6d   :  { %v856_v2 = vrot.slane %v854_v1, 6 }
 0xa6f   :  { %857 = vrot.lane.b32.xlu1 %v856_v2, %s4110_s23 }
 0xae1   :  { %v858_v3 = vpop.permute.xlu1 %857 }
 0xae2   :  { %3655 = vmatmul.mubr.msk.f32.vlgmr.msra.gmra.mxu1 %vm39_vm0, %v858_v3  ;;  %3666 = vmatmul.mubr.msk.f32.vlgmr.msra.gmra.mxu0 %vm39_vm0, %v858_v3 }
 0xae3   :  { %3669 = vmatpush3.msra.mxu1 %v4245_v33  ;;  %3680 = vmatpush3.msra.mxu0 %v4176_v6 }
 0xae4   :  { %3670 = vmatprep.subr.mxu1 %v4107_v7  ;;  %3681 = vmatprep.subr.mxu0 %v4107_v7 }
 0xae5   :  { %3671 = vmatpush3.msra.mxu1 %v4253_v35  ;;  %3682 = vmatpush3.msra.mxu0 %v4184_v8 }
 0xae6   :  { %3672 = vmatprep.subr.mxu1 %v4107_v7  ;;  %3683 = vmatprep.subr.mxu0 %v4107_v7 }
 0xae7   :  { %3673 = vmatpush3.msra.mxu1 %v4261_v36  ;;  %3684 = vmatpush3.msra.mxu0 %v4193_v9 }
 0xae8   :  { %3674 = vmatprep.subr.mxu1 %v4107_v7  ;;  %3685 = vmatprep.subr.mxu0 %v4107_v7 }
 0xae9   :  { %3686 = vmatpush3.msra.mxu0 %v4200_v10  ;;  %3687 = vmatprep.mubr.msk.f32.mxu0 %vm4108_vm1, %v4107_v7 }
 0xaea   :  { %3675 = vmatpush3.msra.mxu1 %v4270_v37  ;;  %3676 = vmatprep.mubr.msk.f32.mxu1 %vm4108_vm1, %v4107_v7 }
 0xaeb   :  { %3690 = vmatprep.subr.mxu1 %v4107_v7  ;;  %3701 = vmatprep.subr.mxu0 %v4107_v7 }
 0xba2   :  { %v929_v5 = vpop.f32.mrf.mxu1  ;;  %v1001_v11 = vpop.f32.mrf.mxu0 }
 0xba3   :  { %v930_v12 = vadd.f32 %v929_v5, %v859_v4  ;;  %v1005_v14 = vadd.f32 %v1001_v11, %v4220_v13 }
 0xba4   :  { %v3656_v16 = vpop.f32.mrf.mxu1  ;;  %v3667_v17 = vpop.f32.mrf.mxu0 }
 0xba5   :  { %3985 = vtanh.f32 %v930_v12  ;;  %v3305_v20 = vmul.f32 -1.442695, %v1005_v14 }
 0xba6   :  { %3987 = vtanh.f32 %v1005_v14 }
 0xba7   :  { %3989 = vpow2.f32 %v3305_v20 }
 0xbb2   :  { %v3986_v18 = vpop.eup %3985 }
 0xbb3   :  { %v3988_v19 = vpop.eup %3987  ;;  %934 = vst.msk [vmem:[%s4862_s7 + $0x6] sm:$0x3] %vm389_vm2, %v3986_v18 }
 0xbb4   :  { %1018 = vrot.lane.b32.xlu0 %v3988_v19, %s4109_s22  ;;  %v3990_v45 = vpop.eup %3989 }
 0xbb5   :  { %v1009_v21 = vadd.f32 1.0, %v3990_v45 }
 0xbb7   :  { %3991 = vrcp.f32 %v1009_v21 }
 0xbc4   :  { %v3992_v22 = vpop.eup %3991 }
 0xbc5   :  { %v1016_v26 = vmul.f32 %v3992_v22, %v1014_v25  ;;  %v1654_v25 = vld [vmem:[%s4862_s7] sm:$0xff] }
 0xc26   :  { %v1019_v23 = vpop.permute.xlu0 %1018 }
 0xc27   :  { %v1021_v24 = vmul.f32 %v3992_v22, %v1019_v23 }
 0xc29   :  { %1023 = vrot.lane.b32.xlu1 %v1021_v24, %s4110_s23 }
 0xc9b   :  { %v1024_v27 = vpop.permute.xlu1 %1023 }
 0xc9c   :  { %v1026_v28 = vadd.f32 %v1024_v27, %v1016_v26  ;;  %v1397_v26 = vrot.slane %v4280_v42, 4 }
 0xc9e   :  { %3993 = vtanh.f32 %v1026_v28  ;;  %v1192_v54 = vrot.slane %v1026_v28, 6 }
 0xcab   :  { %v3994_v29 = vpop.eup %3993 }
 0xcac   :  { %1029 = vrot.lane.b32.xlu0 %v3994_v29, %s4109_s22 }
 0xd1e   :  { %v1030_v30 = vpop.permute.xlu0 %1029 }
 0xd1f   :  { %v1032_v31 = vmul.f32 %v3992_v22, %v1030_v30 }
 0xd21   :  { %1034 = vrot.lane.b32.xlu1 %v1032_v31, %s4110_s23 }
 0xd93   :  { %v1035_v32 = vpop.permute.xlu1 %1034 }
 0xd94   :  { %3677 = vmatmul.mubr.msk.f32.vlgmr.msra.gmra.mxu1 %vm39_vm0, %v1035_v32  ;;  %3688 = vmatmul.mubr.msk.f32.vlgmr.msra.gmra.mxu0 %vm39_vm0, %v1035_v32 }
 0xd95   :  { %3691 = vmatpush3.msra.mxu1 %v4245_v33  ;;  %3702 = vmatpush3.msra.mxu0 %v4176_v6 }
 0xd96   :  { %3692 = vmatprep.subr.mxu1 %v4107_v7  ;;  %3703 = vmatprep.subr.mxu0 %v4107_v7 }
 0xd97   :  { %3693 = vmatpush3.msra.mxu1 %v4253_v35  ;;  %3704 = vmatpush3.msra.mxu0 %v4184_v8 }
 0xd98   :  { %3694 = vmatprep.subr.mxu1 %v4107_v7  ;;  %3705 = vmatprep.subr.mxu0 %v4107_v7 }
 0xd99   :  { %3695 = vmatpush3.msra.mxu1 %v4261_v36  ;;  %3706 = vmatpush3.msra.mxu0 %v4193_v9 }
 0xd9a   :  { %3696 = vmatprep.subr.mxu1 %v4107_v7  ;;  %3707 = vmatprep.subr.mxu0 %v4107_v7 }
 0xd9b   :  { %3708 = vmatpush3.msra.mxu0 %v4200_v10  ;;  %3709 = vmatprep.mubr.msk.f32.mxu0 %vm4108_vm1, %v4107_v7 }
 0xd9c   :  { %3697 = vmatpush3.msra.mxu1 %v4270_v37  ;;  %3698 = vmatprep.mubr.msk.f32.mxu1 %vm4108_vm1, %v4107_v7 }
 0xd9d   :  { %3712 = vmatprep.subr.mxu1 %v4107_v7  ;;  %3723 = vmatprep.subr.mxu0 %v4107_v7 }
 0xe54   :  { %v1104_v34 = vpop.f32.mrf.mxu1  ;;  %v1176_v38 = vpop.f32.mrf.mxu0 }
 0xe55   :  { %v1105_v39 = vadd.f32 %v1104_v34, %v4280_v42  ;;  %v1181_v40 = vrot.slane %v1176_v38, 6 }
 0xe56   :  { %v3678_v41 = vpop.f32.mrf.mxu1  ;;  %v3689_v43 = vpop.f32.mrf.mxu0 }
 0xe57   :  { %3995 = vtanh.f32 %v1105_v39  ;;  %v1183_v44 = vadd.f32 %v1181_v40, %v4220_v13 }
 0xe59   :  { %3997 = vtanh.f32 %v1183_v44  ;;  %v3308_v48 = vmul.f32 -1.442695, %v1183_v44 }
 0xe5b   :  { %3999 = vpow2.f32 %v3308_v48 }
 0xe64   :  { %v3996_v46 = vpop.eup %3995 }
 0xe65   :  { %1109 = vst.msk [vmem:[%s4862_s7 + $0x8] sm:$0x3] %vm389_vm2, %v3996_v46 }
 0xe66   :  { %v3998_v47 = vpop.eup %3997 }
 0xe67   :  { %1196 = vrot.lane.b32.xlu0 %v3998_v47, %s4109_s22 }
 0xe68   :  { %v4000_v49 = vpop.eup %3999 }
 0xe69   :  { %v1187_v50 = vadd.f32 1.0, %v4000_v49 }
 0xe6b   :  { %4001 = vrcp.f32 %v1187_v50 }
 0xe78   :  { %v4002_v51 = vpop.eup %4001 }
 0xe79   :  { %v1194_v55 = vmul.f32 %v4002_v51, %v1192_v54  ;;  %v3318_v54 = vld [vmem:[%s4855_s1 + $0x30] sm:$0xff] }
 0xed9   :  { %v1197_v52 = vpop.permute.xlu0 %1196 }
 0xeda   :  { %v1199_v53 = vmul.f32 %v4002_v51, %v1197_v52  ;;  %v3319_v52 = vld [vmem:[%s4855_s1 + $0x38] sm:$0xff] }
 0xedc   :  { %1201 = vrot.lane.b32.xlu1 %v1199_v53, %s4110_s23  ;;  %v3327_v53 = vld [vmem:[%s4859_s5 + $0x38] sm:$0xff] }
 0xf4e   :  { %v1202_v56 = vpop.permute.xlu1 %1201 }
 0xf4f   :  { %v1204_v57 = vadd.f32 %v1202_v56, %v1194_v55  ;;  %v3326_v55 = vld [vmem:[%s4859_s5 + $0x30] sm:$0xff]  ;;  %v3317_v56 = vld [vmem:[%s4855_s1 + $0x28] sm:$0xff] }
 0xf51   :  { %4003 = vtanh.f32 %v1204_v57  ;;  %v1374_v17 = vrot.slane %v1204_v57, 6  ;;  %v3325_v57 = vld [vmem:[%s4859_s5 + $0x28] sm:$0xff] }
 0xf5e   :  { %v4004_v58 = vpop.eup %4003 }
 0xf5f   :  { %1207 = vrot.lane.b32.xlu0 %v4004_v58, %s4109_s22  ;;  %v3316_v58 = vld [vmem:[%s4855_s1 + $0x20] sm:$0xff] }
 0xfd1   :  { %v1208_v59 = vpop.permute.xlu0 %1207 }
 0xfd2   :  { %v1210_v15 = vmul.f32 %v4002_v51, %v1208_v59  ;;  %v3324_v59 = vld [vmem:[%s4859_s5 + $0x20] sm:$0xff] }
 0xfd4   :  { %v1212_v60 = vrot.slane %v1210_v15, 2  ;;  %v1578_v15 = vrot.slane %v4280_v42, 6 }
 0xfd6   :  { %1213 = vrot.lane.b32.xlu1 %v1212_v60, %s4110_s23 }
0x1048   :  { %v1214_v61 = vpop.permute.xlu1 %1213 }
0x1049   :  { %3699 = vmatmul.mubr.msk.f32.vlgmr.msra.gmra.mxu1 %vm39_vm0, %v1214_v61  ;;  %3710 = vmatmul.mubr.msk.f32.vlgmr.msra.gmra.mxu0 %vm39_vm0, %v1214_v61 }
0x104a   :  { %3713 = vmatpush3.msra.mxu1 %v4245_v33  ;;  %3724 = vmatpush3.msra.mxu0 %v4176_v6  ;;  %v1216_v6 = vrot.slane %v4280_v42, 2  ;;  %v4547_v42 = vld [vmem:[%s4857_s2 + $0x30] sm:$0xff] }
0x104b   :  { %3714 = vmatprep.subr.mxu1 %v4107_v7  ;;  %3725 = vmatprep.subr.mxu0 %v4107_v7 }
0x104c   :  { %3715 = vmatpush3.msra.mxu1 %v4253_v35  ;;  %3726 = vmatpush3.msra.mxu0 %v4184_v8 }
0x104d   :  { %3716 = vmatprep.subr.mxu1 %v4107_v7  ;;  %3727 = vmatprep.subr.mxu0 %v4107_v7 }
0x104e   :  { %3717 = vmatpush3.msra.mxu1 %v4261_v36  ;;  %3728 = vmatpush3.msra.mxu0 %v4193_v9 }
0x104f   :  { %3718 = vmatprep.subr.mxu1 %v4107_v7  ;;  %3729 = vmatprep.subr.mxu0 %v4107_v7 }
0x1050   :  { %3730 = vmatpush3.msra.mxu0 %v4200_v10  ;;  %3731 = vmatprep.mubr.msk.f32.mxu0 %vm4108_vm1, %v4107_v7 }
0x1051   :  { %3719 = vmatpush3.msra.mxu1 %v4270_v37  ;;  %3720 = vmatprep.mubr.msk.f32.mxu1 %vm4108_vm1, %v4107_v7 }
0x1052   :  { %3734 = vmatprep.subr.mxu1 %v4107_v7  ;;  %3745 = vmatprep.subr.mxu0 %v3319_v52 }
0x1109   :  { %v1286_v8 = vpop.f32.mrf.mxu1  ;;  %v1358_v9 = vpop.f32.mrf.mxu0 }
0x110a   :  { %v1287_v62 = vadd.f32 %v1286_v8, %v1216_v6  ;;  %v1363_v63 = vrot.slane %v1358_v9, 4  ;;  %v4537_v9 = vld [vmem:[%s4857_s2 + $0x38] sm:$0xff] }
0x110b   :  { %v3700_v0 = vpop.f32.mrf.mxu1  ;;  %v3711_v1 = vpop.f32.mrf.mxu0 }
0x110c   :  { %4005 = vtanh.f32 %v1287_v62  ;;  %v1365_v10 = vadd.f32 %v1363_v63, %v4220_v13  ;;  %v4556_v63 = vld [vmem:[%s4857_s2 + $0x28] sm:$0xff]  ;;  %v4565_v0 = vld [vmem:[%s4857_s2 + $0x20] sm:$0xff] }
0x110d   :  { %v3321_v1 = vld [vmem:[%s4858_s3 + $0x1] ss:$0 sm:$0xff] }
0x110e   :  { %4007 = vtanh.f32 %v1365_v10  ;;  %v3311_v4 = vmul.f32 -1.442695, %v1365_v10  ;;  %v4588_v10 = vld [vmem:[%s4861_s6 + $0x1] ss:$0 sm:$0xff] }
0x1110   :  { %4009 = vpow2.f32 %v3311_v4 }
0x1119   :  { %v4006_v2 = vpop.eup %4005 }
0x111a   :  { %1291 = vst.msk [vmem:[%s4862_s7 + $0xa] sm:$0x3] %vm389_vm2, %v4006_v2 }
0x111b   :  { %v4008_v3 = vpop.eup %4007 }
0x111c   :  { %1378 = vrot.lane.b32.xlu0 %v4008_v3, %s4109_s22 }
0x111d   :  { %v4010_v5 = vpop.eup %4009 }
0x111e   :  { %v1369_v11 = vadd.f32 1.0, %v4010_v5 }
0x1120   :  { %4011 = vrcp.f32 %v1369_v11 }
0x112d   :  { %v4012_v12 = vpop.eup %4011 }
0x112e   :  { %v1376_v18 = vmul.f32 %v4012_v12, %v1374_v17 }
0x118e   :  { %v1379_v14 = vpop.permute.xlu0 %1378 }
0x118f   :  { %v1381_v16 = vmul.f32 %v4012_v12, %v1379_v14 }
0x1191   :  { %1383 = vrot.lane.b32.xlu1 %v1381_v16, %s4110_s23 }
0x1203   :  { %v1384_v19 = vpop.permute.xlu1 %1383 }
0x1204   :  { %v1386_v20 = vadd.f32 %v1384_v19, %v1376_v18 }
0x1206   :  { %4013 = vtanh.f32 %v1386_v20 }
0x1213   :  { %v4014_v45 = vpop.eup %4013 }
0x1214   :  { %1389 = vrot.lane.b32.xlu0 %v4014_v45, %s4109_s22 }
0x1286   :  { %v1390_v21 = vpop.permute.xlu0 %1389 }
0x1287   :  { %v1392_v22 = vmul.f32 %v4012_v12, %v1390_v21 }
0x1289   :  { %v1394_v23 = vrot.slane %v1392_v22, 4 }
0x128b   :  { %1395 = vrot.lane.b32.xlu1 %v1394_v23, %s4110_s23 }
0x12fd   :  { %v1396_v24 = vpop.permute.xlu1 %1395 }
0x12fe   :  { %3721 = vmatmul.mubr.msk.f32.vlgmr.msra.gmra.mxu1 %vm39_vm0, %v1396_v24  ;;  %3732 = vmatmul.mubr.msk.f32.vlgmr.msra.gmra.mxu0 %vm39_vm0, %v1396_v24 }
0x12ff   :  { %3753 = vmatprep.mubr.msk.f32.mxu0 %vm39_vm0, %v1654_v25  ;;  %3735 = vmatpush3.msra.mxu1 %v4245_v33 }
0x1300   :  { %3736 = vmatprep.subr.mxu1 %v4107_v7  ;;  %3742 = vmatprep.mubr.msk.f32.mxu1 %vm4108_vm1, %v4107_v7 }
0x1301   :  { %3737 = vmatpush3.msra.mxu1 %v4253_v35  ;;  %3746 = vmatpush3.msra.mxu0 %v3319_v52 }
0x1302   :  { %3738 = vmatprep.subr.mxu1 %v4107_v7  ;;  %3747 = vmatprep.subr.mxu0 %v3318_v54 }
0x1303   :  { %3739 = vmatpush3.msra.mxu1 %v4261_v36  ;;  %3748 = vmatpush3.msra.mxu0 %v3318_v54 }
0x1304   :  { %3740 = vmatprep.subr.mxu1 %v4107_v7  ;;  %3749 = vmatprep.subr.mxu0 %v3317_v56 }
0x1305   :  { %3741 = vmatpush3.msra.mxu1 %v4270_v37  ;;  %3750 = vmatpush3.msra.mxu0 %v3317_v56 }
0x1306   :  { %3756 = vmatprep.subr.mxu1 %v3327_v53  ;;  %3751 = vmatprep.subr.mxu0 %v3316_v58 }
0x1307   :  { %3752 = vmatpush3.msra.mxu0 %v3316_v58 }
0x1308   :  { %3767 = vmatprep.subr.mxu0 %v4107_v7 }
0x13be   :  { %v1467_v27 = vpop.f32.mrf.mxu1  ;;  %v1539_v28 = vpop.f32.mrf.mxu0 }
0x13bf   :  { %v1468_v33 = vadd.f32 %v1467_v27, %v1397_v26  ;;  %v1544_v29 = vrot.slane %v1539_v28, 2  ;;  %v4606_v27 = vld [vmem:[%s4860_s4 + $0x38] sm:$0xff]  ;;  %v4611_v28 = vld [vmem:[%s4860_s4 + $0x30] sm:$0xff] }
0x13c0   :  { %v3722_v30 = vpop.f32.mrf.mxu1  ;;  %v3733_v31 = vpop.f32.mrf.mxu0 }
0x13c1   :  { %4015 = vtanh.f32 %v1468_v33  ;;  %v1546_v32 = vadd.f32 %v1544_v29, %v4220_v13  ;;  %v1555_v13 = vrot.slane %v1386_v20, 6  ;;  %v4618_v33 = vld [vmem:[%s4860_s4 + $0x28] sm:$0xff]  ;;  %v4625_v29 = vld [vmem:[%s4860_s4 + $0x20] sm:$0xff] }
0x13c3   :  { %4017 = vtanh.f32 %v1546_v32  ;;  %v3314_v37 = vmul.f32 -1.442695, %v1546_v32 }
0x13c5   :  { %4019 = vpow2.f32 %v3314_v37 }
0x13ce   :  { %v4016_v35 = vpop.eup %4015 }
0x13cf   :  { %1472 = vst.msk [vmem:[%s4862_s7 + $0xc] sm:$0x3] %vm389_vm2, %v4016_v35 }
0x13d0   :  { %v4018_v36 = vpop.eup %4017 }
0x13d1   :  { %1559 = vrot.lane.b32.xlu0 %v4018_v36, %s4109_s22 }
0x13d2   :  { %v4020_v34 = vpop.eup %4019 }
0x13d3   :  { %v1550_v38 = vadd.f32 1.0, %v4020_v34 }
0x13d5   :  { %4021 = vrcp.f32 %v1550_v38 }
0x13e2   :  { %v4022_v39 = vpop.eup %4021 }
0x13e3   :  { %v1557_v43 = vmul.f32 %v4022_v39, %v1555_v13 }
0x1443   :  { %v1560_v40 = vpop.permute.xlu0 %1559 }
0x1444   :  { %v1562_v41 = vmul.f32 %v4022_v39, %v1560_v40 }
0x1446   :  { %1564 = vrot.lane.b32.xlu1 %v1562_v41, %s4110_s23 }
0x14b8   :  { %v1565_v44 = vpop.permute.xlu1 %1564 }
0x14b9   :  { %v1567_v46 = vadd.f32 %v1565_v44, %v1557_v43 }
0x14bb   :  { %4023 = vtanh.f32 %v1567_v46 }
0x14c8   :  { %v4024_v47 = vpop.eup %4023 }
0x14c9   :  { %1570 = vrot.lane.b32.xlu0 %v4024_v47, %s4109_s22 }
0x153b   :  { %v1571_v48 = vpop.permute.xlu0 %1570 }
0x153c   :  { %v1573_v49 = vmul.f32 %v4022_v39, %v1571_v48 }
0x153e   :  { %v1575_v50 = vrot.slane %v1573_v49, 6 }
0x1540   :  { %1576 = vrot.lane.b32.xlu1 %v1575_v50, %s4110_s23 }
0x15b2   :  { %v1577_v51 = vpop.permute.xlu1 %1576 }
0x15b3   :  { %3743 = vmatmul.mubr.msk.f32.vlgmr.msra.gmra.mxu1 %vm39_vm0, %v1577_v51 }
0x15b4   :  { %3764 = vmatprep.mubr.msk.f32.mxu1 %vm39_vm0, %v1654_v25  ;;  %3757 = vmatpush3.msra.mxu1 %v3327_v53 }
0x15b5   :  { %3758 = vmatprep.subr.mxu1 %v3326_v55 }
0x15b6   :  { %3759 = vmatpush3.msra.mxu1 %v3326_v55 }
0x15b7   :  { %3760 = vmatprep.subr.mxu1 %v3325_v57 }
0x15b8   :  { %3761 = vmatpush3.msra.mxu1 %v3325_v57 }
0x15b9   :  { %3762 = vmatprep.subr.mxu1 %v3324_v59 }
0x15ba   :  { %3763 = vmatpush3.msra.mxu1 %v3324_v59 }
0x15bb   :  { %3778 = vmatprep.subr.mxu1 %v4107_v7 }
0x1673   :  { %v1648_v60 = vpop.f32.mrf.mxu1 }
0x1674   :  { %v1649_v61 = vadd.f32 %v1648_v60, %v1578_v15 }
0x1675   :  { %v3744_v6 = vpop.f32.mrf.mxu1 }
0x1676   :  { %4025 = vtanh.f32 %v1649_v61 }
0x1683   :  { %v4026_v8 = vpop.eup %4025 }
0x1684   :  { %1653 = vst.msk [vmem:[%s4862_s7 + $0xe] sm:$0x3] %vm389_vm2, %v4026_v8 }
0x168b   :  { %v1655_v62 = vld [vmem:[%s4862_s7 + $0x8] sm:$0xff] }
0x168c   :  { %3754 = vmatmul.mubr.msk.f32.vlgmr.msra.gmra.mxu0 %vm39_vm0, %v1655_v62  ;;  %3765 = vmatmul.mubr.msk.f32.vlgmr.msra.gmra.mxu1 %vm39_vm0, %v1655_v62 }
0x168d   :  { %3768 = vmatpush3.msra.mxu0 %v4537_v9  ;;  %3775 = vmatprep.mubr.msk.f32.mxu0 %vm4108_vm1, %v4107_v7 }
0x168e   :  { %3769 = vmatprep.subr.mxu0 %v4107_v7  ;;  %3786 = vmatprep.mubr.msk.f32.mxu1 %vm4108_vm1, %v4107_v7 }
0x168f   :  { %3770 = vmatpush3.msra.mxu0 %v4547_v42  ;;  %3779 = vmatpush3.msra.mxu1 %v4606_v27 }
0x1690   :  { %3771 = vmatprep.subr.mxu0 %v4107_v7  ;;  %3780 = vmatprep.subr.mxu1 %v4107_v7 }
0x1691   :  { %3772 = vmatpush3.msra.mxu0 %v4556_v63  ;;  %3781 = vmatpush3.msra.mxu1 %v4611_v28 }
0x1692   :  { %3773 = vmatprep.subr.mxu0 %v4107_v7  ;;  %3782 = vmatprep.subr.mxu1 %v4107_v7 }
0x1693   :  { %3774 = vmatpush3.msra.mxu0 %v4565_v0  ;;  %3783 = vmatpush3.msra.mxu1 %v4618_v33 }
0x1694   :  { %3776 = vmatmul.mubr.f32.vlgmr.msra.gmra.mxu0 %v4107_v7  ;;  %3789 = vmatprep.subr.mxu0 %v4107_v7 }
0x1695   :  { %3790 = vmatpush3.msra.mxu0 %v4537_v9  ;;  %3797 = vmatprep.mubr.msk.f32.mxu0 %vm4108_vm1, %v4107_v7 }
0x1696   :  { %3791 = vmatprep.subr.mxu0 %v4107_v7  ;;  %3784 = vmatprep.subr.mxu1 %v4107_v7 }
0x1697   :  { %3792 = vmatpush3.msra.mxu0 %v4547_v42  ;;  %3785 = vmatpush3.msra.mxu1 %v4625_v29 }
0x1698   :  { %3793 = vmatprep.subr.mxu0 %v4107_v7  ;;  %3800 = vmatprep.subr.mxu1 %v4107_v7 }
0x1699   :  { %3794 = vmatpush3.msra.mxu0 %v4556_v63 }
0x169a   :  { %3795 = vmatprep.subr.mxu0 %v4107_v7 }
0x169b   :  { %3796 = vmatpush3.msra.mxu0 %v4565_v0 }
0x169c   :  { %3811 = vmatprep.subr.mxu0 %v4107_v7 }
0x174c   :  { %v3755_v2 = vpop.f32.mrf.mxu0  ;;  %v3766_v3 = vpop.f32.mrf.mxu1 }
0x174d   :  { %v4590_v4 = vadd.f32 %v3755_v2, %v3321_v1  ;;  %v4593_v5 = vadd.f32 %v3766_v3, %v4588_v10 }
0x174e   :  { %v1741_v11 = vpop.f32.mrf.mxu0  ;;  %v1829_v36 = vpop.f32.mrf.mxu1 }
0x174f   :  { %v4595_v12 = vadd.f32 %v3321_v1, %v1741_v11  ;;  %v4656_v37 = vadd.f32 %v4588_v10, %v1829_v36 }
0x1751   :  { %v2126_v61 = vrot.slane %v4656_v37, 2 }
0x1754   :  { %v1914_v14 = vpop.f32.mrf.mxu0 }
0x1755   :  { %v1918_v16 = vadd.f32 %v1914_v14, %v4595_v12 }
0x1756   :  { %v3777_v17 = vpop.f32.mrf.mxu0 }
0x1757   :  { %4027 = vtanh.f32 %v1918_v16  ;;  %v3340_v19 = vmul.f32 -1.442695, %v1918_v16 }
0x1759   :  { %4029 = vpow2.f32 %v3340_v19 }
0x1764   :  { %v4028_v18 = vpop.eup %4027 }
0x1765   :  { %1928 = vrot.lane.b32.xlu0 %v4028_v18, %s4109_s22 }
0x1766   :  { %v4030_v20 = vpop.eup %4029 }
0x1767   :  { %v1922_v45 = vadd.f32 1.0, %v4030_v20 }
0x1769   :  { %4031 = vrcp.f32 %v1922_v45 }
0x1776   :  { %v4032_v21 = vpop.eup %4031 }
0x1777   :  { %v1926_v24 = vmul.f32 0.0, %v4032_v21 }
0x17d7   :  { %v1929_v22 = vpop.permute.xlu0 %1928 }
0x17d8   :  { %v1931_v23 = vmul.f32 %v4032_v21, %v1929_v22 }
0x17da   :  { %1933 = vrot.lane.b32.xlu1 %v1931_v23, %s4110_s23 }
0x184c   :  { %v1934_v25 = vpop.permute.xlu1 %1933 }
0x184d   :  { %v4600_v26 = vadd.f32 %v1934_v25, %v1926_v24 }
0x184f   :  { %4033 = vtanh.f32 %v4600_v26  ;;  %v2102_v53 = vrot.slane %v4600_v26, 6 }
0x185c   :  { %v4034_v30 = vpop.eup %4033 }
0x185d   :  { %1939 = vrot.lane.b32.xlu0 %v4034_v30, %s4109_s22 }
0x18cf   :  { %v1940_v31 = vpop.permute.xlu0 %1939 }
0x18d0   :  { %v1942_v32 = vmul.f32 %v4032_v21, %v1940_v31 }
0x18d2   :  { %1944 = vrot.lane.b32.xlu1 %v1942_v32, %s4110_s23 }
0x1944   :  { %v1945_v35 = vpop.permute.xlu1 %1944 }
0x1945   :  { %3787 = vmatmul.mubr.msk.f32.vlgmr.msra.gmra.mxu1 %vm39_vm0, %v1945_v35  ;;  %3798 = vmatmul.mubr.msk.f32.vlgmr.msra.gmra.mxu0 %vm39_vm0, %v1945_v35  ;;  %v2307_v35 = vrot.slane %v4656_v37, 4 }
0x1946   :  { %3801 = vmatpush3.msra.mxu1 %v4606_v27  ;;  %3812 = vmatpush3.msra.mxu0 %v4537_v9 }
0x1947   :  { %3802 = vmatprep.subr.mxu1 %v4107_v7  ;;  %3813 = vmatprep.subr.mxu0 %v4107_v7 }
0x1948   :  { %3803 = vmatpush3.msra.mxu1 %v4611_v28  ;;  %3814 = vmatpush3.msra.mxu0 %v4547_v42 }
0x1949   :  { %3804 = vmatprep.subr.mxu1 %v4107_v7  ;;  %3815 = vmatprep.subr.mxu0 %v4107_v7 }
0x194a   :  { %3805 = vmatpush3.msra.mxu1 %v4618_v33  ;;  %3816 = vmatpush3.msra.mxu0 %v4556_v63 }
0x194b   :  { %3806 = vmatprep.subr.mxu1 %v4107_v7  ;;  %3817 = vmatprep.subr.mxu0 %v4107_v7 }
0x194c   :  { %3818 = vmatpush3.msra.mxu0 %v4565_v0  ;;  %3819 = vmatprep.mubr.msk.f32.mxu0 %vm4108_vm1, %v4107_v7 }
0x194d   :  { %3807 = vmatpush3.msra.mxu1 %v4625_v29  ;;  %3808 = vmatprep.mubr.msk.f32.mxu1 %vm4108_vm1, %v4107_v7 }
0x194e   :  { %3822 = vmatprep.subr.mxu1 %v4107_v7  ;;  %3833 = vmatprep.subr.mxu0 %v4107_v7 }
0x1a05   :  { %v2014_v34 = vpop.f32.mrf.mxu1  ;;  %v2086_v38 = vpop.f32.mrf.mxu0 }
0x1a06   :  { %v2015_v39 = vadd.f32 %v2014_v34, %v4656_v37  ;;  %v2091_v40 = vrot.slane %v2086_v38, 6 }
0x1a07   :  { %v3788_v41 = vpop.f32.mrf.mxu1  ;;  %v3799_v13 = vpop.f32.mrf.mxu0 }
0x1a08   :  { %4035 = vtanh.f32 %v2015_v39  ;;  %v2093_v43 = vadd.f32 %v2091_v40, %v4595_v12 }
0x1a0a   :  { %4037 = vtanh.f32 %v2093_v43  ;;  %v3343_v47 = vmul.f32 -1.442695, %v2093_v43 }
0x1a0c   :  { %4039 = vpow2.f32 %v3343_v47 }
0x1a15   :  { %v4036_v44 = vpop.eup %4035 }
0x1a16   :  { %2019 = vst.msk [vmem:[%s4862_s7] sm:$0x3] %vm389_vm2, %v4036_v44 }
0x1a17   :  { %v4038_v46 = vpop.eup %4037 }
0x1a18   :  { %2106 = vrot.lane.b32.xlu0 %v4038_v46, %s4109_s22 }
0x1a19   :  { %v4040_v48 = vpop.eup %4039 }
0x1a1a   :  { %v2097_v49 = vadd.f32 1.0, %v4040_v48 }
0x1a1c   :  { %4041 = vrcp.f32 %v2097_v49 }
0x1a29   :  { %v4042_v50 = vpop.eup %4041 }
0x1a2a   :  { %v2104_v54 = vmul.f32 %v4042_v50, %v2102_v53 }
0x1a8a   :  { %v2107_v51 = vpop.permute.xlu0 %2106 }
0x1a8b   :  { %v2109_v52 = vmul.f32 %v4042_v50, %v2107_v51 }
0x1a8d   :  { %2111 = vrot.lane.b32.xlu1 %v2109_v52, %s4110_s23 }
0x1aff   :  { %v2112_v55 = vpop.permute.xlu1 %2111 }
0x1b00   :  { %v2114_v56 = vadd.f32 %v2112_v55, %v2104_v54 }
0x1b02   :  { %4043 = vtanh.f32 %v2114_v56  ;;  %v2284_v21 = vrot.slane %v2114_v56, 6 }
0x1b0f   :  { %v4044_v57 = vpop.eup %4043 }
0x1b10   :  { %2117 = vrot.lane.b32.xlu0 %v4044_v57, %s4109_s22 }
0x1b82   :  { %v2118_v58 = vpop.permute.xlu0 %2117 }
0x1b83   :  { %v2120_v59 = vmul.f32 %v4042_v50, %v2118_v58 }
0x1b85   :  { %v2122_v15 = vrot.slane %v2120_v59, 2 }
0x1b87   :  { %2123 = vrot.lane.b32.xlu1 %v2122_v15, %s4110_s23  ;;  %v2488_v15 = vrot.slane %v4656_v37, 6 }
0x1bf9   :  { %v2124_v60 = vpop.permute.xlu1 %2123 }
0x1bfa   :  { %3809 = vmatmul.mubr.msk.f32.vlgmr.msra.gmra.mxu1 %vm39_vm0, %v2124_v60  ;;  %3820 = vmatmul.mubr.msk.f32.vlgmr.msra.gmra.mxu0 %vm39_vm0, %v2124_v60 }
0x1bfb   :  { %3823 = vmatpush3.msra.mxu1 %v4606_v27  ;;  %3834 = vmatpush3.msra.mxu0 %v4537_v9 }
0x1bfc   :  { %3824 = vmatprep.subr.mxu1 %v4107_v7  ;;  %3835 = vmatprep.subr.mxu0 %v4107_v7 }
0x1bfd   :  { %3825 = vmatpush3.msra.mxu1 %v4611_v28  ;;  %3836 = vmatpush3.msra.mxu0 %v4547_v42 }
0x1bfe   :  { %3826 = vmatprep.subr.mxu1 %v4107_v7  ;;  %3837 = vmatprep.subr.mxu0 %v4107_v7 }
0x1bff   :  { %3827 = vmatpush3.msra.mxu1 %v4618_v33  ;;  %3838 = vmatpush3.msra.mxu0 %v4556_v63 }
0x1c00   :  { %3828 = vmatprep.subr.mxu1 %v4107_v7  ;;  %3839 = vmatprep.subr.mxu0 %v4107_v7 }
0x1c01   :  { %3840 = vmatpush3.msra.mxu0 %v4565_v0  ;;  %3841 = vmatprep.mubr.msk.f32.mxu0 %vm4108_vm1, %v4107_v7 }
0x1c02   :  { %3829 = vmatpush3.msra.mxu1 %v4625_v29  ;;  %3830 = vmatprep.mubr.msk.f32.mxu1 %vm4108_vm1, %v4107_v7 }
0x1c03   :  { %3844 = vmatprep.subr.mxu1 %v4107_v7  ;;  %3855 = vmatprep.subr.mxu0 %v4107_v7 }
0x1cba   :  { %v2196_v6 = vpop.f32.mrf.mxu1  ;;  %v2268_v8 = vpop.f32.mrf.mxu0 }
0x1cbb   :  { %v2197_v62 = vadd.f32 %v2196_v6, %v2126_v61  ;;  %v2273_v1 = vrot.slane %v2268_v8, 4 }
0x1cbc   :  { %v3810_v10 = vpop.f32.mrf.mxu1  ;;  %v3821_v2 = vpop.f32.mrf.mxu0 }
0x1cbd   :  { %4045 = vtanh.f32 %v2197_v62  ;;  %v2275_v3 = vadd.f32 %v2273_v1, %v4595_v12 }
0x1cbf   :  { %4047 = vtanh.f32 %v2275_v3  ;;  %v3346_v16 = vmul.f32 -1.442695, %v2275_v3 }
0x1cc1   :  { %4049 = vpow2.f32 %v3346_v16 }
0x1cca   :  { %v4046_v11 = vpop.eup %4045 }
0x1ccb   :  { %2201 = vst.msk [vmem:[%s4862_s7 + $0x2] sm:$0x3] %vm389_vm2, %v4046_v11 }
0x1ccc   :  { %v4048_v14 = vpop.eup %4047 }
0x1ccd   :  { %2288 = vrot.lane.b32.xlu0 %v4048_v14, %s4109_s22 }
0x1cce   :  { %v4050_v17 = vpop.eup %4049 }
0x1ccf   :  { %v2279_v18 = vadd.f32 1.0, %v4050_v17 }
0x1cd1   :  { %4051 = vrcp.f32 %v2279_v18 }
0x1cde   :  { %v4052_v19 = vpop.eup %4051 }
0x1cdf   :  { %v2286_v22 = vmul.f32 %v4052_v19, %v2284_v21 }
0x1d3f   :  { %v2289_v20 = vpop.permute.xlu0 %2288 }
0x1d40   :  { %v2291_v45 = vmul.f32 %v4052_v19, %v2289_v20 }
0x1d42   :  { %2293 = vrot.lane.b32.xlu1 %v2291_v45, %s4110_s23 }
0x1db4   :  { %v2294_v23 = vpop.permute.xlu1 %2293 }
0x1db5   :  { %v2296_v24 = vadd.f32 %v2294_v23, %v2286_v22 }
0x1db7   :  { %4053 = vtanh.f32 %v2296_v24 }
0x1dc4   :  { %v4054_v25 = vpop.eup %4053 }
0x1dc5   :  { %2299 = vrot.lane.b32.xlu0 %v4054_v25, %s4109_s22 }
0x1e37   :  { %v2300_v26 = vpop.permute.xlu0 %2299 }
0x1e38   :  { %v2302_v30 = vmul.f32 %v4052_v19, %v2300_v26 }
0x1e3a   :  { %v2304_v31 = vrot.slane %v2302_v30, 4 }
0x1e3c   :  { %2305 = vrot.lane.b32.xlu1 %v2304_v31, %s4110_s23 }
0x1eae   :  { %v2306_v32 = vpop.permute.xlu1 %2305 }
0x1eaf   :  { %3831 = vmatmul.mubr.msk.f32.vlgmr.msra.gmra.mxu1 %vm39_vm0, %v2306_v32  ;;  %3842 = vmatmul.mubr.msk.f32.vlgmr.msra.gmra.mxu0 %vm39_vm0, %v2306_v32 }
0x1eb0   :  { %3845 = vmatpush3.msra.mxu1 %v4606_v27  ;;  %3856 = vmatpush3.msra.mxu0 %v4537_v9 }
0x1eb1   :  { %3846 = vmatprep.subr.mxu1 %v4107_v7  ;;  %3857 = vmatprep.subr.mxu0 %v4107_v7 }
0x1eb2   :  { %3847 = vmatpush3.msra.mxu1 %v4611_v28  ;;  %3858 = vmatpush3.msra.mxu0 %v4547_v42 }
0x1eb3   :  { %3848 = vmatprep.subr.mxu1 %v4107_v7  ;;  %3859 = vmatprep.subr.mxu0 %v4107_v7 }
0x1eb4   :  { %3849 = vmatpush3.msra.mxu1 %v4618_v33  ;;  %3860 = vmatpush3.msra.mxu0 %v4556_v63 }
0x1eb5   :  { %3850 = vmatprep.subr.mxu1 %v4107_v7  ;;  %3861 = vmatprep.subr.mxu0 %v4107_v7 }
0x1eb6   :  { %3862 = vmatpush3.msra.mxu0 %v4565_v0  ;;  %3863 = vmatprep.mubr.msk.f32.mxu0 %vm4108_vm1, %v4107_v7 }
0x1eb7   :  { %3851 = vmatpush3.msra.mxu1 %v4625_v29  ;;  %3852 = vmatprep.mubr.msk.f32.mxu1 %vm4108_vm1, %v4107_v7 }
0x1eb8   :  { %3866 = vmatprep.subr.mxu1 %v4107_v7  ;;  %3877 = vmatprep.subr.mxu0 %v4107_v7 }
0x1f6f   :  { %v2377_v36 = vpop.f32.mrf.mxu1  ;;  %v2449_v34 = vpop.f32.mrf.mxu0 }
0x1f70   :  { %v2378_v38 = vadd.f32 %v2377_v36, %v2307_v35  ;;  %v2454_v39 = vrot.slane %v2449_v34, 2 }
0x1f71   :  { %v3832_v40 = vpop.f32.mrf.mxu1  ;;  %v3843_v41 = vpop.f32.mrf.mxu0 }
0x1f72   :  { %4055 = vtanh.f32 %v2378_v38  ;;  %v2456_v13 = vadd.f32 %v2454_v39, %v4595_v12  ;;  %v2465_v12 = vrot.slane %v2296_v24, 6 }
0x1f74   :  { %4057 = vtanh.f32 %v2456_v13  ;;  %v3349_v46 = vmul.f32 -1.442695, %v2456_v13 }
0x1f76   :  { %4059 = vpow2.f32 %v3349_v46 }
0x1f7f   :  { %v4056_v43 = vpop.eup %4055 }
0x1f80   :  { %2382 = vst.msk [vmem:[%s4862_s7 + $0x4] sm:$0x3] %vm389_vm2, %v4056_v43 }
0x1f81   :  { %v4058_v44 = vpop.eup %4057 }
0x1f82   :  { %2469 = vrot.lane.b32.xlu0 %v4058_v44, %s4109_s22 }
0x1f83   :  { %v4060_v47 = vpop.eup %4059 }
0x1f84   :  { %v2460_v48 = vadd.f32 1.0, %v4060_v47 }
0x1f86   :  { %4061 = vrcp.f32 %v2460_v48 }
0x1f93   :  { %v4062_v49 = vpop.eup %4061 }
0x1f94   :  { %v2467_v52 = vmul.f32 %v4062_v49, %v2465_v12 }
0x1ff4   :  { %v2470_v50 = vpop.permute.xlu0 %2469 }
0x1ff5   :  { %v2472_v51 = vmul.f32 %v4062_v49, %v2470_v50 }
0x1ff7   :  { %2474 = vrot.lane.b32.xlu1 %v2472_v51, %s4110_s23 }
0x2069   :  { %v2475_v53 = vpop.permute.xlu1 %2474 }
0x206a   :  { %v2477_v54 = vadd.f32 %v2475_v53, %v2467_v52 }
0x206c   :  { %4063 = vtanh.f32 %v2477_v54  ;;  %v2643_v18 = vrot.slane %v2477_v54, 6 }
0x2079   :  { %v4064_v55 = vpop.eup %4063 }
0x207a   :  { %2480 = vrot.lane.b32.xlu0 %v4064_v55, %s4109_s22 }
0x20ec   :  { %v2481_v56 = vpop.permute.xlu0 %2480 }
0x20ed   :  { %v2483_v57 = vmul.f32 %v4062_v49, %v2481_v56 }
0x20ef   :  { %v2485_v58 = vrot.slane %v2483_v57, 6 }
0x20f1   :  { %2486 = vrot.lane.b32.xlu1 %v2485_v58, %s4110_s23 }
0x2163   :  { %v2487_v59 = vpop.permute.xlu1 %2486 }
0x2164   :  { %3853 = vmatmul.mubr.msk.f32.vlgmr.msra.gmra.mxu1 %vm39_vm0, %v2487_v59  ;;  %3864 = vmatmul.mubr.msk.f32.vlgmr.msra.gmra.mxu0 %vm39_vm0, %v2487_v59 }
0x2165   :  { %3867 = vmatpush3.msra.mxu1 %v4606_v27  ;;  %3878 = vmatpush3.msra.mxu0 %v4537_v9 }
0x2166   :  { %3868 = vmatprep.subr.mxu1 %v4107_v7  ;;  %3879 = vmatprep.subr.mxu0 %v4107_v7 }
0x2167   :  { %3869 = vmatpush3.msra.mxu1 %v4611_v28  ;;  %3880 = vmatpush3.msra.mxu0 %v4547_v42 }
0x2168   :  { %3870 = vmatprep.subr.mxu1 %v4107_v7  ;;  %3881 = vmatprep.subr.mxu0 %v4107_v7 }
0x2169   :  { %3871 = vmatpush3.msra.mxu1 %v4618_v33  ;;  %3882 = vmatpush3.msra.mxu0 %v4556_v63 }
0x216a   :  { %3872 = vmatprep.subr.mxu1 %v4107_v7  ;;  %3883 = vmatprep.subr.mxu0 %v4107_v7 }
0x216b   :  { %3884 = vmatpush3.msra.mxu0 %v4565_v0  ;;  %3885 = vmatprep.mubr.msk.f32.mxu0 %vm4108_vm1, %v4107_v7 }
0x216c   :  { %3873 = vmatpush3.msra.mxu1 %v4625_v29  ;;  %3874 = vmatprep.mubr.msk.f32.mxu1 %vm4108_vm1, %v4107_v7 }
0x216d   :  { %3888 = vmatprep.subr.mxu1 %v4107_v7  ;;  %3899 = vmatprep.subr.mxu0 %v4107_v7 }
0x2224   :  { %v2558_v60 = vpop.f32.mrf.mxu1  ;;  %v2630_v61 = vpop.f32.mrf.mxu0 }
0x2225   :  { %v2559_v6 = vadd.f32 %v2558_v60, %v2488_v15  ;;  %v2634_v8 = vadd.f32 %v2630_v61, %v4590_v4 }
0x2226   :  { %v3854_v62 = vpop.f32.mrf.mxu1  ;;  %v3865_v1 = vpop.f32.mrf.mxu0 }
0x2227   :  { %4065 = vtanh.f32 %v2559_v6  ;;  %v3352_v3 = vmul.f32 -1.442695, %v2634_v8 }
0x2228   :  { %4067 = vtanh.f32 %v2634_v8 }
0x2229   :  { %4069 = vpow2.f32 %v3352_v3 }
0x2234   :  { %v4066_v10 = vpop.eup %4065 }
0x2235   :  { %v4068_v2 = vpop.eup %4067  ;;  %2563 = vst.msk [vmem:[%s4862_s7 + $0x6] sm:$0x3] %vm389_vm2, %v4066_v10 }
0x2236   :  { %2647 = vrot.lane.b32.xlu0 %v4068_v2, %s4109_s22  ;;  %v4070_v37 = vpop.eup %4069 }
0x2237   :  { %v2638_v11 = vadd.f32 1.0, %v4070_v37 }
0x2239   :  { %4071 = vrcp.f32 %v2638_v11 }
0x2246   :  { %v4072_v14 = vpop.eup %4071 }
0x2247   :  { %v2645_v19 = vmul.f32 %v4072_v14, %v2643_v18  ;;  %v3026_v18 = vrot.slane %v4593_v5, 4 }
0x22a8   :  { %v2648_v16 = vpop.permute.xlu0 %2647 }
0x22a9   :  { %v2650_v17 = vmul.f32 %v4072_v14, %v2648_v16 }
0x22ab   :  { %2652 = vrot.lane.b32.xlu1 %v2650_v17, %s4110_s23 }
0x231d   :  { %v2653_v20 = vpop.permute.xlu1 %2652 }
0x231e   :  { %v2655_v45 = vadd.f32 %v2653_v20, %v2645_v19 }
0x2320   :  { %4073 = vtanh.f32 %v2655_v45  ;;  %v2821_v46 = vrot.slane %v2655_v45, 6 }
0x232d   :  { %v4074_v21 = vpop.eup %4073 }
0x232e   :  { %2658 = vrot.lane.b32.xlu0 %v4074_v21, %s4109_s22 }
0x23a0   :  { %v2659_v22 = vpop.permute.xlu0 %2658 }
0x23a1   :  { %v2661_v23 = vmul.f32 %v4072_v14, %v2659_v22 }
0x23a3   :  { %2663 = vrot.lane.b32.xlu1 %v2661_v23, %s4110_s23 }
0x2415   :  { %v2664_v24 = vpop.permute.xlu1 %2663 }
0x2416   :  { %3875 = vmatmul.mubr.msk.f32.vlgmr.msra.gmra.mxu1 %vm39_vm0, %v2664_v24  ;;  %3886 = vmatmul.mubr.msk.f32.vlgmr.msra.gmra.mxu0 %vm39_vm0, %v2664_v24 }
0x2417   :  { %3889 = vmatpush3.msra.mxu1 %v4606_v27  ;;  %3900 = vmatpush3.msra.mxu0 %v4537_v9 }
0x2418   :  { %3890 = vmatprep.subr.mxu1 %v4107_v7  ;;  %3901 = vmatprep.subr.mxu0 %v4107_v7 }
0x2419   :  { %3891 = vmatpush3.msra.mxu1 %v4611_v28  ;;  %3902 = vmatpush3.msra.mxu0 %v4547_v42 }
0x241a   :  { %3892 = vmatprep.subr.mxu1 %v4107_v7  ;;  %3903 = vmatprep.subr.mxu0 %v4107_v7 }
0x241b   :  { %3893 = vmatpush3.msra.mxu1 %v4618_v33  ;;  %3904 = vmatpush3.msra.mxu0 %v4556_v63 }
0x241c   :  { %3894 = vmatprep.subr.mxu1 %v4107_v7  ;;  %3905 = vmatprep.subr.mxu0 %v4107_v7 }
0x241d   :  { %3906 = vmatpush3.msra.mxu0 %v4565_v0  ;;  %3907 = vmatprep.mubr.msk.f32.mxu0 %vm4108_vm1, %v4107_v7 }
0x241e   :  { %3895 = vmatpush3.msra.mxu1 %v4625_v29  ;;  %3896 = vmatprep.mubr.msk.f32.mxu1 %vm4108_vm1, %v4107_v7 }
0x241f   :  { %3910 = vmatprep.subr.mxu1 %v4107_v7  ;;  %3921 = vmatprep.subr.mxu0 %v4107_v7 }
0x24d6   :  { %v2733_v25 = vpop.f32.mrf.mxu1  ;;  %v2805_v26 = vpop.f32.mrf.mxu0 }
0x24d7   :  { %v2734_v30 = vadd.f32 %v2733_v25, %v4593_v5  ;;  %v2810_v31 = vrot.slane %v2805_v26, 6 }
0x24d8   :  { %v3876_v32 = vpop.f32.mrf.mxu1  ;;  %v3887_v35 = vpop.f32.mrf.mxu0 }
0x24d9   :  { %4075 = vtanh.f32 %v2734_v30  ;;  %v2812_v36 = vadd.f32 %v2810_v31, %v4590_v4 }
0x24db   :  { %4077 = vtanh.f32 %v2812_v36  ;;  %v3355_v39 = vmul.f32 -1.442695, %v2812_v36 }
0x24dd   :  { %4079 = vpow2.f32 %v3355_v39 }
0x24e6   :  { %v4076_v34 = vpop.eup %4075 }
0x24e7   :  { %2738 = vst.msk [vmem:[%s4862_s7 + $0x8] sm:$0x3] %vm389_vm2, %v4076_v34 }
0x24e8   :  { %v4078_v38 = vpop.eup %4077 }
0x24e9   :  { %2825 = vrot.lane.b32.xlu0 %v4078_v38, %s4109_s22 }
0x24ea   :  { %v4080_v40 = vpop.eup %4079 }
0x24eb   :  { %v2816_v41 = vadd.f32 1.0, %v4080_v40 }
0x24ed   :  { %4081 = vrcp.f32 %v2816_v41  ;;  %v3207_v41 = vrot.slane %v4593_v5, 6 }
0x24fa   :  { %v4082_v13 = vpop.eup %4081 }
0x24fb   :  { %v2823_v47 = vmul.f32 %v4082_v13, %v2821_v46 }
0x255b   :  { %v2826_v43 = vpop.permute.xlu0 %2825 }
0x255c   :  { %v2828_v44 = vmul.f32 %v4082_v13, %v2826_v43 }
0x255e   :  { %2830 = vrot.lane.b32.xlu1 %v2828_v44, %s4110_s23 }
0x25d0   :  { %v2831_v48 = vpop.permute.xlu1 %2830 }
0x25d1   :  { %v2833_v49 = vadd.f32 %v2831_v48, %v2823_v47 }
0x25d3   :  { %4083 = vtanh.f32 %v2833_v49  ;;  %v3003_v1 = vrot.slane %v2833_v49, 6 }
0x25e0   :  { %v4084_v50 = vpop.eup %4083 }
0x25e1   :  { %2836 = vrot.lane.b32.xlu0 %v4084_v50, %s4109_s22 }
0x2653   :  { %v2837_v51 = vpop.permute.xlu0 %2836 }
0x2654   :  { %v2839_v12 = vmul.f32 %v4082_v13, %v2837_v51 }
0x2656   :  { %v2841_v52 = vrot.slane %v2839_v12, 2 }
0x2658   :  { %2842 = vrot.lane.b32.xlu1 %v2841_v52, %s4110_s23 }
0x26ca   :  { %v2843_v53 = vpop.permute.xlu1 %2842 }
0x26cb   :  { %3897 = vmatmul.mubr.msk.f32.vlgmr.msra.gmra.mxu1 %vm39_vm0, %v2843_v53  ;;  %3908 = vmatmul.mubr.msk.f32.vlgmr.msra.gmra.mxu0 %vm39_vm0, %v2843_v53 }
0x26cc   :  { %3911 = vmatpush3.msra.mxu1 %v4606_v27  ;;  %3922 = vmatpush3.msra.mxu0 %v4537_v9  ;;  %v2845_v9 = vrot.slane %v4593_v5, 2 }
0x26cd   :  { %3912 = vmatprep.subr.mxu1 %v4107_v7  ;;  %3923 = vmatprep.subr.mxu0 %v4107_v7 }
0x26ce   :  { %3913 = vmatpush3.msra.mxu1 %v4611_v28  ;;  %3924 = vmatpush3.msra.mxu0 %v4547_v42 }
0x26cf   :  { %3914 = vmatprep.subr.mxu1 %v4107_v7  ;;  %3925 = vmatprep.subr.mxu0 %v4107_v7 }
0x26d0   :  { %3915 = vmatpush3.msra.mxu1 %v4618_v33  ;;  %3926 = vmatpush3.msra.mxu0 %v4556_v63 }
0x26d1   :  { %3916 = vmatprep.subr.mxu1 %v4107_v7  ;;  %3927 = vmatprep.subr.mxu0 %v4107_v7 }
0x26d2   :  { %3928 = vmatpush3.msra.mxu0 %v4565_v0  ;;  %3929 = vmatprep.mubr.msk.f32.mxu0 %vm4108_vm1, %v4107_v7 }
0x26d3   :  { %3917 = vmatpush3.msra.mxu1 %v4625_v29  ;;  %3918 = vmatprep.mubr.msk.f32.mxu1 %vm4108_vm1, %v4107_v7 }
0x26d4   :  { %3932 = vmatprep.subr.mxu1 %v4107_v7 }
0x278b   :  { %v2915_v42 = vpop.f32.mrf.mxu1  ;;  %v2987_v63 = vpop.f32.mrf.mxu0 }
0x278c   :  { %v2916_v54 = vadd.f32 %v2915_v42, %v2845_v9  ;;  %v2992_v55 = vrot.slane %v2987_v63, 4 }
0x278d   :  { %v3898_v56 = vpop.f32.mrf.mxu1  ;;  %v3909_v57 = vpop.f32.mrf.mxu0 }
0x278e   :  { %4085 = vtanh.f32 %v2916_v54  ;;  %v2994_v0 = vadd.f32 %v2992_v55, %v4590_v4 }
0x2790   :  { %4087 = vtanh.f32 %v2994_v0  ;;  %v3358_v15 = vmul.f32 -1.442695, %v2994_v0 }
0x2792   :  { %4089 = vpow2.f32 %v3358_v15 }
0x279b   :  { %v4086_v58 = vpop.eup %4085 }
0x279c   :  { %2920 = vst.msk [vmem:[%s4862_s7 + $0xa] sm:$0x3] %vm389_vm2, %v4086_v58 }
0x279d   :  { %v4088_v59 = vpop.eup %4087 }
0x279e   :  { %3007 = vrot.lane.b32.xlu0 %v4088_v59, %s4109_s22 }
0x279f   :  { %v4090_v60 = vpop.eup %4089 }
0x27a0   :  { %v2998_v61 = vadd.f32 1.0, %v4090_v60 }
0x27a2   :  { %4091 = vrcp.f32 %v2998_v61 }
0x27af   :  { %v4092_v6 = vpop.eup %4091 }
0x27b0   :  { %v3005_v10 = vmul.f32 %v4092_v6, %v3003_v1 }
0x2810   :  { %v3008_v8 = vpop.permute.xlu0 %3007 }
0x2811   :  { %v3010_v62 = vmul.f32 %v4092_v6, %v3008_v8 }
0x2813   :  { %3012 = vrot.lane.b32.xlu1 %v3010_v62, %s4110_s23 }
0x2885   :  { %v3013_v2 = vpop.permute.xlu1 %3012 }
0x2886   :  { %v3015_v3 = vadd.f32 %v3013_v2, %v3005_v10 }
0x2888   :  { %4093 = vtanh.f32 %v3015_v3 }
0x2895   :  { %v4094_v37 = vpop.eup %4093 }
0x2896   :  { %3018 = vrot.lane.b32.xlu0 %v4094_v37, %s4109_s22 }
0x2908   :  { %v3019_v11 = vpop.permute.xlu0 %3018 }
0x2909   :  { %v3021_v14 = vmul.f32 %v4092_v6, %v3019_v11 }
0x290b   :  { %v3023_v16 = vrot.slane %v3021_v14, 4 }
0x290d   :  { %3024 = vrot.lane.b32.xlu1 %v3023_v16, %s4110_s23 }
0x297f   :  { %v3025_v17 = vpop.permute.xlu1 %3024 }
0x2980   :  { %3919 = vmatmul.mubr.msk.f32.vlgmr.msra.gmra.mxu1 %vm39_vm0, %v3025_v17  ;;  %3930 = vmatmul.mubr.msk.f32.vlgmr.msra.gmra.mxu0 %vm39_vm0, %v3025_v17 }
0x2981   :  { %3933 = vmatpush3.msra.mxu1 %v4606_v27  ;;  %3940 = vmatprep.mubr.msk.f32.mxu1 %vm4108_vm1, %v4107_v7 }
0x2982   :  { %3934 = vmatprep.subr.mxu1 %v4107_v7 }
0x2983   :  { %3935 = vmatpush3.msra.mxu1 %v4611_v28 }
0x2984   :  { %3936 = vmatprep.subr.mxu1 %v4107_v7 }
0x2985   :  { %3937 = vmatpush3.msra.mxu1 %v4618_v33 }
0x2986   :  { %3938 = vmatprep.subr.mxu1 %v4107_v7 }
0x2987   :  { %3939 = vmatpush3.msra.mxu1 %v4625_v29 }
0x2a40   :  { %v3096_v19 = vpop.f32.mrf.mxu1  ;;  %v3168_v20 = vpop.f32.mrf.mxu0 }
0x2a41   :  { %v3097_v27 = vadd.f32 %v3096_v19, %v3026_v18  ;;  %v3173_v45 = vrot.slane %v3168_v20, 2 }
0x2a42   :  { %v3920_v21 = vpop.f32.mrf.mxu1  ;;  %v3931_v22 = vpop.f32.mrf.mxu0 }
0x2a43   :  { %4095 = vtanh.f32 %v3097_v27  ;;  %v3175_v23 = vadd.f32 %v3173_v45, %v4590_v4  ;;  %v3184_v4 = vrot.slane %v3015_v3, 6 }
0x2a45   :  { %4097 = vtanh.f32 %v3175_v23  ;;  %v3361_v33 = vmul.f32 -1.442695, %v3175_v23 }
0x2a47   :  { %4099 = vpow2.f32 %v3361_v33 }
0x2a50   :  { %v4096_v28 = vpop.eup %4095 }
0x2a51   :  { %3101 = vst.msk [vmem:[%s4862_s7 + $0xc] sm:$0x3] %vm389_vm2, %v4096_v28 }
0x2a52   :  { %v4098_v7 = vpop.eup %4097 }
0x2a53   :  { %3188 = vrot.lane.b32.xlu0 %v4098_v7, %s4109_s22 }
0x2a54   :  { %v4100_v29 = vpop.eup %4099 }
0x2a55   :  { %v3179_v24 = vadd.f32 1.0, %v4100_v29 }
0x2a57   :  { %4101 = vrcp.f32 %v3179_v24 }
0x2a64   :  { %v4102_v25 = vpop.eup %4101 }
0x2a65   :  { %v3186_v31 = vmul.f32 %v4102_v25, %v3184_v4 }
0x2ac5   :  { %v3189_v26 = vpop.permute.xlu0 %3188 }
0x2ac6   :  { %v3191_v30 = vmul.f32 %v4102_v25, %v3189_v26 }
0x2ac8   :  { %3193 = vrot.lane.b32.xlu1 %v3191_v30, %s4110_s23 }
0x2b3a   :  { %v3194_v32 = vpop.permute.xlu1 %3193 }
0x2b3b   :  { %v3196_v35 = vadd.f32 %v3194_v32, %v3186_v31 }
0x2b3d   :  { %4103 = vtanh.f32 %v3196_v35 }
0x2b4a   :  { %v4104_v36 = vpop.eup %4103 }
0x2b4b   :  { %3199 = vrot.lane.b32.xlu0 %v4104_v36, %s4109_s22 }
0x2bbd   :  { %v3200_v34 = vpop.permute.xlu0 %3199 }
0x2bbe   :  { %v3202_v38 = vmul.f32 %v4102_v25, %v3200_v34 }
0x2bc0   :  { %v3204_v39 = vrot.slane %v3202_v38, 6 }
0x2bc2   :  { %3205 = vrot.lane.b32.xlu1 %v3204_v39, %s4110_s23 }
0x2c34   :  { %v3206_v40 = vpop.permute.xlu1 %3205 }
0x2c35   :  { %3941 = vmatmul.mubr.msk.f32.vlgmr.msra.gmra.mxu1 %vm39_vm0, %v3206_v40 }
0x2cf5   :  { %v3277_v13 = vpop.f32.mrf.mxu1 }
0x2cf6   :  { %v3278_v43 = vadd.f32 %v3277_v13, %v3207_v41 }
0x2cf7   :  { %v3942_v44 = vpop.f32.mrf.mxu1 }
0x2cf8   :  { %4105 = vtanh.f32 %v3278_v43 }
0x2d05   :  { %v4106_v46 = vpop.eup %4105 }
0x2d06   :  { %3282 = vst.msk [vmem:[%s4862_s7 + $0xe] sm:$0x3] %vm389_vm2, %v4106_v46 }

// kernel: _lambda_.5
= control target key start
LH: loop header
LB: loop body
LE: loop exit
PB: predicated region body
PF: predicated region fallthrough
CT: control target
= control target key end

     0   :  { %19 = vsyncpa [#allocation3], 0  ;;  %s4717_s29 = smov [#allocation2]   ;;  %s5599_s0 = inlined_call_operand.vmem [shape: f32[16,64], index: 0, kind: input, shape index: {}]   ;;  %s5600_s1 = inlined_call_operand.vmem [shape: f32[16,16], index: 1, kind: input, shape index: {}]   ;;  %s5601_s2 = inlined_call_operand.vmem [shape: f32[64,192], index: 2, kind: input, shape index: {}]   ;;  %s5602_s3 = inlined_call_operand.vmem [shape: f32[1,192], index: 3, kind: input, shape index: {}]   ;;  %s5603_s4 = inlined_call_operand.vmem [shape: f32[64,64], index: 4, kind: input, shape index: {}]   ;;  %s5604_s5 = inlined_call_operand.vmem [shape: f32[1,64], index: 5, kind: input, shape index: {}]   ;;  %s5605_s6 = inlined_call_operand.vmem [shape: f32[1,64], index: 6, kind: input, shape index: {}]   ;;  %s5606_s7 = inlined_call_operand.vmem [shape: f32[1,64], index: 7, kind: input, shape index: {}]   ;;  %s5607_s8 = inlined_call_operand.vmem [shape: f32[64,128], index: 8, kind: input, shape index: {}]   ;;  %s5608_s9 = inlined_call_operand.hbm [shape: f32[1,128], index: 9, kind: input, shape index: {}]   ;;  %s5609_s10 = inlined_call_operand.vmem [shape: f32[128,64], index: 10, kind: input, shape index: {}]   ;;  %s5610_s11 = inlined_call_operand.vmem [shape: f32[1,64], index: 11, kind: input, shape index: {}]   ;;  %s5611_s12 = inlined_call_operand.vmem [shape: f32[1,64], index: 12, kind: input, shape index: {}]   ;;  %s5612_s13 = inlined_call_operand.vmem [shape: f32[1,64], index: 13, kind: input, shape index: {}]   ;;  %s5613_s14 = inlined_call_operand.vmem [shape: f32[16,64], index: 14, kind: output, shape index: {}]  }
   0x1   :  { %s44_s30 = sshll.u32 %s4717_s29, 4  ;;  %s45_s30 = int_to_ptr.vmem [resolvable:$true] %s44_s30 }
   0x2   :  { %s4703_s15 = scalar_lea.vmem %s45_s30, 16  ;;  %s4707_s16 = scalar_lea.vmem %s45_s30, 32 }
   0x3   :  { %p4704_p0 = scmp.ne.s32.totalorder %s45_s30, %s4703_s15  ;;  %p4708_p1 = scmp.lt.s32.totalorder %s45_s30, %s45_s30 }
   0x4   :  { %p4709_p2 = scmp.lt.s32.totalorder %s4707_s16, %s4703_s15 }
   0x6   :  { %p4710_p3 = por %p4709_p2, %p4708_p1 }
   0x8   :  { %p4711_p4 = pnand %p4710_p3, %p4704_p0 }
   0xa   :  { %4714 = shalt.err (!%p4711_p4)
}
   0xb   :  { %47 = dma.hbm_to_vmem [thread:$0]  %s5608_s9, 16, %s45_s30, [#allocation3]  }
   0xc   :  { %4715 = dma.done.wait [#allocation3], 16  }
   0xd   :  { %4716 = vsyncadd [#allocation3], 4294967280  ;;  %v4718_v0 = vmov 0.0   ;;  %v76_v1 = vld [vmem:[%s5601_s2 + $0x78] sm:$0xff]  ;;  %v75_v2 = vld [vmem:[%s5601_s2 + $0x70] sm:$0xff]  ;;  %vm89_vm0 = vcmask 523264   ;;  %v79_v19 = vlaneseq }
   0xe   :  { %160 = vmatprep.mubr.f32.mxu0 %v4718_v0  ;;  %v74_v3 = vld [vmem:[%s5601_s2 + $0x68] sm:$0xff]  ;;  %112 = vmatprep.subr.mxu0 %v76_v1  ;;  %v73_v4 = vld [vmem:[%s5601_s2 + $0x60] sm:$0xff]  ;;  %v72_v5 = vld [vmem:[%s5601_s2 + $0x58] sm:$0xff]  ;;  %vm183_vm1 = vcmask 31744   ;;  %s4719_s22 = smov 64   ;;  %vm269_vm2 = vcmask 130048  }
   0xf   :  { %113 = vmatpush1.msra.mxu0 %v75_v2  ;;  %v71_v6 = vld [vmem:[%s5601_s2 + $0x50] sm:$0xff]  ;;  %v70_v7 = vld [vmem:[%s5601_s2 + $0x48] sm:$0xff]  ;;  %v69_v8 = vld [vmem:[%s5601_s2 + $0x40] sm:$0xff]  ;;  %v80_v20 = vshrl.u32 %v79_v19, 7  ;;  %s4720_s26 = smov 60   ;;  %s4721_s9 = smov 124  }
  0x10   :  { %114 = vmatprep.subr.mxu0 %v74_v3  ;;  %v68_v9 = vld [vmem:[%s5601_s2 + $0x38] sm:$0xff]  ;;  %v67_v10 = vld [vmem:[%s5601_s2 + $0x30] sm:$0xff]  ;;  %v66_v11 = vld [vmem:[%s5601_s2 + $0x28] sm:$0xff]  ;;  %s4722_s27 = smov 56   ;;  %s4723_s28 = smov 120   ;;  %vm3497_vm3 = vcmask 64512  }
  0x11   :  { %115 = vmatpush1.msra.mxu0 %v73_v4  ;;  %v65_v12 = vld [vmem:[%s5601_s2 + $0x20] sm:$0xff]  ;;  %v64_v13 = vld [vmem:[%s5601_s2 + $0x18] sm:$0xff]  ;;  %v63_v14 = vld [vmem:[%s5601_s2 + $0x10] sm:$0xff]  ;;  %v81_v21 = vsub.s32 0, %v80_v20  ;;  %v85_v30 = vsub.s32 1, %v80_v20  ;;  %s4724_s29 = smov 52  }
  0x12   :  { %116 = vmatprep.subr.mxu0 %v72_v5  ;;  %v62_v15 = vld [vmem:[%s5601_s2 + $0x8] sm:$0xff]  ;;  %v61_v16 = vld [vmem:[%s5601_s2] sm:$0xff]  ;;  %s4725_s30 = smov 116   ;;  %s4726_s15 = smov 48   ;;  %vm3500_vm4 = vcmask 97280   ;;  %vm3505_vm5 = vcmask 162816  }
  0x13   :  { %117 = vmatpush1.msra.mxu0 %v71_v6  ;;  %v59_v17 = vld [vmem:[%s5599_s0] sm:$0xff]  ;;  %v60_v18 = vld [vmem:[%s5599_s0 + $0x8] sm:$0xff]  ;;  %s4727_s16 = smov 112   ;;  %s4728_s17 = smov 44   ;;  %vm3508_vm6 = vcmask 195584   ;;  %vm3511_vm7 = vcmask 228352  }
  0x14   :  { %118 = vmatprep.subr.mxu0 %v70_v7  ;;  %v77_v22 = vld [vmem:[%s5602_s3] sm:$0x3]  ;;  %v4923_v40 = vld [vmem:[%s5600_s1 + $0x8] sm:$0xff]  ;;  %s4729_s18 = smov 108   ;;  %s4730_s19 = smov 40   ;;  %vm3514_vm8 = vcmask 261120  }
  0x15   :  { %119 = vmatpush1.msra.mxu0 %v69_v8  ;;  %v82_v23 = vrot.slane %v77_v22, %v81_v21  ;;  %v86_v33 = vrot.slane %v77_v22, %v85_v30  ;;  %v4918_v39 = vld [vmem:[%s5600_s1] sm:$0xff]  ;;  %s4731_s20 = smov 104   ;;  %s4732_s2 = smov 36   ;;  %vm3517_vm9 = vcmask 293888   ;;  %vm3520_vm10 = vcmask 326656  }
  0x16   :  { %120 = vmatprep.subr.mxu0 %v68_v9  ;;  %s4733_s21 = smov 100   ;;  %s4735_s3 = smov 96   ;;  %vm3523_vm11 = vcmask 359424   ;;  %vm3526_vm12 = vcmask 392192   ;;  %vm3529_vm13 = vcmask 424960   ;;  %vm3532_vm14 = vcmask 457728  }
  0x17   :  { %121 = vmatpush1.msra.mxu0 %v67_v10  ;;  %s4736_s23 = smov 28   ;;  %s4737_s24 = smov 92   ;;  %vm3535_vm15 = vcmask 490496  }
  0x18   :  { %122 = vmatprep.subr.mxu0 %v66_v11  ;;  %s4745_s25 = smov 76  }
  0x19   :  { %123 = vmatpush1.msra.mxu0 %v65_v12 }
  0x1a   :  { %124 = vmatprep.subr.mxu0 %v64_v13 }
  0x1b   :  { %125 = vmatpush1.msra.mxu0 %v63_v14 }
  0x1c   :  { %126 = vmatprep.subr.mxu0 %v62_v15 }
  0x1d   :  { %127 = vmatpush1.msra.mxu0 %v61_v16 }
  0x1e   :  { %3946 = vmatmul.mubr.msk.f32.vlgmr.msra.gmra.mxu0 %vm89_vm0, %v59_v17 }
  0x1f   :  { %166 = vmatprep.mubr.f32.mxu0 %v4718_v0 }
  0x22   :  { %3947 = vmatmul.mubr.msk.f32.gmra.mxu0 %vm89_vm0, %v60_v18 }
  0xde   :  { %v162_v24 = vpop.f32.mrf.mxu0 }
  0xdf   :  { %v4887_v25 = vadd.f32 %v162_v24, %v82_v23 }
  0xe0   :  { %v164_v26 = vpop.f32.mrf.mxu0 }
  0xe1   :  { %v4890_v27 = vmul.f32 0.5, %v4887_v25  ;;  %v4908_v37 = vadd.f32 %v164_v26, %v86_v33 }
  0xe2   :  { %v168_v28 = vpop.f32.mrf.mxu0 }
  0xe3   :  { %v4892_v29 = vadd.f32 %v168_v28, %v82_v23  ;;  %4225 = vmatprep.mubr.msk.f32.mxu1 %vm183_vm1, %v4890_v27 }
  0xe4   :  { %v170_v32 = vpop.f32.mrf.mxu0 }
  0xe5   :  { %181 = vrot.lane.b32.xlu0 %v4892_v29, %s4719_s22  ;;  %v4900_v35 = vadd.f32 %v170_v32, %v86_v33  ;;  %v4906_v36 = vmul.f32 0.5, %v4892_v29 }
  0xe9   :  { %179 = vrot.lane.b32.xlu0 %v4887_v25, %s4719_s22  ;;  %s4734_s22 = smov 32  }
 0x157   :  { %v182_v31 = vpop.permute.xlu0 %181 }
 0x158   :  { %4221 = vmatprep.subr.msk.mxu1 %vm183_vm1, %v182_v31 }
 0x159   :  { %4222 = vmatpush3.xpose.msk.msra.mxu1 %vm183_vm1, %v182_v31 }
 0x15b   :  { %v180_v34 = vpop.permute.xlu0 %179 }
 0x15c   :  { %4223 = vmatprep.subr.msk.mxu1 %vm183_vm1, %v180_v34 }
 0x15d   :  { %4224 = vmatpush3.xpose.msk.msra.mxu1 %vm183_vm1, %v180_v34 }
 0x15e   :  { %4228 = vmatprep.subr.mxu1 %v4900_v35 }
 0x160   :  { %4226 = vmatmul.mubr.msk.f32.vlgmr.msra.gmra.mxu1 %vm183_vm1, %v4906_v36 }
 0x161   :  { %4229 = vmatpush3.msra.mxu1 %v4900_v35 }
 0x162   :  { %4230 = vmatprep.subr.mxu1 %v4908_v37 }
 0x163   :  { %4231 = vmatpush3.msra.mxu1 %v4908_v37 }
 0x220   :  { %v4227_v38 = vpop.f32.mrf.mxu1 }
 0x221   :  { %v266_v43 = vadd.f32 %v4227_v38, %v4923_v40 }
 0x222   :  { %v260_v41 = vpop.f32.mrf.mxu1 }
 0x223   :  { %v261_v42 = vadd.f32 %v260_v41, %v4918_v39  ;;  %v273_v45 = vsel %vm269_vm2, %v266_v43, -inf }
 0x225   :  { %v270_v44 = vsel %vm269_vm2, %v261_v42, -inf }
 0x226   :  { %271 = vmax.xlane.f32.xlu1 %v270_v44 }
 0x22a   :  { %274 = vmax.xlane.f32.xlu1 %v273_v45 }
 0x2af   :  { %v272_v46 = vpop.xlane.xlu1 %271 }
 0x2b0   :  { %v276_v47 = vsub.f32 %v261_v42, %v272_v46 }
 0x2b2   :  { %v278_v48 = vmul.f32 1.442695, %v276_v47 }
 0x2b3   :  { %v275_v49 = vpop.xlane.xlu1 %274 }
 0x2b4   :  { %4551 = vpow2.f32 %v278_v48  ;;  %v277_v50 = vsub.f32 %v266_v43, %v275_v49 }
 0x2b6   :  { %v280_v51 = vmul.f32 1.442695, %v277_v50 }
 0x2b8   :  { %4553 = vpow2.f32 %v280_v51 }
 0x2c1   :  { %v4552_v52 = vpop.eup %4551 }
 0x2c2   :  { %v282_v53 = vsel %vm269_vm2, %v4552_v52, 0.0 }
 0x2c3   :  { %283 = vadd.xlane.f32.xlu0 %v282_v53 }
 0x2c5   :  { %v4554_v54 = vpop.eup %4553 }
 0x2c6   :  { %v285_v55 = vsel %vm269_vm2, %v4554_v54, 0.0 }
 0x2c7   :  { %286 = vadd.xlane.f32.xlu1 %v285_v55 }
 0x2d8   :  { %379 = vrot.lane.b32.xlu1 %v4892_v29, %s4720_s26 }
 0x2d9   :  { %375 = vrot.lane.b32.xlu0 %v4906_v36, %s4721_s9 }
 0x2dc   :  { %377 = vrot.lane.b32.xlu1 %v4887_v25, %s4720_s26 }
 0x2e0   :  { %373 = vrot.lane.b32.xlu1 %v4890_v27, %s4721_s9 }
 0x2e4   :  { %581 = vrot.lane.b32.xlu1 %v4892_v29, %s4722_s27 }
 0x2e8   :  { %579 = vrot.lane.b32.xlu1 %v4887_v25, %s4722_s27 }
 0x2ec   :  { %575 = vrot.lane.b32.xlu1 %v4890_v27, %s4723_s28 }
 0x2f0   :  { %577 = vrot.lane.b32.xlu1 %v4906_v36, %s4723_s28 }
 0x34c   :  { %v284_v56 = vpop.xlane.xlu0 %283 }
 0x34d   :  { %4555 = vrcp.f32 %v284_v56 }
 0x350   :  { %v287_v57 = vpop.xlane.xlu1 %286  ;;  %v376_v3 = vpop.permute.xlu0 %375 }
 0x351   :  { %4557 = vrcp.f32 %v287_v57 }
 0x354   :  { %v380_v58 = vpop.permute.xlu1 %379 }
 0x355   :  { %4235 = vmatprep.subr.msk.mxu1 %vm183_vm1, %v380_v58 }
 0x358   :  { %v378_v59 = vpop.permute.xlu1 %377 }
 0x35a   :  { %v4556_v60 = vpop.eup %4555 }
 0x35b   :  { %v290_v61 = vmul.f32 %v4556_v60, %v4552_v52 }
 0x35c   :  { %v374_v62 = vpop.permute.xlu1 %373 }
 0x35d   :  { %4232 = vmatprep.mubr.msk.f32.mxu1 %vm269_vm2, %v290_v61 }
 0x35e   :  { %v4558_v63 = vpop.eup %4557 }
 0x35f   :  { %v291_v0 = vmul.f32 %v4558_v63, %v4554_v54 }
 0x360   :  { %v582_v1 = vpop.permute.xlu1 %581 }
 0x361   :  { %4233 = vmatmul.mubr.msk.f32.vlgmr.msra.gmra.mxu1 %vm269_vm2, %v291_v0 }
 0x362   :  { %4236 = vmatpush3.xpose.msk.msra.mxu1 %vm183_vm1, %v380_v58  ;;  %4239 = vmatprep.mubr.msk.f32.mxu1 %vm183_vm1, %v374_v62 }
 0x363   :  { %4237 = vmatprep.subr.msk.mxu1 %vm183_vm1, %v378_v59 }
 0x364   :  { %v580_v2 = vpop.permute.xlu1 %579 }
 0x366   :  { %4238 = vmatpush3.xpose.msk.msra.mxu1 %vm183_vm1, %v378_v59 }
 0x367   :  { %4249 = vmatprep.subr.msk.mxu1 %vm183_vm1, %v582_v1 }
 0x368   :  { %v576_v4 = vpop.permute.xlu1 %575 }
 0x369   :  { %4240 = vmatmul.mubr.msk.f32.vlgmr.msra.gmra.mxu1 %vm183_vm1, %v376_v3 }
 0x36a   :  { %4250 = vmatpush3.xpose.msk.msra.mxu1 %vm183_vm1, %v582_v1  ;;  %4253 = vmatprep.mubr.msk.f32.mxu1 %vm183_vm1, %v576_v4 }
 0x36b   :  { %4251 = vmatprep.subr.msk.mxu1 %vm183_vm1, %v580_v2 }
 0x36c   :  { %v578_v5 = vpop.permute.xlu1 %577 }
 0x36e   :  { %4252 = vmatpush3.xpose.msk.msra.mxu1 %vm183_vm1, %v580_v2 }
 0x371   :  { %4254 = vmatmul.mubr.msk.f32.vlgmr.msra.gmra.mxu1 %vm183_vm1, %v578_v5 }
 0x421   :  { %v4961_v6 = vpop.f32.mrf.mxu1 }
 0x423   :  { %v4963_v7 = vpop.f32.mrf.mxu1 }
 0x429   :  { %v4241_v8 = vpop.f32.mrf.mxu1 }
 0x42a   :  { %v461_v9 = vadd.f32 %v4241_v8, %v4923_v40 }
 0x42b   :  { %v455_v10 = vpop.f32.mrf.mxu1 }
 0x42c   :  { %v456_v11 = vadd.f32 %v455_v10, %v4918_v39  ;;  %v467_v12 = vsel %vm269_vm2, %v461_v9, -inf }
 0x42d   :  { %468 = vmax.xlane.f32.xlu0 %v467_v12 }
 0x42e   :  { %v464_v13 = vsel %vm269_vm2, %v456_v11, -inf }
 0x42f   :  { %465 = vmax.xlane.f32.xlu1 %v464_v13 }
 0x431   :  { %v4255_v14 = vpop.f32.mrf.mxu1 }
 0x432   :  { %v663_v15 = vadd.f32 %v4255_v14, %v4923_v40 }
 0x433   :  { %v657_v17 = vpop.f32.mrf.mxu1 }
 0x434   :  { %v669_v16 = vsel %vm269_vm2, %v663_v15, -inf  ;;  %v658_v18 = vadd.f32 %v657_v17, %v4918_v39 }
 0x435   :  { %670 = vmax.xlane.f32.xlu0 %v669_v16 }
 0x436   :  { %v666_v19 = vsel %vm269_vm2, %v658_v18, -inf }
 0x440   :  { %490 = vrot.lane.b32.xlu1 %v4900_v35, %s4721_s9 }
 0x444   :  { %690 = vrot.lane.b32.xlu1 %v4900_v35, %s4723_s28 }
 0x44b   :  { %488 = vrot.lane.b32.xlu0 %v4908_v37, %s4721_s9  ;;  %s4746_s9 = smov 8  }
 0x468   :  { %667 = vmax.xlane.f32.xlu1 %v666_v19 }
 0x479   :  { %688 = vrot.lane.b32.xlu1 %v4908_v37, %s4723_s28  ;;  %s4747_s28 = smov 72  }
 0x4b6   :  { %v469_v20 = vpop.xlane.xlu0 %468 }
 0x4b7   :  { %v471_v21 = vsub.f32 %v461_v9, %v469_v20 }
 0x4b8   :  { %v466_v22 = vpop.xlane.xlu1 %465 }
 0x4b9   :  { %v474_v23 = vmul.f32 1.442695, %v471_v21  ;;  %v470_v24 = vsub.f32 %v456_v11, %v466_v22 }
 0x4bb   :  { %4559 = vpow2.f32 %v474_v23  ;;  %v472_v26 = vmul.f32 1.442695, %v470_v24 }
 0x4bc   :  { %v491_v28 = vpop.permute.xlu1 %490 }
 0x4bd   :  { %4561 = vpow2.f32 %v472_v26  ;;  %4242 = vmatprep.subr.mxu0 %v491_v28 }
 0x4be   :  { %v671_v30 = vpop.xlane.xlu0 %670  ;;  %4243 = vmatpush3.msra.mxu0 %v491_v28 }
 0x4bf   :  { %v673_v31 = vsub.f32 %v663_v15, %v671_v30 }
 0x4c0   :  { %v691_v34 = vpop.permute.xlu1 %690 }
 0x4c1   :  { %v676_v32 = vmul.f32 1.442695, %v673_v31 }
 0x4c2   :  { %v489_v33 = vpop.permute.xlu0 %488 }
 0x4c3   :  { %4563 = vpow2.f32 %v676_v32  ;;  %4244 = vmatprep.subr.mxu0 %v489_v33 }
 0x4c4   :  { %4245 = vmatpush3.msra.mxu0 %v489_v33 }
 0x4c5   :  { %4256 = vmatprep.subr.mxu0 %v691_v34 }
 0x4c8   :  { %v4560_v38 = vpop.eup %4559 }
 0x4c9   :  { %v479_v41 = vsel %vm269_vm2, %v4560_v38, 0.0 }
 0x4ca   :  { %v4562_v42 = vpop.eup %4561  ;;  %480 = vadd.xlane.f32.xlu0 %v479_v41 }
 0x4cb   :  { %v476_v43 = vsel %vm269_vm2, %v4562_v42, 0.0 }
 0x4cc   :  { %477 = vadd.xlane.f32.xlu1 %v476_v43 }
 0x4d0   :  { %v4564_v44 = vpop.eup %4563 }
 0x4d1   :  { %v681_v45 = vsel %vm269_vm2, %v4564_v44, 0.0 }
 0x4d2   :  { %682 = vadd.xlane.f32.xlu0 %v681_v45 }
 0x4dd   :  { %779 = vrot.lane.b32.xlu1 %v4887_v25, %s4724_s29 }
 0x4e8   :  { %781 = vrot.lane.b32.xlu0 %v4892_v29, %s4724_s29 }
 0x4ec   :  { %775 = vrot.lane.b32.xlu0 %v4890_v27, %s4725_s30 }
 0x4f1   :  { %v668_v46 = vpop.xlane.xlu1 %667 }
 0x4f2   :  { %v672_v47 = vsub.f32 %v658_v18, %v668_v46 }
 0x4f4   :  { %v674_v48 = vmul.f32 1.442695, %v672_v47 }
 0x4f5   :  { %v689_v51 = vpop.permute.xlu1 %688 }
 0x4f6   :  { %4565 = vpow2.f32 %v674_v48 }
 0x503   :  { %v4566_v49 = vpop.eup %4565 }
 0x504   :  { %v678_v50 = vsel %vm269_vm2, %v4566_v49, 0.0 }
 0x505   :  { %679 = vadd.xlane.f32.xlu1 %v678_v50 }
 0x516   :  { %777 = vrot.lane.b32.xlu1 %v4906_v36, %s4725_s30 }
 0x553   :  { %v481_v52 = vpop.xlane.xlu0 %480 }
 0x554   :  { %4567 = vrcp.f32 %v481_v52 }
 0x555   :  { %v478_v53 = vpop.xlane.xlu1 %477 }
 0x556   :  { %4569 = vrcp.f32 %v478_v53 }
 0x559   :  { %v780_v60 = vpop.permute.xlu1 %779 }
 0x55b   :  { %v683_v56 = vpop.xlane.xlu0 %682 }
 0x55c   :  { %4571 = vrcp.f32 %v683_v56 }
 0x55f   :  { %v782_v59 = vpop.permute.xlu0 %781 }
 0x561   :  { %v4568_v54 = vpop.eup %4567 }
 0x562   :  { %v485_v58 = vmul.f32 %v4568_v54, %v4560_v38 }
 0x563   :  { %v4570_v55 = vpop.eup %4569  ;;  %v776_v2 = vpop.permute.xlu0 %775 }
 0x564   :  { %v484_v57 = vmul.f32 %v4570_v55, %v4562_v42 }
 0x566   :  { %4246 = vmatprep.mubr.msk.f32.mxu0 %vm269_vm2, %v484_v57 }
 0x567   :  { %4247 = vmatmul.mubr.msk.f32.vlgmr.msra.gmra.mxu0 %vm269_vm2, %v485_v58 }
 0x568   :  { %4257 = vmatpush3.msra.mxu0 %v691_v34 }
 0x569   :  { %4258 = vmatprep.subr.mxu0 %v689_v51  ;;  %v4572_v62 = vpop.eup %4571 }
 0x56a   :  { %4259 = vmatpush3.msra.mxu0 %v689_v51  ;;  %v687_v1 = vmul.f32 %v4572_v62, %v4564_v44 }
 0x56b   :  { %4263 = vmatprep.subr.msk.mxu0 %vm183_vm1, %v782_v59 }
 0x58e   :  { %v680_v61 = vpop.xlane.xlu1 %679 }
 0x58f   :  { %4573 = vrcp.f32 %v680_v61 }
 0x592   :  { %v778_v3 = vpop.permute.xlu1 %777 }
 0x59c   :  { %v4574_v63 = vpop.eup %4573 }
 0x59d   :  { %v686_v0 = vmul.f32 %v4574_v63, %v4566_v49 }
 0x59f   :  { %4260 = vmatprep.mubr.msk.f32.mxu0 %vm269_vm2, %v686_v0 }
 0x5a0   :  { %4261 = vmatmul.mubr.msk.f32.vlgmr.msra.gmra.mxu0 %vm269_vm2, %v687_v1 }
 0x5a1   :  { %4264 = vmatpush3.xpose.msk.msra.mxu0 %vm183_vm1, %v782_v59  ;;  %4267 = vmatprep.mubr.msk.f32.mxu0 %vm183_vm1, %v776_v2 }
 0x5a2   :  { %4265 = vmatprep.subr.msk.mxu0 %vm183_vm1, %v780_v60 }
 0x5a5   :  { %4266 = vmatpush3.xpose.msk.msra.mxu0 %vm183_vm1, %v780_v60 }
 0x5a8   :  { %4268 = vmatmul.mubr.msk.f32.vlgmr.msra.gmra.mxu0 %vm183_vm1, %v778_v3 }
 0x627   :  { %v5003_v4 = vpop.f32.mrf.mxu0 }
 0x629   :  { %v5005_v5 = vpop.f32.mrf.mxu0 }
 0x660   :  { %v5007_v8 = vpop.f32.mrf.mxu0 }
 0x662   :  { %v5009_v9 = vpop.f32.mrf.mxu0 }
 0x668   :  { %v4269_v10 = vpop.f32.mrf.mxu0 }
 0x669   :  { %v863_v11 = vadd.f32 %v4269_v10, %v4923_v40 }
 0x66a   :  { %v857_v12 = vpop.f32.mrf.mxu0 }
 0x66b   :  { %v858_v13 = vadd.f32 %v857_v12, %v4918_v39  ;;  %v869_v14 = vsel %vm269_vm2, %v863_v11, -inf }
 0x66c   :  { %870 = vmax.xlane.f32.xlu1 %v869_v14 }
 0x66d   :  { %v866_v15 = vsel %vm269_vm2, %v858_v13, -inf }
 0x66e   :  { %867 = vmax.xlane.f32.xlu0 %v866_v15 }
 0x67d   :  { %890 = vrot.lane.b32.xlu1 %v4900_v35, %s4725_s30 }
 0x681   :  { %981 = vrot.lane.b32.xlu1 %v4892_v29, %s4726_s15 }
 0x685   :  { %979 = vrot.lane.b32.xlu1 %v4887_v25, %s4726_s15 }
 0x689   :  { %977 = vrot.lane.b32.xlu1 %v4906_v36, %s4727_s16 }
 0x6f5   :  { %v871_v16 = vpop.xlane.xlu1 %870 }
 0x6f6   :  { %v873_v17 = vsub.f32 %v863_v11, %v871_v16 }
 0x6f7   :  { %v868_v18 = vpop.xlane.xlu0 %867 }
 0x6f8   :  { %v876_v19 = vmul.f32 1.442695, %v873_v17  ;;  %v872_v20 = vsub.f32 %v858_v13, %v868_v18 }
 0x6f9   :  { %v891_v21 = vpop.permute.xlu1 %890 }
 0x6fa   :  { %4575 = vpow2.f32 %v876_v19  ;;  %v874_v22 = vmul.f32 1.442695, %v872_v20  ;;  %4270 = vmatprep.subr.mxu1 %v891_v21 }
 0x6fb   :  { %4271 = vmatpush3.msra.mxu1 %v891_v21 }
 0x6fc   :  { %4577 = vpow2.f32 %v874_v22 }
 0x6fd   :  { %v982_v33 = vpop.permute.xlu1 %981 }
 0x701   :  { %v980_v44 = vpop.permute.xlu1 %979 }
 0x705   :  { %v978_v45 = vpop.permute.xlu1 %977 }
 0x707   :  { %v4576_v23 = vpop.eup %4575 }
 0x708   :  { %v881_v24 = vsel %vm269_vm2, %v4576_v23, 0.0 }
 0x709   :  { %v4578_v26 = vpop.eup %4577  ;;  %882 = vadd.xlane.f32.xlu0 %v881_v24 }
 0x70a   :  { %v878_v28 = vsel %vm269_vm2, %v4578_v26, 0.0 }
 0x70d   :  { %879 = vadd.xlane.f32.xlu0 %v878_v28 }
 0x723   :  { %888 = vrot.lane.b32.xlu0 %v4908_v37, %s4725_s30  ;;  %s4748_s30 = smov 4  }
 0x727   :  { %975 = vrot.lane.b32.xlu0 %v4890_v27, %s4727_s16 }
 0x792   :  { %v883_v30 = vpop.xlane.xlu0 %882 }
 0x793   :  { %4579 = vrcp.f32 %v883_v30 }
 0x796   :  { %v880_v31 = vpop.xlane.xlu0 %879 }
 0x797   :  { %4581 = vrcp.f32 %v880_v31 }
 0x79a   :  { %v889_v32 = vpop.permute.xlu0 %888 }
 0x79b   :  { %4272 = vmatprep.subr.mxu1 %v889_v32 }
 0x79c   :  { %4273 = vmatpush3.msra.mxu1 %v889_v32 }
 0x79d   :  { %4277 = vmatprep.subr.msk.mxu1 %vm183_vm1, %v982_v33 }
 0x79e   :  { %v976_v43 = vpop.permute.xlu0 %975 }
 0x7a0   :  { %v4580_v34 = vpop.eup %4579 }
 0x7a1   :  { %v887_v42 = vmul.f32 %v4580_v34, %v4576_v23 }
 0x7a4   :  { %v4582_v38 = vpop.eup %4581 }
 0x7a5   :  { %v886_v41 = vmul.f32 %v4582_v38, %v4578_v26 }
 0x7a7   :  { %4274 = vmatprep.mubr.msk.f32.mxu1 %vm269_vm2, %v886_v41 }
 0x7a8   :  { %4275 = vmatmul.mubr.msk.f32.vlgmr.msra.gmra.mxu1 %vm269_vm2, %v887_v42 }
 0x7a9   :  { %4278 = vmatpush3.xpose.msk.msra.mxu1 %vm183_vm1, %v982_v33  ;;  %4281 = vmatprep.mubr.msk.f32.mxu1 %vm183_vm1, %v976_v43 }
 0x7aa   :  { %4279 = vmatprep.subr.msk.mxu1 %vm183_vm1, %v980_v44 }
 0x7ad   :  { %4280 = vmatpush3.xpose.msk.msra.mxu1 %vm183_vm1, %v980_v44 }
 0x7b0   :  { %4282 = vmatmul.mubr.msk.f32.vlgmr.msra.gmra.mxu1 %vm183_vm1, %v978_v45 }
 0x868   :  { %v5037_v46 = vpop.f32.mrf.mxu1 }
 0x86a   :  { %v5039_v47 = vpop.f32.mrf.mxu1 }
 0x870   :  { %v4283_v48 = vpop.f32.mrf.mxu1 }
 0x871   :  { %v1063_v49 = vadd.f32 %v4283_v48, %v4923_v40 }
 0x872   :  { %v1057_v50 = vpop.f32.mrf.mxu1 }
 0x873   :  { %v1058_v51 = vadd.f32 %v1057_v50, %v4918_v39  ;;  %v1069_v52 = vsel %vm269_vm2, %v1063_v49, -inf }
 0x874   :  { %1070 = vmax.xlane.f32.xlu1 %v1069_v52 }
 0x875   :  { %v1066_v53 = vsel %vm269_vm2, %v1058_v51, -inf }
 0x876   :  { %1067 = vmax.xlane.f32.xlu0 %v1066_v53 }
 0x885   :  { %1090 = vrot.lane.b32.xlu1 %v4900_v35, %s4727_s16 }
 0x889   :  { %1181 = vrot.lane.b32.xlu1 %v4892_v29, %s4728_s17 }
 0x88d   :  { %1179 = vrot.lane.b32.xlu1 %v4887_v25, %s4728_s17 }
 0x891   :  { %1177 = vrot.lane.b32.xlu1 %v4906_v36, %s4729_s18 }
 0x8fd   :  { %v1071_v54 = vpop.xlane.xlu1 %1070 }
 0x8fe   :  { %v1073_v55 = vsub.f32 %v1063_v49, %v1071_v54 }
 0x8ff   :  { %v1068_v56 = vpop.xlane.xlu0 %1067 }
 0x900   :  { %v1076_v57 = vmul.f32 1.442695, %v1073_v55  ;;  %v1072_v58 = vsub.f32 %v1058_v51, %v1068_v56 }
 0x901   :  { %v1091_v59 = vpop.permute.xlu1 %1090 }
 0x902   :  { %4583 = vpow2.f32 %v1076_v57  ;;  %v1074_v60 = vmul.f32 1.442695, %v1072_v58  ;;  %4284 = vmatprep.subr.mxu0 %v1091_v59 }
 0x903   :  { %4285 = vmatpush3.msra.mxu0 %v1091_v59 }
 0x904   :  { %4585 = vpow2.f32 %v1074_v60 }
 0x905   :  { %v1182_v10 = vpop.permute.xlu1 %1181 }
 0x909   :  { %v1180_v16 = vpop.permute.xlu1 %1179 }
 0x90d   :  { %v1178_v17 = vpop.permute.xlu1 %1177 }
 0x90f   :  { %v4584_v61 = vpop.eup %4583 }
 0x910   :  { %v1081_v62 = vsel %vm269_vm2, %v4584_v61, 0.0 }
 0x911   :  { %v4586_v63 = vpop.eup %4585  ;;  %1082 = vadd.xlane.f32.xlu0 %v1081_v62 }
 0x912   :  { %v1078_v0 = vsel %vm269_vm2, %v4586_v63, 0.0 }
 0x915   :  { %1079 = vadd.xlane.f32.xlu0 %v1078_v0 }
 0x92b   :  { %1088 = vrot.lane.b32.xlu0 %v4908_v37, %s4727_s16  ;;  %s4738_s16 = smov 24  }
 0x92f   :  { %1175 = vrot.lane.b32.xlu0 %v4890_v27, %s4729_s18 }
 0x99a   :  { %v1083_v1 = vpop.xlane.xlu0 %1082 }
 0x99b   :  { %4587 = vrcp.f32 %v1083_v1 }
 0x99e   :  { %v1080_v2 = vpop.xlane.xlu0 %1079 }
 0x99f   :  { %4589 = vrcp.f32 %v1080_v2 }
 0x9a2   :  { %v1089_v3 = vpop.permute.xlu0 %1088 }
 0x9a3   :  { %4286 = vmatprep.subr.mxu0 %v1089_v3 }
 0x9a4   :  { %4287 = vmatpush3.msra.mxu0 %v1089_v3 }
 0x9a5   :  { %4291 = vmatprep.subr.msk.mxu0 %vm183_vm1, %v1182_v10 }
 0x9a6   :  { %v1176_v15 = vpop.permute.xlu0 %1175 }
 0x9a8   :  { %v4588_v11 = vpop.eup %4587 }
 0x9a9   :  { %v1087_v14 = vmul.f32 %v4588_v11, %v4584_v61 }
 0x9ac   :  { %v4590_v12 = vpop.eup %4589 }
 0x9ad   :  { %v1086_v13 = vmul.f32 %v4590_v12, %v4586_v63 }
 0x9af   :  { %4288 = vmatprep.mubr.msk.f32.mxu0 %vm269_vm2, %v1086_v13 }
 0x9b0   :  { %4289 = vmatmul.mubr.msk.f32.vlgmr.msra.gmra.mxu0 %vm269_vm2, %v1087_v14 }
 0x9b1   :  { %4292 = vmatpush3.xpose.msk.msra.mxu0 %vm183_vm1, %v1182_v10  ;;  %4295 = vmatprep.mubr.msk.f32.mxu0 %vm183_vm1, %v1176_v15 }
 0x9b2   :  { %4293 = vmatprep.subr.msk.mxu0 %vm183_vm1, %v1180_v16 }
 0x9b5   :  { %4294 = vmatpush3.xpose.msk.msra.mxu0 %vm183_vm1, %v1180_v16 }
 0x9b8   :  { %4296 = vmatmul.mubr.msk.f32.vlgmr.msra.gmra.mxu0 %vm183_vm1, %v1178_v17 }
 0xa70   :  { %v5067_v18 = vpop.f32.mrf.mxu0 }
 0xa72   :  { %v5069_v19 = vpop.f32.mrf.mxu0 }
 0xa78   :  { %v4297_v20 = vpop.f32.mrf.mxu0 }
 0xa79   :  { %v1263_v21 = vadd.f32 %v4297_v20, %v4923_v40 }
 0xa7a   :  { %v1257_v22 = vpop.f32.mrf.mxu0 }
 0xa7b   :  { %v1258_v23 = vadd.f32 %v1257_v22, %v4918_v39  ;;  %v1269_v24 = vsel %vm269_vm2, %v1263_v21, -inf }
 0xa7c   :  { %1270 = vmax.xlane.f32.xlu1 %v1269_v24 }
 0xa7d   :  { %v1266_v26 = vsel %vm269_vm2, %v1258_v23, -inf }
 0xa7e   :  { %1267 = vmax.xlane.f32.xlu0 %v1266_v26 }
 0xa8d   :  { %1290 = vrot.lane.b32.xlu1 %v4900_v35, %s4729_s18 }
 0xa91   :  { %1381 = vrot.lane.b32.xlu1 %v4892_v29, %s4730_s19 }
 0xa95   :  { %1379 = vrot.lane.b32.xlu1 %v4887_v25, %s4730_s19 }
 0xa99   :  { %1377 = vrot.lane.b32.xlu1 %v4906_v36, %s4731_s20 }
 0xb05   :  { %v1271_v28 = vpop.xlane.xlu1 %1270 }
 0xb06   :  { %v1273_v30 = vsub.f32 %v1263_v21, %v1271_v28 }
 0xb07   :  { %v1268_v31 = vpop.xlane.xlu0 %1267 }
 0xb08   :  { %v1276_v32 = vmul.f32 1.442695, %v1273_v30  ;;  %v1272_v33 = vsub.f32 %v1258_v23, %v1268_v31 }
 0xb09   :  { %v1291_v34 = vpop.permute.xlu1 %1290 }
 0xb0a   :  { %4591 = vpow2.f32 %v1276_v32  ;;  %v1274_v38 = vmul.f32 1.442695, %v1272_v33  ;;  %4298 = vmatprep.subr.mxu1 %v1291_v34 }
 0xb0b   :  { %4299 = vmatpush3.msra.mxu1 %v1291_v34 }
 0xb0c   :  { %4593 = vpow2.f32 %v1274_v38 }
 0xb0d   :  { %v1382_v50 = vpop.permute.xlu1 %1381 }
 0xb11   :  { %v1380_v56 = vpop.permute.xlu1 %1379 }
 0xb15   :  { %v1378_v57 = vpop.permute.xlu1 %1377 }
 0xb17   :  { %v4592_v41 = vpop.eup %4591 }
 0xb18   :  { %v1281_v42 = vsel %vm269_vm2, %v4592_v41, 0.0 }
 0xb19   :  { %v4594_v43 = vpop.eup %4593  ;;  %1282 = vadd.xlane.f32.xlu0 %v1281_v42 }
 0xb1a   :  { %v1278_v44 = vsel %vm269_vm2, %v4594_v43, 0.0 }
 0xb1d   :  { %1279 = vadd.xlane.f32.xlu0 %v1278_v44 }
 0xb33   :  { %1288 = vrot.lane.b32.xlu0 %v4908_v37, %s4729_s18  ;;  %s4740_s18 = smov 20  }
 0xb37   :  { %1375 = vrot.lane.b32.xlu0 %v4890_v27, %s4731_s20 }
 0xba2   :  { %v1283_v45 = vpop.xlane.xlu0 %1282 }
 0xba3   :  { %4595 = vrcp.f32 %v1283_v45 }
 0xba6   :  { %v1280_v48 = vpop.xlane.xlu0 %1279 }
 0xba7   :  { %4597 = vrcp.f32 %v1280_v48 }
 0xbaa   :  { %v1289_v49 = vpop.permute.xlu0 %1288 }
 0xbab   :  { %4300 = vmatprep.subr.mxu1 %v1289_v49 }
 0xbac   :  { %4301 = vmatpush3.msra.mxu1 %v1289_v49 }
 0xbad   :  { %4305 = vmatprep.subr.msk.mxu1 %vm183_vm1, %v1382_v50 }
 0xbae   :  { %v1376_v55 = vpop.permute.xlu0 %1375 }
 0xbb0   :  { %v4596_v51 = vpop.eup %4595 }
 0xbb1   :  { %v1287_v54 = vmul.f32 %v4596_v51, %v4592_v41 }
 0xbb4   :  { %v4598_v52 = vpop.eup %4597 }
 0xbb5   :  { %v1286_v53 = vmul.f32 %v4598_v52, %v4594_v43 }
 0xbb7   :  { %4302 = vmatprep.mubr.msk.f32.mxu1 %vm269_vm2, %v1286_v53 }
 0xbb8   :  { %4303 = vmatmul.mubr.msk.f32.vlgmr.msra.gmra.mxu1 %vm269_vm2, %v1287_v54 }
 0xbb9   :  { %4306 = vmatpush3.xpose.msk.msra.mxu1 %vm183_vm1, %v1382_v50  ;;  %4309 = vmatprep.mubr.msk.f32.mxu1 %vm183_vm1, %v1376_v55 }
 0xbba   :  { %4307 = vmatprep.subr.msk.mxu1 %vm183_vm1, %v1380_v56 }
 0xbbd   :  { %4308 = vmatpush3.xpose.msk.msra.mxu1 %vm183_vm1, %v1380_v56 }
 0xbc0   :  { %4310 = vmatmul.mubr.msk.f32.vlgmr.msra.gmra.mxu1 %vm183_vm1, %v1378_v57 }
 0xc78   :  { %v5097_v58 = vpop.f32.mrf.mxu1 }
 0xc7a   :  { %v5099_v59 = vpop.f32.mrf.mxu1 }
 0xc80   :  { %v4311_v60 = vpop.f32.mrf.mxu1 }
 0xc81   :  { %v1463_v61 = vadd.f32 %v4311_v60, %v4923_v40 }
 0xc82   :  { %v1457_v62 = vpop.f32.mrf.mxu1 }
 0xc83   :  { %v1458_v63 = vadd.f32 %v1457_v62, %v4918_v39  ;;  %v1469_v0 = vsel %vm269_vm2, %v1463_v61, -inf }
 0xc84   :  { %1470 = vmax.xlane.f32.xlu1 %v1469_v0 }
 0xc85   :  { %v1466_v1 = vsel %vm269_vm2, %v1458_v63, -inf }
 0xc86   :  { %1467 = vmax.xlane.f32.xlu0 %v1466_v1 }
 0xc95   :  { %1490 = vrot.lane.b32.xlu1 %v4900_v35, %s4731_s20 }
 0xc99   :  { %1581 = vrot.lane.b32.xlu1 %v4892_v29, %s4732_s2 }
 0xc9d   :  { %1579 = vrot.lane.b32.xlu1 %v4887_v25, %s4732_s2 }
 0xca1   :  { %1577 = vrot.lane.b32.xlu1 %v4906_v36, %s4733_s21 }
 0xd0d   :  { %v1471_v2 = vpop.xlane.xlu1 %1470 }
 0xd0e   :  { %v1473_v3 = vsub.f32 %v1463_v61, %v1471_v2 }
 0xd0f   :  { %v1468_v10 = vpop.xlane.xlu0 %1467 }
 0xd10   :  { %v1476_v11 = vmul.f32 1.442695, %v1473_v3  ;;  %v1472_v12 = vsub.f32 %v1458_v63, %v1468_v10 }
 0xd11   :  { %v1491_v13 = vpop.permute.xlu1 %1490 }
 0xd12   :  { %4599 = vpow2.f32 %v1476_v11  ;;  %v1474_v14 = vmul.f32 1.442695, %v1472_v12  ;;  %4312 = vmatprep.subr.mxu0 %v1491_v13 }
 0xd13   :  { %4313 = vmatpush3.msra.mxu0 %v1491_v13 }
 0xd14   :  { %4601 = vpow2.f32 %v1474_v14 }
 0xd15   :  { %v1582_v24 = vpop.permute.xlu1 %1581 }
 0xd19   :  { %v1580_v33 = vpop.permute.xlu1 %1579 }
 0xd1d   :  { %v1578_v34 = vpop.permute.xlu1 %1577 }
 0xd1f   :  { %v4600_v15 = vpop.eup %4599 }
 0xd20   :  { %v1481_v16 = vsel %vm269_vm2, %v4600_v15, 0.0 }
 0xd21   :  { %v4602_v17 = vpop.eup %4601  ;;  %1482 = vadd.xlane.f32.xlu0 %v1481_v16 }
 0xd22   :  { %v1478_v20 = vsel %vm269_vm2, %v4602_v17, 0.0 }
 0xd25   :  { %1479 = vadd.xlane.f32.xlu0 %v1478_v20 }
 0xd3b   :  { %1488 = vrot.lane.b32.xlu0 %v4908_v37, %s4731_s20  ;;  %s4741_s20 = smov 84  }
 0xd3f   :  { %1575 = vrot.lane.b32.xlu0 %v4890_v27, %s4733_s21 }
 0xdaa   :  { %v1483_v21 = vpop.xlane.xlu0 %1482 }
 0xdab   :  { %4603 = vrcp.f32 %v1483_v21 }
 0xdae   :  { %v1480_v22 = vpop.xlane.xlu0 %1479 }
 0xdaf   :  { %4605 = vrcp.f32 %v1480_v22 }
 0xdb2   :  { %v1489_v23 = vpop.permute.xlu0 %1488 }
 0xdb3   :  { %4314 = vmatprep.subr.mxu0 %v1489_v23 }
 0xdb4   :  { %4315 = vmatpush3.msra.mxu0 %v1489_v23 }
 0xdb5   :  { %4319 = vmatprep.subr.msk.mxu0 %vm183_vm1, %v1582_v24 }
 0xdb6   :  { %v1576_v32 = vpop.permute.xlu0 %1575 }
 0xdb8   :  { %v4604_v26 = vpop.eup %4603 }
 0xdb9   :  { %v1487_v31 = vmul.f32 %v4604_v26, %v4600_v15 }
 0xdbc   :  { %v4606_v28 = vpop.eup %4605 }
 0xdbd   :  { %v1486_v30 = vmul.f32 %v4606_v28, %v4602_v17 }
 0xdbf   :  { %4316 = vmatprep.mubr.msk.f32.mxu0 %vm269_vm2, %v1486_v30 }
 0xdc0   :  { %4317 = vmatmul.mubr.msk.f32.vlgmr.msra.gmra.mxu0 %vm269_vm2, %v1487_v31 }
 0xdc1   :  { %4320 = vmatpush3.xpose.msk.msra.mxu0 %vm183_vm1, %v1582_v24  ;;  %4323 = vmatprep.mubr.msk.f32.mxu0 %vm183_vm1, %v1576_v32 }
 0xdc2   :  { %4321 = vmatprep.subr.msk.mxu0 %vm183_vm1, %v1580_v33 }
 0xdc5   :  { %4322 = vmatpush3.xpose.msk.msra.mxu0 %vm183_vm1, %v1580_v33 }
 0xdc8   :  { %4324 = vmatmul.mubr.msk.f32.vlgmr.msra.gmra.mxu0 %vm183_vm1, %v1578_v34 }
 0xe80   :  { %v5127_v38 = vpop.f32.mrf.mxu0 }
 0xe82   :  { %v5129_v41 = vpop.f32.mrf.mxu0 }
 0xe88   :  { %v4325_v42 = vpop.f32.mrf.mxu0 }
 0xe89   :  { %v1663_v43 = vadd.f32 %v4325_v42, %v4923_v40 }
 0xe8a   :  { %v1657_v44 = vpop.f32.mrf.mxu0 }
 0xe8b   :  { %v1658_v45 = vadd.f32 %v1657_v44, %v4918_v39  ;;  %v1669_v48 = vsel %vm269_vm2, %v1663_v43, -inf }
 0xe8c   :  { %1670 = vmax.xlane.f32.xlu1 %v1669_v48 }
 0xe8d   :  { %v1666_v49 = vsel %vm269_vm2, %v1658_v45, -inf }
 0xe8e   :  { %1667 = vmax.xlane.f32.xlu0 %v1666_v49 }
 0xe9d   :  { %1690 = vrot.lane.b32.xlu1 %v4900_v35, %s4733_s21 }
 0xea1   :  { %1781 = vrot.lane.b32.xlu1 %v4892_v29, %s4734_s22 }
 0xea5   :  { %1779 = vrot.lane.b32.xlu1 %v4887_v25, %s4734_s22 }
 0xea9   :  { %1777 = vrot.lane.b32.xlu1 %v4906_v36, %s4735_s3 }
 0xf15   :  { %v1671_v50 = vpop.xlane.xlu1 %1670 }
 0xf16   :  { %v1673_v51 = vsub.f32 %v1663_v43, %v1671_v50 }
 0xf17   :  { %v1668_v52 = vpop.xlane.xlu0 %1667 }
 0xf18   :  { %v1676_v53 = vmul.f32 1.442695, %v1673_v51  ;;  %v1672_v54 = vsub.f32 %v1658_v45, %v1668_v52 }
 0xf19   :  { %v1691_v55 = vpop.permute.xlu1 %1690 }
 0xf1a   :  { %4607 = vpow2.f32 %v1676_v53  ;;  %v1674_v56 = vmul.f32 1.442695, %v1672_v54  ;;  %4326 = vmatprep.subr.mxu1 %v1691_v55 }
 0xf1b   :  { %4327 = vmatpush3.msra.mxu1 %v1691_v55 }
 0xf1c   :  { %4609 = vpow2.f32 %v1674_v56 }
 0xf1d   :  { %v1782_v2 = vpop.permute.xlu1 %1781 }
 0xf21   :  { %v1780_v14 = vpop.permute.xlu1 %1779 }
 0xf25   :  { %v1778_v15 = vpop.permute.xlu1 %1777 }
 0xf27   :  { %v4608_v57 = vpop.eup %4607 }
 0xf28   :  { %v1681_v60 = vsel %vm269_vm2, %v4608_v57, 0.0 }
 0xf29   :  { %v4610_v61 = vpop.eup %4609  ;;  %1682 = vadd.xlane.f32.xlu0 %v1681_v60 }
 0xf2a   :  { %v1678_v62 = vsel %vm269_vm2, %v4610_v61, 0.0 }
 0xf2d   :  { %1679 = vadd.xlane.f32.xlu0 %v1678_v62 }
 0xf43   :  { %1688 = vrot.lane.b32.xlu0 %v4908_v37, %s4733_s21  ;;  %s4742_s21 = smov 16  }
 0xf47   :  { %1775 = vrot.lane.b32.xlu0 %v4890_v27, %s4735_s3 }
 0xfb2   :  { %v1683_v63 = vpop.xlane.xlu0 %1682 }
 0xfb3   :  { %4611 = vrcp.f32 %v1683_v63  ;;  %v5194_v63 = vld [vmem:[%s5600_s1 + $0x8] sm:$0xff] }
 0xfb6   :  { %v1680_v0 = vpop.xlane.xlu0 %1679 }
 0xfb7   :  { %4613 = vrcp.f32 %v1680_v0 }
 0xfba   :  { %v1689_v1 = vpop.permute.xlu0 %1688 }
 0xfbb   :  { %4328 = vmatprep.subr.mxu1 %v1689_v1 }
 0xfbc   :  { %4329 = vmatpush3.msra.mxu1 %v1689_v1 }
 0xfbd   :  { %4333 = vmatprep.subr.msk.mxu1 %vm183_vm1, %v1782_v2 }
 0xfbe   :  { %v1776_v13 = vpop.permute.xlu0 %1775 }
 0xfc0   :  { %v4612_v3 = vpop.eup %4611 }
 0xfc1   :  { %v1687_v12 = vmul.f32 %v4612_v3, %v4608_v57 }
 0xfc4   :  { %v4614_v10 = vpop.eup %4613 }
 0xfc5   :  { %v1686_v11 = vmul.f32 %v4614_v10, %v4610_v61 }
 0xfc7   :  { %4330 = vmatprep.mubr.msk.f32.mxu1 %vm269_vm2, %v1686_v11 }
 0xfc8   :  { %4331 = vmatmul.mubr.msk.f32.vlgmr.msra.gmra.mxu1 %vm269_vm2, %v1687_v12 }
 0xfc9   :  { %4334 = vmatpush3.xpose.msk.msra.mxu1 %vm183_vm1, %v1782_v2  ;;  %4337 = vmatprep.mubr.msk.f32.mxu1 %vm183_vm1, %v1776_v13  ;;  %v5200_v2 = vld [vmem:[%s5600_s1] sm:$0xff]  ;;  %s4739_s1 = smov 88  }
 0xfca   :  { %4335 = vmatprep.subr.msk.mxu1 %vm183_vm1, %v1780_v14 }
 0xfcd   :  { %4336 = vmatpush3.xpose.msk.msra.mxu1 %vm183_vm1, %v1780_v14 }
 0xfd0   :  { %4338 = vmatmul.mubr.msk.f32.vlgmr.msra.gmra.mxu1 %vm183_vm1, %v1778_v15 }
0x1088   :  { %v5157_v16 = vpop.f32.mrf.mxu1 }
0x108a   :  { %v5159_v17 = vpop.f32.mrf.mxu1 }
0x1090   :  { %v4339_v20 = vpop.f32.mrf.mxu1 }
0x1091   :  { %v1863_v21 = vadd.f32 %v4339_v20, %v4923_v40 }
0x1092   :  { %v1857_v22 = vpop.f32.mrf.mxu1 }
0x1093   :  { %v1858_v23 = vadd.f32 %v1857_v22, %v4918_v39  ;;  %v1869_v24 = vsel %vm269_vm2, %v1863_v21, -inf }
0x1094   :  { %1870 = vmax.xlane.f32.xlu1 %v1869_v24 }
0x1095   :  { %v1866_v26 = vsel %vm269_vm2, %v1858_v23, -inf }
0x1096   :  { %1867 = vmax.xlane.f32.xlu0 %v1866_v26 }
0x10a5   :  { %1890 = vrot.lane.b32.xlu1 %v4900_v35, %s4735_s3 }
0x10a9   :  { %1981 = vrot.lane.b32.xlu1 %v4892_v29, %s4736_s23 }
0x10ad   :  { %1979 = vrot.lane.b32.xlu1 %v4887_v25, %s4736_s23 }
0x10b1   :  { %1977 = vrot.lane.b32.xlu1 %v4906_v36, %s4737_s24 }
0x111d   :  { %v1871_v39 = vpop.xlane.xlu1 %1870 }
0x111e   :  { %v1873_v40 = vsub.f32 %v1863_v21, %v1871_v39 }
0x111f   :  { %v1868_v28 = vpop.xlane.xlu0 %1867 }
0x1120   :  { %v1876_v30 = vmul.f32 1.442695, %v1873_v40  ;;  %v1872_v31 = vsub.f32 %v1858_v23, %v1868_v28 }
0x1121   :  { %v1891_v32 = vpop.permute.xlu1 %1890 }
0x1122   :  { %4615 = vpow2.f32 %v1876_v30  ;;  %v1874_v33 = vmul.f32 1.442695, %v1872_v31  ;;  %4340 = vmatprep.subr.mxu0 %v1891_v32 }
0x1123   :  { %4341 = vmatpush3.msra.mxu0 %v1891_v32 }
0x1124   :  { %4617 = vpow2.f32 %v1874_v33 }
0x1125   :  { %v1982_v50 = vpop.permute.xlu1 %1981 }
0x1129   :  { %v1980_v56 = vpop.permute.xlu1 %1979 }
0x112d   :  { %v1978_v57 = vpop.permute.xlu1 %1977 }
0x112f   :  { %v4616_v34 = vpop.eup %4615 }
0x1130   :  { %v1881_v42 = vsel %vm269_vm2, %v4616_v34, 0.0 }
0x1131   :  { %v4618_v43 = vpop.eup %4617  ;;  %1882 = vadd.xlane.f32.xlu0 %v1881_v42 }
0x1132   :  { %v1878_v44 = vsel %vm269_vm2, %v4618_v43, 0.0 }
0x1135   :  { %1879 = vadd.xlane.f32.xlu0 %v1878_v44 }
0x114b   :  { %1888 = vrot.lane.b32.xlu0 %v4908_v37, %s4735_s3  ;;  %s4743_s3 = smov 80  }
0x114f   :  { %1975 = vrot.lane.b32.xlu0 %v4890_v27, %s4737_s24 }
0x11ba   :  { %v1883_v45 = vpop.xlane.xlu0 %1882 }
0x11bb   :  { %4619 = vrcp.f32 %v1883_v45 }
0x11be   :  { %v1880_v48 = vpop.xlane.xlu0 %1879 }
0x11bf   :  { %4621 = vrcp.f32 %v1880_v48 }
0x11c2   :  { %v1889_v49 = vpop.permute.xlu0 %1888 }
0x11c3   :  { %4342 = vmatprep.subr.mxu0 %v1889_v49 }
0x11c4   :  { %4343 = vmatpush3.msra.mxu0 %v1889_v49 }
0x11c5   :  { %4347 = vmatprep.subr.msk.mxu0 %vm183_vm1, %v1982_v50 }
0x11c6   :  { %v1976_v55 = vpop.permute.xlu0 %1975 }
0x11c8   :  { %v4620_v51 = vpop.eup %4619 }
0x11c9   :  { %v1887_v54 = vmul.f32 %v4620_v51, %v4616_v34 }
0x11cc   :  { %v4622_v52 = vpop.eup %4621 }
0x11cd   :  { %v1886_v53 = vmul.f32 %v4622_v52, %v4618_v43 }
0x11cf   :  { %4344 = vmatprep.mubr.msk.f32.mxu0 %vm269_vm2, %v1886_v53 }
0x11d0   :  { %4345 = vmatmul.mubr.msk.f32.vlgmr.msra.gmra.mxu0 %vm269_vm2, %v1887_v54 }
0x11d1   :  { %4348 = vmatpush3.xpose.msk.msra.mxu0 %vm183_vm1, %v1982_v50  ;;  %4351 = vmatprep.mubr.msk.f32.mxu0 %vm183_vm1, %v1976_v55 }
0x11d2   :  { %4349 = vmatprep.subr.msk.mxu0 %vm183_vm1, %v1980_v56 }
0x11d5   :  { %4350 = vmatpush3.xpose.msk.msra.mxu0 %vm183_vm1, %v1980_v56 }
0x11d8   :  { %4352 = vmatmul.mubr.msk.f32.vlgmr.msra.gmra.mxu0 %vm183_vm1, %v1978_v57 }
0x1290   :  { %v5187_v60 = vpop.f32.mrf.mxu0 }
0x1292   :  { %v5189_v61 = vpop.f32.mrf.mxu0 }
0x1298   :  { %v4353_v62 = vpop.f32.mrf.mxu0 }
0x1299   :  { %v2063_v0 = vadd.f32 %v5194_v63, %v4353_v62 }
0x129a   :  { %v2057_v1 = vpop.f32.mrf.mxu0 }
0x129b   :  { %v2058_v3 = vadd.f32 %v5200_v2, %v2057_v1  ;;  %v2069_v10 = vsel %vm269_vm2, %v2063_v0, -inf }
0x129c   :  { %2070 = vmax.xlane.f32.xlu1 %v2069_v10 }
0x129d   :  { %v2066_v11 = vsel %vm269_vm2, %v2058_v3, -inf }
0x129e   :  { %2067 = vmax.xlane.f32.xlu0 %v2066_v11 }
0x12ad   :  { %2090 = vrot.lane.b32.xlu1 %v4900_v35, %s4737_s24 }
0x12b1   :  { %2181 = vrot.lane.b32.xlu1 %v4892_v29, %s4738_s16 }
0x12b5   :  { %2179 = vrot.lane.b32.xlu1 %v4887_v25, %s4738_s16 }
0x12b9   :  { %2177 = vrot.lane.b32.xlu1 %v4906_v36, %s4739_s1 }
0x1325   :  { %v2071_v12 = vpop.xlane.xlu1 %2070 }
0x1326   :  { %v2073_v13 = vsub.f32 %v2063_v0, %v2071_v12 }
0x1327   :  { %v2068_v14 = vpop.xlane.xlu0 %2067 }
0x1328   :  { %v2076_v15 = vmul.f32 1.442695, %v2073_v13  ;;  %v2072_v20 = vsub.f32 %v2058_v3, %v2068_v14 }
0x1329   :  { %v2091_v21 = vpop.permute.xlu1 %2090 }
0x132a   :  { %4623 = vpow2.f32 %v2076_v15  ;;  %v2074_v22 = vmul.f32 1.442695, %v2072_v20  ;;  %4354 = vmatprep.subr.mxu1 %v2091_v21 }
0x132b   :  { %4355 = vmatpush3.msra.mxu1 %v2091_v21 }
0x132c   :  { %4625 = vpow2.f32 %v2074_v22 }
0x132d   :  { %v2182_v31 = vpop.permute.xlu1 %2181 }
0x1331   :  { %v2180_v44 = vpop.permute.xlu1 %2179 }
0x1335   :  { %v2178_v45 = vpop.permute.xlu1 %2177 }
0x1337   :  { %v4624_v23 = vpop.eup %4623 }
0x1338   :  { %v2081_v24 = vsel %vm269_vm2, %v4624_v23, 0.0 }
0x1339   :  { %v4626_v26 = vpop.eup %4625  ;;  %2082 = vadd.xlane.f32.xlu0 %v2081_v24 }
0x133a   :  { %v2078_v39 = vsel %vm269_vm2, %v4626_v26, 0.0 }
0x133d   :  { %2079 = vadd.xlane.f32.xlu0 %v2078_v39 }
0x1353   :  { %2088 = vrot.lane.b32.xlu0 %v4908_v37, %s4737_s24  ;;  %s4744_s24 = smov 12  }
0x1357   :  { %2175 = vrot.lane.b32.xlu0 %v4890_v27, %s4739_s1 }
0x13c2   :  { %v2083_v40 = vpop.xlane.xlu0 %2082 }
0x13c3   :  { %4627 = vrcp.f32 %v2083_v40 }
0x13c6   :  { %v2080_v28 = vpop.xlane.xlu0 %2079 }
0x13c7   :  { %4629 = vrcp.f32 %v2080_v28 }
0x13ca   :  { %v2089_v30 = vpop.permute.xlu0 %2088 }
0x13cb   :  { %4356 = vmatprep.subr.mxu1 %v2089_v30 }
0x13cc   :  { %4357 = vmatpush3.msra.mxu1 %v2089_v30 }
0x13cd   :  { %4361 = vmatprep.subr.msk.mxu1 %vm183_vm1, %v2182_v31 }
0x13ce   :  { %v2176_v43 = vpop.permute.xlu0 %2175 }
0x13d0   :  { %v4628_v32 = vpop.eup %4627 }
0x13d1   :  { %v2087_v42 = vmul.f32 %v4628_v32, %v4624_v23 }
0x13d4   :  { %v4630_v33 = vpop.eup %4629 }
0x13d5   :  { %v2086_v34 = vmul.f32 %v4630_v33, %v4626_v26 }
0x13d7   :  { %4358 = vmatprep.mubr.msk.f32.mxu1 %vm269_vm2, %v2086_v34 }
0x13d8   :  { %4359 = vmatmul.mubr.msk.f32.vlgmr.msra.gmra.mxu1 %vm269_vm2, %v2087_v42 }
0x13d9   :  { %4362 = vmatpush3.xpose.msk.msra.mxu1 %vm183_vm1, %v2182_v31  ;;  %4365 = vmatprep.mubr.msk.f32.mxu1 %vm183_vm1, %v2176_v43 }
0x13da   :  { %4363 = vmatprep.subr.msk.mxu1 %vm183_vm1, %v2180_v44 }
0x13dd   :  { %4364 = vmatpush3.xpose.msk.msra.mxu1 %vm183_vm1, %v2180_v44 }
0x13e0   :  { %4366 = vmatmul.mubr.msk.f32.vlgmr.msra.gmra.mxu1 %vm183_vm1, %v2178_v45 }
0x1498   :  { %v5227_v48 = vpop.f32.mrf.mxu1 }
0x149a   :  { %v5229_v49 = vpop.f32.mrf.mxu1 }
0x14a0   :  { %v4367_v50 = vpop.f32.mrf.mxu1 }
0x14a1   :  { %v2263_v51 = vadd.f32 %v5194_v63, %v4367_v50 }
0x14a2   :  { %v2257_v52 = vpop.f32.mrf.mxu1 }
0x14a3   :  { %v2258_v53 = vadd.f32 %v5200_v2, %v2257_v52  ;;  %v2269_v54 = vsel %vm269_vm2, %v2263_v51, -inf }
0x14a4   :  { %2270 = vmax.xlane.f32.xlu1 %v2269_v54 }
0x14a5   :  { %v2266_v55 = vsel %vm269_vm2, %v2258_v53, -inf }
0x14a6   :  { %2267 = vmax.xlane.f32.xlu0 %v2266_v55 }
0x14b5   :  { %2290 = vrot.lane.b32.xlu1 %v4900_v35, %s4739_s1 }
0x14b9   :  { %2381 = vrot.lane.b32.xlu1 %v4892_v29, %s4740_s18 }
0x14bd   :  { %2379 = vrot.lane.b32.xlu1 %v4887_v25, %s4740_s18 }
0x14c1   :  { %2377 = vrot.lane.b32.xlu1 %v4906_v36, %s4741_s20 }
0x152d   :  { %v2271_v56 = vpop.xlane.xlu1 %2270 }
0x152e   :  { %v2273_v57 = vsub.f32 %v2263_v51, %v2271_v56 }
0x152f   :  { %v2268_v62 = vpop.xlane.xlu0 %2267 }
0x1530   :  { %v2276_v0 = vmul.f32 1.442695, %v2273_v57  ;;  %v2272_v1 = vsub.f32 %v2258_v53, %v2268_v62 }
0x1531   :  { %v2291_v3 = vpop.permute.xlu1 %2290 }
0x1532   :  { %4631 = vpow2.f32 %v2276_v0  ;;  %v2274_v10 = vmul.f32 1.442695, %v2272_v1  ;;  %4368 = vmatprep.subr.mxu0 %v2291_v3 }
0x1533   :  { %4369 = vmatpush3.msra.mxu0 %v2291_v3 }
0x1534   :  { %4633 = vpow2.f32 %v2274_v10 }
0x1535   :  { %v2382_v22 = vpop.permute.xlu1 %2381 }
0x1539   :  { %v2380_v28 = vpop.permute.xlu1 %2379 }
0x153d   :  { %v2378_v30 = vpop.permute.xlu1 %2377 }
0x153f   :  { %v4632_v11 = vpop.eup %4631 }
0x1540   :  { %v2281_v12 = vsel %vm269_vm2, %v4632_v11, 0.0 }
0x1541   :  { %v4634_v13 = vpop.eup %4633  ;;  %2282 = vadd.xlane.f32.xlu0 %v2281_v12 }
0x1542   :  { %v2278_v14 = vsel %vm269_vm2, %v4634_v13, 0.0 }
0x1545   :  { %2279 = vadd.xlane.f32.xlu0 %v2278_v14 }
0x155b   :  { %2288 = vrot.lane.b32.xlu0 %v4908_v37, %s4739_s1  ;;  %s4749_s1 = smov 68  }
0x155f   :  { %2375 = vrot.lane.b32.xlu0 %v4890_v27, %s4741_s20 }
0x15ca   :  { %v2283_v15 = vpop.xlane.xlu0 %2282 }
0x15cb   :  { %4635 = vrcp.f32 %v2283_v15 }
0x15ce   :  { %v2280_v20 = vpop.xlane.xlu0 %2279 }
0x15cf   :  { %4637 = vrcp.f32 %v2280_v20 }
0x15d2   :  { %v2289_v21 = vpop.permute.xlu0 %2288 }
0x15d3   :  { %4370 = vmatprep.subr.mxu0 %v2289_v21 }
0x15d4   :  { %4371 = vmatpush3.msra.mxu0 %v2289_v21 }
0x15d5   :  { %4375 = vmatprep.subr.msk.mxu0 %vm183_vm1, %v2382_v22 }
0x15d6   :  { %v2376_v40 = vpop.permute.xlu0 %2375 }
0x15d8   :  { %v4636_v23 = vpop.eup %4635 }
0x15d9   :  { %v2287_v39 = vmul.f32 %v4636_v23, %v4632_v11 }
0x15dc   :  { %v4638_v24 = vpop.eup %4637 }
0x15dd   :  { %v2286_v26 = vmul.f32 %v4638_v24, %v4634_v13 }
0x15df   :  { %4372 = vmatprep.mubr.msk.f32.mxu0 %vm269_vm2, %v2286_v26 }
0x15e0   :  { %4373 = vmatmul.mubr.msk.f32.vlgmr.msra.gmra.mxu0 %vm269_vm2, %v2287_v39 }
0x15e1   :  { %4376 = vmatpush3.xpose.msk.msra.mxu0 %vm183_vm1, %v2382_v22  ;;  %4379 = vmatprep.mubr.msk.f32.mxu0 %vm183_vm1, %v2376_v40 }
0x15e2   :  { %4377 = vmatprep.subr.msk.mxu0 %vm183_vm1, %v2380_v28 }
0x15e5   :  { %4378 = vmatpush3.xpose.msk.msra.mxu0 %vm183_vm1, %v2380_v28 }
0x15e8   :  { %4380 = vmatmul.mubr.msk.f32.vlgmr.msra.gmra.mxu0 %vm183_vm1, %v2378_v30 }
0x16a0   :  { %v5257_v31 = vpop.f32.mrf.mxu0 }
0x16a2   :  { %v5259_v32 = vpop.f32.mrf.mxu0 }
0x16a8   :  { %v4381_v33 = vpop.f32.mrf.mxu0 }
0x16a9   :  { %v2463_v34 = vadd.f32 %v5194_v63, %v4381_v33 }
0x16aa   :  { %v2457_v42 = vpop.f32.mrf.mxu0 }
0x16ab   :  { %v2458_v43 = vadd.f32 %v5200_v2, %v2457_v42  ;;  %v2469_v44 = vsel %vm269_vm2, %v2463_v34, -inf }
0x16ac   :  { %2470 = vmax.xlane.f32.xlu1 %v2469_v44 }
0x16ad   :  { %v2466_v45 = vsel %vm269_vm2, %v2458_v43, -inf }
0x16ae   :  { %2467 = vmax.xlane.f32.xlu0 %v2466_v45 }
0x16bd   :  { %2490 = vrot.lane.b32.xlu1 %v4900_v35, %s4741_s20 }
0x16c1   :  { %2581 = vrot.lane.b32.xlu1 %v4892_v29, %s4742_s21 }
0x16c5   :  { %2579 = vrot.lane.b32.xlu1 %v4887_v25, %s4742_s21 }
0x16c9   :  { %2577 = vrot.lane.b32.xlu1 %v4906_v36, %s4743_s3 }
0x1735   :  { %v2471_v50 = vpop.xlane.xlu1 %2470 }
0x1736   :  { %v2473_v51 = vsub.f32 %v2463_v34, %v2471_v50 }
0x1737   :  { %v2468_v52 = vpop.xlane.xlu0 %2467 }
0x1738   :  { %v2476_v53 = vmul.f32 1.442695, %v2473_v51  ;;  %v2472_v54 = vsub.f32 %v2458_v43, %v2468_v52 }
0x1739   :  { %v2491_v55 = vpop.permute.xlu1 %2490 }
0x173a   :  { %4639 = vpow2.f32 %v2476_v53  ;;  %v2474_v56 = vmul.f32 1.442695, %v2472_v54  ;;  %4382 = vmatprep.subr.mxu1 %v2491_v55 }
0x173b   :  { %4383 = vmatpush3.msra.mxu1 %v2491_v55 }
0x173c   :  { %4641 = vpow2.f32 %v2474_v56 }
0x173d   :  { %v2582_v12 = vpop.permute.xlu1 %2581 }
0x1741   :  { %v2580_v22 = vpop.permute.xlu1 %2579 }
0x1745   :  { %v2578_v23 = vpop.permute.xlu1 %2577 }
0x1747   :  { %v4640_v57 = vpop.eup %4639 }
0x1748   :  { %v2481_v62 = vsel %vm269_vm2, %v4640_v57, 0.0 }
0x1749   :  { %v4642_v0 = vpop.eup %4641  ;;  %2482 = vadd.xlane.f32.xlu0 %v2481_v62 }
0x174a   :  { %v2478_v1 = vsel %vm269_vm2, %v4642_v0, 0.0 }
0x174d   :  { %2479 = vadd.xlane.f32.xlu0 %v2478_v1 }
0x1763   :  { %2488 = vrot.lane.b32.xlu0 %v4908_v37, %s4741_s20 }
0x1767   :  { %2575 = vrot.lane.b32.xlu0 %v4890_v27, %s4743_s3 }
0x17d2   :  { %v2483_v3 = vpop.xlane.xlu0 %2482 }
0x17d3   :  { %4643 = vrcp.f32 %v2483_v3 }
0x17d6   :  { %v2480_v10 = vpop.xlane.xlu0 %2479 }
0x17d7   :  { %4645 = vrcp.f32 %v2480_v10 }
0x17da   :  { %v2489_v11 = vpop.permute.xlu0 %2488 }
0x17db   :  { %4384 = vmatprep.subr.mxu1 %v2489_v11 }
0x17dc   :  { %4385 = vmatpush3.msra.mxu1 %v2489_v11 }
0x17dd   :  { %4389 = vmatprep.subr.msk.mxu1 %vm183_vm1, %v2582_v12 }
0x17de   :  { %v2576_v21 = vpop.permute.xlu0 %2575 }
0x17e0   :  { %v4644_v13 = vpop.eup %4643 }
0x17e1   :  { %v2487_v20 = vmul.f32 %v4644_v13, %v4640_v57 }
0x17e4   :  { %v4646_v14 = vpop.eup %4645 }
0x17e5   :  { %v2486_v15 = vmul.f32 %v4646_v14, %v4642_v0 }
0x17e7   :  { %4386 = vmatprep.mubr.msk.f32.mxu1 %vm269_vm2, %v2486_v15 }
0x17e8   :  { %4387 = vmatmul.mubr.msk.f32.vlgmr.msra.gmra.mxu1 %vm269_vm2, %v2487_v20 }
0x17e9   :  { %4390 = vmatpush3.xpose.msk.msra.mxu1 %vm183_vm1, %v2582_v12  ;;  %4393 = vmatprep.mubr.msk.f32.mxu1 %vm183_vm1, %v2576_v21 }
0x17ea   :  { %4391 = vmatprep.subr.msk.mxu1 %vm183_vm1, %v2580_v22 }
0x17ed   :  { %4392 = vmatpush3.xpose.msk.msra.mxu1 %vm183_vm1, %v2580_v22 }
0x17f0   :  { %4394 = vmatmul.mubr.msk.f32.vlgmr.msra.gmra.mxu1 %vm183_vm1, %v2578_v23 }
0x18a8   :  { %v5287_v24 = vpop.f32.mrf.mxu1 }
0x18aa   :  { %v5289_v26 = vpop.f32.mrf.mxu1 }
0x18b0   :  { %v4395_v39 = vpop.f32.mrf.mxu1 }
0x18b1   :  { %v2663_v40 = vadd.f32 %v5194_v63, %v4395_v39 }
0x18b2   :  { %v2657_v28 = vpop.f32.mrf.mxu1 }
0x18b3   :  { %v2658_v30 = vadd.f32 %v5200_v2, %v2657_v28  ;;  %v2669_v33 = vsel %vm269_vm2, %v2663_v40, -inf }
0x18b4   :  { %2670 = vmax.xlane.f32.xlu1 %v2669_v33 }
0x18b5   :  { %v2666_v34 = vsel %vm269_vm2, %v2658_v30, -inf }
0x18b6   :  { %2667 = vmax.xlane.f32.xlu0 %v2666_v34 }
0x18c5   :  { %2690 = vrot.lane.b32.xlu1 %v4900_v35, %s4743_s3 }
0x18c9   :  { %2781 = vrot.lane.b32.xlu1 %v4892_v29, %s4744_s24 }
0x18cd   :  { %2779 = vrot.lane.b32.xlu1 %v4887_v25, %s4744_s24 }
0x18d1   :  { %2777 = vrot.lane.b32.xlu1 %v4906_v36, %s4745_s25 }
0x193d   :  { %v2671_v42 = vpop.xlane.xlu1 %2670 }
0x193e   :  { %v2673_v43 = vsub.f32 %v2663_v40, %v2671_v42 }
0x193f   :  { %v2668_v44 = vpop.xlane.xlu0 %2667 }
0x1940   :  { %v2676_v45 = vmul.f32 1.442695, %v2673_v43  ;;  %v2672_v50 = vsub.f32 %v2658_v30, %v2668_v44 }
0x1941   :  { %v2691_v51 = vpop.permute.xlu1 %2690 }
0x1942   :  { %4647 = vpow2.f32 %v2676_v45  ;;  %v2674_v52 = vmul.f32 1.442695, %v2672_v50  ;;  %4396 = vmatprep.subr.mxu0 %v2691_v51 }
0x1943   :  { %4397 = vmatpush3.msra.mxu0 %v2691_v51 }
0x1944   :  { %4649 = vpow2.f32 %v2674_v52 }
0x1945   :  { %v2782_v1 = vpop.permute.xlu1 %2781 }
0x1949   :  { %v2780_v14 = vpop.permute.xlu1 %2779 }
0x194d   :  { %v2778_v15 = vpop.permute.xlu1 %2777 }
0x194f   :  { %v4648_v53 = vpop.eup %4647 }
0x1950   :  { %v2681_v54 = vsel %vm269_vm2, %v4648_v53, 0.0 }
0x1951   :  { %v4650_v55 = vpop.eup %4649  ;;  %2682 = vadd.xlane.f32.xlu0 %v2681_v54 }
0x1952   :  { %v2678_v56 = vsel %vm269_vm2, %v4650_v55, 0.0 }
0x1955   :  { %2679 = vadd.xlane.f32.xlu0 %v2678_v56 }
0x196b   :  { %2688 = vrot.lane.b32.xlu0 %v4908_v37, %s4743_s3 }
0x196f   :  { %2775 = vrot.lane.b32.xlu0 %v4890_v27, %s4745_s25 }
0x19da   :  { %v2683_v57 = vpop.xlane.xlu0 %2682 }
0x19db   :  { %4651 = vrcp.f32 %v2683_v57 }
0x19de   :  { %v2680_v62 = vpop.xlane.xlu0 %2679 }
0x19df   :  { %4653 = vrcp.f32 %v2680_v62 }
0x19e2   :  { %v2689_v0 = vpop.permute.xlu0 %2688 }
0x19e3   :  { %4398 = vmatprep.subr.mxu0 %v2689_v0 }
0x19e4   :  { %4399 = vmatpush3.msra.mxu0 %v2689_v0 }
0x19e5   :  { %4403 = vmatprep.subr.msk.mxu0 %vm183_vm1, %v2782_v1 }
0x19e6   :  { %v2776_v13 = vpop.permute.xlu0 %2775 }
0x19e8   :  { %v4652_v3 = vpop.eup %4651 }
0x19e9   :  { %v2687_v12 = vmul.f32 %v4652_v3, %v4648_v53 }
0x19ec   :  { %v4654_v10 = vpop.eup %4653 }
0x19ed   :  { %v2686_v11 = vmul.f32 %v4654_v10, %v4650_v55 }
0x19ef   :  { %4400 = vmatprep.mubr.msk.f32.mxu0 %vm269_vm2, %v2686_v11 }
0x19f0   :  { %4401 = vmatmul.mubr.msk.f32.vlgmr.msra.gmra.mxu0 %vm269_vm2, %v2687_v12 }
0x19f1   :  { %4404 = vmatpush3.xpose.msk.msra.mxu0 %vm183_vm1, %v2782_v1  ;;  %4407 = vmatprep.mubr.msk.f32.mxu0 %vm183_vm1, %v2776_v13 }
0x19f2   :  { %4405 = vmatprep.subr.msk.mxu0 %vm183_vm1, %v2780_v14 }
0x19f5   :  { %4406 = vmatpush3.xpose.msk.msra.mxu0 %vm183_vm1, %v2780_v14 }
0x19f8   :  { %4408 = vmatmul.mubr.msk.f32.vlgmr.msra.gmra.mxu0 %vm183_vm1, %v2778_v15 }
0x1ab0   :  { %v5317_v20 = vpop.f32.mrf.mxu0 }
0x1ab2   :  { %v5319_v21 = vpop.f32.mrf.mxu0 }
0x1ab8   :  { %v4409_v22 = vpop.f32.mrf.mxu0 }
0x1ab9   :  { %v2863_v23 = vadd.f32 %v5194_v63, %v4409_v22 }
0x1aba   :  { %v2857_v39 = vpop.f32.mrf.mxu0 }
0x1abb   :  { %v2858_v40 = vadd.f32 %v5200_v2, %v2857_v39  ;;  %v2869_v28 = vsel %vm269_vm2, %v2863_v23, -inf }
0x1abc   :  { %2870 = vmax.xlane.f32.xlu1 %v2869_v28 }
0x1abd   :  { %v2866_v30 = vsel %vm269_vm2, %v2858_v40, -inf }
0x1abe   :  { %2867 = vmax.xlane.f32.xlu0 %v2866_v30 }
0x1acd   :  { %2890 = vrot.lane.b32.xlu1 %v4900_v35, %s4745_s25 }
0x1ad1   :  { %2981 = vrot.lane.b32.xlu1 %v4892_v29, %s4746_s9 }
0x1ad5   :  { %2979 = vrot.lane.b32.xlu1 %v4887_v25, %s4746_s9 }
0x1ad9   :  { %2977 = vrot.lane.b32.xlu1 %v4906_v36, %s4747_s28 }
0x1b45   :  { %v2871_v33 = vpop.xlane.xlu1 %2870 }
0x1b46   :  { %v2873_v34 = vsub.f32 %v2863_v23, %v2871_v33 }
0x1b47   :  { %v2868_v42 = vpop.xlane.xlu0 %2867 }
0x1b48   :  { %v2876_v43 = vmul.f32 1.442695, %v2873_v34  ;;  %v2872_v44 = vsub.f32 %v2858_v40, %v2868_v42 }
0x1b49   :  { %v2891_v45 = vpop.permute.xlu1 %2890 }
0x1b4a   :  { %4655 = vpow2.f32 %v2876_v43  ;;  %v2874_v50 = vmul.f32 1.442695, %v2872_v44  ;;  %4410 = vmatprep.subr.mxu1 %v2891_v45 }
0x1b4b   :  { %4411 = vmatpush3.msra.mxu1 %v2891_v45 }
0x1b4c   :  { %4657 = vpow2.f32 %v2874_v50 }
0x1b4d   :  { %v2982_v62 = vpop.permute.xlu1 %2981 }
0x1b51   :  { %v2980_v12 = vpop.permute.xlu1 %2979 }
0x1b55   :  { %v2978_v13 = vpop.permute.xlu1 %2977 }
0x1b57   :  { %v4656_v51 = vpop.eup %4655 }
0x1b58   :  { %v2881_v52 = vsel %vm269_vm2, %v4656_v51, 0.0 }
0x1b59   :  { %v4658_v53 = vpop.eup %4657  ;;  %2882 = vadd.xlane.f32.xlu0 %v2881_v52 }
0x1b5a   :  { %v2878_v54 = vsel %vm269_vm2, %v4658_v53, 0.0 }
0x1b5d   :  { %2879 = vadd.xlane.f32.xlu0 %v2878_v54 }
0x1b73   :  { %2888 = vrot.lane.b32.xlu0 %v4908_v37, %s4745_s25 }
0x1b77   :  { %2975 = vrot.lane.b32.xlu0 %v4890_v27, %s4747_s28 }
0x1be2   :  { %v2883_v55 = vpop.xlane.xlu0 %2882 }
0x1be3   :  { %4659 = vrcp.f32 %v2883_v55 }
0x1be6   :  { %v2880_v56 = vpop.xlane.xlu0 %2879 }
0x1be7   :  { %4661 = vrcp.f32 %v2880_v56 }
0x1bea   :  { %v2889_v57 = vpop.permute.xlu0 %2888 }
0x1beb   :  { %4412 = vmatprep.subr.mxu1 %v2889_v57 }
0x1bec   :  { %4413 = vmatpush3.msra.mxu1 %v2889_v57 }
0x1bed   :  { %4417 = vmatprep.subr.msk.mxu1 %vm183_vm1, %v2982_v62 }
0x1bee   :  { %v2976_v11 = vpop.permute.xlu0 %2975 }
0x1bf0   :  { %v4660_v0 = vpop.eup %4659 }
0x1bf1   :  { %v2887_v10 = vmul.f32 %v4660_v0, %v4656_v51 }
0x1bf4   :  { %v4662_v1 = vpop.eup %4661 }
0x1bf5   :  { %v2886_v3 = vmul.f32 %v4662_v1, %v4658_v53 }
0x1bf7   :  { %4414 = vmatprep.mubr.msk.f32.mxu1 %vm269_vm2, %v2886_v3 }
0x1bf8   :  { %4415 = vmatmul.mubr.msk.f32.vlgmr.msra.gmra.mxu1 %vm269_vm2, %v2887_v10 }
0x1bf9   :  { %4418 = vmatpush3.xpose.msk.msra.mxu1 %vm183_vm1, %v2982_v62  ;;  %4421 = vmatprep.mubr.msk.f32.mxu1 %vm183_vm1, %v2976_v11 }
0x1bfa   :  { %4419 = vmatprep.subr.msk.mxu1 %vm183_vm1, %v2980_v12 }
0x1bfd   :  { %4420 = vmatpush3.xpose.msk.msra.mxu1 %vm183_vm1, %v2980_v12 }
0x1c00   :  { %4422 = vmatmul.mubr.msk.f32.vlgmr.msra.gmra.mxu1 %vm183_vm1, %v2978_v13 }
0x1cb8   :  { %v5347_v14 = vpop.f32.mrf.mxu1 }
0x1cba   :  { %v5349_v15 = vpop.f32.mrf.mxu1 }
0x1cc0   :  { %v4423_v22 = vpop.f32.mrf.mxu1 }
0x1cc1   :  { %v3063_v23 = vadd.f32 %v5194_v63, %v4423_v22 }
0x1cc2   :  { %v3057_v39 = vpop.f32.mrf.mxu1 }
0x1cc3   :  { %v3058_v40 = vadd.f32 %v5200_v2, %v3057_v39  ;;  %v3069_v28 = vsel %vm269_vm2, %v3063_v23, -inf }
0x1cc4   :  { %3070 = vmax.xlane.f32.xlu1 %v3069_v28 }
0x1cc5   :  { %v3066_v30 = vsel %vm269_vm2, %v3058_v40, -inf }
0x1cc6   :  { %3067 = vmax.xlane.f32.xlu0 %v3066_v30 }
0x1cd5   :  { %3090 = vrot.lane.b32.xlu1 %v4900_v35, %s4747_s28 }
0x1cd9   :  { %3181 = vrot.lane.b32.xlu1 %v4892_v29, %s4748_s30 }
0x1cdd   :  { %3179 = vrot.lane.b32.xlu1 %v4887_v25, %s4748_s30 }
0x1ce1   :  { %3177 = vrot.lane.b32.xlu1 %v4906_v36, %s4749_s1 }
0x1d4d   :  { %v3071_v33 = vpop.xlane.xlu1 %3070 }
0x1d4e   :  { %v3073_v34 = vsub.f32 %v3063_v23, %v3071_v33 }
0x1d4f   :  { %v3068_v42 = vpop.xlane.xlu0 %3067 }
0x1d50   :  { %v3076_v43 = vmul.f32 1.442695, %v3073_v34  ;;  %v3072_v44 = vsub.f32 %v3058_v40, %v3068_v42 }
0x1d51   :  { %v3091_v45 = vpop.permute.xlu1 %3090 }
0x1d52   :  { %4663 = vpow2.f32 %v3076_v43  ;;  %v3074_v50 = vmul.f32 1.442695, %v3072_v44  ;;  %4424 = vmatprep.subr.mxu0 %v3091_v45 }
0x1d53   :  { %4425 = vmatpush3.msra.mxu0 %v3091_v45 }
0x1d54   :  { %4665 = vpow2.f32 %v3074_v50 }
0x1d55   :  { %v3182_v55 = vpop.permute.xlu1 %3181 }
0x1d5f   :  { %v4664_v51 = vpop.eup %4663 }
0x1d60   :  { %v3081_v29 = vsel %vm269_vm2, %v4664_v51, 0.0 }
0x1d61   :  { %v4666_v52 = vpop.eup %4665  ;;  %3082 = vadd.xlane.f32.xlu0 %v3081_v29 }
0x1d62   :  { %v3078_v25 = vsel %vm269_vm2, %v4666_v52, 0.0 }
0x1d65   :  { %3079 = vadd.xlane.f32.xlu0 %v3078_v25 }
0x1d7b   :  { %3088 = vrot.lane.b32.xlu0 %v4908_v37, %s4747_s28 }
0x1d7f   :  { %3175 = vrot.lane.b32.xlu0 %v4890_v27, %s4749_s1  ;;  %v3180_v27 = vpop.permute.xlu1 %3179 }
0x1d83   :  { %v3178_v3 = vpop.permute.xlu1 %3177 }
0x1dea   :  { %v3083_v36 = vpop.xlane.xlu0 %3082 }
0x1deb   :  { %4667 = vrcp.f32 %v3083_v36 }
0x1dee   :  { %v3080_v53 = vpop.xlane.xlu0 %3079 }
0x1def   :  { %4669 = vrcp.f32 %v3080_v53 }
0x1df2   :  { %v3089_v54 = vpop.permute.xlu0 %3088 }
0x1df3   :  { %4426 = vmatprep.subr.mxu0 %v3089_v54 }
0x1df4   :  { %4427 = vmatpush3.msra.mxu0 %v3089_v54 }
0x1df5   :  { %4431 = vmatprep.subr.msk.mxu0 %vm183_vm1, %v3182_v55 }
0x1df6   :  { %v3176_v1 = vpop.permute.xlu0 %3175 }
0x1df8   :  { %v4668_v56 = vpop.eup %4667 }
0x1df9   :  { %v3087_v0 = vmul.f32 %v4668_v56, %v4664_v51 }
0x1dfc   :  { %v4670_v57 = vpop.eup %4669 }
0x1dfd   :  { %v3086_v62 = vmul.f32 %v4670_v57, %v4666_v52 }
0x1dff   :  { %4428 = vmatprep.mubr.msk.f32.mxu0 %vm269_vm2, %v3086_v62 }
0x1e00   :  { %4429 = vmatmul.mubr.msk.f32.vlgmr.msra.gmra.mxu0 %vm269_vm2, %v3087_v0 }
0x1e01   :  { %4432 = vmatpush3.xpose.msk.msra.mxu0 %vm183_vm1, %v3182_v55  ;;  %4435 = vmatprep.mubr.msk.f32.mxu0 %vm183_vm1, %v3176_v1 }
0x1e02   :  { %4433 = vmatprep.subr.msk.mxu0 %vm183_vm1, %v3180_v27 }
0x1e05   :  { %4434 = vmatpush3.xpose.msk.msra.mxu0 %vm183_vm1, %v3180_v27 }
0x1e08   :  { %4436 = vmatmul.mubr.msk.f32.vlgmr.msra.gmra.mxu0 %vm183_vm1, %v3178_v3 }
0x1ec0   :  { %v4430_v10 = vpop.f32.mrf.mxu0 }
0x1ec2   :  { %v3166_v11 = vpop.f32.mrf.mxu0 }
0x1ec8   :  { %v4437_v12 = vpop.f32.mrf.mxu0 }
0x1ec9   :  { %v3263_v13 = vadd.f32 %v5194_v63, %v4437_v12 }
0x1eca   :  { %v3257_v22 = vpop.f32.mrf.mxu0 }
0x1ecb   :  { %v3258_v23 = vadd.f32 %v5200_v2, %v3257_v22  ;;  %v3269_v39 = vsel %vm269_vm2, %v3263_v13, -inf  ;;  %v3544_v2 = vld [vmem:[%s5603_s4 + $0x30] sm:$0xff] }
0x1ecc   :  { %3270 = vmax.xlane.f32.xlu1 %v3269_v39 }
0x1ecd   :  { %v3266_v40 = vsel %vm269_vm2, %v3258_v23, -inf }
0x1ece   :  { %3267 = vmax.xlane.f32.xlu0 %v3266_v40 }
0x1edd   :  { %3290 = vrot.lane.b32.xlu1 %v4900_v35, %s4749_s1 }
0x1ee1   :  { %3377 = vrot.lane.b32.xlu1 %v5005_v5, %s4748_s30 }
0x1ee5   :  { %3379 = vrot.lane.b32.xlu1 %v5003_v4, %s4748_s30 }
0x1ee9   :  { %3387 = vrot.lane.b32.xlu1 %v5007_v8, %s4746_s9 }
0x1eed   :  { %3395 = vrot.lane.b32.xlu1 %v5037_v46, %s4744_s24 }
0x1ef1   :  { %3403 = vrot.lane.b32.xlu1 %v5067_v18, %s4742_s21 }
0x1ef5   :  { %3411 = vrot.lane.b32.xlu1 %v5097_v58, %s4740_s18 }
0x1ef9   :  { %3419 = vrot.lane.b32.xlu1 %v5127_v38, %s4738_s16 }
0x1efd   :  { %3427 = vrot.lane.b32.xlu1 %v5157_v16, %s4736_s23 }
0x1f01   :  { %3435 = vrot.lane.b32.xlu1 %v5187_v60, %s4734_s22 }
0x1f05   :  { %3443 = vrot.lane.b32.xlu1 %v5227_v48, %s4732_s2  ;;  %v3543_v48 = vld [vmem:[%s5603_s4 + $0x28] sm:$0xff] }
0x1f09   :  { %3451 = vrot.lane.b32.xlu1 %v5257_v31, %s4730_s19  ;;  %v3541_v31 = vld [vmem:[%s5603_s4 + $0x18] sm:$0xff] }
0x1f0d   :  { %3459 = vrot.lane.b32.xlu1 %v5287_v24, %s4728_s17  ;;  %v3539_v24 = vld [vmem:[%s5603_s4 + $0x8] sm:$0xff] }
0x1f11   :  { %3467 = vrot.lane.b32.xlu1 %v5317_v20, %s4726_s15 }
0x1f15   :  { %3475 = vrot.lane.b32.xlu1 %v5347_v14, %s4724_s29 }
0x1f19   :  { %3483 = vrot.lane.b32.xlu1 %v4430_v10, %s4722_s27 }
0x1f55   :  { %v3271_v35 = vpop.xlane.xlu1 %3270 }
0x1f56   :  { %v3273_v4 = vsub.f32 %v3263_v13, %v3271_v35 }
0x1f57   :  { %v3268_v5 = vpop.xlane.xlu0 %3267 }
0x1f58   :  { %v3276_v8 = vmul.f32 1.442695, %v3273_v4  ;;  %v3272_v46 = vsub.f32 %v3258_v23, %v3268_v5 }
0x1f59   :  { %v3291_v18 = vpop.permute.xlu1 %3290 }
0x1f5a   :  { %4671 = vpow2.f32 %v3276_v8  ;;  %v3274_v58 = vmul.f32 1.442695, %v3272_v46  ;;  %4438 = vmatprep.subr.mxu1 %v3291_v18 }
0x1f5b   :  { %4439 = vmatpush3.msra.mxu1 %v3291_v18 }
0x1f5c   :  { %4673 = vpow2.f32 %v3274_v58 }
0x1f5d   :  { %v3378_v14 = vpop.permute.xlu1 %3377 }
0x1f5e   :  { %v3495_v27 = vsel %vm183_vm1, %v4963_v7, %v3378_v14  ;;  %v4693_v14 = vld [vmem:[%s5599_s0 + $0x8] sm:$0xff] }
0x1f67   :  { %v4672_v38 = vpop.eup %4671 }
0x1f68   :  { %v3281_v16 = vsel %vm269_vm2, %v4672_v38, 0.0 }
0x1f69   :  { %v4674_v60 = vpop.eup %4673  ;;  %3282 = vadd.xlane.f32.xlu0 %v3281_v16 }
0x1f6a   :  { %v3278_v63 = vsel %vm269_vm2, %v4674_v60, 0.0 }
0x1f6d   :  { %3279 = vadd.xlane.f32.xlu0 %v3278_v63 }
0x1f83   :  { %3288 = vrot.lane.b32.xlu0 %v4908_v37, %s4749_s1 }
0x1f87   :  { %3385 = vrot.lane.b32.xlu0 %v5009_v9, %s4746_s9 }
0x1f8b   :  { %3393 = vrot.lane.b32.xlu0 %v5039_v47, %s4744_s24 }
0x1f8f   :  { %3401 = vrot.lane.b32.xlu0 %v5069_v19, %s4742_s21 }
0x1f93   :  { %3409 = vrot.lane.b32.xlu0 %v5099_v59, %s4740_s18 }
0x1f97   :  { %3417 = vrot.lane.b32.xlu0 %v5129_v41, %s4738_s16 }
0x1f9b   :  { %3425 = vrot.lane.b32.xlu0 %v5159_v17, %s4736_s23 }
0x1f9f   :  { %3433 = vrot.lane.b32.xlu0 %v5189_v61, %s4734_s22  ;;  %v3545_v61 = vld [vmem:[%s5603_s4 + $0x38] sm:$0xff] }
0x1fa0   :  { %4445 = vmatprep.subr.mxu0 %v3545_v61 }
0x1fa1   :  { %4446 = vmatpush3.msra.mxu0 %v3545_v61 }
0x1fa2   :  { %4447 = vmatprep.subr.mxu0 %v3544_v2 }
0x1fa3   :  { %3441 = vrot.lane.b32.xlu0 %v5229_v49, %s4732_s2  ;;  %4448 = vmatpush3.msra.mxu0 %v3544_v2  ;;  %v3542_v49 = vld [vmem:[%s5603_s4 + $0x20] sm:$0xff] }
0x1fa4   :  { %4449 = vmatprep.subr.mxu0 %v3543_v48 }
0x1fa5   :  { %4450 = vmatpush3.msra.mxu0 %v3543_v48 }
0x1fa6   :  { %4451 = vmatprep.subr.mxu0 %v3542_v49 }
0x1fa7   :  { %3449 = vrot.lane.b32.xlu0 %v5259_v32, %s4730_s19  ;;  %4452 = vmatpush3.msra.mxu0 %v3542_v49  ;;  %v3540_v32 = vld [vmem:[%s5603_s4 + $0x10] sm:$0xff] }
0x1fa8   :  { %4453 = vmatprep.subr.mxu0 %v3541_v31 }
0x1fa9   :  { %4454 = vmatpush3.msra.mxu0 %v3541_v31 }
0x1faa   :  { %4455 = vmatprep.subr.mxu0 %v3540_v32 }
0x1fab   :  { %3457 = vrot.lane.b32.xlu0 %v5289_v26, %s4728_s17  ;;  %4456 = vmatpush3.msra.mxu0 %v3540_v32  ;;  %v3538_v26 = vld [vmem:[%s5603_s4] sm:$0xff] }
0x1fac   :  { %4457 = vmatprep.subr.mxu0 %v3539_v24 }
0x1fad   :  { %4458 = vmatpush3.msra.mxu0 %v3539_v24  ;;  %v4044_v24 = vld [vmem:[%s5604_s5] ss:$0 sm:$0xff] }
0x1fae   :  { %4459 = vmatprep.subr.mxu0 %v3538_v26 }
0x1faf   :  { %3465 = vrot.lane.b32.xlu0 %v5319_v21, %s4726_s15  ;;  %4460 = vmatpush3.msra.mxu0 %v3538_v26 }
0x1fb3   :  { %3473 = vrot.lane.b32.xlu0 %v5349_v15, %s4724_s29  ;;  %v3380_v15 = vpop.permute.xlu1 %3379 }
0x1fb4   :  { %v3496_v3 = vsel %vm183_vm1, %v4961_v6, %v3380_v15 }
0x1fb7   :  { %3481 = vrot.lane.b32.xlu0 %v3166_v11, %s4722_s27  ;;  %v3388_v28 = vpop.permute.xlu1 %3387 }
0x1fb8   :  { %v3499_v11 = vsel %vm3497_vm3, %v3496_v3, %v3388_v28 }
0x1fbb   :  { %v3396_v33 = vpop.permute.xlu1 %3395 }
0x1fbc   :  { %v3502_v22 = vsel %vm3500_vm4, %v3499_v11, %v3396_v33 }
0x1fbf   :  { %v3404_v42 = vpop.permute.xlu1 %3403 }
0x1fc0   :  { %v3504_v40 = vsel %vm269_vm2, %v3502_v22, %v3404_v42 }
0x1fc3   :  { %v3412_v44 = vpop.permute.xlu1 %3411 }
0x1fc4   :  { %v3507_v4 = vsel %vm3505_vm5, %v3504_v40, %v3412_v44 }
0x1fc7   :  { %v3420_v50 = vpop.permute.xlu1 %3419 }
0x1fc8   :  { %v3510_v5 = vsel %vm3508_vm6, %v3507_v4, %v3420_v50 }
0x1fcb   :  { %v3428_v29 = vpop.permute.xlu1 %3427 }
0x1fcc   :  { %v3513_v8 = vsel %vm3511_vm7, %v3510_v5, %v3428_v29 }
0x1fcf   :  { %v3436_v25 = vpop.permute.xlu1 %3435 }
0x1fd0   :  { %v3516_v18 = vsel %vm3514_vm8, %v3513_v8, %v3436_v25 }
0x1fd3   :  { %v3444_v53 = vpop.permute.xlu1 %3443 }
0x1fd4   :  { %v3519_v16 = vsel %vm3517_vm9, %v3516_v18, %v3444_v53  ;;  %v3810_v18 = vld [vmem:[%s5609_s10 + $0x78] sm:$0xff] }
0x1fd7   :  { %v3452_v55 = vpop.permute.xlu1 %3451 }
0x1fdb   :  { %v3460_v57 = vpop.permute.xlu1 %3459 }
0x1fdf   :  { %v3468_v0 = vpop.permute.xlu1 %3467 }
0x1fe3   :  { %v3476_v12 = vpop.permute.xlu1 %3475 }
0x1fe7   :  { %v3484_v58 = vpop.permute.xlu1 %3483 }
0x1ff2   :  { %v3283_v37 = vpop.xlane.xlu0 %3282 }
0x1ff3   :  { %4675 = vrcp.f32 %v3283_v37  ;;  %v3522_v37 = vsel %vm3520_vm10, %v3519_v16, %v3452_v55  ;;  %v3687_v55 = vld [vmem:[%s5607_s8 + $0x30] sm:$0xff]  ;;  %v3807_v16 = vld [vmem:[%s5609_s10 + $0x60] sm:$0xff] }
0x1ff6   :  { %v3280_v9 = vpop.xlane.xlu0 %3279 }
0x1ff7   :  { %4677 = vrcp.f32 %v3280_v9 }
0x1ffa   :  { %v3289_v47 = vpop.permute.xlu0 %3288 }
0x1ffb   :  { %4440 = vmatprep.subr.mxu1 %v3289_v47 }
0x1ffc   :  { %4441 = vmatpush3.msra.mxu1 %v3289_v47  ;;  %v3525_v47 = vsel %vm3523_vm11, %v3522_v37, %v3460_v57  ;;  %v3685_v57 = vld [vmem:[%s5607_s8 + $0x20] sm:$0xff]  ;;  %v3804_v37 = vld [vmem:[%s5609_s10 + $0x48] sm:$0xff] }
0x1ffd   :  { %4483 = vmatprep.subr.mxu1 %v3810_v18 }
0x1ffe   :  { %v3386_v30 = vpop.permute.xlu0 %3385 }
0x1fff   :  { %v3498_v10 = vsel %vm3497_vm3, %v3495_v27, %v3386_v30  ;;  %v4694_v30 = vld [vmem:[%s5599_s0] sm:$0xff] }
0x2000   :  { %v4676_v19 = vpop.eup %4675  ;;  %v3681_v27 = vld [vmem:[%s5607_s8] sm:$0xff] }
0x2001   :  { %v3287_v17 = vmul.f32 %v4676_v19, %v4672_v38 }
0x2002   :  { %v3394_v34 = vpop.permute.xlu0 %3393 }
0x2003   :  { %v3501_v13 = vsel %vm3500_vm4, %v3498_v10, %v3394_v34 }
0x2004   :  { %v4678_v59 = vpop.eup %4677 }
0x2005   :  { %v3286_v41 = vmul.f32 %v4678_v59, %v4674_v60  ;;  %v3528_v59 = vsel %vm3526_vm12, %v3525_v47, %v3468_v0  ;;  %v3683_v0 = vld [vmem:[%s5607_s8 + $0x10] sm:$0xff]  ;;  %v3802_v47 = vld [vmem:[%s5609_s10 + $0x38] sm:$0xff] }
0x2006   :  { %v3402_v43 = vpop.permute.xlu0 %3401  ;;  %v3531_v61 = vsel %vm3529_vm13, %v3528_v59, %v3476_v12  ;;  %v3800_v59 = vld [vmem:[%s5609_s10 + $0x28] sm:$0xff] }
0x2007   :  { %4442 = vmatprep.mubr.msk.f32.mxu1 %vm269_vm2, %v3286_v41  ;;  %v3503_v23 = vsel %vm269_vm2, %v3501_v13, %v3402_v43  ;;  %v3534_v49 = vsel %vm3532_vm14, %v3531_v61, %v3484_v58  ;;  %v3809_v58 = vld [vmem:[%s5609_s10 + $0x70] sm:$0xff] }
0x2008   :  { %4443 = vmatmul.mubr.msk.f32.vlgmr.msra.gmra.mxu1 %vm269_vm2, %v3287_v17  ;;  %v3797_v61 = vld [vmem:[%s5609_s10 + $0x10] sm:$0xff] }
0x2009   :  { %4484 = vmatpush3.msra.mxu1 %v3810_v18 }
0x200a   :  { %v3410_v45 = vpop.permute.xlu0 %3409  ;;  %4485 = vmatprep.subr.mxu1 %v3809_v58 }
0x200b   :  { %v3506_v35 = vsel %vm3505_vm5, %v3503_v23, %v3410_v45  ;;  %4486 = vmatpush3.msra.mxu1 %v3809_v58  ;;  %v4053_v58 = vld [vmem:[%s5611_s12] ss:$0 sm:$0xff] }
0x200e   :  { %v3418_v51 = vpop.permute.xlu0 %3417 }
0x200f   :  { %v3509_v7 = vsel %vm3508_vm6, %v3506_v35, %v3418_v51  ;;  %v4048_v35 = vld [vmem:[%s5606_s7] ss:$0 sm:$0xff] }
0x2012   :  { %v3426_v52 = vpop.permute.xlu0 %3425 }
0x2013   :  { %v3512_v6 = vsel %vm3511_vm7, %v3509_v7, %v3426_v52 }
0x2016   :  { %v3434_v36 = vpop.permute.xlu0 %3433 }
0x2017   :  { %v3515_v46 = vsel %vm3514_vm8, %v3512_v6, %v3434_v36 }
0x201a   :  { %v3442_v54 = vpop.permute.xlu0 %3441 }
0x201b   :  { %v3518_v38 = vsel %vm3517_vm9, %v3515_v46, %v3442_v54  ;;  %v3688_v54 = vld [vmem:[%s5607_s8 + $0x38] sm:$0xff] }
0x201c   :  { %4464 = vmatprep.subr.mxu0 %v3688_v54 }
0x201e   :  { %v3450_v56 = vpop.permute.xlu0 %3449 }
0x201f   :  { %v3521_v60 = vsel %vm3520_vm10, %v3518_v38, %v3450_v56  ;;  %v3686_v56 = vld [vmem:[%s5607_s8 + $0x28] sm:$0xff] }
0x2020   :  { %v3808_v38 = vld [vmem:[%s5609_s10 + $0x68] sm:$0xff] }
0x2021   :  { %4487 = vmatprep.subr.mxu1 %v3808_v38 }
0x2022   :  { %v3458_v62 = vpop.permute.xlu0 %3457  ;;  %4488 = vmatpush3.msra.mxu1 %v3808_v38 }
0x2023   :  { %v3524_v9 = vsel %vm3523_vm11, %v3521_v60, %v3458_v62  ;;  %v3684_v62 = vld [vmem:[%s5607_s8 + $0x18] sm:$0xff]  ;;  %4489 = vmatprep.subr.mxu1 %v3807_v16 }
0x2024   :  { %4490 = vmatpush3.msra.mxu1 %v3807_v16  ;;  %v3806_v60 = vld [vmem:[%s5609_s10 + $0x58] sm:$0xff] }
0x2025   :  { %4491 = vmatprep.subr.mxu1 %v3806_v60 }
0x2026   :  { %v3466_v1 = vpop.permute.xlu0 %3465  ;;  %4492 = vmatpush3.msra.mxu1 %v3806_v60  ;;  %v4054_v60 = vld [vmem:[%s5612_s13] ss:$0 sm:$0xff] }
0x2027   :  { %v3527_v19 = vsel %vm3526_vm12, %v3524_v9, %v3466_v1  ;;  %v3682_v1 = vld [vmem:[%s5607_s8 + $0x8] sm:$0xff]  ;;  %v3803_v9 = vld [vmem:[%s5609_s10 + $0x40] sm:$0xff] }
0x202a   :  { %v3474_v39 = vpop.permute.xlu0 %3473 }
0x202b   :  { %v3530_v41 = vsel %vm3529_vm13, %v3527_v19, %v3474_v39  ;;  %v4047_v39 = vld [vmem:[%s5605_s6] ss:$0 sm:$0xff]  ;;  %v3801_v19 = vld [vmem:[%s5609_s10 + $0x30] sm:$0xff] }
0x202e   :  { %v3482_v63 = vpop.permute.xlu0 %3481 }
0x202f   :  { %v3533_v2 = vsel %vm3532_vm14, %v3530_v41, %v3482_v63  ;;  %v3805_v63 = vld [vmem:[%s5609_s10 + $0x50] sm:$0xff]  ;;  %v3799_v41 = vld [vmem:[%s5609_s10 + $0x20] sm:$0xff] }
0x2030   :  { %4493 = vmatprep.subr.mxu1 %v3805_v63 }
0x2031   :  { %4494 = vmatpush3.msra.mxu1 %v3805_v63 }
0x2032   :  { %4495 = vmatprep.subr.mxu1 %v3804_v37 }
0x2033   :  { %4496 = vmatpush3.msra.mxu1 %v3804_v37 }
0x2034   :  { %4497 = vmatprep.subr.mxu1 %v3803_v9 }
0x2035   :  { %4498 = vmatpush3.msra.mxu1 %v3803_v9 }
0x2036   :  { %4499 = vmatprep.subr.mxu1 %v3802_v47 }
0x2037   :  { %4500 = vmatpush3.msra.mxu1 %v3802_v47 }
0x2038   :  { %4501 = vmatprep.subr.mxu1 %v3801_v19 }
0x2039   :  { %4502 = vmatpush3.msra.mxu1 %v3801_v19 }
0x203a   :  { %4503 = vmatprep.subr.mxu1 %v3800_v59 }
0x203b   :  { %4504 = vmatpush3.msra.mxu1 %v3800_v59 }
0x203c   :  { %4505 = vmatprep.subr.mxu1 %v3799_v41 }
0x203d   :  { %4506 = vmatpush3.msra.mxu1 %v3799_v41 }
0x20c8   :  { %v4444_v20 = vpop.f32.mrf.mxu1 }
0x20c9   :  { %3491 = vrot.lane.b32.xlu1 %v4444_v20, %s4720_s26 }
0x20ca   :  { %v3366_v21 = vpop.f32.mrf.mxu1 }
0x20cb   :  { %3489 = vrot.lane.b32.xlu0 %v3366_v21, %s4720_s26 }
0x213b   :  { %v3492_v17 = vpop.permute.xlu1 %3491 }
0x213c   :  { %v3537_v32 = vsel %vm3535_vm15, %v3534_v49, %v3492_v17  ;;  %v3798_v17 = vld [vmem:[%s5609_s10 + $0x18] sm:$0xff]  ;;  %v4049_v49 = vld [vmem:[#allocation2] ss:$0 sm:$0xff] }
0x213d   :  { %v3490_v48 = vpop.permute.xlu0 %3489  ;;  %4507 = vmatprep.subr.mxu1 %v3798_v17 }
0x213e   :  { %v3536_v31 = vsel %vm3535_vm15, %v3533_v2, %v3490_v48  ;;  %4508 = vmatpush3.msra.mxu1 %v3798_v17  ;;  %v3796_v2 = vld [vmem:[%s5609_s10 + $0x8] sm:$0xff]  ;;  %v3795_v48 = vld [vmem:[%s5609_s10] sm:$0xff] }
0x213f   :  { %4461 = vmatprep.mubr.msk.f32.mxu0 %vm89_vm0, %v3536_v31  ;;  %4509 = vmatprep.subr.mxu1 %v3797_v61 }
0x2140   :  { %4462 = vmatmul.mubr.msk.f32.vlgmr.msra.gmra.mxu0 %vm89_vm0, %v3537_v32  ;;  %4510 = vmatpush3.msra.mxu1 %v3797_v61 }
0x2141   :  { %4465 = vmatpush3.msra.mxu0 %v3688_v54  ;;  %4511 = vmatprep.subr.mxu1 %v3796_v2 }
0x2142   :  { %4466 = vmatprep.subr.mxu0 %v3687_v55  ;;  %4512 = vmatpush3.msra.mxu1 %v3796_v2 }
0x2143   :  { %4467 = vmatpush3.msra.mxu0 %v3687_v55  ;;  %4513 = vmatprep.subr.mxu1 %v3795_v48 }
0x2144   :  { %4468 = vmatprep.subr.mxu0 %v3686_v56  ;;  %4514 = vmatpush3.msra.mxu1 %v3795_v48 }
0x2145   :  { %4469 = vmatpush3.msra.mxu0 %v3686_v56 }
0x2146   :  { %4470 = vmatprep.subr.mxu0 %v3685_v57 }
0x2147   :  { %4471 = vmatpush3.msra.mxu0 %v3685_v57 }
0x2148   :  { %4472 = vmatprep.subr.mxu0 %v3684_v62 }
0x2149   :  { %4473 = vmatpush3.msra.mxu0 %v3684_v62 }
0x214a   :  { %4474 = vmatprep.subr.mxu0 %v3683_v0 }
0x214b   :  { %4475 = vmatpush3.msra.mxu0 %v3683_v0 }
0x214c   :  { %4476 = vmatprep.subr.mxu0 %v3682_v1 }
0x214d   :  { %4477 = vmatpush3.msra.mxu0 %v3682_v1 }
0x214e   :  { %4478 = vmatprep.subr.mxu0 %v3681_v27 }
0x214f   :  { %4479 = vmatpush3.msra.mxu0 %v3681_v27 }
0x2200   :  { %v4463_v26 = vpop.f32.mrf.mxu0 }
0x2201   :  { %v3631_v20 = vadd.f32 %v4463_v26, %v4044_v24 }
0x2202   :  { %v3625_v21 = vpop.f32.mrf.mxu0 }
0x2203   :  { %v3635_v15 = vadd.f32 %v4693_v14, %v3631_v20  ;;  %v3626_v28 = vadd.f32 %v4044_v24, %v3625_v21 }
0x2205   :  { %v3634_v33 = vadd.f32 %v4694_v30, %v3626_v28  ;;  %v3641_v34 = vsel %vm89_vm0, %v3635_v15, 0.0 }
0x2206   :  { %3642 = vadd.xlane.f32.xlu1 %v3641_v34 }
0x2207   :  { %v3638_v42 = vsel %vm89_vm0, %v3634_v33, 0.0 }
0x2208   :  { %3639 = vadd.xlane.f32.xlu0 %v3638_v42 }
0x228f   :  { %v3643_v43 = vpop.xlane.xlu1 %3642 }
0x2290   :  { %v3646_v44 = vmul.f32 0.015625, %v3643_v43 }
0x2291   :  { %v3640_v45 = vpop.xlane.xlu0 %3639 }
0x2292   :  { %v3645_v50 = vmul.f32 0.015625, %v3640_v45  ;;  %v3648_v51 = vsub.f32 %v3635_v15, %v3646_v44 }
0x2294   :  { %v3647_v29 = vsub.f32 %v3634_v33, %v3645_v50  ;;  %v3650_v36 = vmul.f32 %v3648_v51, %v3648_v51 }
0x2296   :  { %v3649_v52 = vmul.f32 %v3647_v29, %v3647_v29  ;;  %v3654_v53 = vsel %vm89_vm0, %v3650_v36, 0.0 }
0x2298   :  { %v3651_v25 = vsel %vm89_vm0, %v3649_v52, 0.0 }
0x2299   :  { %3652 = vadd.xlane.f32.xlu0 %v3651_v25 }
0x229d   :  { %3655 = vadd.xlane.f32.xlu0 %v3654_v53  ;;  %v4052_v53 = vld [vmem:[%s5610_s11] ss:$0 sm:$0xff] }
0x2322   :  { %v3653_v3 = vpop.xlane.xlu0 %3652 }
0x2323   :  { %v3657_v10 = vmul.f32 0.015625, %v3653_v3 }
0x2325   :  { %v3659_v11 = vadd.f32 1e-05, %v3657_v10 }
0x2326   :  { %v3656_v12 = vpop.xlane.xlu0 %3655 }
0x2327   :  { %4679 = vrsqrt.f32 %v3659_v11  ;;  %v3658_v13 = vmul.f32 0.015625, %v3656_v12 }
0x2329   :  { %v3660_v22 = vadd.f32 1e-05, %v3658_v13 }
0x232b   :  { %4681 = vrsqrt.f32 %v3660_v22 }
0x2334   :  { %v4680_v23 = vpop.eup %4679 }
0x2335   :  { %v3663_v40 = vmul.f32 %v4680_v23, %v3647_v29 }
0x2337   :  { %v3671_v4 = vmul.f32 %v4047_v39, %v3663_v40 }
0x2338   :  { %v4682_v7 = vpop.eup %4681 }
0x2339   :  { %v3664_v5 = vmul.f32 %v4682_v7, %v3648_v51  ;;  %v5520_v6 = vadd.f32 %v4048_v35, %v3671_v4 }
0x233b   :  { %v3672_v8 = vmul.f32 %v4047_v39, %v3664_v5  ;;  %4480 = vmatprep.mubr.msk.f32.mxu0 %vm89_vm0, %v5520_v6 }
0x233d   :  { %v5524_v46 = vadd.f32 %v4048_v35, %v3672_v8 }
0x233f   :  { %4481 = vmatmul.mubr.msk.f32.vlgmr.msra.gmra.mxu0 %vm89_vm0, %v5524_v46 }
0x23ff   :  { %v4482_v31 = vpop.f32.mrf.mxu0 }
0x2400   :  { %v3774_v32 = vadd.f32 %v4482_v31, %v4049_v49 }
0x2401   :  { %v3768_v24 = vpop.f32.mrf.mxu0 }
0x2402   :  { %v3780_v26 = vmul.f32 0.044715, %v3774_v32  ;;  %v3769_v20 = vadd.f32 %v4049_v49, %v3768_v24  ;;  %v3778_v52 = vmul.f32 0.5, %v3774_v32 }
0x2404   :  { %v3782_v21 = vmul.f32 %v3780_v26, %v3774_v32  ;;  %v3779_v14 = vmul.f32 0.044715, %v3769_v20  ;;  %v3777_v51 = vmul.f32 0.5, %v3769_v20 }
0x2406   :  { %v3784_v15 = vmul.f32 %v3782_v21, %v3774_v32  ;;  %v3781_v28 = vmul.f32 %v3779_v14, %v3769_v20 }
0x2408   :  { %v3786_v30 = vadd.f32 %v3784_v15, %v3774_v32  ;;  %v3783_v33 = vmul.f32 %v3781_v28, %v3769_v20 }
0x240a   :  { %v3785_v34 = vadd.f32 %v3783_v33, %v3769_v20  ;;  %v3788_v42 = vmul.f32 0.7978846, %v3786_v30 }
0x240c   :  { %v3787_v43 = vmul.f32 0.7978846, %v3785_v34  ;;  %4683 = vtanh.f32 %v3788_v42 }
0x240e   :  { %4685 = vtanh.f32 %v3787_v43 }
0x2419   :  { %v4684_v44 = vpop.eup %4683 }
0x241a   :  { %v3792_v50 = vadd.f32 1.0, %v4684_v44 }
0x241b   :  { %v4686_v45 = vpop.eup %4685 }
0x241c   :  { %v3791_v29 = vadd.f32 1.0, %v4686_v45  ;;  %v3794_v36 = vmul.f32 %v3792_v50, %v3778_v52 }
0x241e   :  { %v3793_v25 = vmul.f32 %v3791_v29, %v3777_v51 }
0x2420   :  { %4515 = vmatprep.mubr.f32.mxu1 %v3793_v25 }
0x2421   :  { %4516 = vmatmul.mubr.f32.vlgmr.msra.gmra.mxu1 %v3794_v36 }
0x24e1   :  { %v4517_v54 = vpop.f32.mrf.mxu1 }
0x24e2   :  { %v3890_v55 = vadd.f32 %v4517_v54, %v4052_v53 }
0x24e3   :  { %v3884_v56 = vpop.f32.mrf.mxu1 }
0x24e4   :  { %v3894_v57 = vadd.f32 %v3890_v55, %v5524_v46  ;;  %v3885_v62 = vadd.f32 %v4052_v53, %v3884_v56 }
0x24e6   :  { %v3893_v0 = vadd.f32 %v3885_v62, %v5520_v6  ;;  %v3900_v1 = vsel %vm89_vm0, %v3894_v57, 0.0 }
0x24e7   :  { %3901 = vadd.xlane.f32.xlu0 %v3900_v1 }
0x24e8   :  { %v3897_v27 = vsel %vm89_vm0, %v3893_v0, 0.0 }
0x24e9   :  { %3898 = vadd.xlane.f32.xlu1 %v3897_v27 }
0x2570   :  { %v3902_v3 = vpop.xlane.xlu0 %3901 }
0x2571   :  { %v3904_v10 = vmul.f32 0.015625, %v3902_v3 }
0x2572   :  { %v3899_v11 = vpop.xlane.xlu1 %3898 }
0x2573   :  { %v3906_v12 = vsub.f32 %v3894_v57, %v3904_v10  ;;  %v3903_v13 = vmul.f32 0.015625, %v3899_v11 }
0x2575   :  { %v3905_v22 = vsub.f32 %v3893_v0, %v3903_v13  ;;  %v3908_v23 = vmul.f32 %v3906_v12, %v3906_v12 }
0x2577   :  { %v3912_v39 = vsel %vm89_vm0, %v3908_v23, 0.0  ;;  %v3907_v40 = vmul.f32 %v3905_v22, %v3905_v22 }
0x2578   :  { %3913 = vadd.xlane.f32.xlu0 %v3912_v39 }
0x2579   :  { %v3909_v35 = vsel %vm89_vm0, %v3907_v40, 0.0 }
0x257a   :  { %3910 = vadd.xlane.f32.xlu1 %v3909_v35 }
0x2601   :  { %v3914_v4 = vpop.xlane.xlu0 %3913 }
0x2602   :  { %v3916_v7 = vmul.f32 0.015625, %v3914_v4 }
0x2603   :  { %v3911_v5 = vpop.xlane.xlu1 %3910 }
0x2604   :  { %v3918_v6 = vadd.f32 1e-05, %v3916_v7  ;;  %v3915_v8 = vmul.f32 0.015625, %v3911_v5 }
0x2606   :  { %4687 = vrsqrt.f32 %v3918_v6  ;;  %v3917_v46 = vadd.f32 1e-05, %v3915_v8 }
0x2608   :  { %4689 = vrsqrt.f32 %v3917_v46 }
0x2613   :  { %v4688_v18 = vpop.eup %4687 }
0x2614   :  { %v3922_v38 = vmul.f32 %v4688_v18, %v3906_v12 }
0x2615   :  { %v4690_v16 = vpop.eup %4689 }
0x2616   :  { %v3930_v63 = vmul.f32 %v4053_v58, %v3922_v38  ;;  %v3921_v37 = vmul.f32 %v4690_v16, %v3905_v22 }
0x2618   :  { %v3938_v9 = vadd.f32 %v4054_v60, %v3930_v63  ;;  %v3929_v47 = vmul.f32 %v4053_v58, %v3921_v37 }
0x261a   :  { %3940 = vst.msk [vmem:[%s5613_s14 + $0x8] sm:$0xff] %vm89_vm0, %v3938_v9  ;;  %v3937_v19 = vadd.f32 %v4054_v60, %v3929_v47 }
0x261c   :  { %3939 = vst.msk [vmem:[%s5613_s14] sm:$0xff] %vm89_vm0, %v3937_v19 }
0x261d   :  { %3945 = vsyncpa [#allocation3], 1 }

// kernel: _lambda_.6
= control target key start
LH: loop header
LB: loop body
LE: loop exit
PB: predicated region body
PF: predicated region fallthrough
CT: control target
= control target key end

     0   :  { %v4681_v3 = vmov 0.0   ;;  %vm77_vm0 = vcmask 523264   ;;  %v67_v19 = vlaneseq  ;;  %vm171_vm1 = vcmask 31744   ;;  %s4682_s18 = smov 64   ;;  %s4683_s22 = smov 60   ;;  %s5562_s2 = inlined_call_operand.vmem [shape: f32[64,192], index: 2, kind: input, shape index: {}]   ;;  %s5563_s0 = inlined_call_operand.vmem [shape: f32[16,64], index: 0, kind: input, shape index: {}]   ;;  %s5564_s3 = inlined_call_operand.vmem [shape: f32[1,192], index: 3, kind: input, shape index: {}]   ;;  %s5565_s1 = inlined_call_operand.vmem [shape: f32[16,16], index: 1, kind: input, shape index: {}]   ;;  %s5566_s4 = inlined_call_operand.vmem [shape: f32[64,64], index: 4, kind: input, shape index: {}]   ;;  %s5567_s5 = inlined_call_operand.vmem [shape: f32[1,64], index: 5, kind: input, shape index: {}]   ;;  %s5568_s8 = inlined_call_operand.vmem [shape: f32[64,128], index: 8, kind: input, shape index: {}]   ;;  %s5569_s6 = inlined_call_operand.vmem [shape: f32[1,64], index: 6, kind: input, shape index: {}]   ;;  %s5570_s7 = inlined_call_operand.vmem [shape: f32[1,64], index: 7, kind: input, shape index: {}]   ;;  %s5571_s10 = inlined_call_operand.vmem [shape: f32[128,64], index: 10, kind: input, shape index: {}]   ;;  %s5572_s9 = inlined_call_operand.vmem [shape: f32[1,128], index: 9, kind: input, shape index: {}]   ;;  %s5573_s11 = inlined_call_operand.vmem [shape: f32[1,64], index: 11, kind: input, shape index: {}]   ;;  %s5574_s12 = inlined_call_operand.vmem [shape: f32[1,64], index: 12, kind: input, shape index: {}]   ;;  %s5575_s13 = inlined_call_operand.vmem [shape: f32[1,64], index: 13, kind: input, shape index: {}]   ;;  %s5576_s14 = inlined_call_operand.vmem [shape: f32[16,64], index: 14, kind: output, shape index: {}]  }
   0x1   :  { %v64_v0 = vld [vmem:[%s5562_s2 + $0x78] sm:$0xff]  ;;  %v63_v1 = vld [vmem:[%s5562_s2 + $0x70] sm:$0xff]  ;;  %v62_v2 = vld [vmem:[%s5562_s2 + $0x68] sm:$0xff]  ;;  %148 = vmatprep.mubr.f32.mxu0 %v4681_v3  ;;  %vm257_vm2 = vcmask 130048   ;;  %s4684_s23 = smov 124   ;;  %s4685_s24 = smov 56  }
   0x2   :  { %100 = vmatprep.subr.mxu0 %v64_v0  ;;  %v61_v4 = vld [vmem:[%s5562_s2 + $0x60] sm:$0xff]  ;;  %v60_v5 = vld [vmem:[%s5562_s2 + $0x58] sm:$0xff]  ;;  %v59_v6 = vld [vmem:[%s5562_s2 + $0x50] sm:$0xff]  ;;  %v68_v20 = vshrl.u32 %v67_v19, 7  ;;  %s4686_s25 = smov 120   ;;  %s4687_s26 = smov 52  }
   0x3   :  { %101 = vmatpush1.msra.mxu0 %v63_v1  ;;  %v58_v7 = vld [vmem:[%s5562_s2 + $0x48] sm:$0xff]  ;;  %v57_v8 = vld [vmem:[%s5562_s2 + $0x40] sm:$0xff]  ;;  %v56_v9 = vld [vmem:[%s5562_s2 + $0x38] sm:$0xff]  ;;  %s4688_s27 = smov 116   ;;  %s4689_s28 = smov 48   ;;  %vm3485_vm3 = vcmask 64512  }
   0x4   :  { %102 = vmatprep.subr.mxu0 %v62_v2  ;;  %v55_v10 = vld [vmem:[%s5562_s2 + $0x30] sm:$0xff]  ;;  %v54_v11 = vld [vmem:[%s5562_s2 + $0x28] sm:$0xff]  ;;  %v53_v12 = vld [vmem:[%s5562_s2 + $0x20] sm:$0xff]  ;;  %v69_v21 = vsub.s32 0, %v68_v20  ;;  %v73_v30 = vsub.s32 1, %v68_v20  ;;  %s4690_s29 = smov 112  }
   0x5   :  { %103 = vmatpush1.msra.mxu0 %v61_v4  ;;  %v52_v13 = vld [vmem:[%s5562_s2 + $0x18] sm:$0xff]  ;;  %v51_v14 = vld [vmem:[%s5562_s2 + $0x10] sm:$0xff]  ;;  %v50_v15 = vld [vmem:[%s5562_s2 + $0x8] sm:$0xff]  ;;  %s4691_s30 = smov 44   ;;  %s4692_s15 = smov 108   ;;  %vm3488_vm4 = vcmask 97280  }
   0x6   :  { %104 = vmatprep.subr.mxu0 %v60_v5  ;;  %v49_v16 = vld [vmem:[%s5562_s2] sm:$0xff]  ;;  %v48_v18 = vld [vmem:[%s5563_s0 + $0x8] sm:$0xff]  ;;  %s4693_s16 = smov 40   ;;  %s4694_s2 = smov 104   ;;  %vm3493_vm5 = vcmask 162816   ;;  %vm3496_vm6 = vcmask 195584  }
   0x7   :  { %105 = vmatpush1.msra.mxu0 %v59_v6  ;;  %v47_v17 = vld [vmem:[%s5563_s0] sm:$0xff]  ;;  %v4883_v40 = vld [vmem:[%s5565_s1 + $0x8] sm:$0xff]  ;;  %s4695_s17 = smov 36   ;;  %s4698_s19 = smov 96   ;;  %vm3499_vm7 = vcmask 228352   ;;  %vm3502_vm8 = vcmask 261120  }
   0x8   :  { %106 = vmatprep.subr.mxu0 %v58_v7  ;;  %v65_v22 = vld [vmem:[%s5564_s3] sm:$0x3]  ;;  %s4697_s3 = smov 32   ;;  %s4699_s20 = smov 28   ;;  %vm3505_vm9 = vcmask 293888   ;;  %vm3508_vm10 = vcmask 326656  }
   0x9   :  { %107 = vmatpush1.msra.mxu0 %v57_v8  ;;  %v70_v23 = vrot.slane %v65_v22, %v69_v21  ;;  %v74_v33 = vrot.slane %v65_v22, %v73_v30  ;;  %v4878_v39 = vld [vmem:[%s5565_s1] sm:$0xff]  ;;  %s4700_s21 = smov 92   ;;  %vm3511_vm11 = vcmask 359424   ;;  %vm3514_vm12 = vcmask 392192  }
   0xa   :  { %108 = vmatprep.subr.mxu0 %v56_v9  ;;  %vm3517_vm13 = vcmask 424960   ;;  %vm3520_vm14 = vcmask 457728   ;;  %vm3523_vm15 = vcmask 490496  }
   0xb   :  { %109 = vmatpush1.msra.mxu0 %v55_v10 }
   0xc   :  { %110 = vmatprep.subr.mxu0 %v54_v11 }
   0xd   :  { %111 = vmatpush1.msra.mxu0 %v53_v12 }
   0xe   :  { %112 = vmatprep.subr.mxu0 %v52_v13 }
   0xf   :  { %113 = vmatpush1.msra.mxu0 %v51_v14 }
  0x10   :  { %114 = vmatprep.subr.mxu0 %v50_v15 }
  0x11   :  { %115 = vmatpush1.msra.mxu0 %v49_v16 }
  0x12   :  { %3933 = vmatmul.mubr.msk.f32.vlgmr.msra.gmra.mxu0 %vm77_vm0, %v47_v17 }
  0x13   :  { %154 = vmatprep.mubr.f32.mxu0 %v4681_v3 }
  0x16   :  { %3934 = vmatmul.mubr.msk.f32.gmra.mxu0 %vm77_vm0, %v48_v18 }
  0xd2   :  { %v150_v24 = vpop.f32.mrf.mxu0 }
  0xd3   :  { %v4847_v25 = vadd.f32 %v150_v24, %v70_v23 }
  0xd4   :  { %v152_v26 = vpop.f32.mrf.mxu0 }
  0xd5   :  { %v4850_v27 = vmul.f32 0.5, %v4847_v25  ;;  %v4868_v37 = vadd.f32 %v152_v26, %v74_v33 }
  0xd6   :  { %v156_v28 = vpop.f32.mrf.mxu0 }
  0xd7   :  { %v4852_v29 = vadd.f32 %v156_v28, %v70_v23  ;;  %4212 = vmatprep.mubr.msk.f32.mxu1 %vm171_vm1, %v4850_v27 }
  0xd8   :  { %v158_v32 = vpop.f32.mrf.mxu0 }
  0xd9   :  { %169 = vrot.lane.b32.xlu0 %v4852_v29, %s4682_s18  ;;  %v4860_v35 = vadd.f32 %v158_v32, %v74_v33  ;;  %v4866_v36 = vmul.f32 0.5, %v4852_v29 }
  0xdd   :  { %167 = vrot.lane.b32.xlu0 %v4847_v25, %s4682_s18  ;;  %s4696_s18 = smov 100  }
 0x14b   :  { %v170_v31 = vpop.permute.xlu0 %169 }
 0x14c   :  { %4208 = vmatprep.subr.msk.mxu1 %vm171_vm1, %v170_v31 }
 0x14d   :  { %4209 = vmatpush3.xpose.msk.msra.mxu1 %vm171_vm1, %v170_v31 }
 0x14f   :  { %v168_v34 = vpop.permute.xlu0 %167 }
 0x150   :  { %4210 = vmatprep.subr.msk.mxu1 %vm171_vm1, %v168_v34 }
 0x151   :  { %4211 = vmatpush3.xpose.msk.msra.mxu1 %vm171_vm1, %v168_v34 }
 0x152   :  { %4215 = vmatprep.subr.mxu1 %v4860_v35 }
 0x154   :  { %4213 = vmatmul.mubr.msk.f32.vlgmr.msra.gmra.mxu1 %vm171_vm1, %v4866_v36 }
 0x155   :  { %4216 = vmatpush3.msra.mxu1 %v4860_v35 }
 0x156   :  { %4217 = vmatprep.subr.mxu1 %v4868_v37 }
 0x157   :  { %4218 = vmatpush3.msra.mxu1 %v4868_v37 }
 0x214   :  { %v4214_v38 = vpop.f32.mrf.mxu1 }
 0x215   :  { %v254_v43 = vadd.f32 %v4214_v38, %v4883_v40 }
 0x216   :  { %v248_v41 = vpop.f32.mrf.mxu1 }
 0x217   :  { %v249_v42 = vadd.f32 %v248_v41, %v4878_v39  ;;  %v261_v45 = vsel %vm257_vm2, %v254_v43, -inf }
 0x219   :  { %v258_v44 = vsel %vm257_vm2, %v249_v42, -inf }
 0x21a   :  { %259 = vmax.xlane.f32.xlu1 %v258_v44 }
 0x21e   :  { %262 = vmax.xlane.f32.xlu1 %v261_v45 }
 0x2a3   :  { %v260_v46 = vpop.xlane.xlu1 %259 }
 0x2a4   :  { %v264_v47 = vsub.f32 %v249_v42, %v260_v46 }
 0x2a6   :  { %v266_v48 = vmul.f32 1.442695, %v264_v47 }
 0x2a7   :  { %v263_v49 = vpop.xlane.xlu1 %262 }
 0x2a8   :  { %4537 = vpow2.f32 %v266_v48  ;;  %v265_v50 = vsub.f32 %v254_v43, %v263_v49 }
 0x2aa   :  { %v268_v51 = vmul.f32 1.442695, %v265_v50 }
 0x2ac   :  { %4539 = vpow2.f32 %v268_v51 }
 0x2b5   :  { %v4538_v52 = vpop.eup %4537 }
 0x2b6   :  { %v270_v53 = vsel %vm257_vm2, %v4538_v52, 0.0 }
 0x2b7   :  { %271 = vadd.xlane.f32.xlu0 %v270_v53 }
 0x2b9   :  { %v4540_v54 = vpop.eup %4539 }
 0x2ba   :  { %v273_v55 = vsel %vm257_vm2, %v4540_v54, 0.0 }
 0x2bb   :  { %274 = vadd.xlane.f32.xlu1 %v273_v55 }
 0x2cc   :  { %367 = vrot.lane.b32.xlu1 %v4852_v29, %s4683_s22 }
 0x2cd   :  { %363 = vrot.lane.b32.xlu0 %v4866_v36, %s4684_s23 }
 0x2d0   :  { %365 = vrot.lane.b32.xlu1 %v4847_v25, %s4683_s22 }
 0x2d4   :  { %361 = vrot.lane.b32.xlu1 %v4850_v27, %s4684_s23 }
 0x2d8   :  { %569 = vrot.lane.b32.xlu1 %v4852_v29, %s4685_s24 }
 0x2dc   :  { %567 = vrot.lane.b32.xlu1 %v4847_v25, %s4685_s24 }
 0x2e0   :  { %563 = vrot.lane.b32.xlu1 %v4850_v27, %s4686_s25 }
 0x2e4   :  { %565 = vrot.lane.b32.xlu1 %v4866_v36, %s4686_s25 }
 0x340   :  { %v272_v56 = vpop.xlane.xlu0 %271 }
 0x341   :  { %4541 = vrcp.f32 %v272_v56 }
 0x344   :  { %v275_v57 = vpop.xlane.xlu1 %274  ;;  %v364_v3 = vpop.permute.xlu0 %363 }
 0x345   :  { %4543 = vrcp.f32 %v275_v57 }
 0x348   :  { %v368_v58 = vpop.permute.xlu1 %367 }
 0x349   :  { %4222 = vmatprep.subr.msk.mxu1 %vm171_vm1, %v368_v58 }
 0x34c   :  { %v366_v59 = vpop.permute.xlu1 %365 }
 0x34e   :  { %v4542_v60 = vpop.eup %4541 }
 0x34f   :  { %v278_v61 = vmul.f32 %v4542_v60, %v4538_v52 }
 0x350   :  { %v362_v62 = vpop.permute.xlu1 %361 }
 0x351   :  { %4219 = vmatprep.mubr.msk.f32.mxu1 %vm257_vm2, %v278_v61 }
 0x352   :  { %v4544_v63 = vpop.eup %4543 }
 0x353   :  { %v279_v0 = vmul.f32 %v4544_v63, %v4540_v54 }
 0x354   :  { %v570_v1 = vpop.permute.xlu1 %569 }
 0x355   :  { %4220 = vmatmul.mubr.msk.f32.vlgmr.msra.gmra.mxu1 %vm257_vm2, %v279_v0 }
 0x356   :  { %4223 = vmatpush3.xpose.msk.msra.mxu1 %vm171_vm1, %v368_v58  ;;  %4226 = vmatprep.mubr.msk.f32.mxu1 %vm171_vm1, %v362_v62 }
 0x357   :  { %4224 = vmatprep.subr.msk.mxu1 %vm171_vm1, %v366_v59 }
 0x358   :  { %v568_v2 = vpop.permute.xlu1 %567 }
 0x35a   :  { %4225 = vmatpush3.xpose.msk.msra.mxu1 %vm171_vm1, %v366_v59 }
 0x35b   :  { %4236 = vmatprep.subr.msk.mxu1 %vm171_vm1, %v570_v1 }
 0x35c   :  { %v564_v4 = vpop.permute.xlu1 %563 }
 0x35d   :  { %4227 = vmatmul.mubr.msk.f32.vlgmr.msra.gmra.mxu1 %vm171_vm1, %v364_v3 }
 0x35e   :  { %4237 = vmatpush3.xpose.msk.msra.mxu1 %vm171_vm1, %v570_v1  ;;  %4240 = vmatprep.mubr.msk.f32.mxu1 %vm171_vm1, %v564_v4 }
 0x35f   :  { %4238 = vmatprep.subr.msk.mxu1 %vm171_vm1, %v568_v2 }
 0x360   :  { %v566_v5 = vpop.permute.xlu1 %565 }
 0x362   :  { %4239 = vmatpush3.xpose.msk.msra.mxu1 %vm171_vm1, %v568_v2 }
 0x365   :  { %4241 = vmatmul.mubr.msk.f32.vlgmr.msra.gmra.mxu1 %vm171_vm1, %v566_v5 }
 0x415   :  { %v4921_v6 = vpop.f32.mrf.mxu1 }
 0x417   :  { %v4923_v7 = vpop.f32.mrf.mxu1 }
 0x41d   :  { %v4228_v8 = vpop.f32.mrf.mxu1 }
 0x41e   :  { %v449_v9 = vadd.f32 %v4228_v8, %v4883_v40 }
 0x41f   :  { %v443_v10 = vpop.f32.mrf.mxu1 }
 0x420   :  { %v444_v11 = vadd.f32 %v443_v10, %v4878_v39  ;;  %v455_v12 = vsel %vm257_vm2, %v449_v9, -inf }
 0x421   :  { %456 = vmax.xlane.f32.xlu0 %v455_v12 }
 0x422   :  { %v452_v13 = vsel %vm257_vm2, %v444_v11, -inf }
 0x423   :  { %453 = vmax.xlane.f32.xlu1 %v452_v13 }
 0x425   :  { %v4242_v14 = vpop.f32.mrf.mxu1 }
 0x426   :  { %v651_v15 = vadd.f32 %v4242_v14, %v4883_v40 }
 0x427   :  { %v645_v17 = vpop.f32.mrf.mxu1 }
 0x428   :  { %v657_v16 = vsel %vm257_vm2, %v651_v15, -inf  ;;  %v646_v18 = vadd.f32 %v645_v17, %v4878_v39 }
 0x429   :  { %658 = vmax.xlane.f32.xlu0 %v657_v16 }
 0x42a   :  { %v654_v19 = vsel %vm257_vm2, %v646_v18, -inf }
 0x434   :  { %478 = vrot.lane.b32.xlu1 %v4860_v35, %s4684_s23 }
 0x438   :  { %678 = vrot.lane.b32.xlu1 %v4860_v35, %s4686_s25 }
 0x43f   :  { %476 = vrot.lane.b32.xlu0 %v4868_v37, %s4684_s23  ;;  %s4707_s23 = smov 12  }
 0x45c   :  { %655 = vmax.xlane.f32.xlu1 %v654_v19 }
 0x46d   :  { %676 = vrot.lane.b32.xlu1 %v4868_v37, %s4686_s25  ;;  %s4708_s25 = smov 76  }
 0x4aa   :  { %v457_v20 = vpop.xlane.xlu0 %456 }
 0x4ab   :  { %v459_v21 = vsub.f32 %v449_v9, %v457_v20 }
 0x4ac   :  { %v454_v22 = vpop.xlane.xlu1 %453 }
 0x4ad   :  { %v462_v23 = vmul.f32 1.442695, %v459_v21  ;;  %v458_v24 = vsub.f32 %v444_v11, %v454_v22 }
 0x4af   :  { %4545 = vpow2.f32 %v462_v23  ;;  %v460_v26 = vmul.f32 1.442695, %v458_v24 }
 0x4b0   :  { %v479_v28 = vpop.permute.xlu1 %478 }
 0x4b1   :  { %4547 = vpow2.f32 %v460_v26  ;;  %4229 = vmatprep.subr.mxu0 %v479_v28 }
 0x4b2   :  { %v659_v30 = vpop.xlane.xlu0 %658  ;;  %4230 = vmatpush3.msra.mxu0 %v479_v28 }
 0x4b3   :  { %v661_v31 = vsub.f32 %v651_v15, %v659_v30 }
 0x4b4   :  { %v679_v34 = vpop.permute.xlu1 %678 }
 0x4b5   :  { %v664_v32 = vmul.f32 1.442695, %v661_v31 }
 0x4b6   :  { %v477_v33 = vpop.permute.xlu0 %476 }
 0x4b7   :  { %4549 = vpow2.f32 %v664_v32  ;;  %4231 = vmatprep.subr.mxu0 %v477_v33 }
 0x4b8   :  { %4232 = vmatpush3.msra.mxu0 %v477_v33 }
 0x4b9   :  { %4243 = vmatprep.subr.mxu0 %v679_v34 }
 0x4bc   :  { %v4546_v38 = vpop.eup %4545 }
 0x4bd   :  { %v467_v41 = vsel %vm257_vm2, %v4546_v38, 0.0 }
 0x4be   :  { %v4548_v42 = vpop.eup %4547  ;;  %468 = vadd.xlane.f32.xlu0 %v467_v41 }
 0x4bf   :  { %v464_v43 = vsel %vm257_vm2, %v4548_v42, 0.0 }
 0x4c0   :  { %465 = vadd.xlane.f32.xlu1 %v464_v43 }
 0x4c4   :  { %v4550_v44 = vpop.eup %4549 }
 0x4c5   :  { %v669_v45 = vsel %vm257_vm2, %v4550_v44, 0.0 }
 0x4c6   :  { %670 = vadd.xlane.f32.xlu0 %v669_v45 }
 0x4d1   :  { %767 = vrot.lane.b32.xlu1 %v4847_v25, %s4687_s26 }
 0x4dc   :  { %769 = vrot.lane.b32.xlu0 %v4852_v29, %s4687_s26 }
 0x4e0   :  { %763 = vrot.lane.b32.xlu0 %v4850_v27, %s4688_s27 }
 0x4e5   :  { %v656_v46 = vpop.xlane.xlu1 %655 }
 0x4e6   :  { %v660_v47 = vsub.f32 %v646_v18, %v656_v46 }
 0x4e8   :  { %v662_v48 = vmul.f32 1.442695, %v660_v47 }
 0x4e9   :  { %v677_v51 = vpop.permute.xlu1 %676 }
 0x4ea   :  { %4551 = vpow2.f32 %v662_v48 }
 0x4f7   :  { %v4552_v49 = vpop.eup %4551 }
 0x4f8   :  { %v666_v50 = vsel %vm257_vm2, %v4552_v49, 0.0 }
 0x4f9   :  { %667 = vadd.xlane.f32.xlu1 %v666_v50 }
 0x50a   :  { %765 = vrot.lane.b32.xlu1 %v4866_v36, %s4688_s27 }
 0x547   :  { %v469_v52 = vpop.xlane.xlu0 %468 }
 0x548   :  { %4553 = vrcp.f32 %v469_v52 }
 0x549   :  { %v466_v53 = vpop.xlane.xlu1 %465 }
 0x54a   :  { %4555 = vrcp.f32 %v466_v53 }
 0x54d   :  { %v768_v60 = vpop.permute.xlu1 %767 }
 0x54f   :  { %v671_v56 = vpop.xlane.xlu0 %670 }
 0x550   :  { %4557 = vrcp.f32 %v671_v56 }
 0x553   :  { %v770_v59 = vpop.permute.xlu0 %769 }
 0x555   :  { %v4554_v54 = vpop.eup %4553 }
 0x556   :  { %v473_v58 = vmul.f32 %v4554_v54, %v4546_v38 }
 0x557   :  { %v4556_v55 = vpop.eup %4555  ;;  %v764_v2 = vpop.permute.xlu0 %763 }
 0x558   :  { %v472_v57 = vmul.f32 %v4556_v55, %v4548_v42 }
 0x55a   :  { %4233 = vmatprep.mubr.msk.f32.mxu0 %vm257_vm2, %v472_v57 }
 0x55b   :  { %4234 = vmatmul.mubr.msk.f32.vlgmr.msra.gmra.mxu0 %vm257_vm2, %v473_v58 }
 0x55c   :  { %4244 = vmatpush3.msra.mxu0 %v679_v34 }
 0x55d   :  { %4245 = vmatprep.subr.mxu0 %v677_v51  ;;  %v4558_v62 = vpop.eup %4557 }
 0x55e   :  { %4246 = vmatpush3.msra.mxu0 %v677_v51  ;;  %v675_v1 = vmul.f32 %v4558_v62, %v4550_v44 }
 0x55f   :  { %4250 = vmatprep.subr.msk.mxu0 %vm171_vm1, %v770_v59 }
 0x582   :  { %v668_v61 = vpop.xlane.xlu1 %667 }
 0x583   :  { %4559 = vrcp.f32 %v668_v61 }
 0x586   :  { %v766_v3 = vpop.permute.xlu1 %765 }
 0x590   :  { %v4560_v63 = vpop.eup %4559 }
 0x591   :  { %v674_v0 = vmul.f32 %v4560_v63, %v4552_v49 }
 0x593   :  { %4247 = vmatprep.mubr.msk.f32.mxu0 %vm257_vm2, %v674_v0 }
 0x594   :  { %4248 = vmatmul.mubr.msk.f32.vlgmr.msra.gmra.mxu0 %vm257_vm2, %v675_v1 }
 0x595   :  { %4251 = vmatpush3.xpose.msk.msra.mxu0 %vm171_vm1, %v770_v59  ;;  %4254 = vmatprep.mubr.msk.f32.mxu0 %vm171_vm1, %v764_v2 }
 0x596   :  { %4252 = vmatprep.subr.msk.mxu0 %vm171_vm1, %v768_v60 }
 0x599   :  { %4253 = vmatpush3.xpose.msk.msra.mxu0 %vm171_vm1, %v768_v60 }
 0x59c   :  { %4255 = vmatmul.mubr.msk.f32.vlgmr.msra.gmra.mxu0 %vm171_vm1, %v766_v3 }
 0x61b   :  { %v4963_v4 = vpop.f32.mrf.mxu0 }
 0x61d   :  { %v4965_v5 = vpop.f32.mrf.mxu0 }
 0x654   :  { %v4967_v8 = vpop.f32.mrf.mxu0 }
 0x656   :  { %v4969_v9 = vpop.f32.mrf.mxu0 }
 0x65c   :  { %v4256_v10 = vpop.f32.mrf.mxu0 }
 0x65d   :  { %v851_v11 = vadd.f32 %v4256_v10, %v4883_v40 }
 0x65e   :  { %v845_v12 = vpop.f32.mrf.mxu0 }
 0x65f   :  { %v846_v13 = vadd.f32 %v845_v12, %v4878_v39  ;;  %v857_v14 = vsel %vm257_vm2, %v851_v11, -inf }
 0x660   :  { %858 = vmax.xlane.f32.xlu1 %v857_v14 }
 0x661   :  { %v854_v15 = vsel %vm257_vm2, %v846_v13, -inf }
 0x662   :  { %855 = vmax.xlane.f32.xlu0 %v854_v15 }
 0x671   :  { %878 = vrot.lane.b32.xlu1 %v4860_v35, %s4688_s27 }
 0x675   :  { %969 = vrot.lane.b32.xlu1 %v4852_v29, %s4689_s28 }
 0x679   :  { %967 = vrot.lane.b32.xlu1 %v4847_v25, %s4689_s28 }
 0x67d   :  { %965 = vrot.lane.b32.xlu1 %v4866_v36, %s4690_s29 }
 0x6e9   :  { %v859_v16 = vpop.xlane.xlu1 %858 }
 0x6ea   :  { %v861_v17 = vsub.f32 %v851_v11, %v859_v16 }
 0x6eb   :  { %v856_v18 = vpop.xlane.xlu0 %855 }
 0x6ec   :  { %v864_v19 = vmul.f32 1.442695, %v861_v17  ;;  %v860_v20 = vsub.f32 %v846_v13, %v856_v18 }
 0x6ed   :  { %v879_v21 = vpop.permute.xlu1 %878 }
 0x6ee   :  { %4561 = vpow2.f32 %v864_v19  ;;  %v862_v22 = vmul.f32 1.442695, %v860_v20  ;;  %4257 = vmatprep.subr.mxu1 %v879_v21 }
 0x6ef   :  { %4258 = vmatpush3.msra.mxu1 %v879_v21 }
 0x6f0   :  { %4563 = vpow2.f32 %v862_v22 }
 0x6f1   :  { %v970_v33 = vpop.permute.xlu1 %969 }
 0x6f5   :  { %v968_v44 = vpop.permute.xlu1 %967 }
 0x6f9   :  { %v966_v45 = vpop.permute.xlu1 %965 }
 0x6fb   :  { %v4562_v23 = vpop.eup %4561 }
 0x6fc   :  { %v869_v24 = vsel %vm257_vm2, %v4562_v23, 0.0 }
 0x6fd   :  { %v4564_v26 = vpop.eup %4563  ;;  %870 = vadd.xlane.f32.xlu0 %v869_v24 }
 0x6fe   :  { %v866_v28 = vsel %vm257_vm2, %v4564_v26, 0.0 }
 0x701   :  { %867 = vadd.xlane.f32.xlu0 %v866_v28 }
 0x717   :  { %876 = vrot.lane.b32.xlu0 %v4868_v37, %s4688_s27  ;;  %s4709_s27 = smov 8  }
 0x71b   :  { %963 = vrot.lane.b32.xlu0 %v4850_v27, %s4690_s29 }
 0x786   :  { %v871_v30 = vpop.xlane.xlu0 %870 }
 0x787   :  { %4565 = vrcp.f32 %v871_v30 }
 0x78a   :  { %v868_v31 = vpop.xlane.xlu0 %867 }
 0x78b   :  { %4567 = vrcp.f32 %v868_v31 }
 0x78e   :  { %v877_v32 = vpop.permute.xlu0 %876 }
 0x78f   :  { %4259 = vmatprep.subr.mxu1 %v877_v32 }
 0x790   :  { %4260 = vmatpush3.msra.mxu1 %v877_v32 }
 0x791   :  { %4264 = vmatprep.subr.msk.mxu1 %vm171_vm1, %v970_v33 }
 0x792   :  { %v964_v43 = vpop.permute.xlu0 %963 }
 0x794   :  { %v4566_v34 = vpop.eup %4565 }
 0x795   :  { %v875_v42 = vmul.f32 %v4566_v34, %v4562_v23 }
 0x798   :  { %v4568_v38 = vpop.eup %4567 }
 0x799   :  { %v874_v41 = vmul.f32 %v4568_v38, %v4564_v26 }
 0x79b   :  { %4261 = vmatprep.mubr.msk.f32.mxu1 %vm257_vm2, %v874_v41 }
 0x79c   :  { %4262 = vmatmul.mubr.msk.f32.vlgmr.msra.gmra.mxu1 %vm257_vm2, %v875_v42 }
 0x79d   :  { %4265 = vmatpush3.xpose.msk.msra.mxu1 %vm171_vm1, %v970_v33  ;;  %4268 = vmatprep.mubr.msk.f32.mxu1 %vm171_vm1, %v964_v43 }
 0x79e   :  { %4266 = vmatprep.subr.msk.mxu1 %vm171_vm1, %v968_v44 }
 0x7a1   :  { %4267 = vmatpush3.xpose.msk.msra.mxu1 %vm171_vm1, %v968_v44 }
 0x7a4   :  { %4269 = vmatmul.mubr.msk.f32.vlgmr.msra.gmra.mxu1 %vm171_vm1, %v966_v45 }
 0x85c   :  { %v4997_v46 = vpop.f32.mrf.mxu1 }
 0x85e   :  { %v4999_v47 = vpop.f32.mrf.mxu1 }
 0x864   :  { %v4270_v48 = vpop.f32.mrf.mxu1 }
 0x865   :  { %v1051_v49 = vadd.f32 %v4270_v48, %v4883_v40 }
 0x866   :  { %v1045_v50 = vpop.f32.mrf.mxu1 }
 0x867   :  { %v1046_v51 = vadd.f32 %v1045_v50, %v4878_v39  ;;  %v1057_v52 = vsel %vm257_vm2, %v1051_v49, -inf }
 0x868   :  { %1058 = vmax.xlane.f32.xlu1 %v1057_v52 }
 0x869   :  { %v1054_v53 = vsel %vm257_vm2, %v1046_v51, -inf }
 0x86a   :  { %1055 = vmax.xlane.f32.xlu0 %v1054_v53 }
 0x879   :  { %1078 = vrot.lane.b32.xlu1 %v4860_v35, %s4690_s29 }
 0x87d   :  { %1169 = vrot.lane.b32.xlu1 %v4852_v29, %s4691_s30 }
 0x881   :  { %1167 = vrot.lane.b32.xlu1 %v4847_v25, %s4691_s30 }
 0x885   :  { %1165 = vrot.lane.b32.xlu1 %v4866_v36, %s4692_s15 }
 0x8f1   :  { %v1059_v54 = vpop.xlane.xlu1 %1058 }
 0x8f2   :  { %v1061_v55 = vsub.f32 %v1051_v49, %v1059_v54 }
 0x8f3   :  { %v1056_v56 = vpop.xlane.xlu0 %1055 }
 0x8f4   :  { %v1064_v57 = vmul.f32 1.442695, %v1061_v55  ;;  %v1060_v58 = vsub.f32 %v1046_v51, %v1056_v56 }
 0x8f5   :  { %v1079_v59 = vpop.permute.xlu1 %1078 }
 0x8f6   :  { %4569 = vpow2.f32 %v1064_v57  ;;  %v1062_v60 = vmul.f32 1.442695, %v1060_v58  ;;  %4271 = vmatprep.subr.mxu0 %v1079_v59 }
 0x8f7   :  { %4272 = vmatpush3.msra.mxu0 %v1079_v59 }
 0x8f8   :  { %4571 = vpow2.f32 %v1062_v60 }
 0x8f9   :  { %v1170_v10 = vpop.permute.xlu1 %1169 }
 0x8fd   :  { %v1168_v16 = vpop.permute.xlu1 %1167 }
 0x901   :  { %v1166_v17 = vpop.permute.xlu1 %1165 }
 0x903   :  { %v4570_v61 = vpop.eup %4569 }
 0x904   :  { %v1069_v62 = vsel %vm257_vm2, %v4570_v61, 0.0 }
 0x905   :  { %v4572_v63 = vpop.eup %4571  ;;  %1070 = vadd.xlane.f32.xlu0 %v1069_v62 }
 0x906   :  { %v1066_v0 = vsel %vm257_vm2, %v4572_v63, 0.0 }
 0x909   :  { %1067 = vadd.xlane.f32.xlu0 %v1066_v0 }
 0x91f   :  { %1076 = vrot.lane.b32.xlu0 %v4868_v37, %s4690_s29  ;;  %s4710_s29 = smov 72  }
 0x923   :  { %1163 = vrot.lane.b32.xlu0 %v4850_v27, %s4692_s15 }
 0x98e   :  { %v1071_v1 = vpop.xlane.xlu0 %1070 }
 0x98f   :  { %4573 = vrcp.f32 %v1071_v1 }
 0x992   :  { %v1068_v2 = vpop.xlane.xlu0 %1067 }
 0x993   :  { %4575 = vrcp.f32 %v1068_v2 }
 0x996   :  { %v1077_v3 = vpop.permute.xlu0 %1076 }
 0x997   :  { %4273 = vmatprep.subr.mxu0 %v1077_v3 }
 0x998   :  { %4274 = vmatpush3.msra.mxu0 %v1077_v3 }
 0x999   :  { %4278 = vmatprep.subr.msk.mxu0 %vm171_vm1, %v1170_v10 }
 0x99a   :  { %v1164_v15 = vpop.permute.xlu0 %1163 }
 0x99c   :  { %v4574_v11 = vpop.eup %4573 }
 0x99d   :  { %v1075_v14 = vmul.f32 %v4574_v11, %v4570_v61 }
 0x9a0   :  { %v4576_v12 = vpop.eup %4575 }
 0x9a1   :  { %v1074_v13 = vmul.f32 %v4576_v12, %v4572_v63 }
 0x9a3   :  { %4275 = vmatprep.mubr.msk.f32.mxu0 %vm257_vm2, %v1074_v13 }
 0x9a4   :  { %4276 = vmatmul.mubr.msk.f32.vlgmr.msra.gmra.mxu0 %vm257_vm2, %v1075_v14 }
 0x9a5   :  { %4279 = vmatpush3.xpose.msk.msra.mxu0 %vm171_vm1, %v1170_v10  ;;  %4282 = vmatprep.mubr.msk.f32.mxu0 %vm171_vm1, %v1164_v15 }
 0x9a6   :  { %4280 = vmatprep.subr.msk.mxu0 %vm171_vm1, %v1168_v16 }
 0x9a9   :  { %4281 = vmatpush3.xpose.msk.msra.mxu0 %vm171_vm1, %v1168_v16 }
 0x9ac   :  { %4283 = vmatmul.mubr.msk.f32.vlgmr.msra.gmra.mxu0 %vm171_vm1, %v1166_v17 }
 0xa64   :  { %v5027_v18 = vpop.f32.mrf.mxu0 }
 0xa66   :  { %v5029_v19 = vpop.f32.mrf.mxu0 }
 0xa6c   :  { %v4284_v20 = vpop.f32.mrf.mxu0 }
 0xa6d   :  { %v1251_v21 = vadd.f32 %v4284_v20, %v4883_v40 }
 0xa6e   :  { %v1245_v22 = vpop.f32.mrf.mxu0 }
 0xa6f   :  { %v1246_v23 = vadd.f32 %v1245_v22, %v4878_v39  ;;  %v1257_v24 = vsel %vm257_vm2, %v1251_v21, -inf }
 0xa70   :  { %1258 = vmax.xlane.f32.xlu1 %v1257_v24 }
 0xa71   :  { %v1254_v26 = vsel %vm257_vm2, %v1246_v23, -inf }
 0xa72   :  { %1255 = vmax.xlane.f32.xlu0 %v1254_v26 }
 0xa81   :  { %1278 = vrot.lane.b32.xlu1 %v4860_v35, %s4692_s15 }
 0xa85   :  { %1369 = vrot.lane.b32.xlu1 %v4852_v29, %s4693_s16 }
 0xa89   :  { %1367 = vrot.lane.b32.xlu1 %v4847_v25, %s4693_s16 }
 0xa8d   :  { %1365 = vrot.lane.b32.xlu1 %v4866_v36, %s4694_s2 }
 0xaf9   :  { %v1259_v28 = vpop.xlane.xlu1 %1258 }
 0xafa   :  { %v1261_v30 = vsub.f32 %v1251_v21, %v1259_v28 }
 0xafb   :  { %v1256_v31 = vpop.xlane.xlu0 %1255 }
 0xafc   :  { %v1264_v32 = vmul.f32 1.442695, %v1261_v30  ;;  %v1260_v33 = vsub.f32 %v1246_v23, %v1256_v31 }
 0xafd   :  { %v1279_v34 = vpop.permute.xlu1 %1278 }
 0xafe   :  { %4577 = vpow2.f32 %v1264_v32  ;;  %v1262_v38 = vmul.f32 1.442695, %v1260_v33  ;;  %4285 = vmatprep.subr.mxu1 %v1279_v34 }
 0xaff   :  { %4286 = vmatpush3.msra.mxu1 %v1279_v34 }
 0xb00   :  { %4579 = vpow2.f32 %v1262_v38 }
 0xb01   :  { %v1370_v50 = vpop.permute.xlu1 %1369 }
 0xb05   :  { %v1368_v56 = vpop.permute.xlu1 %1367 }
 0xb09   :  { %v1366_v57 = vpop.permute.xlu1 %1365 }
 0xb0b   :  { %v4578_v41 = vpop.eup %4577 }
 0xb0c   :  { %v1269_v42 = vsel %vm257_vm2, %v4578_v41, 0.0 }
 0xb0d   :  { %v4580_v43 = vpop.eup %4579  ;;  %1270 = vadd.xlane.f32.xlu0 %v1269_v42 }
 0xb0e   :  { %v1266_v44 = vsel %vm257_vm2, %v4580_v43, 0.0 }
 0xb11   :  { %1267 = vadd.xlane.f32.xlu0 %v1266_v44 }
 0xb27   :  { %1276 = vrot.lane.b32.xlu0 %v4868_v37, %s4692_s15  ;;  %s4701_s15 = smov 24  }
 0xb2b   :  { %1363 = vrot.lane.b32.xlu0 %v4850_v27, %s4694_s2 }
 0xb96   :  { %v1271_v45 = vpop.xlane.xlu0 %1270 }
 0xb97   :  { %4581 = vrcp.f32 %v1271_v45 }
 0xb9a   :  { %v1268_v48 = vpop.xlane.xlu0 %1267 }
 0xb9b   :  { %4583 = vrcp.f32 %v1268_v48 }
 0xb9e   :  { %v1277_v49 = vpop.permute.xlu0 %1276 }
 0xb9f   :  { %4287 = vmatprep.subr.mxu1 %v1277_v49 }
 0xba0   :  { %4288 = vmatpush3.msra.mxu1 %v1277_v49 }
 0xba1   :  { %4292 = vmatprep.subr.msk.mxu1 %vm171_vm1, %v1370_v50 }
 0xba2   :  { %v1364_v55 = vpop.permute.xlu0 %1363 }
 0xba4   :  { %v4582_v51 = vpop.eup %4581 }
 0xba5   :  { %v1275_v54 = vmul.f32 %v4582_v51, %v4578_v41 }
 0xba8   :  { %v4584_v52 = vpop.eup %4583 }
 0xba9   :  { %v1274_v53 = vmul.f32 %v4584_v52, %v4580_v43 }
 0xbab   :  { %4289 = vmatprep.mubr.msk.f32.mxu1 %vm257_vm2, %v1274_v53 }
 0xbac   :  { %4290 = vmatmul.mubr.msk.f32.vlgmr.msra.gmra.mxu1 %vm257_vm2, %v1275_v54 }
 0xbad   :  { %4293 = vmatpush3.xpose.msk.msra.mxu1 %vm171_vm1, %v1370_v50  ;;  %4296 = vmatprep.mubr.msk.f32.mxu1 %vm171_vm1, %v1364_v55 }
 0xbae   :  { %4294 = vmatprep.subr.msk.mxu1 %vm171_vm1, %v1368_v56 }
 0xbb1   :  { %4295 = vmatpush3.xpose.msk.msra.mxu1 %vm171_vm1, %v1368_v56 }
 0xbb4   :  { %4297 = vmatmul.mubr.msk.f32.vlgmr.msra.gmra.mxu1 %vm171_vm1, %v1366_v57 }
 0xc6c   :  { %v5057_v58 = vpop.f32.mrf.mxu1 }
 0xc6e   :  { %v5059_v59 = vpop.f32.mrf.mxu1 }
 0xc74   :  { %v4298_v60 = vpop.f32.mrf.mxu1 }
 0xc75   :  { %v1451_v61 = vadd.f32 %v4298_v60, %v4883_v40 }
 0xc76   :  { %v1445_v62 = vpop.f32.mrf.mxu1 }
 0xc77   :  { %v1446_v63 = vadd.f32 %v1445_v62, %v4878_v39  ;;  %v1457_v0 = vsel %vm257_vm2, %v1451_v61, -inf }
 0xc78   :  { %1458 = vmax.xlane.f32.xlu1 %v1457_v0 }
 0xc79   :  { %v1454_v1 = vsel %vm257_vm2, %v1446_v63, -inf }
 0xc7a   :  { %1455 = vmax.xlane.f32.xlu0 %v1454_v1 }
 0xc89   :  { %1478 = vrot.lane.b32.xlu1 %v4860_v35, %s4694_s2 }
 0xc8d   :  { %1569 = vrot.lane.b32.xlu1 %v4852_v29, %s4695_s17 }
 0xc91   :  { %1567 = vrot.lane.b32.xlu1 %v4847_v25, %s4695_s17 }
 0xc95   :  { %1565 = vrot.lane.b32.xlu1 %v4866_v36, %s4696_s18 }
 0xd01   :  { %v1459_v2 = vpop.xlane.xlu1 %1458 }
 0xd02   :  { %v1461_v3 = vsub.f32 %v1451_v61, %v1459_v2 }
 0xd03   :  { %v1456_v10 = vpop.xlane.xlu0 %1455 }
 0xd04   :  { %v1464_v11 = vmul.f32 1.442695, %v1461_v3  ;;  %v1460_v12 = vsub.f32 %v1446_v63, %v1456_v10 }
 0xd05   :  { %v1479_v13 = vpop.permute.xlu1 %1478 }
 0xd06   :  { %4585 = vpow2.f32 %v1464_v11  ;;  %v1462_v14 = vmul.f32 1.442695, %v1460_v12  ;;  %4299 = vmatprep.subr.mxu0 %v1479_v13 }
 0xd07   :  { %4300 = vmatpush3.msra.mxu0 %v1479_v13 }
 0xd08   :  { %4587 = vpow2.f32 %v1462_v14 }
 0xd09   :  { %v1570_v24 = vpop.permute.xlu1 %1569 }
 0xd0d   :  { %v1568_v33 = vpop.permute.xlu1 %1567 }
 0xd11   :  { %v1566_v34 = vpop.permute.xlu1 %1565 }
 0xd13   :  { %v4586_v15 = vpop.eup %4585 }
 0xd14   :  { %v1469_v16 = vsel %vm257_vm2, %v4586_v15, 0.0 }
 0xd15   :  { %v4588_v17 = vpop.eup %4587  ;;  %1470 = vadd.xlane.f32.xlu0 %v1469_v16 }
 0xd16   :  { %v1466_v20 = vsel %vm257_vm2, %v4588_v17, 0.0 }
 0xd19   :  { %1467 = vadd.xlane.f32.xlu0 %v1466_v20 }
 0xd2f   :  { %1476 = vrot.lane.b32.xlu0 %v4868_v37, %s4694_s2  ;;  %s4703_s2 = smov 20  }
 0xd33   :  { %1563 = vrot.lane.b32.xlu0 %v4850_v27, %s4696_s18 }
 0xd9e   :  { %v1471_v21 = vpop.xlane.xlu0 %1470 }
 0xd9f   :  { %4589 = vrcp.f32 %v1471_v21 }
 0xda2   :  { %v1468_v22 = vpop.xlane.xlu0 %1467 }
 0xda3   :  { %4591 = vrcp.f32 %v1468_v22 }
 0xda6   :  { %v1477_v23 = vpop.permute.xlu0 %1476 }
 0xda7   :  { %4301 = vmatprep.subr.mxu0 %v1477_v23 }
 0xda8   :  { %4302 = vmatpush3.msra.mxu0 %v1477_v23 }
 0xda9   :  { %4306 = vmatprep.subr.msk.mxu0 %vm171_vm1, %v1570_v24 }
 0xdaa   :  { %v1564_v32 = vpop.permute.xlu0 %1563 }
 0xdac   :  { %v4590_v26 = vpop.eup %4589 }
 0xdad   :  { %v1475_v31 = vmul.f32 %v4590_v26, %v4586_v15 }
 0xdb0   :  { %v4592_v28 = vpop.eup %4591 }
 0xdb1   :  { %v1474_v30 = vmul.f32 %v4592_v28, %v4588_v17 }
 0xdb3   :  { %4303 = vmatprep.mubr.msk.f32.mxu0 %vm257_vm2, %v1474_v30 }
 0xdb4   :  { %4304 = vmatmul.mubr.msk.f32.vlgmr.msra.gmra.mxu0 %vm257_vm2, %v1475_v31 }
 0xdb5   :  { %4307 = vmatpush3.xpose.msk.msra.mxu0 %vm171_vm1, %v1570_v24  ;;  %4310 = vmatprep.mubr.msk.f32.mxu0 %vm171_vm1, %v1564_v32 }
 0xdb6   :  { %4308 = vmatprep.subr.msk.mxu0 %vm171_vm1, %v1568_v33 }
 0xdb9   :  { %4309 = vmatpush3.xpose.msk.msra.mxu0 %vm171_vm1, %v1568_v33 }
 0xdbc   :  { %4311 = vmatmul.mubr.msk.f32.vlgmr.msra.gmra.mxu0 %vm171_vm1, %v1566_v34 }
 0xe74   :  { %v5087_v38 = vpop.f32.mrf.mxu0 }
 0xe76   :  { %v5089_v41 = vpop.f32.mrf.mxu0 }
 0xe7c   :  { %v4312_v42 = vpop.f32.mrf.mxu0 }
 0xe7d   :  { %v1651_v43 = vadd.f32 %v4312_v42, %v4883_v40 }
 0xe7e   :  { %v1645_v44 = vpop.f32.mrf.mxu0 }
 0xe7f   :  { %v1646_v45 = vadd.f32 %v1645_v44, %v4878_v39  ;;  %v1657_v48 = vsel %vm257_vm2, %v1651_v43, -inf }
 0xe80   :  { %1658 = vmax.xlane.f32.xlu1 %v1657_v48 }
 0xe81   :  { %v1654_v49 = vsel %vm257_vm2, %v1646_v45, -inf }
 0xe82   :  { %1655 = vmax.xlane.f32.xlu0 %v1654_v49 }
 0xe91   :  { %1678 = vrot.lane.b32.xlu1 %v4860_v35, %s4696_s18 }
 0xe95   :  { %1769 = vrot.lane.b32.xlu1 %v4852_v29, %s4697_s3 }
 0xe99   :  { %1767 = vrot.lane.b32.xlu1 %v4847_v25, %s4697_s3 }
 0xe9d   :  { %1765 = vrot.lane.b32.xlu1 %v4866_v36, %s4698_s19 }
 0xf09   :  { %v1659_v50 = vpop.xlane.xlu1 %1658 }
 0xf0a   :  { %v1661_v51 = vsub.f32 %v1651_v43, %v1659_v50 }
 0xf0b   :  { %v1656_v52 = vpop.xlane.xlu0 %1655 }
 0xf0c   :  { %v1664_v53 = vmul.f32 1.442695, %v1661_v51  ;;  %v1660_v54 = vsub.f32 %v1646_v45, %v1656_v52 }
 0xf0d   :  { %v1679_v55 = vpop.permute.xlu1 %1678 }
 0xf0e   :  { %4593 = vpow2.f32 %v1664_v53  ;;  %v1662_v56 = vmul.f32 1.442695, %v1660_v54  ;;  %4313 = vmatprep.subr.mxu1 %v1679_v55 }
 0xf0f   :  { %4314 = vmatpush3.msra.mxu1 %v1679_v55 }
 0xf10   :  { %4595 = vpow2.f32 %v1662_v56 }
 0xf11   :  { %v1770_v2 = vpop.permute.xlu1 %1769 }
 0xf15   :  { %v1768_v14 = vpop.permute.xlu1 %1767 }
 0xf19   :  { %v1766_v15 = vpop.permute.xlu1 %1765 }
 0xf1b   :  { %v4594_v57 = vpop.eup %4593 }
 0xf1c   :  { %v1669_v60 = vsel %vm257_vm2, %v4594_v57, 0.0 }
 0xf1d   :  { %v4596_v61 = vpop.eup %4595  ;;  %1670 = vadd.xlane.f32.xlu0 %v1669_v60 }
 0xf1e   :  { %v1666_v62 = vsel %vm257_vm2, %v4596_v61, 0.0 }
 0xf21   :  { %1667 = vadd.xlane.f32.xlu0 %v1666_v62 }
 0xf37   :  { %1676 = vrot.lane.b32.xlu0 %v4868_v37, %s4696_s18  ;;  %s4704_s18 = smov 84  }
 0xf3b   :  { %1763 = vrot.lane.b32.xlu0 %v4850_v27, %s4698_s19 }
 0xfa6   :  { %v1671_v63 = vpop.xlane.xlu0 %1670 }
 0xfa7   :  { %4597 = vrcp.f32 %v1671_v63  ;;  %v5154_v63 = vld [vmem:[%s5565_s1 + $0x8] sm:$0xff] }
 0xfaa   :  { %v1668_v0 = vpop.xlane.xlu0 %1667 }
 0xfab   :  { %4599 = vrcp.f32 %v1668_v0 }
 0xfae   :  { %v1677_v1 = vpop.permute.xlu0 %1676 }
 0xfaf   :  { %4315 = vmatprep.subr.mxu1 %v1677_v1 }
 0xfb0   :  { %4316 = vmatpush3.msra.mxu1 %v1677_v1 }
 0xfb1   :  { %4320 = vmatprep.subr.msk.mxu1 %vm171_vm1, %v1770_v2 }
 0xfb2   :  { %v1764_v13 = vpop.permute.xlu0 %1763 }
 0xfb4   :  { %v4598_v3 = vpop.eup %4597 }
 0xfb5   :  { %v1675_v12 = vmul.f32 %v4598_v3, %v4594_v57 }
 0xfb8   :  { %v4600_v10 = vpop.eup %4599 }
 0xfb9   :  { %v1674_v11 = vmul.f32 %v4600_v10, %v4596_v61 }
 0xfbb   :  { %4317 = vmatprep.mubr.msk.f32.mxu1 %vm257_vm2, %v1674_v11 }
 0xfbc   :  { %4318 = vmatmul.mubr.msk.f32.vlgmr.msra.gmra.mxu1 %vm257_vm2, %v1675_v12 }
 0xfbd   :  { %4321 = vmatpush3.xpose.msk.msra.mxu1 %vm171_vm1, %v1770_v2  ;;  %4324 = vmatprep.mubr.msk.f32.mxu1 %vm171_vm1, %v1764_v13  ;;  %v5160_v2 = vld [vmem:[%s5565_s1] sm:$0xff]  ;;  %s4702_s1 = smov 88  }
 0xfbe   :  { %4322 = vmatprep.subr.msk.mxu1 %vm171_vm1, %v1768_v14 }
 0xfc1   :  { %4323 = vmatpush3.xpose.msk.msra.mxu1 %vm171_vm1, %v1768_v14 }
 0xfc4   :  { %4325 = vmatmul.mubr.msk.f32.vlgmr.msra.gmra.mxu1 %vm171_vm1, %v1766_v15 }
0x107c   :  { %v5117_v16 = vpop.f32.mrf.mxu1 }
0x107e   :  { %v5119_v17 = vpop.f32.mrf.mxu1 }
0x1084   :  { %v4326_v20 = vpop.f32.mrf.mxu1 }
0x1085   :  { %v1851_v21 = vadd.f32 %v4326_v20, %v4883_v40 }
0x1086   :  { %v1845_v22 = vpop.f32.mrf.mxu1 }
0x1087   :  { %v1846_v23 = vadd.f32 %v1845_v22, %v4878_v39  ;;  %v1857_v24 = vsel %vm257_vm2, %v1851_v21, -inf }
0x1088   :  { %1858 = vmax.xlane.f32.xlu1 %v1857_v24 }
0x1089   :  { %v1854_v26 = vsel %vm257_vm2, %v1846_v23, -inf }
0x108a   :  { %1855 = vmax.xlane.f32.xlu0 %v1854_v26 }
0x1099   :  { %1878 = vrot.lane.b32.xlu1 %v4860_v35, %s4698_s19 }
0x109d   :  { %1969 = vrot.lane.b32.xlu1 %v4852_v29, %s4699_s20 }
0x10a1   :  { %1967 = vrot.lane.b32.xlu1 %v4847_v25, %s4699_s20 }
0x10a5   :  { %1965 = vrot.lane.b32.xlu1 %v4866_v36, %s4700_s21 }
0x1111   :  { %v1859_v39 = vpop.xlane.xlu1 %1858 }
0x1112   :  { %v1861_v40 = vsub.f32 %v1851_v21, %v1859_v39 }
0x1113   :  { %v1856_v28 = vpop.xlane.xlu0 %1855 }
0x1114   :  { %v1864_v30 = vmul.f32 1.442695, %v1861_v40  ;;  %v1860_v31 = vsub.f32 %v1846_v23, %v1856_v28 }
0x1115   :  { %v1879_v32 = vpop.permute.xlu1 %1878 }
0x1116   :  { %4601 = vpow2.f32 %v1864_v30  ;;  %v1862_v33 = vmul.f32 1.442695, %v1860_v31  ;;  %4327 = vmatprep.subr.mxu0 %v1879_v32 }
0x1117   :  { %4328 = vmatpush3.msra.mxu0 %v1879_v32 }
0x1118   :  { %4603 = vpow2.f32 %v1862_v33 }
0x1119   :  { %v1970_v50 = vpop.permute.xlu1 %1969 }
0x111d   :  { %v1968_v56 = vpop.permute.xlu1 %1967 }
0x1121   :  { %v1966_v57 = vpop.permute.xlu1 %1965 }
0x1123   :  { %v4602_v34 = vpop.eup %4601 }
0x1124   :  { %v1869_v42 = vsel %vm257_vm2, %v4602_v34, 0.0 }
0x1125   :  { %v4604_v43 = vpop.eup %4603  ;;  %1870 = vadd.xlane.f32.xlu0 %v1869_v42 }
0x1126   :  { %v1866_v44 = vsel %vm257_vm2, %v4604_v43, 0.0 }
0x1129   :  { %1867 = vadd.xlane.f32.xlu0 %v1866_v44 }
0x113f   :  { %1876 = vrot.lane.b32.xlu0 %v4868_v37, %s4698_s19  ;;  %s4705_s19 = smov 16  }
0x1143   :  { %1963 = vrot.lane.b32.xlu0 %v4850_v27, %s4700_s21 }
0x11ae   :  { %v1871_v45 = vpop.xlane.xlu0 %1870 }
0x11af   :  { %4605 = vrcp.f32 %v1871_v45 }
0x11b2   :  { %v1868_v48 = vpop.xlane.xlu0 %1867 }
0x11b3   :  { %4607 = vrcp.f32 %v1868_v48 }
0x11b6   :  { %v1877_v49 = vpop.permute.xlu0 %1876 }
0x11b7   :  { %4329 = vmatprep.subr.mxu0 %v1877_v49 }
0x11b8   :  { %4330 = vmatpush3.msra.mxu0 %v1877_v49 }
0x11b9   :  { %4334 = vmatprep.subr.msk.mxu0 %vm171_vm1, %v1970_v50 }
0x11ba   :  { %v1964_v55 = vpop.permute.xlu0 %1963 }
0x11bc   :  { %v4606_v51 = vpop.eup %4605 }
0x11bd   :  { %v1875_v54 = vmul.f32 %v4606_v51, %v4602_v34 }
0x11c0   :  { %v4608_v52 = vpop.eup %4607 }
0x11c1   :  { %v1874_v53 = vmul.f32 %v4608_v52, %v4604_v43 }
0x11c3   :  { %4331 = vmatprep.mubr.msk.f32.mxu0 %vm257_vm2, %v1874_v53 }
0x11c4   :  { %4332 = vmatmul.mubr.msk.f32.vlgmr.msra.gmra.mxu0 %vm257_vm2, %v1875_v54 }
0x11c5   :  { %4335 = vmatpush3.xpose.msk.msra.mxu0 %vm171_vm1, %v1970_v50  ;;  %4338 = vmatprep.mubr.msk.f32.mxu0 %vm171_vm1, %v1964_v55 }
0x11c6   :  { %4336 = vmatprep.subr.msk.mxu0 %vm171_vm1, %v1968_v56 }
0x11c9   :  { %4337 = vmatpush3.xpose.msk.msra.mxu0 %vm171_vm1, %v1968_v56 }
0x11cc   :  { %4339 = vmatmul.mubr.msk.f32.vlgmr.msra.gmra.mxu0 %vm171_vm1, %v1966_v57 }
0x1284   :  { %v5147_v60 = vpop.f32.mrf.mxu0 }
0x1286   :  { %v5149_v61 = vpop.f32.mrf.mxu0 }
0x128c   :  { %v4340_v62 = vpop.f32.mrf.mxu0 }
0x128d   :  { %v2051_v0 = vadd.f32 %v5154_v63, %v4340_v62 }
0x128e   :  { %v2045_v1 = vpop.f32.mrf.mxu0 }
0x128f   :  { %v2046_v3 = vadd.f32 %v5160_v2, %v2045_v1  ;;  %v2057_v10 = vsel %vm257_vm2, %v2051_v0, -inf }
0x1290   :  { %2058 = vmax.xlane.f32.xlu1 %v2057_v10 }
0x1291   :  { %v2054_v11 = vsel %vm257_vm2, %v2046_v3, -inf }
0x1292   :  { %2055 = vmax.xlane.f32.xlu0 %v2054_v11 }
0x12a1   :  { %2078 = vrot.lane.b32.xlu1 %v4860_v35, %s4700_s21 }
0x12a5   :  { %2169 = vrot.lane.b32.xlu1 %v4852_v29, %s4701_s15 }
0x12a9   :  { %2167 = vrot.lane.b32.xlu1 %v4847_v25, %s4701_s15 }
0x12ad   :  { %2165 = vrot.lane.b32.xlu1 %v4866_v36, %s4702_s1 }
0x1319   :  { %v2059_v12 = vpop.xlane.xlu1 %2058 }
0x131a   :  { %v2061_v13 = vsub.f32 %v2051_v0, %v2059_v12 }
0x131b   :  { %v2056_v14 = vpop.xlane.xlu0 %2055 }
0x131c   :  { %v2064_v15 = vmul.f32 1.442695, %v2061_v13  ;;  %v2060_v20 = vsub.f32 %v2046_v3, %v2056_v14 }
0x131d   :  { %v2079_v21 = vpop.permute.xlu1 %2078 }
0x131e   :  { %4609 = vpow2.f32 %v2064_v15  ;;  %v2062_v22 = vmul.f32 1.442695, %v2060_v20  ;;  %4341 = vmatprep.subr.mxu1 %v2079_v21 }
0x131f   :  { %4342 = vmatpush3.msra.mxu1 %v2079_v21 }
0x1320   :  { %4611 = vpow2.f32 %v2062_v22 }
0x1321   :  { %v2170_v31 = vpop.permute.xlu1 %2169 }
0x1325   :  { %v2168_v44 = vpop.permute.xlu1 %2167 }
0x1329   :  { %v2166_v45 = vpop.permute.xlu1 %2165 }
0x132b   :  { %v4610_v23 = vpop.eup %4609 }
0x132c   :  { %v2069_v24 = vsel %vm257_vm2, %v4610_v23, 0.0 }
0x132d   :  { %v4612_v26 = vpop.eup %4611  ;;  %2070 = vadd.xlane.f32.xlu0 %v2069_v24 }
0x132e   :  { %v2066_v39 = vsel %vm257_vm2, %v4612_v26, 0.0 }
0x1331   :  { %2067 = vadd.xlane.f32.xlu0 %v2066_v39 }
0x1347   :  { %2076 = vrot.lane.b32.xlu0 %v4868_v37, %s4700_s21  ;;  %s4706_s21 = smov 80  }
0x134b   :  { %2163 = vrot.lane.b32.xlu0 %v4850_v27, %s4702_s1 }
0x13b6   :  { %v2071_v40 = vpop.xlane.xlu0 %2070 }
0x13b7   :  { %4613 = vrcp.f32 %v2071_v40 }
0x13ba   :  { %v2068_v28 = vpop.xlane.xlu0 %2067 }
0x13bb   :  { %4615 = vrcp.f32 %v2068_v28 }
0x13be   :  { %v2077_v30 = vpop.permute.xlu0 %2076 }
0x13bf   :  { %4343 = vmatprep.subr.mxu1 %v2077_v30 }
0x13c0   :  { %4344 = vmatpush3.msra.mxu1 %v2077_v30 }
0x13c1   :  { %4348 = vmatprep.subr.msk.mxu1 %vm171_vm1, %v2170_v31 }
0x13c2   :  { %v2164_v43 = vpop.permute.xlu0 %2163 }
0x13c4   :  { %v4614_v32 = vpop.eup %4613 }
0x13c5   :  { %v2075_v42 = vmul.f32 %v4614_v32, %v4610_v23 }
0x13c8   :  { %v4616_v33 = vpop.eup %4615 }
0x13c9   :  { %v2074_v34 = vmul.f32 %v4616_v33, %v4612_v26 }
0x13cb   :  { %4345 = vmatprep.mubr.msk.f32.mxu1 %vm257_vm2, %v2074_v34 }
0x13cc   :  { %4346 = vmatmul.mubr.msk.f32.vlgmr.msra.gmra.mxu1 %vm257_vm2, %v2075_v42 }
0x13cd   :  { %4349 = vmatpush3.xpose.msk.msra.mxu1 %vm171_vm1, %v2170_v31  ;;  %4352 = vmatprep.mubr.msk.f32.mxu1 %vm171_vm1, %v2164_v43 }
0x13ce   :  { %4350 = vmatprep.subr.msk.mxu1 %vm171_vm1, %v2168_v44 }
0x13d1   :  { %4351 = vmatpush3.xpose.msk.msra.mxu1 %vm171_vm1, %v2168_v44 }
0x13d4   :  { %4353 = vmatmul.mubr.msk.f32.vlgmr.msra.gmra.mxu1 %vm171_vm1, %v2166_v45 }
0x148c   :  { %v5187_v48 = vpop.f32.mrf.mxu1 }
0x148e   :  { %v5189_v49 = vpop.f32.mrf.mxu1 }
0x1494   :  { %v4354_v50 = vpop.f32.mrf.mxu1 }
0x1495   :  { %v2251_v51 = vadd.f32 %v5154_v63, %v4354_v50 }
0x1496   :  { %v2245_v52 = vpop.f32.mrf.mxu1 }
0x1497   :  { %v2246_v53 = vadd.f32 %v5160_v2, %v2245_v52  ;;  %v2257_v54 = vsel %vm257_vm2, %v2251_v51, -inf }
0x1498   :  { %2258 = vmax.xlane.f32.xlu1 %v2257_v54 }
0x1499   :  { %v2254_v55 = vsel %vm257_vm2, %v2246_v53, -inf }
0x149a   :  { %2255 = vmax.xlane.f32.xlu0 %v2254_v55 }
0x14a9   :  { %2278 = vrot.lane.b32.xlu1 %v4860_v35, %s4702_s1 }
0x14ad   :  { %2369 = vrot.lane.b32.xlu1 %v4852_v29, %s4703_s2 }
0x14b1   :  { %2367 = vrot.lane.b32.xlu1 %v4847_v25, %s4703_s2 }
0x14b5   :  { %2365 = vrot.lane.b32.xlu1 %v4866_v36, %s4704_s18 }
0x1521   :  { %v2259_v56 = vpop.xlane.xlu1 %2258 }
0x1522   :  { %v2261_v57 = vsub.f32 %v2251_v51, %v2259_v56 }
0x1523   :  { %v2256_v62 = vpop.xlane.xlu0 %2255 }
0x1524   :  { %v2264_v0 = vmul.f32 1.442695, %v2261_v57  ;;  %v2260_v1 = vsub.f32 %v2246_v53, %v2256_v62 }
0x1525   :  { %v2279_v3 = vpop.permute.xlu1 %2278 }
0x1526   :  { %4617 = vpow2.f32 %v2264_v0  ;;  %v2262_v10 = vmul.f32 1.442695, %v2260_v1  ;;  %4355 = vmatprep.subr.mxu0 %v2279_v3 }
0x1527   :  { %4356 = vmatpush3.msra.mxu0 %v2279_v3 }
0x1528   :  { %4619 = vpow2.f32 %v2262_v10 }
0x1529   :  { %v2370_v22 = vpop.permute.xlu1 %2369 }
0x152d   :  { %v2368_v28 = vpop.permute.xlu1 %2367 }
0x1531   :  { %v2366_v30 = vpop.permute.xlu1 %2365 }
0x1533   :  { %v4618_v11 = vpop.eup %4617 }
0x1534   :  { %v2269_v12 = vsel %vm257_vm2, %v4618_v11, 0.0 }
0x1535   :  { %v4620_v13 = vpop.eup %4619  ;;  %2270 = vadd.xlane.f32.xlu0 %v2269_v12 }
0x1536   :  { %v2266_v14 = vsel %vm257_vm2, %v4620_v13, 0.0 }
0x1539   :  { %2267 = vadd.xlane.f32.xlu0 %v2266_v14 }
0x154f   :  { %2276 = vrot.lane.b32.xlu0 %v4868_v37, %s4702_s1  ;;  %s4711_s1 = smov 4  }
0x1553   :  { %2363 = vrot.lane.b32.xlu0 %v4850_v27, %s4704_s18 }
0x15be   :  { %v2271_v15 = vpop.xlane.xlu0 %2270 }
0x15bf   :  { %4621 = vrcp.f32 %v2271_v15 }
0x15c2   :  { %v2268_v20 = vpop.xlane.xlu0 %2267 }
0x15c3   :  { %4623 = vrcp.f32 %v2268_v20 }
0x15c6   :  { %v2277_v21 = vpop.permute.xlu0 %2276 }
0x15c7   :  { %4357 = vmatprep.subr.mxu0 %v2277_v21 }
0x15c8   :  { %4358 = vmatpush3.msra.mxu0 %v2277_v21 }
0x15c9   :  { %4362 = vmatprep.subr.msk.mxu0 %vm171_vm1, %v2370_v22 }
0x15ca   :  { %v2364_v40 = vpop.permute.xlu0 %2363 }
0x15cc   :  { %v4622_v23 = vpop.eup %4621 }
0x15cd   :  { %v2275_v39 = vmul.f32 %v4622_v23, %v4618_v11 }
0x15d0   :  { %v4624_v24 = vpop.eup %4623 }
0x15d1   :  { %v2274_v26 = vmul.f32 %v4624_v24, %v4620_v13 }
0x15d3   :  { %4359 = vmatprep.mubr.msk.f32.mxu0 %vm257_vm2, %v2274_v26 }
0x15d4   :  { %4360 = vmatmul.mubr.msk.f32.vlgmr.msra.gmra.mxu0 %vm257_vm2, %v2275_v39 }
0x15d5   :  { %4363 = vmatpush3.xpose.msk.msra.mxu0 %vm171_vm1, %v2370_v22  ;;  %4366 = vmatprep.mubr.msk.f32.mxu0 %vm171_vm1, %v2364_v40 }
0x15d6   :  { %4364 = vmatprep.subr.msk.mxu0 %vm171_vm1, %v2368_v28 }
0x15d9   :  { %4365 = vmatpush3.xpose.msk.msra.mxu0 %vm171_vm1, %v2368_v28 }
0x15dc   :  { %4367 = vmatmul.mubr.msk.f32.vlgmr.msra.gmra.mxu0 %vm171_vm1, %v2366_v30 }
0x1694   :  { %v5217_v31 = vpop.f32.mrf.mxu0 }
0x1696   :  { %v5219_v32 = vpop.f32.mrf.mxu0 }
0x169c   :  { %v4368_v33 = vpop.f32.mrf.mxu0 }
0x169d   :  { %v2451_v34 = vadd.f32 %v5154_v63, %v4368_v33 }
0x169e   :  { %v2445_v42 = vpop.f32.mrf.mxu0 }
0x169f   :  { %v2446_v43 = vadd.f32 %v5160_v2, %v2445_v42  ;;  %v2457_v44 = vsel %vm257_vm2, %v2451_v34, -inf }
0x16a0   :  { %2458 = vmax.xlane.f32.xlu1 %v2457_v44 }
0x16a1   :  { %v2454_v45 = vsel %vm257_vm2, %v2446_v43, -inf }
0x16a2   :  { %2455 = vmax.xlane.f32.xlu0 %v2454_v45 }
0x16b1   :  { %2478 = vrot.lane.b32.xlu1 %v4860_v35, %s4704_s18 }
0x16b5   :  { %2569 = vrot.lane.b32.xlu1 %v4852_v29, %s4705_s19 }
0x16b9   :  { %2567 = vrot.lane.b32.xlu1 %v4847_v25, %s4705_s19 }
0x16bd   :  { %2565 = vrot.lane.b32.xlu1 %v4866_v36, %s4706_s21 }
0x1729   :  { %v2459_v50 = vpop.xlane.xlu1 %2458 }
0x172a   :  { %v2461_v51 = vsub.f32 %v2451_v34, %v2459_v50 }
0x172b   :  { %v2456_v52 = vpop.xlane.xlu0 %2455 }
0x172c   :  { %v2464_v53 = vmul.f32 1.442695, %v2461_v51  ;;  %v2460_v54 = vsub.f32 %v2446_v43, %v2456_v52 }
0x172d   :  { %v2479_v55 = vpop.permute.xlu1 %2478 }
0x172e   :  { %4625 = vpow2.f32 %v2464_v53  ;;  %v2462_v56 = vmul.f32 1.442695, %v2460_v54  ;;  %4369 = vmatprep.subr.mxu1 %v2479_v55 }
0x172f   :  { %4370 = vmatpush3.msra.mxu1 %v2479_v55 }
0x1730   :  { %4627 = vpow2.f32 %v2462_v56 }
0x1731   :  { %v2570_v12 = vpop.permute.xlu1 %2569 }
0x1735   :  { %v2568_v22 = vpop.permute.xlu1 %2567 }
0x1739   :  { %v2566_v23 = vpop.permute.xlu1 %2565 }
0x173b   :  { %v4626_v57 = vpop.eup %4625 }
0x173c   :  { %v2469_v62 = vsel %vm257_vm2, %v4626_v57, 0.0 }
0x173d   :  { %v4628_v0 = vpop.eup %4627  ;;  %2470 = vadd.xlane.f32.xlu0 %v2469_v62 }
0x173e   :  { %v2466_v1 = vsel %vm257_vm2, %v4628_v0, 0.0 }
0x1741   :  { %2467 = vadd.xlane.f32.xlu0 %v2466_v1 }
0x1757   :  { %2476 = vrot.lane.b32.xlu0 %v4868_v37, %s4704_s18  ;;  %s4712_s18 = smov 68  }
0x175b   :  { %2563 = vrot.lane.b32.xlu0 %v4850_v27, %s4706_s21 }
0x17c6   :  { %v2471_v3 = vpop.xlane.xlu0 %2470 }
0x17c7   :  { %4629 = vrcp.f32 %v2471_v3 }
0x17ca   :  { %v2468_v10 = vpop.xlane.xlu0 %2467 }
0x17cb   :  { %4631 = vrcp.f32 %v2468_v10 }
0x17ce   :  { %v2477_v11 = vpop.permute.xlu0 %2476 }
0x17cf   :  { %4371 = vmatprep.subr.mxu1 %v2477_v11 }
0x17d0   :  { %4372 = vmatpush3.msra.mxu1 %v2477_v11 }
0x17d1   :  { %4376 = vmatprep.subr.msk.mxu1 %vm171_vm1, %v2570_v12 }
0x17d2   :  { %v2564_v21 = vpop.permute.xlu0 %2563 }
0x17d4   :  { %v4630_v13 = vpop.eup %4629 }
0x17d5   :  { %v2475_v20 = vmul.f32 %v4630_v13, %v4626_v57 }
0x17d8   :  { %v4632_v14 = vpop.eup %4631 }
0x17d9   :  { %v2474_v15 = vmul.f32 %v4632_v14, %v4628_v0 }
0x17db   :  { %4373 = vmatprep.mubr.msk.f32.mxu1 %vm257_vm2, %v2474_v15 }
0x17dc   :  { %4374 = vmatmul.mubr.msk.f32.vlgmr.msra.gmra.mxu1 %vm257_vm2, %v2475_v20 }
0x17dd   :  { %4377 = vmatpush3.xpose.msk.msra.mxu1 %vm171_vm1, %v2570_v12  ;;  %4380 = vmatprep.mubr.msk.f32.mxu1 %vm171_vm1, %v2564_v21 }
0x17de   :  { %4378 = vmatprep.subr.msk.mxu1 %vm171_vm1, %v2568_v22 }
0x17e1   :  { %4379 = vmatpush3.xpose.msk.msra.mxu1 %vm171_vm1, %v2568_v22 }
0x17e4   :  { %4381 = vmatmul.mubr.msk.f32.vlgmr.msra.gmra.mxu1 %vm171_vm1, %v2566_v23 }
0x189c   :  { %v5247_v24 = vpop.f32.mrf.mxu1 }
0x189e   :  { %v5249_v26 = vpop.f32.mrf.mxu1 }
0x18a4   :  { %v4382_v39 = vpop.f32.mrf.mxu1 }
0x18a5   :  { %v2651_v40 = vadd.f32 %v5154_v63, %v4382_v39 }
0x18a6   :  { %v2645_v28 = vpop.f32.mrf.mxu1 }
0x18a7   :  { %v2646_v30 = vadd.f32 %v5160_v2, %v2645_v28  ;;  %v2657_v33 = vsel %vm257_vm2, %v2651_v40, -inf }
0x18a8   :  { %2658 = vmax.xlane.f32.xlu1 %v2657_v33 }
0x18a9   :  { %v2654_v34 = vsel %vm257_vm2, %v2646_v30, -inf }
0x18aa   :  { %2655 = vmax.xlane.f32.xlu0 %v2654_v34 }
0x18b9   :  { %2678 = vrot.lane.b32.xlu1 %v4860_v35, %s4706_s21 }
0x18bd   :  { %2769 = vrot.lane.b32.xlu1 %v4852_v29, %s4707_s23 }
0x18c1   :  { %2767 = vrot.lane.b32.xlu1 %v4847_v25, %s4707_s23 }
0x18c5   :  { %2765 = vrot.lane.b32.xlu1 %v4866_v36, %s4708_s25 }
0x1931   :  { %v2659_v42 = vpop.xlane.xlu1 %2658 }
0x1932   :  { %v2661_v43 = vsub.f32 %v2651_v40, %v2659_v42 }
0x1933   :  { %v2656_v44 = vpop.xlane.xlu0 %2655 }
0x1934   :  { %v2664_v45 = vmul.f32 1.442695, %v2661_v43  ;;  %v2660_v50 = vsub.f32 %v2646_v30, %v2656_v44 }
0x1935   :  { %v2679_v51 = vpop.permute.xlu1 %2678 }
0x1936   :  { %4633 = vpow2.f32 %v2664_v45  ;;  %v2662_v52 = vmul.f32 1.442695, %v2660_v50  ;;  %4383 = vmatprep.subr.mxu0 %v2679_v51 }
0x1937   :  { %4384 = vmatpush3.msra.mxu0 %v2679_v51 }
0x1938   :  { %4635 = vpow2.f32 %v2662_v52 }
0x1939   :  { %v2770_v1 = vpop.permute.xlu1 %2769 }
0x193d   :  { %v2768_v14 = vpop.permute.xlu1 %2767 }
0x1941   :  { %v2766_v15 = vpop.permute.xlu1 %2765 }
0x1943   :  { %v4634_v53 = vpop.eup %4633 }
0x1944   :  { %v2669_v54 = vsel %vm257_vm2, %v4634_v53, 0.0 }
0x1945   :  { %v4636_v55 = vpop.eup %4635  ;;  %2670 = vadd.xlane.f32.xlu0 %v2669_v54 }
0x1946   :  { %v2666_v56 = vsel %vm257_vm2, %v4636_v55, 0.0 }
0x1949   :  { %2667 = vadd.xlane.f32.xlu0 %v2666_v56 }
0x195f   :  { %2676 = vrot.lane.b32.xlu0 %v4868_v37, %s4706_s21 }
0x1963   :  { %2763 = vrot.lane.b32.xlu0 %v4850_v27, %s4708_s25 }
0x19ce   :  { %v2671_v57 = vpop.xlane.xlu0 %2670 }
0x19cf   :  { %4637 = vrcp.f32 %v2671_v57 }
0x19d2   :  { %v2668_v62 = vpop.xlane.xlu0 %2667 }
0x19d3   :  { %4639 = vrcp.f32 %v2668_v62 }
0x19d6   :  { %v2677_v0 = vpop.permute.xlu0 %2676 }
0x19d7   :  { %4385 = vmatprep.subr.mxu0 %v2677_v0 }
0x19d8   :  { %4386 = vmatpush3.msra.mxu0 %v2677_v0 }
0x19d9   :  { %4390 = vmatprep.subr.msk.mxu0 %vm171_vm1, %v2770_v1 }
0x19da   :  { %v2764_v13 = vpop.permute.xlu0 %2763 }
0x19dc   :  { %v4638_v3 = vpop.eup %4637 }
0x19dd   :  { %v2675_v12 = vmul.f32 %v4638_v3, %v4634_v53 }
0x19e0   :  { %v4640_v10 = vpop.eup %4639 }
0x19e1   :  { %v2674_v11 = vmul.f32 %v4640_v10, %v4636_v55 }
0x19e3   :  { %4387 = vmatprep.mubr.msk.f32.mxu0 %vm257_vm2, %v2674_v11 }
0x19e4   :  { %4388 = vmatmul.mubr.msk.f32.vlgmr.msra.gmra.mxu0 %vm257_vm2, %v2675_v12 }
0x19e5   :  { %4391 = vmatpush3.xpose.msk.msra.mxu0 %vm171_vm1, %v2770_v1  ;;  %4394 = vmatprep.mubr.msk.f32.mxu0 %vm171_vm1, %v2764_v13 }
0x19e6   :  { %4392 = vmatprep.subr.msk.mxu0 %vm171_vm1, %v2768_v14 }
0x19e9   :  { %4393 = vmatpush3.xpose.msk.msra.mxu0 %vm171_vm1, %v2768_v14 }
0x19ec   :  { %4395 = vmatmul.mubr.msk.f32.vlgmr.msra.gmra.mxu0 %vm171_vm1, %v2766_v15 }
0x1aa4   :  { %v5277_v20 = vpop.f32.mrf.mxu0 }
0x1aa6   :  { %v5279_v21 = vpop.f32.mrf.mxu0 }
0x1aac   :  { %v4396_v22 = vpop.f32.mrf.mxu0 }
0x1aad   :  { %v2851_v23 = vadd.f32 %v5154_v63, %v4396_v22 }
0x1aae   :  { %v2845_v39 = vpop.f32.mrf.mxu0 }
0x1aaf   :  { %v2846_v40 = vadd.f32 %v5160_v2, %v2845_v39  ;;  %v2857_v28 = vsel %vm257_vm2, %v2851_v23, -inf }
0x1ab0   :  { %2858 = vmax.xlane.f32.xlu1 %v2857_v28 }
0x1ab1   :  { %v2854_v30 = vsel %vm257_vm2, %v2846_v40, -inf }
0x1ab2   :  { %2855 = vmax.xlane.f32.xlu0 %v2854_v30 }
0x1ac1   :  { %2878 = vrot.lane.b32.xlu1 %v4860_v35, %s4708_s25 }
0x1ac5   :  { %2969 = vrot.lane.b32.xlu1 %v4852_v29, %s4709_s27 }
0x1ac9   :  { %2967 = vrot.lane.b32.xlu1 %v4847_v25, %s4709_s27 }
0x1acd   :  { %2965 = vrot.lane.b32.xlu1 %v4866_v36, %s4710_s29 }
0x1b39   :  { %v2859_v33 = vpop.xlane.xlu1 %2858 }
0x1b3a   :  { %v2861_v34 = vsub.f32 %v2851_v23, %v2859_v33 }
0x1b3b   :  { %v2856_v42 = vpop.xlane.xlu0 %2855 }
0x1b3c   :  { %v2864_v43 = vmul.f32 1.442695, %v2861_v34  ;;  %v2860_v44 = vsub.f32 %v2846_v40, %v2856_v42 }
0x1b3d   :  { %v2879_v45 = vpop.permute.xlu1 %2878 }
0x1b3e   :  { %4641 = vpow2.f32 %v2864_v43  ;;  %v2862_v50 = vmul.f32 1.442695, %v2860_v44  ;;  %4397 = vmatprep.subr.mxu1 %v2879_v45 }
0x1b3f   :  { %4398 = vmatpush3.msra.mxu1 %v2879_v45 }
0x1b40   :  { %4643 = vpow2.f32 %v2862_v50 }
0x1b41   :  { %v2970_v62 = vpop.permute.xlu1 %2969 }
0x1b45   :  { %v2968_v12 = vpop.permute.xlu1 %2967 }
0x1b49   :  { %v2966_v13 = vpop.permute.xlu1 %2965 }
0x1b4b   :  { %v4642_v51 = vpop.eup %4641 }
0x1b4c   :  { %v2869_v52 = vsel %vm257_vm2, %v4642_v51, 0.0 }
0x1b4d   :  { %v4644_v53 = vpop.eup %4643  ;;  %2870 = vadd.xlane.f32.xlu0 %v2869_v52 }
0x1b4e   :  { %v2866_v54 = vsel %vm257_vm2, %v4644_v53, 0.0 }
0x1b51   :  { %2867 = vadd.xlane.f32.xlu0 %v2866_v54 }
0x1b67   :  { %2876 = vrot.lane.b32.xlu0 %v4868_v37, %s4708_s25 }
0x1b6b   :  { %2963 = vrot.lane.b32.xlu0 %v4850_v27, %s4710_s29 }
0x1bd6   :  { %v2871_v55 = vpop.xlane.xlu0 %2870 }
0x1bd7   :  { %4645 = vrcp.f32 %v2871_v55 }
0x1bda   :  { %v2868_v56 = vpop.xlane.xlu0 %2867 }
0x1bdb   :  { %4647 = vrcp.f32 %v2868_v56 }
0x1bde   :  { %v2877_v57 = vpop.permute.xlu0 %2876 }
0x1bdf   :  { %4399 = vmatprep.subr.mxu1 %v2877_v57 }
0x1be0   :  { %4400 = vmatpush3.msra.mxu1 %v2877_v57 }
0x1be1   :  { %4404 = vmatprep.subr.msk.mxu1 %vm171_vm1, %v2970_v62 }
0x1be2   :  { %v2964_v11 = vpop.permute.xlu0 %2963 }
0x1be4   :  { %v4646_v0 = vpop.eup %4645 }
0x1be5   :  { %v2875_v10 = vmul.f32 %v4646_v0, %v4642_v51 }
0x1be8   :  { %v4648_v1 = vpop.eup %4647 }
0x1be9   :  { %v2874_v3 = vmul.f32 %v4648_v1, %v4644_v53 }
0x1beb   :  { %4401 = vmatprep.mubr.msk.f32.mxu1 %vm257_vm2, %v2874_v3 }
0x1bec   :  { %4402 = vmatmul.mubr.msk.f32.vlgmr.msra.gmra.mxu1 %vm257_vm2, %v2875_v10 }
0x1bed   :  { %4405 = vmatpush3.xpose.msk.msra.mxu1 %vm171_vm1, %v2970_v62  ;;  %4408 = vmatprep.mubr.msk.f32.mxu1 %vm171_vm1, %v2964_v11 }
0x1bee   :  { %4406 = vmatprep.subr.msk.mxu1 %vm171_vm1, %v2968_v12 }
0x1bf1   :  { %4407 = vmatpush3.xpose.msk.msra.mxu1 %vm171_vm1, %v2968_v12 }
0x1bf4   :  { %4409 = vmatmul.mubr.msk.f32.vlgmr.msra.gmra.mxu1 %vm171_vm1, %v2966_v13 }
0x1cac   :  { %v5307_v14 = vpop.f32.mrf.mxu1 }
0x1cae   :  { %v5309_v15 = vpop.f32.mrf.mxu1 }
0x1cb4   :  { %v4410_v22 = vpop.f32.mrf.mxu1 }
0x1cb5   :  { %v3051_v23 = vadd.f32 %v5154_v63, %v4410_v22 }
0x1cb6   :  { %v3045_v39 = vpop.f32.mrf.mxu1 }
0x1cb7   :  { %v3046_v40 = vadd.f32 %v5160_v2, %v3045_v39  ;;  %v3057_v28 = vsel %vm257_vm2, %v3051_v23, -inf }
0x1cb8   :  { %3058 = vmax.xlane.f32.xlu1 %v3057_v28 }
0x1cb9   :  { %v3054_v30 = vsel %vm257_vm2, %v3046_v40, -inf }
0x1cba   :  { %3055 = vmax.xlane.f32.xlu0 %v3054_v30 }
0x1cc9   :  { %3078 = vrot.lane.b32.xlu1 %v4860_v35, %s4710_s29 }
0x1ccd   :  { %3169 = vrot.lane.b32.xlu1 %v4852_v29, %s4711_s1 }
0x1cd1   :  { %3167 = vrot.lane.b32.xlu1 %v4847_v25, %s4711_s1 }
0x1cd5   :  { %3165 = vrot.lane.b32.xlu1 %v4866_v36, %s4712_s18 }
0x1d41   :  { %v3059_v33 = vpop.xlane.xlu1 %3058 }
0x1d42   :  { %v3061_v34 = vsub.f32 %v3051_v23, %v3059_v33 }
0x1d43   :  { %v3056_v42 = vpop.xlane.xlu0 %3055 }
0x1d44   :  { %v3064_v43 = vmul.f32 1.442695, %v3061_v34  ;;  %v3060_v44 = vsub.f32 %v3046_v40, %v3056_v42 }
0x1d45   :  { %v3079_v45 = vpop.permute.xlu1 %3078 }
0x1d46   :  { %4649 = vpow2.f32 %v3064_v43  ;;  %v3062_v50 = vmul.f32 1.442695, %v3060_v44  ;;  %4411 = vmatprep.subr.mxu0 %v3079_v45 }
0x1d47   :  { %4412 = vmatpush3.msra.mxu0 %v3079_v45 }
0x1d48   :  { %4651 = vpow2.f32 %v3062_v50 }
0x1d49   :  { %v3170_v55 = vpop.permute.xlu1 %3169 }
0x1d53   :  { %v4650_v51 = vpop.eup %4649 }
0x1d54   :  { %v3069_v29 = vsel %vm257_vm2, %v4650_v51, 0.0 }
0x1d55   :  { %v4652_v52 = vpop.eup %4651  ;;  %3070 = vadd.xlane.f32.xlu0 %v3069_v29 }
0x1d56   :  { %v3066_v25 = vsel %vm257_vm2, %v4652_v52, 0.0 }
0x1d59   :  { %3067 = vadd.xlane.f32.xlu0 %v3066_v25 }
0x1d6f   :  { %3076 = vrot.lane.b32.xlu0 %v4868_v37, %s4710_s29 }
0x1d73   :  { %3163 = vrot.lane.b32.xlu0 %v4850_v27, %s4712_s18  ;;  %v3168_v27 = vpop.permute.xlu1 %3167 }
0x1d77   :  { %v3166_v3 = vpop.permute.xlu1 %3165 }
0x1dde   :  { %v3071_v36 = vpop.xlane.xlu0 %3070 }
0x1ddf   :  { %4653 = vrcp.f32 %v3071_v36 }
0x1de2   :  { %v3068_v53 = vpop.xlane.xlu0 %3067 }
0x1de3   :  { %4655 = vrcp.f32 %v3068_v53 }
0x1de6   :  { %v3077_v54 = vpop.permute.xlu0 %3076 }
0x1de7   :  { %4413 = vmatprep.subr.mxu0 %v3077_v54 }
0x1de8   :  { %4414 = vmatpush3.msra.mxu0 %v3077_v54 }
0x1de9   :  { %4418 = vmatprep.subr.msk.mxu0 %vm171_vm1, %v3170_v55 }
0x1dea   :  { %v3164_v1 = vpop.permute.xlu0 %3163 }
0x1dec   :  { %v4654_v56 = vpop.eup %4653 }
0x1ded   :  { %v3075_v0 = vmul.f32 %v4654_v56, %v4650_v51 }
0x1df0   :  { %v4656_v57 = vpop.eup %4655 }
0x1df1   :  { %v3074_v62 = vmul.f32 %v4656_v57, %v4652_v52 }
0x1df3   :  { %4415 = vmatprep.mubr.msk.f32.mxu0 %vm257_vm2, %v3074_v62 }
0x1df4   :  { %4416 = vmatmul.mubr.msk.f32.vlgmr.msra.gmra.mxu0 %vm257_vm2, %v3075_v0 }
0x1df5   :  { %4419 = vmatpush3.xpose.msk.msra.mxu0 %vm171_vm1, %v3170_v55  ;;  %4422 = vmatprep.mubr.msk.f32.mxu0 %vm171_vm1, %v3164_v1 }
0x1df6   :  { %4420 = vmatprep.subr.msk.mxu0 %vm171_vm1, %v3168_v27 }
0x1df9   :  { %4421 = vmatpush3.xpose.msk.msra.mxu0 %vm171_vm1, %v3168_v27 }
0x1dfc   :  { %4423 = vmatmul.mubr.msk.f32.vlgmr.msra.gmra.mxu0 %vm171_vm1, %v3166_v3 }
0x1eb4   :  { %v4417_v10 = vpop.f32.mrf.mxu0 }
0x1eb6   :  { %v3154_v11 = vpop.f32.mrf.mxu0 }
0x1ebc   :  { %v4424_v12 = vpop.f32.mrf.mxu0 }
0x1ebd   :  { %v3251_v13 = vadd.f32 %v5154_v63, %v4424_v12 }
0x1ebe   :  { %v3245_v22 = vpop.f32.mrf.mxu0 }
0x1ebf   :  { %v3246_v23 = vadd.f32 %v5160_v2, %v3245_v22  ;;  %v3257_v39 = vsel %vm257_vm2, %v3251_v13, -inf  ;;  %v3532_v2 = vld [vmem:[%s5566_s4 + $0x30] sm:$0xff] }
0x1ec0   :  { %3258 = vmax.xlane.f32.xlu1 %v3257_v39 }
0x1ec1   :  { %v3254_v40 = vsel %vm257_vm2, %v3246_v23, -inf }
0x1ec2   :  { %3255 = vmax.xlane.f32.xlu0 %v3254_v40 }
0x1ed1   :  { %3278 = vrot.lane.b32.xlu1 %v4860_v35, %s4712_s18 }
0x1ed5   :  { %3365 = vrot.lane.b32.xlu1 %v4965_v5, %s4711_s1 }
0x1ed9   :  { %3367 = vrot.lane.b32.xlu1 %v4963_v4, %s4711_s1 }
0x1edd   :  { %3375 = vrot.lane.b32.xlu1 %v4967_v8, %s4709_s27 }
0x1ee1   :  { %3383 = vrot.lane.b32.xlu1 %v4997_v46, %s4707_s23 }
0x1ee5   :  { %3391 = vrot.lane.b32.xlu1 %v5027_v18, %s4705_s19 }
0x1ee9   :  { %3399 = vrot.lane.b32.xlu1 %v5057_v58, %s4703_s2 }
0x1eed   :  { %3407 = vrot.lane.b32.xlu1 %v5087_v38, %s4701_s15 }
0x1ef1   :  { %3415 = vrot.lane.b32.xlu1 %v5117_v16, %s4699_s20 }
0x1ef5   :  { %3423 = vrot.lane.b32.xlu1 %v5147_v60, %s4697_s3 }
0x1ef9   :  { %3431 = vrot.lane.b32.xlu1 %v5187_v48, %s4695_s17  ;;  %v3531_v48 = vld [vmem:[%s5566_s4 + $0x28] sm:$0xff] }
0x1efd   :  { %3439 = vrot.lane.b32.xlu1 %v5217_v31, %s4693_s16  ;;  %v3529_v31 = vld [vmem:[%s5566_s4 + $0x18] sm:$0xff] }
0x1f01   :  { %3447 = vrot.lane.b32.xlu1 %v5247_v24, %s4691_s30  ;;  %v3527_v24 = vld [vmem:[%s5566_s4 + $0x8] sm:$0xff] }
0x1f05   :  { %3455 = vrot.lane.b32.xlu1 %v5277_v20, %s4689_s28 }
0x1f09   :  { %3463 = vrot.lane.b32.xlu1 %v5307_v14, %s4687_s26 }
0x1f0d   :  { %3471 = vrot.lane.b32.xlu1 %v4417_v10, %s4685_s24 }
0x1f49   :  { %v3259_v35 = vpop.xlane.xlu1 %3258 }
0x1f4a   :  { %v3261_v4 = vsub.f32 %v3251_v13, %v3259_v35 }
0x1f4b   :  { %v3256_v5 = vpop.xlane.xlu0 %3255 }
0x1f4c   :  { %v3264_v8 = vmul.f32 1.442695, %v3261_v4  ;;  %v3260_v46 = vsub.f32 %v3246_v23, %v3256_v5 }
0x1f4d   :  { %v3279_v18 = vpop.permute.xlu1 %3278 }
0x1f4e   :  { %4657 = vpow2.f32 %v3264_v8  ;;  %v3262_v58 = vmul.f32 1.442695, %v3260_v46  ;;  %4425 = vmatprep.subr.mxu1 %v3279_v18 }
0x1f4f   :  { %4426 = vmatpush3.msra.mxu1 %v3279_v18 }
0x1f50   :  { %4659 = vpow2.f32 %v3262_v58 }
0x1f51   :  { %v3366_v14 = vpop.permute.xlu1 %3365 }
0x1f52   :  { %v3483_v27 = vsel %vm171_vm1, %v4923_v7, %v3366_v14  ;;  %v4679_v14 = vld [vmem:[%s5563_s0 + $0x8] sm:$0xff] }
0x1f5b   :  { %v4658_v38 = vpop.eup %4657 }
0x1f5c   :  { %v3269_v16 = vsel %vm257_vm2, %v4658_v38, 0.0 }
0x1f5d   :  { %v4660_v60 = vpop.eup %4659  ;;  %3270 = vadd.xlane.f32.xlu0 %v3269_v16 }
0x1f5e   :  { %v3266_v63 = vsel %vm257_vm2, %v4660_v60, 0.0 }
0x1f61   :  { %3267 = vadd.xlane.f32.xlu0 %v3266_v63 }
0x1f77   :  { %3276 = vrot.lane.b32.xlu0 %v4868_v37, %s4712_s18 }
0x1f7b   :  { %3373 = vrot.lane.b32.xlu0 %v4969_v9, %s4709_s27 }
0x1f7f   :  { %3381 = vrot.lane.b32.xlu0 %v4999_v47, %s4707_s23 }
0x1f83   :  { %3389 = vrot.lane.b32.xlu0 %v5029_v19, %s4705_s19 }
0x1f87   :  { %3397 = vrot.lane.b32.xlu0 %v5059_v59, %s4703_s2 }
0x1f8b   :  { %3405 = vrot.lane.b32.xlu0 %v5089_v41, %s4701_s15 }
0x1f8f   :  { %3413 = vrot.lane.b32.xlu0 %v5119_v17, %s4699_s20 }
0x1f93   :  { %3421 = vrot.lane.b32.xlu0 %v5149_v61, %s4697_s3  ;;  %v3533_v61 = vld [vmem:[%s5566_s4 + $0x38] sm:$0xff] }
0x1f94   :  { %4432 = vmatprep.subr.mxu0 %v3533_v61 }
0x1f95   :  { %4433 = vmatpush3.msra.mxu0 %v3533_v61 }
0x1f96   :  { %4434 = vmatprep.subr.mxu0 %v3532_v2 }
0x1f97   :  { %3429 = vrot.lane.b32.xlu0 %v5189_v49, %s4695_s17  ;;  %4435 = vmatpush3.msra.mxu0 %v3532_v2  ;;  %v3530_v49 = vld [vmem:[%s5566_s4 + $0x20] sm:$0xff] }
0x1f98   :  { %4436 = vmatprep.subr.mxu0 %v3531_v48 }
0x1f99   :  { %4437 = vmatpush3.msra.mxu0 %v3531_v48 }
0x1f9a   :  { %4438 = vmatprep.subr.mxu0 %v3530_v49 }
0x1f9b   :  { %3437 = vrot.lane.b32.xlu0 %v5219_v32, %s4693_s16  ;;  %4439 = vmatpush3.msra.mxu0 %v3530_v49  ;;  %v3528_v32 = vld [vmem:[%s5566_s4 + $0x10] sm:$0xff] }
0x1f9c   :  { %4440 = vmatprep.subr.mxu0 %v3529_v31 }
0x1f9d   :  { %4441 = vmatpush3.msra.mxu0 %v3529_v31 }
0x1f9e   :  { %4442 = vmatprep.subr.mxu0 %v3528_v32 }
0x1f9f   :  { %3445 = vrot.lane.b32.xlu0 %v5249_v26, %s4691_s30  ;;  %4443 = vmatpush3.msra.mxu0 %v3528_v32  ;;  %v3526_v26 = vld [vmem:[%s5566_s4] sm:$0xff] }
0x1fa0   :  { %4444 = vmatprep.subr.mxu0 %v3527_v24 }
0x1fa1   :  { %4445 = vmatpush3.msra.mxu0 %v3527_v24  ;;  %v4031_v24 = vld [vmem:[%s5567_s5] ss:$0 sm:$0xff] }
0x1fa2   :  { %4446 = vmatprep.subr.mxu0 %v3526_v26 }
0x1fa3   :  { %3453 = vrot.lane.b32.xlu0 %v5279_v21, %s4689_s28  ;;  %4447 = vmatpush3.msra.mxu0 %v3526_v26 }
0x1fa7   :  { %3461 = vrot.lane.b32.xlu0 %v5309_v15, %s4687_s26  ;;  %v3368_v15 = vpop.permute.xlu1 %3367 }
0x1fa8   :  { %v3484_v3 = vsel %vm171_vm1, %v4921_v6, %v3368_v15 }
0x1fab   :  { %3469 = vrot.lane.b32.xlu0 %v3154_v11, %s4685_s24  ;;  %v3376_v28 = vpop.permute.xlu1 %3375 }
0x1fac   :  { %v3487_v11 = vsel %vm3485_vm3, %v3484_v3, %v3376_v28 }
0x1faf   :  { %v3384_v33 = vpop.permute.xlu1 %3383 }
0x1fb0   :  { %v3490_v22 = vsel %vm3488_vm4, %v3487_v11, %v3384_v33 }
0x1fb3   :  { %v3392_v42 = vpop.permute.xlu1 %3391 }
0x1fb4   :  { %v3492_v40 = vsel %vm257_vm2, %v3490_v22, %v3392_v42 }
0x1fb7   :  { %v3400_v44 = vpop.permute.xlu1 %3399 }
0x1fb8   :  { %v3495_v4 = vsel %vm3493_vm5, %v3492_v40, %v3400_v44 }
0x1fbb   :  { %v3408_v50 = vpop.permute.xlu1 %3407 }
0x1fbc   :  { %v3498_v5 = vsel %vm3496_vm6, %v3495_v4, %v3408_v50 }
0x1fbf   :  { %v3416_v29 = vpop.permute.xlu1 %3415 }
0x1fc0   :  { %v3501_v8 = vsel %vm3499_vm7, %v3498_v5, %v3416_v29 }
0x1fc3   :  { %v3424_v25 = vpop.permute.xlu1 %3423 }
0x1fc4   :  { %v3504_v18 = vsel %vm3502_vm8, %v3501_v8, %v3424_v25 }
0x1fc7   :  { %v3432_v53 = vpop.permute.xlu1 %3431 }
0x1fc8   :  { %v3507_v16 = vsel %vm3505_vm9, %v3504_v18, %v3432_v53  ;;  %v3798_v18 = vld [vmem:[%s5571_s10 + $0x78] sm:$0xff] }
0x1fcb   :  { %v3440_v55 = vpop.permute.xlu1 %3439 }
0x1fcf   :  { %v3448_v57 = vpop.permute.xlu1 %3447 }
0x1fd3   :  { %v3456_v0 = vpop.permute.xlu1 %3455 }
0x1fd7   :  { %v3464_v12 = vpop.permute.xlu1 %3463 }
0x1fdb   :  { %v3472_v58 = vpop.permute.xlu1 %3471 }
0x1fe6   :  { %v3271_v37 = vpop.xlane.xlu0 %3270 }
0x1fe7   :  { %4661 = vrcp.f32 %v3271_v37  ;;  %v3510_v37 = vsel %vm3508_vm10, %v3507_v16, %v3440_v55  ;;  %v3675_v55 = vld [vmem:[%s5568_s8 + $0x30] sm:$0xff]  ;;  %v3795_v16 = vld [vmem:[%s5571_s10 + $0x60] sm:$0xff] }
0x1fea   :  { %v3268_v9 = vpop.xlane.xlu0 %3267 }
0x1feb   :  { %4663 = vrcp.f32 %v3268_v9 }
0x1fee   :  { %v3277_v47 = vpop.permute.xlu0 %3276 }
0x1fef   :  { %4427 = vmatprep.subr.mxu1 %v3277_v47 }
0x1ff0   :  { %4428 = vmatpush3.msra.mxu1 %v3277_v47  ;;  %v3513_v47 = vsel %vm3511_vm11, %v3510_v37, %v3448_v57  ;;  %v3673_v57 = vld [vmem:[%s5568_s8 + $0x20] sm:$0xff]  ;;  %v3792_v37 = vld [vmem:[%s5571_s10 + $0x48] sm:$0xff] }
0x1ff1   :  { %4470 = vmatprep.subr.mxu1 %v3798_v18 }
0x1ff2   :  { %v3374_v30 = vpop.permute.xlu0 %3373 }
0x1ff3   :  { %v3486_v10 = vsel %vm3485_vm3, %v3483_v27, %v3374_v30  ;;  %v4680_v30 = vld [vmem:[%s5563_s0] sm:$0xff] }
0x1ff4   :  { %v4662_v19 = vpop.eup %4661  ;;  %v3669_v27 = vld [vmem:[%s5568_s8] sm:$0xff] }
0x1ff5   :  { %v3275_v17 = vmul.f32 %v4662_v19, %v4658_v38 }
0x1ff6   :  { %v3382_v34 = vpop.permute.xlu0 %3381 }
0x1ff7   :  { %v3489_v13 = vsel %vm3488_vm4, %v3486_v10, %v3382_v34 }
0x1ff8   :  { %v4664_v59 = vpop.eup %4663 }
0x1ff9   :  { %v3274_v41 = vmul.f32 %v4664_v59, %v4660_v60  ;;  %v3516_v59 = vsel %vm3514_vm12, %v3513_v47, %v3456_v0  ;;  %v3671_v0 = vld [vmem:[%s5568_s8 + $0x10] sm:$0xff]  ;;  %v3790_v47 = vld [vmem:[%s5571_s10 + $0x38] sm:$0xff] }
0x1ffa   :  { %v3390_v43 = vpop.permute.xlu0 %3389  ;;  %v3519_v61 = vsel %vm3517_vm13, %v3516_v59, %v3464_v12  ;;  %v3788_v59 = vld [vmem:[%s5571_s10 + $0x28] sm:$0xff] }
0x1ffb   :  { %4429 = vmatprep.mubr.msk.f32.mxu1 %vm257_vm2, %v3274_v41  ;;  %v3491_v23 = vsel %vm257_vm2, %v3489_v13, %v3390_v43  ;;  %v3522_v49 = vsel %vm3520_vm14, %v3519_v61, %v3472_v58  ;;  %v3797_v58 = vld [vmem:[%s5571_s10 + $0x70] sm:$0xff] }
0x1ffc   :  { %4430 = vmatmul.mubr.msk.f32.vlgmr.msra.gmra.mxu1 %vm257_vm2, %v3275_v17  ;;  %v3785_v61 = vld [vmem:[%s5571_s10 + $0x10] sm:$0xff] }
0x1ffd   :  { %4471 = vmatpush3.msra.mxu1 %v3798_v18 }
0x1ffe   :  { %v3398_v45 = vpop.permute.xlu0 %3397  ;;  %4472 = vmatprep.subr.mxu1 %v3797_v58 }
0x1fff   :  { %v3494_v35 = vsel %vm3493_vm5, %v3491_v23, %v3398_v45  ;;  %4473 = vmatpush3.msra.mxu1 %v3797_v58  ;;  %v4040_v58 = vld [vmem:[%s5574_s12] ss:$0 sm:$0xff] }
0x2002   :  { %v3406_v51 = vpop.permute.xlu0 %3405 }
0x2003   :  { %v3497_v7 = vsel %vm3496_vm6, %v3494_v35, %v3406_v51  ;;  %v4035_v35 = vld [vmem:[%s5570_s7] ss:$0 sm:$0xff] }
0x2006   :  { %v3414_v52 = vpop.permute.xlu0 %3413 }
0x2007   :  { %v3500_v6 = vsel %vm3499_vm7, %v3497_v7, %v3414_v52 }
0x200a   :  { %v3422_v36 = vpop.permute.xlu0 %3421 }
0x200b   :  { %v3503_v46 = vsel %vm3502_vm8, %v3500_v6, %v3422_v36 }
0x200e   :  { %v3430_v54 = vpop.permute.xlu0 %3429 }
0x200f   :  { %v3506_v38 = vsel %vm3505_vm9, %v3503_v46, %v3430_v54  ;;  %v3676_v54 = vld [vmem:[%s5568_s8 + $0x38] sm:$0xff] }
0x2010   :  { %4451 = vmatprep.subr.mxu0 %v3676_v54 }
0x2012   :  { %v3438_v56 = vpop.permute.xlu0 %3437 }
0x2013   :  { %v3509_v60 = vsel %vm3508_vm10, %v3506_v38, %v3438_v56  ;;  %v3674_v56 = vld [vmem:[%s5568_s8 + $0x28] sm:$0xff] }
0x2014   :  { %v3796_v38 = vld [vmem:[%s5571_s10 + $0x68] sm:$0xff] }
0x2015   :  { %4474 = vmatprep.subr.mxu1 %v3796_v38 }
0x2016   :  { %v3446_v62 = vpop.permute.xlu0 %3445  ;;  %4475 = vmatpush3.msra.mxu1 %v3796_v38 }
0x2017   :  { %v3512_v9 = vsel %vm3511_vm11, %v3509_v60, %v3446_v62  ;;  %v3672_v62 = vld [vmem:[%s5568_s8 + $0x18] sm:$0xff]  ;;  %4476 = vmatprep.subr.mxu1 %v3795_v16 }
0x2018   :  { %4477 = vmatpush3.msra.mxu1 %v3795_v16  ;;  %v3794_v60 = vld [vmem:[%s5571_s10 + $0x58] sm:$0xff] }
0x2019   :  { %4478 = vmatprep.subr.mxu1 %v3794_v60 }
0x201a   :  { %v3454_v1 = vpop.permute.xlu0 %3453  ;;  %4479 = vmatpush3.msra.mxu1 %v3794_v60  ;;  %v4041_v60 = vld [vmem:[%s5575_s13] ss:$0 sm:$0xff] }
0x201b   :  { %v3515_v19 = vsel %vm3514_vm12, %v3512_v9, %v3454_v1  ;;  %v3670_v1 = vld [vmem:[%s5568_s8 + $0x8] sm:$0xff]  ;;  %v3791_v9 = vld [vmem:[%s5571_s10 + $0x40] sm:$0xff] }
0x201e   :  { %v3462_v39 = vpop.permute.xlu0 %3461 }
0x201f   :  { %v3518_v41 = vsel %vm3517_vm13, %v3515_v19, %v3462_v39  ;;  %v4034_v39 = vld [vmem:[%s5569_s6] ss:$0 sm:$0xff]  ;;  %v3789_v19 = vld [vmem:[%s5571_s10 + $0x30] sm:$0xff] }
0x2022   :  { %v3470_v63 = vpop.permute.xlu0 %3469 }
0x2023   :  { %v3521_v2 = vsel %vm3520_vm14, %v3518_v41, %v3470_v63  ;;  %v3793_v63 = vld [vmem:[%s5571_s10 + $0x50] sm:$0xff]  ;;  %v3787_v41 = vld [vmem:[%s5571_s10 + $0x20] sm:$0xff] }
0x2024   :  { %4480 = vmatprep.subr.mxu1 %v3793_v63 }
0x2025   :  { %4481 = vmatpush3.msra.mxu1 %v3793_v63 }
0x2026   :  { %4482 = vmatprep.subr.mxu1 %v3792_v37 }
0x2027   :  { %4483 = vmatpush3.msra.mxu1 %v3792_v37 }
0x2028   :  { %4484 = vmatprep.subr.mxu1 %v3791_v9 }
0x2029   :  { %4485 = vmatpush3.msra.mxu1 %v3791_v9 }
0x202a   :  { %4486 = vmatprep.subr.mxu1 %v3790_v47 }
0x202b   :  { %4487 = vmatpush3.msra.mxu1 %v3790_v47 }
0x202c   :  { %4488 = vmatprep.subr.mxu1 %v3789_v19 }
0x202d   :  { %4489 = vmatpush3.msra.mxu1 %v3789_v19 }
0x202e   :  { %4490 = vmatprep.subr.mxu1 %v3788_v59 }
0x202f   :  { %4491 = vmatpush3.msra.mxu1 %v3788_v59 }
0x2030   :  { %4492 = vmatprep.subr.mxu1 %v3787_v41 }
0x2031   :  { %4493 = vmatpush3.msra.mxu1 %v3787_v41 }
0x20bc   :  { %v4431_v20 = vpop.f32.mrf.mxu1 }
0x20bd   :  { %3479 = vrot.lane.b32.xlu1 %v4431_v20, %s4683_s22 }
0x20be   :  { %v3354_v21 = vpop.f32.mrf.mxu1 }
0x20bf   :  { %3477 = vrot.lane.b32.xlu0 %v3354_v21, %s4683_s22 }
0x212f   :  { %v3480_v17 = vpop.permute.xlu1 %3479 }
0x2130   :  { %v3525_v32 = vsel %vm3523_vm15, %v3522_v49, %v3480_v17  ;;  %v3786_v17 = vld [vmem:[%s5571_s10 + $0x18] sm:$0xff]  ;;  %v4036_v49 = vld [vmem:[%s5572_s9] ss:$0 sm:$0xff] }
0x2131   :  { %v3478_v48 = vpop.permute.xlu0 %3477  ;;  %4494 = vmatprep.subr.mxu1 %v3786_v17 }
0x2132   :  { %v3524_v31 = vsel %vm3523_vm15, %v3521_v2, %v3478_v48  ;;  %4495 = vmatpush3.msra.mxu1 %v3786_v17  ;;  %v3784_v2 = vld [vmem:[%s5571_s10 + $0x8] sm:$0xff]  ;;  %v3783_v48 = vld [vmem:[%s5571_s10] sm:$0xff] }
0x2133   :  { %4448 = vmatprep.mubr.msk.f32.mxu0 %vm77_vm0, %v3524_v31  ;;  %4496 = vmatprep.subr.mxu1 %v3785_v61 }
0x2134   :  { %4449 = vmatmul.mubr.msk.f32.vlgmr.msra.gmra.mxu0 %vm77_vm0, %v3525_v32  ;;  %4497 = vmatpush3.msra.mxu1 %v3785_v61 }
0x2135   :  { %4452 = vmatpush3.msra.mxu0 %v3676_v54  ;;  %4498 = vmatprep.subr.mxu1 %v3784_v2 }
0x2136   :  { %4453 = vmatprep.subr.mxu0 %v3675_v55  ;;  %4499 = vmatpush3.msra.mxu1 %v3784_v2 }
0x2137   :  { %4454 = vmatpush3.msra.mxu0 %v3675_v55  ;;  %4500 = vmatprep.subr.mxu1 %v3783_v48 }
0x2138   :  { %4455 = vmatprep.subr.mxu0 %v3674_v56  ;;  %4501 = vmatpush3.msra.mxu1 %v3783_v48 }
0x2139   :  { %4456 = vmatpush3.msra.mxu0 %v3674_v56 }
0x213a   :  { %4457 = vmatprep.subr.mxu0 %v3673_v57 }
0x213b   :  { %4458 = vmatpush3.msra.mxu0 %v3673_v57 }
0x213c   :  { %4459 = vmatprep.subr.mxu0 %v3672_v62 }
0x213d   :  { %4460 = vmatpush3.msra.mxu0 %v3672_v62 }
0x213e   :  { %4461 = vmatprep.subr.mxu0 %v3671_v0 }
0x213f   :  { %4462 = vmatpush3.msra.mxu0 %v3671_v0 }
0x2140   :  { %4463 = vmatprep.subr.mxu0 %v3670_v1 }
0x2141   :  { %4464 = vmatpush3.msra.mxu0 %v3670_v1 }
0x2142   :  { %4465 = vmatprep.subr.mxu0 %v3669_v27 }
0x2143   :  { %4466 = vmatpush3.msra.mxu0 %v3669_v27 }
0x21f4   :  { %v4450_v26 = vpop.f32.mrf.mxu0 }
0x21f5   :  { %v3619_v20 = vadd.f32 %v4450_v26, %v4031_v24 }
0x21f6   :  { %v3613_v21 = vpop.f32.mrf.mxu0 }
0x21f7   :  { %v3623_v15 = vadd.f32 %v4679_v14, %v3619_v20  ;;  %v3614_v28 = vadd.f32 %v4031_v24, %v3613_v21 }
0x21f9   :  { %v3622_v33 = vadd.f32 %v4680_v30, %v3614_v28  ;;  %v3629_v34 = vsel %vm77_vm0, %v3623_v15, 0.0 }
0x21fa   :  { %3630 = vadd.xlane.f32.xlu1 %v3629_v34 }
0x21fb   :  { %v3626_v42 = vsel %vm77_vm0, %v3622_v33, 0.0 }
0x21fc   :  { %3627 = vadd.xlane.f32.xlu0 %v3626_v42 }
0x2283   :  { %v3631_v43 = vpop.xlane.xlu1 %3630 }
0x2284   :  { %v3634_v44 = vmul.f32 0.015625, %v3631_v43 }
0x2285   :  { %v3628_v45 = vpop.xlane.xlu0 %3627 }
0x2286   :  { %v3633_v50 = vmul.f32 0.015625, %v3628_v45  ;;  %v3636_v51 = vsub.f32 %v3623_v15, %v3634_v44 }
0x2288   :  { %v3635_v29 = vsub.f32 %v3622_v33, %v3633_v50  ;;  %v3638_v36 = vmul.f32 %v3636_v51, %v3636_v51 }
0x228a   :  { %v3637_v52 = vmul.f32 %v3635_v29, %v3635_v29  ;;  %v3642_v53 = vsel %vm77_vm0, %v3638_v36, 0.0 }
0x228c   :  { %v3639_v25 = vsel %vm77_vm0, %v3637_v52, 0.0 }
0x228d   :  { %3640 = vadd.xlane.f32.xlu0 %v3639_v25 }
0x2291   :  { %3643 = vadd.xlane.f32.xlu0 %v3642_v53  ;;  %v4039_v53 = vld [vmem:[%s5573_s11] ss:$0 sm:$0xff] }
0x2316   :  { %v3641_v3 = vpop.xlane.xlu0 %3640 }
0x2317   :  { %v3645_v10 = vmul.f32 0.015625, %v3641_v3 }
0x2319   :  { %v3647_v11 = vadd.f32 1e-05, %v3645_v10 }
0x231a   :  { %v3644_v12 = vpop.xlane.xlu0 %3643 }
0x231b   :  { %4665 = vrsqrt.f32 %v3647_v11  ;;  %v3646_v13 = vmul.f32 0.015625, %v3644_v12 }
0x231d   :  { %v3648_v22 = vadd.f32 1e-05, %v3646_v13 }
0x231f   :  { %4667 = vrsqrt.f32 %v3648_v22 }
0x2328   :  { %v4666_v23 = vpop.eup %4665 }
0x2329   :  { %v3651_v40 = vmul.f32 %v4666_v23, %v3635_v29 }
0x232b   :  { %v3659_v4 = vmul.f32 %v4034_v39, %v3651_v40 }
0x232c   :  { %v4668_v7 = vpop.eup %4667 }
0x232d   :  { %v3652_v5 = vmul.f32 %v4668_v7, %v3636_v51  ;;  %v5480_v6 = vadd.f32 %v4035_v35, %v3659_v4 }
0x232f   :  { %v3660_v8 = vmul.f32 %v4034_v39, %v3652_v5  ;;  %4467 = vmatprep.mubr.msk.f32.mxu0 %vm77_vm0, %v5480_v6 }
0x2331   :  { %v5484_v46 = vadd.f32 %v4035_v35, %v3660_v8 }
0x2333   :  { %4468 = vmatmul.mubr.msk.f32.vlgmr.msra.gmra.mxu0 %vm77_vm0, %v5484_v46 }
0x23f3   :  { %v4469_v31 = vpop.f32.mrf.mxu0 }
0x23f4   :  { %v3762_v32 = vadd.f32 %v4469_v31, %v4036_v49 }
0x23f5   :  { %v3756_v24 = vpop.f32.mrf.mxu0 }
0x23f6   :  { %v3768_v26 = vmul.f32 0.044715, %v3762_v32  ;;  %v3757_v20 = vadd.f32 %v4036_v49, %v3756_v24  ;;  %v3766_v52 = vmul.f32 0.5, %v3762_v32 }
0x23f8   :  { %v3770_v21 = vmul.f32 %v3768_v26, %v3762_v32  ;;  %v3767_v14 = vmul.f32 0.044715, %v3757_v20  ;;  %v3765_v51 = vmul.f32 0.5, %v3757_v20 }
0x23fa   :  { %v3772_v15 = vmul.f32 %v3770_v21, %v3762_v32  ;;  %v3769_v28 = vmul.f32 %v3767_v14, %v3757_v20 }
0x23fc   :  { %v3774_v30 = vadd.f32 %v3772_v15, %v3762_v32  ;;  %v3771_v33 = vmul.f32 %v3769_v28, %v3757_v20 }
0x23fe   :  { %v3773_v34 = vadd.f32 %v3771_v33, %v3757_v20  ;;  %v3776_v42 = vmul.f32 0.7978846, %v3774_v30 }
0x2400   :  { %v3775_v43 = vmul.f32 0.7978846, %v3773_v34  ;;  %4669 = vtanh.f32 %v3776_v42 }
0x2402   :  { %4671 = vtanh.f32 %v3775_v43 }
0x240d   :  { %v4670_v44 = vpop.eup %4669 }
0x240e   :  { %v3780_v50 = vadd.f32 1.0, %v4670_v44 }
0x240f   :  { %v4672_v45 = vpop.eup %4671 }
0x2410   :  { %v3779_v29 = vadd.f32 1.0, %v4672_v45  ;;  %v3782_v36 = vmul.f32 %v3780_v50, %v3766_v52 }
0x2412   :  { %v3781_v25 = vmul.f32 %v3779_v29, %v3765_v51 }
0x2414   :  { %4502 = vmatprep.mubr.f32.mxu1 %v3781_v25 }
0x2415   :  { %4503 = vmatmul.mubr.f32.vlgmr.msra.gmra.mxu1 %v3782_v36 }
0x24d5   :  { %v4504_v54 = vpop.f32.mrf.mxu1 }
0x24d6   :  { %v3878_v55 = vadd.f32 %v4504_v54, %v4039_v53 }
0x24d7   :  { %v3872_v56 = vpop.f32.mrf.mxu1 }
0x24d8   :  { %v3882_v57 = vadd.f32 %v3878_v55, %v5484_v46  ;;  %v3873_v62 = vadd.f32 %v4039_v53, %v3872_v56 }
0x24da   :  { %v3881_v0 = vadd.f32 %v3873_v62, %v5480_v6  ;;  %v3888_v1 = vsel %vm77_vm0, %v3882_v57, 0.0 }
0x24db   :  { %3889 = vadd.xlane.f32.xlu0 %v3888_v1 }
0x24dc   :  { %v3885_v27 = vsel %vm77_vm0, %v3881_v0, 0.0 }
0x24dd   :  { %3886 = vadd.xlane.f32.xlu1 %v3885_v27 }
0x2564   :  { %v3890_v3 = vpop.xlane.xlu0 %3889 }
0x2565   :  { %v3892_v10 = vmul.f32 0.015625, %v3890_v3 }
0x2566   :  { %v3887_v11 = vpop.xlane.xlu1 %3886 }
0x2567   :  { %v3894_v12 = vsub.f32 %v3882_v57, %v3892_v10  ;;  %v3891_v13 = vmul.f32 0.015625, %v3887_v11 }
0x2569   :  { %v3893_v22 = vsub.f32 %v3881_v0, %v3891_v13  ;;  %v3896_v23 = vmul.f32 %v3894_v12, %v3894_v12 }
0x256b   :  { %v3900_v39 = vsel %vm77_vm0, %v3896_v23, 0.0  ;;  %v3895_v40 = vmul.f32 %v3893_v22, %v3893_v22 }
0x256c   :  { %3901 = vadd.xlane.f32.xlu0 %v3900_v39 }
0x256d   :  { %v3897_v35 = vsel %vm77_vm0, %v3895_v40, 0.0 }
0x256e   :  { %3898 = vadd.xlane.f32.xlu1 %v3897_v35 }
0x25f5   :  { %v3902_v4 = vpop.xlane.xlu0 %3901 }
0x25f6   :  { %v3904_v7 = vmul.f32 0.015625, %v3902_v4 }
0x25f7   :  { %v3899_v5 = vpop.xlane.xlu1 %3898 }
0x25f8   :  { %v3906_v6 = vadd.f32 1e-05, %v3904_v7  ;;  %v3903_v8 = vmul.f32 0.015625, %v3899_v5 }
0x25fa   :  { %4673 = vrsqrt.f32 %v3906_v6  ;;  %v3905_v46 = vadd.f32 1e-05, %v3903_v8 }
0x25fc   :  { %4675 = vrsqrt.f32 %v3905_v46 }
0x2607   :  { %v4674_v18 = vpop.eup %4673 }
0x2608   :  { %v3910_v38 = vmul.f32 %v4674_v18, %v3894_v12 }
0x2609   :  { %v4676_v16 = vpop.eup %4675 }
0x260a   :  { %v3918_v63 = vmul.f32 %v4040_v58, %v3910_v38  ;;  %v3909_v37 = vmul.f32 %v4676_v16, %v3893_v22 }
0x260c   :  { %v3926_v9 = vadd.f32 %v4041_v60, %v3918_v63  ;;  %v3917_v47 = vmul.f32 %v4040_v58, %v3909_v37 }
0x260e   :  { %3928 = vst.msk [vmem:[%s5576_s14 + $0x8] sm:$0xff] %vm77_vm0, %v3926_v9  ;;  %v3925_v19 = vadd.f32 %v4041_v60, %v3917_v47 }
0x2610   :  { %3927 = vst.msk [vmem:[%s5576_s14] sm:$0xff] %vm77_vm0, %v3925_v19 }

</bundles_post_ra>
